<compile_context>
chip_gen: v7x
topology: tpu7x:2x2x1
jax: 0.10.0
libtpu: 0.0.40
codegen_flags: <defaults>
</compile_context>

<pallas_src>
import functools

import jax
import jax.numpy as jnp
from jax.experimental import pallas as pl
from jax.experimental.pallas import tpu as pltpu

CPAD = 128  # lane-dense channel padding


# ----------------------------------------------------------------------------
# Fused backbone-block kernel
# ----------------------------------------------------------------------------
def _qat_conv_block_kernel(xp_ref, w_ref, b_ref, o_ref, xq_scr, y_scr, m_scr,
                           *, n, h, w, w_bits, f_bits):
    """One backbone block, fully fused in VMEM.

    xp_ref : (n, h+2, w+2, CPAD)  zero-padded (spatial + channel) NHWC input
    w_ref  : (9, CPAD, CPAD)      per-tap weight matrices (zero padded)
    b_ref  : (1, CPAD)            bias (zero padded)
    o_ref  : (n*h//2, w//2, CPAD) pooled output, rows ordered (n, ho)
    """
    ho, wo = h // 2, w // 2
    nhw = n * h * w

    # --- STE(x, 'per_channel', weight_bitwidth) on the conv input -----------
    wq_hi = float(2 ** (w_bits - 1) - 1)
    wq_lo = float(-(2 ** (w_bits - 1)))
    x = xp_ref[...]
    am = jnp.max(jnp.abs(x), axis=2, keepdims=True)
    am = jnp.max(am, axis=1, keepdims=True)
    am = jnp.max(am, axis=0, keepdims=True)                      # (1, 1, 1, C)
    sc = jnp.where(am > 0.0, am / wq_hi, 1.0)
    xq_scr[...] = jnp.clip(jnp.round(x / sc), wq_lo, wq_hi) * sc

    # --- Conv2d(3x3, stride=1, pad=1): 9 shifted accumulating MXU dots ------
    acc = jnp.zeros((nhw, CPAD), jnp.float32)
    for t in range(9):                       # static unroll over the 3x3 taps
        di, dj = t // 3, t % 3
        patch = xq_scr[:, di:di + h, dj:dj + w, :].reshape(nhw, CPAD)
        acc = acc + jnp.dot(patch, w_ref[t],
                            preferred_element_type=jnp.float32)
    acc = acc + b_ref[...]                                        # (nhw, CPAD)

    # --- STE(x, 'all', feature_bitwidth), then ReLU --------------------------
    fq_hi = float(2 ** (f_bits - 1) - 1)
    fq_lo = float(-(2 ** (f_bits - 1)))
    amt = jnp.max(jnp.abs(acc), axis=1, keepdims=True)
    amt = jnp.max(amt, axis=0, keepdims=True)                     # (1, 1)
    sct = jnp.where(amt > 0.0, amt / fq_hi, 1.0)
    y = jnp.clip(jnp.round(acc / sct), fq_lo, fq_hi) * sct
    y = jnp.maximum(y, 0.0)

    # --- MaxPool2d(2): H via major-dim stride, W via sublane-strided load ---
    y_scr[...] = y.reshape(n * h, w, CPAD)
    m_scr[...] = jnp.maximum(y_scr[pl.ds(0, n * ho, 2), :, :],
                             y_scr[pl.ds(1, n * ho, 2), :, :])
    o_ref[...] = jnp.maximum(m_scr[:, pl.ds(0, wo, 2), :],
                             m_scr[:, pl.ds(1, wo, 2), :])


def qat_conv_block(xp, w9, b, *, weight_bits, feature_bits):
    n, hp, wp, cpad = xp.shape
    assert cpad == CPAD
    h, w = hp - 2, wp - 2
    ho, wo = h // 2, w // 2
    kernel = functools.partial(_qat_conv_block_kernel, n=n, h=h, w=w,
                               w_bits=weight_bits, f_bits=feature_bits)
    out = pl.pallas_call(
        kernel,
        out_shape=jax.ShapeDtypeStruct((n * ho, wo, CPAD), jnp.float32),
        grid=(1,),
        in_specs=[
            pl.BlockSpec((n, hp, wp, CPAD), lambda i: (0, 0, 0, 0)),
            pl.BlockSpec((9, CPAD, CPAD), lambda i: (0, 0, 0)),
            pl.BlockSpec((1, CPAD), lambda i: (0, 0)),
        ],
        out_specs=pl.BlockSpec((n * ho, wo, CPAD), lambda i: (0, 0, 0)),
        scratch_shapes=[
            pltpu.VMEM((n, hp, wp, CPAD), jnp.float32),      # fake-quant input
            pltpu.VMEM((n * h, w, CPAD), jnp.float32),       # pre-pool activ.
            pltpu.VMEM((n * ho, w, CPAD), jnp.float32),      # H-pooled activ.
        ],
        compiler_params=pltpu.CompilerParams(
            dimension_semantics=("arbitrary",)),
    )(xp, w9, b)
    return out.reshape(n, ho, wo, CPAD)


# ----------------------------------------------------------------------------
# Classifier (Linear) kernel — lane-dense (N padded to 128)
# ----------------------------------------------------------------------------
def _linear_kernel(a_ref, w_ref, b_ref, o_ref):
    o_ref[...] = (jnp.dot(a_ref[...], w_ref[...],
                          preferred_element_type=jnp.float32) + b_ref[...])


def linear_lane_dense(a, w, b):
    m, k = a.shape
    _, npad = w.shape
    return pl.pallas_call(
        _linear_kernel,
        out_shape=jax.ShapeDtypeStruct((m, npad), jnp.float32),
        grid=(1,),
        in_specs=[pl.BlockSpec((m, k), lambda i: (0, 0)),
                  pl.BlockSpec((k, npad), lambda i: (0, 0)),
                  pl.BlockSpec((1, npad), lambda i: (0, 0))],
        out_specs=pl.BlockSpec((m, npad), lambda i: (0, 0)),
    )(a, w, b)


# ----------------------------------------------------------------------------
# Parameter packing (host side, one-time layout plumbing)
# ----------------------------------------------------------------------------
def pack_params(params):
    def conv_pack(wt, bias):
        cout, cin, kh, kw = wt.shape
        wm = jnp.transpose(wt, (2, 3, 1, 0)).reshape(kh * kw, cin, cout)
        wm = jnp.pad(wm, ((0, 0), (0, CPAD - cin), (0, CPAD - cout)))
        bp = jnp.pad(bias, (0, CPAD - cout)).reshape(1, CPAD)
        return wm.astype(jnp.float32), bp.astype(jnp.float32)

    w1, b1 = conv_pack(params["conv1_w"], params["conv1_b"])
    w2, b2 = conv_pack(params["conv2_w"], params["conv2_b"])

    # Classifier: permute the (out, C*H*W) weight so the contraction axis
    # matches the NHWC, channel-padded flatten produced by the last block.
    c2 = params["conv2_w"].shape[0]
    out_f, in_f = params["fc_w"].shape
    side = int(round((in_f // c2) ** 0.5))
    fw = params["fc_w"].reshape(out_f, c2, side, side)            # (O, C, H, W)
    fw = jnp.transpose(fw, (2, 3, 1, 0))                          # (H, W, C, O)
    fw = jnp.pad(fw, ((0, 0), (0, 0), (0, CPAD - c2), (0, CPAD - out_f)))
    fw = fw.reshape(side * side * CPAD, CPAD).astype(jnp.float32)
    fb = jnp.pad(params["fc_b"], (0, CPAD - out_f)).reshape(1, CPAD)
    return dict(w1=w1, b1=b1, w2=w2, b2=b2,
                fc_w=fw, fc_b=fb.astype(jnp.float32))


# ----------------------------------------------------------------------------
# Synthetic original_model parameters (deterministic PyTorch-style init)
# ----------------------------------------------------------------------------
def init_params(key):
    k1, k2, k3 = jax.random.split(key, 3)

    def conv_init(k, cout, cin, kh, kw):
        bound = 1.0 / float(cin * kh * kw) ** 0.5
        kw_, kb_ = jax.random.split(k)
        wgt = jax.random.uniform(kw_, (cout, cin, kh, kw), jnp.float32, -bound, bound)
        b = jax.random.uniform(kb_, (cout,), jnp.float32, -bound, bound)
        return wgt, b

    def linear_init(k, cout, cin):
        bound = 1.0 / float(cin) ** 0.5
        kw_, kb_ = jax.random.split(k)
        wgt = jax.random.uniform(kw_, (cout, cin), jnp.float32, -bound, bound)
        b = jax.random.uniform(kb_, (cout,), jnp.float32, -bound, bound)
        return wgt, b

    c1w, c1b = conv_init(k1, 8, 4, 3, 3)
    c2w, c2b = conv_init(k2, 16, 8, 3, 3)
    fcw, fcb = linear_init(k3, 10, 16 * 4 * 4)
    return dict(conv1_w=c1w, conv1_b=c1b, conv2_w=c2w, conv2_b=c2b,
                fc_w=fcw, fc_b=fcb)


# ----------------------------------------------------------------------------
# QuantizationAwareVGG.forward
# ----------------------------------------------------------------------------
@functools.partial(jax.jit, static_argnames=("feature_bitwidth", "weight_bitwidth"))
def quantization_aware_vgg_forward(params, x_nchw, feature_bitwidth=8,
                                   weight_bitwidth=8):
    p = pack_params(params)
    n, cin = x_nchw.shape[0], x_nchw.shape[1]
    n_classes = params["fc_w"].shape[0]

    # NCHW -> NHWC, pad spatially (conv pad=1) and channels up to 128 lanes.
    x = jnp.transpose(x_nchw, (0, 2, 3, 1)).astype(jnp.float32)
    x = jnp.pad(x, ((0, 0), (1, 1), (1, 1), (0, CPAD - cin)))

    # backbone block 1: STE(per_channel) -> Conv -> STE(all) -> ReLU -> MaxPool
    x = qat_conv_block(x, p["w1"], p["b1"],
                       weight_bits=weight_bitwidth, feature_bits=feature_bitwidth)
    x = jnp.pad(x, ((0, 0), (1, 1), (1, 1), (0, 0)))              # re-pad spatial

    # backbone block 2
    x = qat_conv_block(x, p["w2"], p["b2"],
                       weight_bits=weight_bitwidth, feature_bits=feature_bitwidth)

    # x.view(N, -1) + classifier: the packed FC weight absorbs the NCHW
    # flatten-order permutation and the channel padding, so a plain reshape
    # feeds a lane-dense (K, 128) GEMM; no STE (classifier is outside backbone).
    x = x.reshape(n, -1)
    logits = linear_lane_dense(x, p["fc_w"], p["fc_b"])
    return logits[:, :n_classes]


if __name__ == "__main__":
    key = jax.random.PRNGKey(0)
    pkey, xkey = jax.random.split(key)
    params = init_params(pkey)
    x = jax.random.normal(xkey, (2, 4, 16, 16), jnp.float32)   # NCHW like PyTorch

    y = quantization_aware_vgg_forward(params, x)
    y = jax.block_until_ready(y)
    assert y.shape == (2, 10) and y.dtype == jnp.float32
    print("KERNEL_OK")
</pallas_src>

<mosaic_0001>
module attributes {stable_mosaic.version = 11 : i64} {
  func.func @_qat_conv_block_kernel(%arg0: i32, %arg1: memref<2x18x18x128xf32, #tpu.memory_space<vmem>>, %arg2: memref<9x128x128xf32, #tpu.memory_space<vmem>>, %arg3: memref<1x128xf32, #tpu.memory_space<vmem>>, %arg4: memref<16x8x128xf32, #tpu.memory_space<vmem>>, %arg5: memref<2x18x18x128xf32, #tpu.memory_space<vmem>>, %arg6: memref<32x16x128xf32, #tpu.memory_space<vmem>>, %arg7: memref<16x16x128xf32, #tpu.memory_space<vmem>>) attributes {dimension_semantics = [#tpu.dimension_semantics<arbitrary>], iteration_bounds = array<i64: 1>, scalar_prefetch = 0 : i64, scratch_operands = 3 : i64, tpu.core_type = #tpu.core_type<tc>, window_params = [{pipeline_mode = #tpu.pipeline_mode<synchronous>, transform_indices = @transform_0, window_bounds = array<i64: 2, 18, 18, 128>}, {pipeline_mode = #tpu.pipeline_mode<synchronous>, transform_indices = @transform_1, window_bounds = array<i64: 9, 128, 128>}, {pipeline_mode = #tpu.pipeline_mode<synchronous>, transform_indices = @transform_2, window_bounds = array<i64: 1, 128>}, {pipeline_mode = #tpu.pipeline_mode<synchronous>, transform_indices = @transform_3, window_bounds = array<i64: 16, 8, 128>}]} {
    %c0 = arith.constant 0 : index
    %c0_0 = arith.constant 0 : index
    %c0_1 = arith.constant 0 : index
    %c0_2 = arith.constant 0 : index
    %0 = vector.load %arg1[%c0, %c0_0, %c0_1, %c0_2] : memref<2x18x18x128xf32, #tpu.memory_space<vmem>>, vector<2x18x18x128xf32>
    %1 = math.absf %0 : vector<2x18x18x128xf32>
    %cst = arith.constant dense<0xFF800000> : vector<2x18x128xf32>
    %2 = vector.multi_reduction <maximumf>, %1, %cst [2] : vector<2x18x18x128xf32> to vector<2x18x128xf32>
    %3 = vector.shape_cast %2 : vector<2x18x128xf32> to vector<2x18x1x128xf32>
    %cst_3 = arith.constant dense<0xFF800000> : vector<2x1x128xf32>
    %4 = vector.multi_reduction <maximumf>, %3, %cst_3 [1] : vector<2x18x1x128xf32> to vector<2x1x128xf32>
    %5 = vector.shape_cast %4 : vector<2x1x128xf32> to vector<2x1x1x128xf32>
    %cst_4 = arith.constant dense<0xFF800000> : vector<1x1x128xf32>
    %6 = vector.multi_reduction <maximumf>, %5, %cst_4 [0] : vector<2x1x1x128xf32> to vector<1x1x128xf32>
    %7 = vector.shape_cast %6 : vector<1x1x128xf32> to vector<1x1x1x128xf32>
    %cst_5 = arith.constant 0.000000e+00 : f32
    %8 = vector.broadcast %cst_5 : f32 to vector<1x1x1x128xf32>
    %9 = arith.cmpf ogt, %7, %8 : vector<1x1x1x128xf32>
    %cst_6 = arith.constant 1.270000e+02 : f32
    %10 = vector.broadcast %cst_6 : f32 to vector<1x1x1x128xf32>
    %11 = arith.divf %7, %10 : vector<1x1x1x128xf32>
    %cst_7 = arith.constant 1.000000e+00 : f32
    %12 = vector.broadcast %cst_7 : f32 to vector<1x1x1x128xf32>
    %13 = arith.select %9, %11, %12 : vector<1x1x1x128xi1>, vector<1x1x1x128xf32>
    %14 = vector.broadcast %13 : vector<1x1x1x128xf32> to vector<2x18x18x128xf32>
    %15 = arith.divf %0, %14 : vector<2x18x18x128xf32>
    %16 = math.roundeven %15 : vector<2x18x18x128xf32>
    %cst_8 = arith.constant -1.280000e+02 : f32
    %cst_9 = arith.constant 1.270000e+02 : f32
    %17 = vector.broadcast %cst_8 : f32 to vector<2x18x18x128xf32>
    %18 = arith.maximumf %17, %16 : vector<2x18x18x128xf32>
    %19 = vector.broadcast %cst_9 : f32 to vector<2x18x18x128xf32>
    %20 = arith.minimumf %19, %18 : vector<2x18x18x128xf32>
    %21 = vector.broadcast %13 : vector<1x1x1x128xf32> to vector<2x18x18x128xf32>
    %22 = arith.mulf %20, %21 : vector<2x18x18x128xf32>
    %c0_10 = arith.constant 0 : index
    %c0_11 = arith.constant 0 : index
    %c0_12 = arith.constant 0 : index
    %c0_13 = arith.constant 0 : index
    %23 = vector.load %arg5[%c0_10, %c0_11, %c0_12, %c0_13] : memref<2x18x18x128xf32, #tpu.memory_space<vmem>>, vector<2x18x18x128xf32>
    tpu.vector_store %arg5[%c0_10, %c0_11, %c0_12, %c0_13], %22 {strides = array<i32>} : memref<2x18x18x128xf32, #tpu.memory_space<vmem>>, vector<2x18x18x128xf32>,
    %cst_14 = arith.constant 0.000000e+00 : f32
    %24 = vector.broadcast %cst_14 : f32 to vector<512x128xf32>
    %c0_15 = arith.constant 0 : index
    %c0_16 = arith.constant 0 : index
    %c0_17 = arith.constant 0 : index
    %c0_18 = arith.constant 0 : index
    %25 = vector.load %arg5[%c0_15, %c0_16, %c0_17, %c0_18] : memref<2x18x18x128xf32, #tpu.memory_space<vmem>>, vector<2x16x16x128xf32>
    %26 = vector.shape_cast %25 : vector<2x16x16x128xf32> to vector<512x128xf32>
    %c0_19 = arith.constant 0 : index
    %c0_20 = arith.constant 0 : index
    %c0_21 = arith.constant 0 : index
    %27 = vector.load %arg2[%c0_19, %c0_20, %c0_21] : memref<9x128x128xf32, #tpu.memory_space<vmem>>, vector<1x128x128xf32>
    %28 = vector.shape_cast %27 : vector<1x128x128xf32> to vector<128x128xf32>
    %cst_22 = arith.constant dense<0.000000e+00> : vector<512x128xf32>
    %29 = tpu.matmul %26, %28, %cst_22 {dimension_numbers = #tpu.dot_dimension_numbers<[1], [0], [0], [1], [0, 0, 1, 1], [], []>} : vector<512x128xf32>, vector<128x128xf32>, vector<512x128xf32> -> vector<512x128xf32>
    %30 = arith.addf %24, %29 : vector<512x128xf32>
    %c0_23 = arith.constant 0 : index
    %c0_24 = arith.constant 0 : index
    %c1 = arith.constant 1 : index
    %c0_25 = arith.constant 0 : index
    %31 = vector.load %arg5[%c0_23, %c0_24, %c1, %c0_25] : memref<2x18x18x128xf32, #tpu.memory_space<vmem>>, vector<2x16x16x128xf32>
    %32 = vector.shape_cast %31 : vector<2x16x16x128xf32> to vector<512x128xf32>
    %c1_26 = arith.constant 1 : index
    %c0_27 = arith.constant 0 : index
    %c0_28 = arith.constant 0 : index
    %33 = vector.load %arg2[%c1_26, %c0_27, %c0_28] : memref<9x128x128xf32, #tpu.memory_space<vmem>>, vector<1x128x128xf32>
    %34 = vector.shape_cast %33 : vector<1x128x128xf32> to vector<128x128xf32>
    %cst_29 = arith.constant dense<0.000000e+00> : vector<512x128xf32>
    %35 = tpu.matmul %32, %34, %cst_29 {dimension_numbers = #tpu.dot_dimension_numbers<[1], [0], [0], [1], [0, 0, 1, 1], [], []>} : vector<512x128xf32>, vector<128x128xf32>, vector<512x128xf32> -> vector<512x128xf32>
    %36 = arith.addf %30, %35 : vector<512x128xf32>
    %c0_30 = arith.constant 0 : index
    %c0_31 = arith.constant 0 : index
    %c2 = arith.constant 2 : index
    %c0_32 = arith.constant 0 : index
    %37 = vector.load %arg5[%c0_30, %c0_31, %c2, %c0_32] : memref<2x18x18x128xf32, #tpu.memory_space<vmem>>, vector<2x16x16x128xf32>
    %38 = vector.shape_cast %37 : vector<2x16x16x128xf32> to vector<512x128xf32>
    %c2_33 = arith.constant 2 : index
    %c0_34 = arith.constant 0 : index
    %c0_35 = arith.constant 0 : index
    %39 = vector.load %arg2[%c2_33, %c0_34, %c0_35] : memref<9x128x128xf32, #tpu.memory_space<vmem>>, vector<1x128x128xf32>
    %40 = vector.shape_cast %39 : vector<1x128x128xf32> to vector<128x128xf32>
    %cst_36 = arith.constant dense<0.000000e+00> : vector<512x128xf32>
    %41 = tpu.matmul %38, %40, %cst_36 {dimension_numbers = #tpu.dot_dimension_numbers<[1], [0], [0], [1], [0, 0, 1, 1], [], []>} : vector<512x128xf32>, vector<128x128xf32>, vector<512x128xf32> -> vector<512x128xf32>
    %42 = arith.addf %36, %41 : vector<512x128xf32>
    %c0_37 = arith.constant 0 : index
    %c1_38 = arith.constant 1 : index
    %c0_39 = arith.constant 0 : index
    %c0_40 = arith.constant 0 : index
    %43 = vector.load %arg5[%c0_37, %c1_38, %c0_39, %c0_40] : memref<2x18x18x128xf32, #tpu.memory_space<vmem>>, vector<2x16x16x128xf32>
    %44 = vector.shape_cast %43 : vector<2x16x16x128xf32> to vector<512x128xf32>
    %c3 = arith.constant 3 : index
    %c0_41 = arith.constant 0 : index
    %c0_42 = arith.constant 0 : index
    %45 = vector.load %arg2[%c3, %c0_41, %c0_42] : memref<9x128x128xf32, #tpu.memory_space<vmem>>, vector<1x128x128xf32>
    %46 = vector.shape_cast %45 : vector<1x128x128xf32> to vector<128x128xf32>
    %cst_43 = arith.constant dense<0.000000e+00> : vector<512x128xf32>
    %47 = tpu.matmul %44, %46, %cst_43 {dimension_numbers = #tpu.dot_dimension_numbers<[1], [0], [0], [1], [0, 0, 1, 1], [], []>} : vector<512x128xf32>, vector<128x128xf32>, vector<512x128xf32> -> vector<512x128xf32>
    %48 = arith.addf %42, %47 : vector<512x128xf32>
    %c0_44 = arith.constant 0 : index
    %c1_45 = arith.constant 1 : index
    %c1_46 = arith.constant 1 : index
    %c0_47 = arith.constant 0 : index
    %49 = vector.load %arg5[%c0_44, %c1_45, %c1_46, %c0_47] : memref<2x18x18x128xf32, #tpu.memory_space<vmem>>, vector<2x16x16x128xf32>
    %50 = vector.shape_cast %49 : vector<2x16x16x128xf32> to vector<512x128xf32>
    %c4 = arith.constant 4 : index
    %c0_48 = arith.constant 0 : index
    %c0_49 = arith.constant 0 : index
    %51 = vector.load %arg2[%c4, %c0_48, %c0_49] : memref<9x128x128xf32, #tpu.memory_space<vmem>>, vector<1x128x128xf32>
    %52 = vector.shape_cast %51 : vector<1x128x128xf32> to vector<128x128xf32>
    %cst_50 = arith.constant dense<0.000000e+00> : vector<512x128xf32>
    %53 = tpu.matmul %50, %52, %cst_50 {dimension_numbers = #tpu.dot_dimension_numbers<[1], [0], [0], [1], [0, 0, 1, 1], [], []>} : vector<512x128xf32>, vector<128x128xf32>, vector<512x128xf32> -> vector<512x128xf32>
    %54 = arith.addf %48, %53 : vector<512x128xf32>
    %c0_51 = arith.constant 0 : index
    %c1_52 = arith.constant 1 : index
    %c2_53 = arith.constant 2 : index
    %c0_54 = arith.constant 0 : index
    %55 = vector.load %arg5[%c0_51, %c1_52, %c2_53, %c0_54] : memref<2x18x18x128xf32, #tpu.memory_space<vmem>>, vector<2x16x16x128xf32>
    %56 = vector.shape_cast %55 : vector<2x16x16x128xf32> to vector<512x128xf32>
    %c5 = arith.constant 5 : index
    %c0_55 = arith.constant 0 : index
    %c0_56 = arith.constant 0 : index
    %57 = vector.load %arg2[%c5, %c0_55, %c0_56] : memref<9x128x128xf32, #tpu.memory_space<vmem>>, vector<1x128x128xf32>
    %58 = vector.shape_cast %57 : vector<1x128x128xf32> to vector<128x128xf32>
    %cst_57 = arith.constant dense<0.000000e+00> : vector<512x128xf32>
    %59 = tpu.matmul %56, %58, %cst_57 {dimension_numbers = #tpu.dot_dimension_numbers<[1], [0], [0], [1], [0, 0, 1, 1], [], []>} : vector<512x128xf32>, vector<128x128xf32>, vector<512x128xf32> -> vector<512x128xf32>
    %60 = arith.addf %54, %59 : vector<512x128xf32>
    %c0_58 = arith.constant 0 : index
    %c2_59 = arith.constant 2 : index
    %c0_60 = arith.constant 0 : index
    %c0_61 = arith.constant 0 : index
    %61 = vector.load %arg5[%c0_58, %c2_59, %c0_60, %c0_61] : memref<2x18x18x128xf32, #tpu.memory_space<vmem>>, vector<2x16x16x128xf32>
    %62 = vector.shape_cast %61 : vector<2x16x16x128xf32> to vector<512x128xf32>
    %c6 = arith.constant 6 : index
    %c0_62 = arith.constant 0 : index
    %c0_63 = arith.constant 0 : index
    %63 = vector.load %arg2[%c6, %c0_62, %c0_63] : memref<9x128x128xf32, #tpu.memory_space<vmem>>, vector<1x128x128xf32>
    %64 = vector.shape_cast %63 : vector<1x128x128xf32> to vector<128x128xf32>
    %cst_64 = arith.constant dense<0.000000e+00> : vector<512x128xf32>
    %65 = tpu.matmul %62, %64, %cst_64 {dimension_numbers = #tpu.dot_dimension_numbers<[1], [0], [0], [1], [0, 0, 1, 1], [], []>} : vector<512x128xf32>, vector<128x128xf32>, vector<512x128xf32> -> vector<512x128xf32>
    %66 = arith.addf %60, %65 : vector<512x128xf32>
    %c0_65 = arith.constant 0 : index
    %c2_66 = arith.constant 2 : index
    %c1_67 = arith.constant 1 : index
    %c0_68 = arith.constant 0 : index
    %67 = vector.load %arg5[%c0_65, %c2_66, %c1_67, %c0_68] : memref<2x18x18x128xf32, #tpu.memory_space<vmem>>, vector<2x16x16x128xf32>
    %68 = vector.shape_cast %67 : vector<2x16x16x128xf32> to vector<512x128xf32>
    %c7 = arith.constant 7 : index
    %c0_69 = arith.constant 0 : index
    %c0_70 = arith.constant 0 : index
    %69 = vector.load %arg2[%c7, %c0_69, %c0_70] : memref<9x128x128xf32, #tpu.memory_space<vmem>>, vector<1x128x128xf32>
    %70 = vector.shape_cast %69 : vector<1x128x128xf32> to vector<128x128xf32>
    %cst_71 = arith.constant dense<0.000000e+00> : vector<512x128xf32>
    %71 = tpu.matmul %68, %70, %cst_71 {dimension_numbers = #tpu.dot_dimension_numbers<[1], [0], [0], [1], [0, 0, 1, 1], [], []>} : vector<512x128xf32>, vector<128x128xf32>, vector<512x128xf32> -> vector<512x128xf32>
    %72 = arith.addf %66, %71 : vector<512x128xf32>
    %c0_72 = arith.constant 0 : index
    %c2_73 = arith.constant 2 : index
    %c2_74 = arith.constant 2 : index
    %c0_75 = arith.constant 0 : index
    %73 = vector.load %arg5[%c0_72, %c2_73, %c2_74, %c0_75] : memref<2x18x18x128xf32, #tpu.memory_space<vmem>>, vector<2x16x16x128xf32>
    %74 = vector.shape_cast %73 : vector<2x16x16x128xf32> to vector<512x128xf32>
    %c8 = arith.constant 8 : index
    %c0_76 = arith.constant 0 : index
    %c0_77 = arith.constant 0 : index
    %75 = vector.load %arg2[%c8, %c0_76, %c0_77] : memref<9x128x128xf32, #tpu.memory_space<vmem>>, vector<1x128x128xf32>
    %76 = vector.shape_cast %75 : vector<1x128x128xf32> to vector<128x128xf32>
    %cst_78 = arith.constant dense<0.000000e+00> : vector<512x128xf32>
    %77 = tpu.matmul %74, %76, %cst_78 {dimension_numbers = #tpu.dot_dimension_numbers<[1], [0], [0], [1], [0, 0, 1, 1], [], []>} : vector<512x128xf32>, vector<128x128xf32>, vector<512x128xf32> -> vector<512x128xf32>
    %78 = arith.addf %72, %77 : vector<512x128xf32>
    %c0_79 = arith.constant 0 : index
    %c0_80 = arith.constant 0 : index
    %79 = vector.load %arg3[%c0_79, %c0_80] : memref<1x128xf32, #tpu.memory_space<vmem>>, vector<1x128xf32>
    %80 = vector.broadcast %79 : vector<1x128xf32> to vector<512x128xf32>
    %81 = arith.addf %78, %80 : vector<512x128xf32>
    %82 = math.absf %81 : vector<512x128xf32>
    %cst_81 = arith.constant dense<0xFF800000> : vector<512xf32>
    %83 = vector.multi_reduction <maximumf>, %82, %cst_81 [1] : vector<512x128xf32> to vector<512xf32>
    %84 = vector.shape_cast %83 : vector<512xf32> to vector<512x1xf32>
    %cst_82 = arith.constant dense<0xFF800000> : vector<1xf32>
    %85 = vector.multi_reduction <maximumf>, %84, %cst_82 [0] : vector<512x1xf32> to vector<1xf32>
    %86 = vector.shape_cast %85 : vector<1xf32> to vector<1x1xf32>
    %cst_83 = arith.constant 0.000000e+00 : f32
    %87 = vector.broadcast %cst_83 : f32 to vector<1x1xf32>
    %88 = arith.cmpf ogt, %86, %87 : vector<1x1xf32>
    %cst_84 = arith.constant 1.270000e+02 : f32
    %89 = vector.broadcast %cst_84 : f32 to vector<1x1xf32>
    %90 = arith.divf %86, %89 : vector<1x1xf32>
    %cst_85 = arith.constant 1.000000e+00 : f32
    %91 = vector.broadcast %cst_85 : f32 to vector<1x1xf32>
    %92 = arith.select %88, %90, %91 : vector<1x1xi1>, vector<1x1xf32>
    %93 = vector.broadcast %92 : vector<1x1xf32> to vector<512x128xf32>
    %94 = arith.divf %81, %93 : vector<512x128xf32>
    %95 = math.roundeven %94 : vector<512x128xf32>
    %cst_86 = arith.constant -1.280000e+02 : f32
    %cst_87 = arith.constant 1.270000e+02 : f32
    %96 = vector.broadcast %cst_86 : f32 to vector<512x128xf32>
    %97 = arith.maximumf %96, %95 : vector<512x128xf32>
    %98 = vector.broadcast %cst_87 : f32 to vector<512x128xf32>
    %99 = arith.minimumf %98, %97 : vector<512x128xf32>
    %100 = vector.broadcast %92 : vector<1x1xf32> to vector<512x128xf32>
    %101 = arith.mulf %99, %100 : vector<512x128xf32>
    %cst_88 = arith.constant 0.000000e+00 : f32
    %102 = vector.broadcast %cst_88 : f32 to vector<512x128xf32>
    %103 = arith.maximumf %101, %102 : vector<512x128xf32>
    %104 = vector.shape_cast %103 : vector<512x128xf32> to vector<32x16x128xf32>
    %c0_89 = arith.constant 0 : index
    %c0_90 = arith.constant 0 : index
    %c0_91 = arith.constant 0 : index
    %105 = vector.load %arg6[%c0_89, %c0_90, %c0_91] : memref<32x16x128xf32, #tpu.memory_space<vmem>>, vector<32x16x128xf32>
    tpu.vector_store %arg6[%c0_89, %c0_90, %c0_91], %104 {strides = array<i32>} : memref<32x16x128xf32, #tpu.memory_space<vmem>>, vector<32x16x128xf32>,
    %c0_92 = arith.constant 0 : index
    %c0_93 = arith.constant 0 : index
    %c0_94 = arith.constant 0 : index
    %106 = tpu.strided_load %arg6[%c0_92, %c0_93, %c0_94] {strides = array<i32: 2, 1, 1>} : memref<32x16x128xf32, #tpu.memory_space<vmem>>, vector<16x16x128xf32>
    %c1_95 = arith.constant 1 : index
    %c0_96 = arith.constant 0 : index
    %c0_97 = arith.constant 0 : index
    %107 = tpu.strided_load %arg6[%c1_95, %c0_96, %c0_97] {strides = array<i32: 2, 1, 1>} : memref<32x16x128xf32, #tpu.memory_space<vmem>>, vector<16x16x128xf32>
    %108 = arith.maximumf %106, %107 : vector<16x16x128xf32>
    %c0_98 = arith.constant 0 : index
    %c0_99 = arith.constant 0 : index
    %c0_100 = arith.constant 0 : index
    %109 = vector.load %arg7[%c0_98, %c0_99, %c0_100] : memref<16x16x128xf32, #tpu.memory_space<vmem>>, vector<16x16x128xf32>
    tpu.vector_store %arg7[%c0_98, %c0_99, %c0_100], %108 {strides = array<i32>} : memref<16x16x128xf32, #tpu.memory_space<vmem>>, vector<16x16x128xf32>,
    %c0_101 = arith.constant 0 : index
    %c0_102 = arith.constant 0 : index
    %c0_103 = arith.constant 0 : index
    %110 = tpu.strided_load %arg7[%c0_101, %c0_102, %c0_103] {strides = array<i32: 1, 2, 1>} : memref<16x16x128xf32, #tpu.memory_space<vmem>>, vector<16x8x128xf32>
    %c0_104 = arith.constant 0 : index
    %c1_105 = arith.constant 1 : index
    %c0_106 = arith.constant 0 : index
    %111 = tpu.strided_load %arg7[%c0_104, %c1_105, %c0_106] {strides = array<i32: 1, 2, 1>} : memref<16x16x128xf32, #tpu.memory_space<vmem>>, vector<16x8x128xf32>
    %112 = arith.maximumf %110, %111 : vector<16x8x128xf32>
    %c0_107 = arith.constant 0 : index
    %c0_108 = arith.constant 0 : index
    %c0_109 = arith.constant 0 : index
    %113 = vector.load %arg4[%c0_107, %c0_108, %c0_109] : memref<16x8x128xf32, #tpu.memory_space<vmem>>, vector<16x8x128xf32>
    tpu.vector_store %arg4[%c0_107, %c0_108, %c0_109], %112 {strides = array<i32>} : memref<16x8x128xf32, #tpu.memory_space<vmem>>, vector<16x8x128xf32>,
    return
  }
  func.func @transform_0(%arg0: i32) -> (i32, i32, i32, i32) {
    %c0_i32 = arith.constant 0 : i32
    %c0_i32_0 = arith.constant 0 : i32
    %c0_i32_1 = arith.constant 0 : i32
    %c0_i32_2 = arith.constant 0 : i32
    %c0_i32_3 = arith.constant 0 : i32
    return %c0_i32, %c0_i32_0, %c0_i32_1, %c0_i32_2 : i32, i32, i32, i32
  }
  func.func @transform_1(%arg0: i32) -> (i32, i32, i32) {
    %c0_i32 = arith.constant 0 : i32
    %c0_i32_0 = arith.constant 0 : i32
    %c0_i32_1 = arith.constant 0 : i32
    %c0_i32_2 = arith.constant 0 : i32
    return %c0_i32, %c0_i32_0, %c0_i32_1 : i32, i32, i32
  }
  func.func @transform_2(%arg0: i32) -> (i32, i32) {
    %c0_i32 = arith.constant 0 : i32
    %c0_i32_0 = arith.constant 0 : i32
    %c0_i32_1 = arith.constant 0 : i32
    return %c0_i32, %c0_i32_0 : i32, i32
  }
  func.func @transform_3(%arg0: i32) -> (i32, i32, i32) {
    %c0_i32 = arith.constant 0 : i32
    %c0_i32_0 = arith.constant 0 : i32
    %c0_i32_1 = arith.constant 0 : i32
    %c0_i32_2 = arith.constant 0 : i32
    return %c0_i32, %c0_i32_0, %c0_i32_1 : i32, i32, i32
  }
}

module attributes {stable_mosaic.version = 11 : i64} {
  func.func @_qat_conv_block_kernel(%arg0: i32, %arg1: memref<2x10x10x128xf32, #tpu.memory_space<vmem>>, %arg2: memref<9x128x128xf32, #tpu.memory_space<vmem>>, %arg3: memref<1x128xf32, #tpu.memory_space<vmem>>, %arg4: memref<8x4x128xf32, #tpu.memory_space<vmem>>, %arg5: memref<2x10x10x128xf32, #tpu.memory_space<vmem>>, %arg6: memref<16x8x128xf32, #tpu.memory_space<vmem>>, %arg7: memref<8x8x128xf32, #tpu.memory_space<vmem>>) attributes {dimension_semantics = [#tpu.dimension_semantics<arbitrary>], iteration_bounds = array<i64: 1>, scalar_prefetch = 0 : i64, scratch_operands = 3 : i64, tpu.core_type = #tpu.core_type<tc>, window_params = [{pipeline_mode = #tpu.pipeline_mode<synchronous>, transform_indices = @transform_0, window_bounds = array<i64: 2, 10, 10, 128>}, {pipeline_mode = #tpu.pipeline_mode<synchronous>, transform_indices = @transform_1, window_bounds = array<i64: 9, 128, 128>}, {pipeline_mode = #tpu.pipeline_mode<synchronous>, transform_indices = @transform_2, window_bounds = array<i64: 1, 128>}, {pipeline_mode = #tpu.pipeline_mode<synchronous>, transform_indices = @transform_3, window_bounds = array<i64: 8, 4, 128>}]} {
    %c0 = arith.constant 0 : index
    %c0_0 = arith.constant 0 : index
    %c0_1 = arith.constant 0 : index
    %c0_2 = arith.constant 0 : index
    %0 = vector.load %arg1[%c0, %c0_0, %c0_1, %c0_2] : memref<2x10x10x128xf32, #tpu.memory_space<vmem>>, vector<2x10x10x128xf32>
    %1 = math.absf %0 : vector<2x10x10x128xf32>
    %cst = arith.constant dense<0xFF800000> : vector<2x10x128xf32>
    %2 = vector.multi_reduction <maximumf>, %1, %cst [2] : vector<2x10x10x128xf32> to vector<2x10x128xf32>
    %3 = vector.shape_cast %2 : vector<2x10x128xf32> to vector<2x10x1x128xf32>
    %cst_3 = arith.constant dense<0xFF800000> : vector<2x1x128xf32>
    %4 = vector.multi_reduction <maximumf>, %3, %cst_3 [1] : vector<2x10x1x128xf32> to vector<2x1x128xf32>
    %5 = vector.shape_cast %4 : vector<2x1x128xf32> to vector<2x1x1x128xf32>
    %cst_4 = arith.constant dense<0xFF800000> : vector<1x1x128xf32>
    %6 = vector.multi_reduction <maximumf>, %5, %cst_4 [0] : vector<2x1x1x128xf32> to vector<1x1x128xf32>
    %7 = vector.shape_cast %6 : vector<1x1x128xf32> to vector<1x1x1x128xf32>
    %cst_5 = arith.constant 0.000000e+00 : f32
    %8 = vector.broadcast %cst_5 : f32 to vector<1x1x1x128xf32>
    %9 = arith.cmpf ogt, %7, %8 : vector<1x1x1x128xf32>
    %cst_6 = arith.constant 1.270000e+02 : f32
    %10 = vector.broadcast %cst_6 : f32 to vector<1x1x1x128xf32>
    %11 = arith.divf %7, %10 : vector<1x1x1x128xf32>
    %cst_7 = arith.constant 1.000000e+00 : f32
    %12 = vector.broadcast %cst_7 : f32 to vector<1x1x1x128xf32>
    %13 = arith.select %9, %11, %12 : vector<1x1x1x128xi1>, vector<1x1x1x128xf32>
    %14 = vector.broadcast %13 : vector<1x1x1x128xf32> to vector<2x10x10x128xf32>
    %15 = arith.divf %0, %14 : vector<2x10x10x128xf32>
    %16 = math.roundeven %15 : vector<2x10x10x128xf32>
    %cst_8 = arith.constant -1.280000e+02 : f32
    %cst_9 = arith.constant 1.270000e+02 : f32
    %17 = vector.broadcast %cst_8 : f32 to vector<2x10x10x128xf32>
    %18 = arith.maximumf %17, %16 : vector<2x10x10x128xf32>
    %19 = vector.broadcast %cst_9 : f32 to vector<2x10x10x128xf32>
    %20 = arith.minimumf %19, %18 : vector<2x10x10x128xf32>
    %21 = vector.broadcast %13 : vector<1x1x1x128xf32> to vector<2x10x10x128xf32>
    %22 = arith.mulf %20, %21 : vector<2x10x10x128xf32>
    %c0_10 = arith.constant 0 : index
    %c0_11 = arith.constant 0 : index
    %c0_12 = arith.constant 0 : index
    %c0_13 = arith.constant 0 : index
    %23 = vector.load %arg5[%c0_10, %c0_11, %c0_12, %c0_13] : memref<2x10x10x128xf32, #tpu.memory_space<vmem>>, vector<2x10x10x128xf32>
    tpu.vector_store %arg5[%c0_10, %c0_11, %c0_12, %c0_13], %22 {strides = array<i32>} : memref<2x10x10x128xf32, #tpu.memory_space<vmem>>, vector<2x10x10x128xf32>,
    %cst_14 = arith.constant 0.000000e+00 : f32
    %24 = vector.broadcast %cst_14 : f32 to vector<128x128xf32>
    %c0_15 = arith.constant 0 : index
    %c0_16 = arith.constant 0 : index
    %c0_17 = arith.constant 0 : index
    %c0_18 = arith.constant 0 : index
    %25 = vector.load %arg5[%c0_15, %c0_16, %c0_17, %c0_18] : memref<2x10x10x128xf32, #tpu.memory_space<vmem>>, vector<2x8x8x128xf32>
    %26 = vector.shape_cast %25 : vector<2x8x8x128xf32> to vector<128x128xf32>
    %c0_19 = arith.constant 0 : index
    %c0_20 = arith.constant 0 : index
    %c0_21 = arith.constant 0 : index
    %27 = vector.load %arg2[%c0_19, %c0_20, %c0_21] : memref<9x128x128xf32, #tpu.memory_space<vmem>>, vector<1x128x128xf32>
    %28 = vector.shape_cast %27 : vector<1x128x128xf32> to vector<128x128xf32>
    %cst_22 = arith.constant dense<0.000000e+00> : vector<128x128xf32>
    %29 = tpu.matmul %26, %28, %cst_22 {dimension_numbers = #tpu.dot_dimension_numbers<[1], [0], [0], [1], [0, 0, 1, 1], [], []>} : vector<128x128xf32>, vector<128x128xf32>, vector<128x128xf32> -> vector<128x128xf32>
    %30 = arith.addf %24, %29 : vector<128x128xf32>
    %c0_23 = arith.constant 0 : index
    %c0_24 = arith.constant 0 : index
    %c1 = arith.constant 1 : index
    %c0_25 = arith.constant 0 : index
    %31 = vector.load %arg5[%c0_23, %c0_24, %c1, %c0_25] : memref<2x10x10x128xf32, #tpu.memory_space<vmem>>, vector<2x8x8x128xf32>
    %32 = vector.shape_cast %31 : vector<2x8x8x128xf32> to vector<128x128xf32>
    %c1_26 = arith.constant 1 : index
    %c0_27 = arith.constant 0 : index
    %c0_28 = arith.constant 0 : index
    %33 = vector.load %arg2[%c1_26, %c0_27, %c0_28] : memref<9x128x128xf32, #tpu.memory_space<vmem>>, vector<1x128x128xf32>
    %34 = vector.shape_cast %33 : vector<1x128x128xf32> to vector<128x128xf32>
    %cst_29 = arith.constant dense<0.000000e+00> : vector<128x128xf32>
    %35 = tpu.matmul %32, %34, %cst_29 {dimension_numbers = #tpu.dot_dimension_numbers<[1], [0], [0], [1], [0, 0, 1, 1], [], []>} : vector<128x128xf32>, vector<128x128xf32>, vector<128x128xf32> -> vector<128x128xf32>
    %36 = arith.addf %30, %35 : vector<128x128xf32>
    %c0_30 = arith.constant 0 : index
    %c0_31 = arith.constant 0 : index
    %c2 = arith.constant 2 : index
    %c0_32 = arith.constant 0 : index
    %37 = vector.load %arg5[%c0_30, %c0_31, %c2, %c0_32] : memref<2x10x10x128xf32, #tpu.memory_space<vmem>>, vector<2x8x8x128xf32>
    %38 = vector.shape_cast %37 : vector<2x8x8x128xf32> to vector<128x128xf32>
    %c2_33 = arith.constant 2 : index
    %c0_34 = arith.constant 0 : index
    %c0_35 = arith.constant 0 : index
    %39 = vector.load %arg2[%c2_33, %c0_34, %c0_35] : memref<9x128x128xf32, #tpu.memory_space<vmem>>, vector<1x128x128xf32>
    %40 = vector.shape_cast %39 : vector<1x128x128xf32> to vector<128x128xf32>
    %cst_36 = arith.constant dense<0.000000e+00> : vector<128x128xf32>
    %41 = tpu.matmul %38, %40, %cst_36 {dimension_numbers = #tpu.dot_dimension_numbers<[1], [0], [0], [1], [0, 0, 1, 1], [], []>} : vector<128x128xf32>, vector<128x128xf32>, vector<128x128xf32> -> vector<128x128xf32>
    %42 = arith.addf %36, %41 : vector<128x128xf32>
    %c0_37 = arith.constant 0 : index
    %c1_38 = arith.constant 1 : index
    %c0_39 = arith.constant 0 : index
    %c0_40 = arith.constant 0 : index
    %43 = vector.load %arg5[%c0_37, %c1_38, %c0_39, %c0_40] : memref<2x10x10x128xf32, #tpu.memory_space<vmem>>, vector<2x8x8x128xf32>
    %44 = vector.shape_cast %43 : vector<2x8x8x128xf32> to vector<128x128xf32>
    %c3 = arith.constant 3 : index
    %c0_41 = arith.constant 0 : index
    %c0_42 = arith.constant 0 : index
    %45 = vector.load %arg2[%c3, %c0_41, %c0_42] : memref<9x128x128xf32, #tpu.memory_space<vmem>>, vector<1x128x128xf32>
    %46 = vector.shape_cast %45 : vector<1x128x128xf32> to vector<128x128xf32>
    %cst_43 = arith.constant dense<0.000000e+00> : vector<128x128xf32>
    %47 = tpu.matmul %44, %46, %cst_43 {dimension_numbers = #tpu.dot_dimension_numbers<[1], [0], [0], [1], [0, 0, 1, 1], [], []>} : vector<128x128xf32>, vector<128x128xf32>, vector<128x128xf32> -> vector<128x128xf32>
    %48 = arith.addf %42, %47 : vector<128x128xf32>
    %c0_44 = arith.constant 0 : index
    %c1_45 = arith.constant 1 : index
    %c1_46 = arith.constant 1 : index
    %c0_47 = arith.constant 0 : index
    %49 = vector.load %arg5[%c0_44, %c1_45, %c1_46, %c0_47] : memref<2x10x10x128xf32, #tpu.memory_space<vmem>>, vector<2x8x8x128xf32>
    %50 = vector.shape_cast %49 : vector<2x8x8x128xf32> to vector<128x128xf32>
    %c4 = arith.constant 4 : index
    %c0_48 = arith.constant 0 : index
    %c0_49 = arith.constant 0 : index
    %51 = vector.load %arg2[%c4, %c0_48, %c0_49] : memref<9x128x128xf32, #tpu.memory_space<vmem>>, vector<1x128x128xf32>
    %52 = vector.shape_cast %51 : vector<1x128x128xf32> to vector<128x128xf32>
    %cst_50 = arith.constant dense<0.000000e+00> : vector<128x128xf32>
    %53 = tpu.matmul %50, %52, %cst_50 {dimension_numbers = #tpu.dot_dimension_numbers<[1], [0], [0], [1], [0, 0, 1, 1], [], []>} : vector<128x128xf32>, vector<128x128xf32>, vector<128x128xf32> -> vector<128x128xf32>
    %54 = arith.addf %48, %53 : vector<128x128xf32>
    %c0_51 = arith.constant 0 : index
    %c1_52 = arith.constant 1 : index
    %c2_53 = arith.constant 2 : index
    %c0_54 = arith.constant 0 : index
    %55 = vector.load %arg5[%c0_51, %c1_52, %c2_53, %c0_54] : memref<2x10x10x128xf32, #tpu.memory_space<vmem>>, vector<2x8x8x128xf32>
    %56 = vector.shape_cast %55 : vector<2x8x8x128xf32> to vector<128x128xf32>
    %c5 = arith.constant 5 : index
    %c0_55 = arith.constant 0 : index
    %c0_56 = arith.constant 0 : index
    %57 = vector.load %arg2[%c5, %c0_55, %c0_56] : memref<9x128x128xf32, #tpu.memory_space<vmem>>, vector<1x128x128xf32>
    %58 = vector.shape_cast %57 : vector<1x128x128xf32> to vector<128x128xf32>
    %cst_57 = arith.constant dense<0.000000e+00> : vector<128x128xf32>
    %59 = tpu.matmul %56, %58, %cst_57 {dimension_numbers = #tpu.dot_dimension_numbers<[1], [0], [0], [1], [0, 0, 1, 1], [], []>} : vector<128x128xf32>, vector<128x128xf32>, vector<128x128xf32> -> vector<128x128xf32>
    %60 = arith.addf %54, %59 : vector<128x128xf32>
    %c0_58 = arith.constant 0 : index
    %c2_59 = arith.constant 2 : index
    %c0_60 = arith.constant 0 : index
    %c0_61 = arith.constant 0 : index
    %61 = vector.load %arg5[%c0_58, %c2_59, %c0_60, %c0_61] : memref<2x10x10x128xf32, #tpu.memory_space<vmem>>, vector<2x8x8x128xf32>
    %62 = vector.shape_cast %61 : vector<2x8x8x128xf32> to vector<128x128xf32>
    %c6 = arith.constant 6 : index
    %c0_62 = arith.constant 0 : index
    %c0_63 = arith.constant 0 : index
    %63 = vector.load %arg2[%c6, %c0_62, %c0_63] : memref<9x128x128xf32, #tpu.memory_space<vmem>>, vector<1x128x128xf32>
    %64 = vector.shape_cast %63 : vector<1x128x128xf32> to vector<128x128xf32>
    %cst_64 = arith.constant dense<0.000000e+00> : vector<128x128xf32>
    %65 = tpu.matmul %62, %64, %cst_64 {dimension_numbers = #tpu.dot_dimension_numbers<[1], [0], [0], [1], [0, 0, 1, 1], [], []>} : vector<128x128xf32>, vector<128x128xf32>, vector<128x128xf32> -> vector<128x128xf32>
    %66 = arith.addf %60, %65 : vector<128x128xf32>
    %c0_65 = arith.constant 0 : index
    %c2_66 = arith.constant 2 : index
    %c1_67 = arith.constant 1 : index
    %c0_68 = arith.constant 0 : index
    %67 = vector.load %arg5[%c0_65, %c2_66, %c1_67, %c0_68] : memref<2x10x10x128xf32, #tpu.memory_space<vmem>>, vector<2x8x8x128xf32>
    %68 = vector.shape_cast %67 : vector<2x8x8x128xf32> to vector<128x128xf32>
    %c7 = arith.constant 7 : index
    %c0_69 = arith.constant 0 : index
    %c0_70 = arith.constant 0 : index
    %69 = vector.load %arg2[%c7, %c0_69, %c0_70] : memref<9x128x128xf32, #tpu.memory_space<vmem>>, vector<1x128x128xf32>
    %70 = vector.shape_cast %69 : vector<1x128x128xf32> to vector<128x128xf32>
    %cst_71 = arith.constant dense<0.000000e+00> : vector<128x128xf32>
    %71 = tpu.matmul %68, %70, %cst_71 {dimension_numbers = #tpu.dot_dimension_numbers<[1], [0], [0], [1], [0, 0, 1, 1], [], []>} : vector<128x128xf32>, vector<128x128xf32>, vector<128x128xf32> -> vector<128x128xf32>
    %72 = arith.addf %66, %71 : vector<128x128xf32>
    %c0_72 = arith.constant 0 : index
    %c2_73 = arith.constant 2 : index
    %c2_74 = arith.constant 2 : index
    %c0_75 = arith.constant 0 : index
    %73 = vector.load %arg5[%c0_72, %c2_73, %c2_74, %c0_75] : memref<2x10x10x128xf32, #tpu.memory_space<vmem>>, vector<2x8x8x128xf32>
    %74 = vector.shape_cast %73 : vector<2x8x8x128xf32> to vector<128x128xf32>
    %c8 = arith.constant 8 : index
    %c0_76 = arith.constant 0 : index
    %c0_77 = arith.constant 0 : index
    %75 = vector.load %arg2[%c8, %c0_76, %c0_77] : memref<9x128x128xf32, #tpu.memory_space<vmem>>, vector<1x128x128xf32>
    %76 = vector.shape_cast %75 : vector<1x128x128xf32> to vector<128x128xf32>
    %cst_78 = arith.constant dense<0.000000e+00> : vector<128x128xf32>
    %77 = tpu.matmul %74, %76, %cst_78 {dimension_numbers = #tpu.dot_dimension_numbers<[1], [0], [0], [1], [0, 0, 1, 1], [], []>} : vector<128x128xf32>, vector<128x128xf32>, vector<128x128xf32> -> vector<128x128xf32>
    %78 = arith.addf %72, %77 : vector<128x128xf32>
    %c0_79 = arith.constant 0 : index
    %c0_80 = arith.constant 0 : index
    %79 = vector.load %arg3[%c0_79, %c0_80] : memref<1x128xf32, #tpu.memory_space<vmem>>, vector<1x128xf32>
    %80 = vector.broadcast %79 : vector<1x128xf32> to vector<128x128xf32>
    %81 = arith.addf %78, %80 : vector<128x128xf32>
    %82 = math.absf %81 : vector<128x128xf32>
    %cst_81 = arith.constant dense<0xFF800000> : vector<128xf32>
    %83 = vector.multi_reduction <maximumf>, %82, %cst_81 [1] : vector<128x128xf32> to vector<128xf32>
    %84 = vector.shape_cast %83 : vector<128xf32> to vector<128x1xf32>
    %cst_82 = arith.constant dense<0xFF800000> : vector<1xf32>
    %85 = vector.multi_reduction <maximumf>, %84, %cst_82 [0] : vector<128x1xf32> to vector<1xf32>
    %86 = vector.shape_cast %85 : vector<1xf32> to vector<1x1xf32>
    %cst_83 = arith.constant 0.000000e+00 : f32
    %87 = vector.broadcast %cst_83 : f32 to vector<1x1xf32>
    %88 = arith.cmpf ogt, %86, %87 : vector<1x1xf32>
    %cst_84 = arith.constant 1.270000e+02 : f32
    %89 = vector.broadcast %cst_84 : f32 to vector<1x1xf32>
    %90 = arith.divf %86, %89 : vector<1x1xf32>
    %cst_85 = arith.constant 1.000000e+00 : f32
    %91 = vector.broadcast %cst_85 : f32 to vector<1x1xf32>
    %92 = arith.select %88, %90, %91 : vector<1x1xi1>, vector<1x1xf32>
    %93 = vector.broadcast %92 : vector<1x1xf32> to vector<128x128xf32>
    %94 = arith.divf %81, %93 : vector<128x128xf32>
    %95 = math.roundeven %94 : vector<128x128xf32>
    %cst_86 = arith.constant -1.280000e+02 : f32
    %cst_87 = arith.constant 1.270000e+02 : f32
    %96 = vector.broadcast %cst_86 : f32 to vector<128x128xf32>
    %97 = arith.maximumf %96, %95 : vector<128x128xf32>
    %98 = vector.broadcast %cst_87 : f32 to vector<128x128xf32>
    %99 = arith.minimumf %98, %97 : vector<128x128xf32>
    %100 = vector.broadcast %92 : vector<1x1xf32> to vector<128x128xf32>
    %101 = arith.mulf %99, %100 : vector<128x128xf32>
    %cst_88 = arith.constant 0.000000e+00 : f32
    %102 = vector.broadcast %cst_88 : f32 to vector<128x128xf32>
    %103 = arith.maximumf %101, %102 : vector<128x128xf32>
    %104 = vector.shape_cast %103 : vector<128x128xf32> to vector<16x8x128xf32>
    %c0_89 = arith.constant 0 : index
    %c0_90 = arith.constant 0 : index
    %c0_91 = arith.constant 0 : index
    %105 = vector.load %arg6[%c0_89, %c0_90, %c0_91] : memref<16x8x128xf32, #tpu.memory_space<vmem>>, vector<16x8x128xf32>
    tpu.vector_store %arg6[%c0_89, %c0_90, %c0_91], %104 {strides = array<i32>} : memref<16x8x128xf32, #tpu.memory_space<vmem>>, vector<16x8x128xf32>,
    %c0_92 = arith.constant 0 : index
    %c0_93 = arith.constant 0 : index
    %c0_94 = arith.constant 0 : index
    %106 = tpu.strided_load %arg6[%c0_92, %c0_93, %c0_94] {strides = array<i32: 2, 1, 1>} : memref<16x8x128xf32, #tpu.memory_space<vmem>>, vector<8x8x128xf32>
    %c1_95 = arith.constant 1 : index
    %c0_96 = arith.constant 0 : index
    %c0_97 = arith.constant 0 : index
    %107 = tpu.strided_load %arg6[%c1_95, %c0_96, %c0_97] {strides = array<i32: 2, 1, 1>} : memref<16x8x128xf32, #tpu.memory_space<vmem>>, vector<8x8x128xf32>
    %108 = arith.maximumf %106, %107 : vector<8x8x128xf32>
    %c0_98 = arith.constant 0 : index
    %c0_99 = arith.constant 0 : index
    %c0_100 = arith.constant 0 : index
    %109 = vector.load %arg7[%c0_98, %c0_99, %c0_100] : memref<8x8x128xf32, #tpu.memory_space<vmem>>, vector<8x8x128xf32>
    tpu.vector_store %arg7[%c0_98, %c0_99, %c0_100], %108 {strides = array<i32>} : memref<8x8x128xf32, #tpu.memory_space<vmem>>, vector<8x8x128xf32>,
    %c0_101 = arith.constant 0 : index
    %c0_102 = arith.constant 0 : index
    %c0_103 = arith.constant 0 : index
    %110 = tpu.strided_load %arg7[%c0_101, %c0_102, %c0_103] {strides = array<i32: 1, 2, 1>} : memref<8x8x128xf32, #tpu.memory_space<vmem>>, vector<8x4x128xf32>
    %c0_104 = arith.constant 0 : index
    %c1_105 = arith.constant 1 : index
    %c0_106 = arith.constant 0 : index
    %111 = tpu.strided_load %arg7[%c0_104, %c1_105, %c0_106] {strides = array<i32: 1, 2, 1>} : memref<8x8x128xf32, #tpu.memory_space<vmem>>, vector<8x4x128xf32>
    %112 = arith.maximumf %110, %111 : vector<8x4x128xf32>
    %c0_107 = arith.constant 0 : index
    %c0_108 = arith.constant 0 : index
    %c0_109 = arith.constant 0 : index
    %113 = vector.load %arg4[%c0_107, %c0_108, %c0_109] : memref<8x4x128xf32, #tpu.memory_space<vmem>>, vector<8x4x128xf32>
    tpu.vector_store %arg4[%c0_107, %c0_108, %c0_109], %112 {strides = array<i32>} : memref<8x4x128xf32, #tpu.memory_space<vmem>>, vector<8x4x128xf32>,
    return
  }
  func.func @transform_0(%arg0: i32) -> (i32, i32, i32, i32) {
    %c0_i32 = arith.constant 0 : i32
    %c0_i32_0 = arith.constant 0 : i32
    %c0_i32_1 = arith.constant 0 : i32
    %c0_i32_2 = arith.constant 0 : i32
    %c0_i32_3 = arith.constant 0 : i32
    return %c0_i32, %c0_i32_0, %c0_i32_1, %c0_i32_2 : i32, i32, i32, i32
  }
  func.func @transform_1(%arg0: i32) -> (i32, i32, i32) {
    %c0_i32 = arith.constant 0 : i32
    %c0_i32_0 = arith.constant 0 : i32
    %c0_i32_1 = arith.constant 0 : i32
    %c0_i32_2 = arith.constant 0 : i32
    return %c0_i32, %c0_i32_0, %c0_i32_1 : i32, i32, i32
  }
  func.func @transform_2(%arg0: i32) -> (i32, i32) {
    %c0_i32 = arith.constant 0 : i32
    %c0_i32_0 = arith.constant 0 : i32
    %c0_i32_1 = arith.constant 0 : i32
    return %c0_i32, %c0_i32_0 : i32, i32
  }
  func.func @transform_3(%arg0: i32) -> (i32, i32, i32) {
    %c0_i32 = arith.constant 0 : i32
    %c0_i32_0 = arith.constant 0 : i32
    %c0_i32_1 = arith.constant 0 : i32
    %c0_i32_2 = arith.constant 0 : i32
    return %c0_i32, %c0_i32_0, %c0_i32_1 : i32, i32, i32
  }
}

module attributes {stable_mosaic.version = 11 : i64} {
  func.func @_linear_kernel(%arg0: i32, %arg1: memref<2x2048xf32, #tpu.memory_space<vmem>>, %arg2: memref<2048x128xf32, #tpu.memory_space<vmem>>, %arg3: memref<1x128xf32, #tpu.memory_space<vmem>>, %arg4: memref<2x128xf32, #tpu.memory_space<vmem>>) attributes {dimension_semantics = [#tpu.dimension_semantics<arbitrary>], iteration_bounds = array<i64: 1>, scalar_prefetch = 0 : i64, scratch_operands = 0 : i64, tpu.core_type = #tpu.core_type<tc>, window_params = [{pipeline_mode = #tpu.pipeline_mode<synchronous>, transform_indices = @transform_0, window_bounds = array<i64: 2, 2048>}, {pipeline_mode = #tpu.pipeline_mode<synchronous>, transform_indices = @transform_1, window_bounds = array<i64: 2048, 128>}, {pipeline_mode = #tpu.pipeline_mode<synchronous>, transform_indices = @transform_2, window_bounds = array<i64: 1, 128>}, {pipeline_mode = #tpu.pipeline_mode<synchronous>, transform_indices = @transform_3, window_bounds = array<i64: 2, 128>}]} {
    %c0 = arith.constant 0 : index
    %c0_0 = arith.constant 0 : index
    %0 = vector.load %arg1[%c0, %c0_0] : memref<2x2048xf32, #tpu.memory_space<vmem>>, vector<2x2048xf32>
    %c0_1 = arith.constant 0 : index
    %c0_2 = arith.constant 0 : index
    %1 = vector.load %arg2[%c0_1, %c0_2] : memref<2048x128xf32, #tpu.memory_space<vmem>>, vector<2048x128xf32>
    %cst = arith.constant dense<0.000000e+00> : vector<2x128xf32>
    %2 = tpu.matmul %0, %1, %cst {dimension_numbers = #tpu.dot_dimension_numbers<[1], [0], [0], [1], [0, 0, 1, 1], [], []>} : vector<2x2048xf32>, vector<2048x128xf32>, vector<2x128xf32> -> vector<2x128xf32>
    %c0_3 = arith.constant 0 : index
    %c0_4 = arith.constant 0 : index
    %3 = vector.load %arg3[%c0_3, %c0_4] : memref<1x128xf32, #tpu.memory_space<vmem>>, vector<1x128xf32>
    %4 = vector.broadcast %3 : vector<1x128xf32> to vector<2x128xf32>
    %5 = arith.addf %2, %4 : vector<2x128xf32>
    %c0_5 = arith.constant 0 : index
    %c0_6 = arith.constant 0 : index
    %6 = vector.load %arg4[%c0_5, %c0_6] : memref<2x128xf32, #tpu.memory_space<vmem>>, vector<2x128xf32>
    tpu.vector_store %arg4[%c0_5, %c0_6], %5 {strides = array<i32>} : memref<2x128xf32, #tpu.memory_space<vmem>>, vector<2x128xf32>,
    return
  }
  func.func @transform_0(%arg0: i32) -> (i32, i32) {
    %c0_i32 = arith.constant 0 : i32
    %c0_i32_0 = arith.constant 0 : i32
    %c0_i32_1 = arith.constant 0 : i32
    return %c0_i32, %c0_i32_0 : i32, i32
  }
  func.func @transform_1(%arg0: i32) -> (i32, i32) {
    %c0_i32 = arith.constant 0 : i32
    %c0_i32_0 = arith.constant 0 : i32
    %c0_i32_1 = arith.constant 0 : i32
    return %c0_i32, %c0_i32_0 : i32, i32
  }
  func.func @transform_2(%arg0: i32) -> (i32, i32) {
    %c0_i32 = arith.constant 0 : i32
    %c0_i32_0 = arith.constant 0 : i32
    %c0_i32_1 = arith.constant 0 : i32
    return %c0_i32, %c0_i32_0 : i32, i32
  }
  func.func @transform_3(%arg0: i32) -> (i32, i32) {
    %c0_i32 = arith.constant 0 : i32
    %c0_i32_0 = arith.constant 0 : i32
    %c0_i32_1 = arith.constant 0 : i32
    return %c0_i32, %c0_i32_0 : i32, i32
  }
}

</mosaic_0001>

<bundles_post_ra>
// kernel: quantization_aware_vgg_forward.5
= control target key start
LH: loop header
LB: loop body
LE: loop exit
PB: predicated region body
PF: predicated region fallthrough
CT: control target
= control target key end

     0   :  { %v1512_v47 = vmov 1983009808   ;;  %v290_v49 = vlaneseq  ;;  %s2369_s0 = inlined_call_operand.vmem [shape: f32[2,2048], index: 0, kind: input, shape index: {}]   ;;  %s2370_s1 = inlined_call_operand.vmem [shape: f32[2048,128], index: 1, kind: input, shape index: {}]   ;;  %s2371_s2 = inlined_call_operand.vmem [shape: f32[1,128], index: 2, kind: input, shape index: {}]   ;;  %s2372_s3 = inlined_call_operand.hbm [shape: f32[2,128], index: 3, kind: output, shape index: {}]  }
   0x1   :  { %v35_v0 = vld [vmem:[%s2370_s1 + $0x80] sm:$0xff]  ;;  %v36_v1 = vld [vmem:[%s2370_s1 + $0x88] sm:$0xff]  ;;  %v37_v11 = vld [vmem:[%s2370_s1 + $0x90] sm:$0xff]  ;;  %v288_v48 = vunpack.c.l.s4 %v1512_v47 }
   0x2   :  { %v19_v2 = vld [vmem:[%s2370_s1] sm:$0xff]  ;;  %v1226_v3 = vpack.c.bf16 %v36_v1, %v35_v0  ;;  %v20_v4 = vld [vmem:[%s2370_s1 + $0x8] sm:$0xff]  ;;  %v38_v13 = vld [vmem:[%s2370_s1 + $0x98] sm:$0xff]  ;;  %v291_v0 = vshrl.u32 %v290_v49, 7 }
   0x3   :  { %v67_v5 = vld [vmem:[%s2370_s1 + $0x180] sm:$0xff]  ;;  %v68_v6 = vld [vmem:[%s2370_s1 + $0x188] sm:$0xff]  ;;  %v1228_v7 = vpack.c.bf16 %v20_v4, %v19_v2  ;;  %v21_v14 = vld [vmem:[%s2370_s1 + $0x10] sm:$0xff]  ;;  %v1230_v16 = vpack.c.bf16 %v38_v13, %v37_v11  ;;  %v289_v63 = vunpack.c.0.s8 %v288_v48 }
   0x4   :  { %v1258_v8 = vpack.c.bf16 %v68_v6, %v67_v5  ;;  %v51_v9 = vld [vmem:[%s2370_s1 + $0x100] sm:$0xff]  ;;  %v52_v10 = vld [vmem:[%s2370_s1 + $0x108] sm:$0xff]  ;;  %1227 = vmatprep.subr.bf16.mxu0 %v1226_v3  ;;  %v22_v15 = vld [vmem:[%s2370_s1 + $0x18] sm:$0xff] }
   0x5   :  { %v1260_v12 = vpack.c.bf16 %v52_v10, %v51_v9  ;;  %1229 = vmatpush3.bf16.msra.mxu0 %v1228_v7  ;;  %v1232_v17 = vpack.c.bf16 %v22_v15, %v21_v14  ;;  %v69_v18 = vld [vmem:[%s2370_s1 + $0x190] sm:$0xff]  ;;  %v70_v19 = vld [vmem:[%s2370_s1 + $0x198] sm:$0xff]  ;;  %v39_v23 = vld [vmem:[%s2370_s1 + $0xa0] sm:$0xff]  ;;  %v1684_v13 = vsub.s32 %v289_v63, %v291_v0 }
   0x6   :  { %1259 = vmatprep.subr.bf16.mxu1 %v1258_v8  ;;  %v53_v20 = vld [vmem:[%s2370_s1 + $0x110] sm:$0xff]  ;;  %v1262_v21 = vpack.c.bf16 %v70_v19, %v69_v18  ;;  %v54_v22 = vld [vmem:[%s2370_s1 + $0x118] sm:$0xff]  ;;  %v40_v24 = vld [vmem:[%s2370_s1 + $0xa8] sm:$0xff]  ;;  %1231 = vmatprep.subr.bf16.mxu0 %v1230_v16 }
   0x7   :  { %1261 = vmatpush3.bf16.msra.mxu1 %v1260_v12  ;;  %v1264_v25 = vpack.c.bf16 %v54_v22, %v53_v20  ;;  %v1234_v26 = vpack.c.bf16 %v40_v24, %v39_v23  ;;  %v23_v27 = vld [vmem:[%s2370_s1 + $0x20] sm:$0xff]  ;;  %v24_v28 = vld [vmem:[%s2370_s1 + $0x28] sm:$0xff]  ;;  %v41_v35 = vld [vmem:[%s2370_s1 + $0xb0] sm:$0xff] }
   0x8   :  { %v71_v29 = vld [vmem:[%s2370_s1 + $0x1a0] sm:$0xff]  ;;  %1263 = vmatprep.subr.bf16.mxu1 %v1262_v21  ;;  %v72_v30 = vld [vmem:[%s2370_s1 + $0x1a8] sm:$0xff]  ;;  %v1236_v33 = vpack.c.bf16 %v24_v28, %v23_v27  ;;  %v42_v36 = vld [vmem:[%s2370_s1 + $0xb8] sm:$0xff] }
   0x9   :  { %v55_v31 = vld [vmem:[%s2370_s1 + $0x120] sm:$0xff]  ;;  %v56_v32 = vld [vmem:[%s2370_s1 + $0x128] sm:$0xff]  ;;  %1233 = vmatpush3.bf16.msra.mxu0 %v1232_v17  ;;  %v1266_v34 = vpack.c.bf16 %v72_v30, %v71_v29  ;;  %v25_v37 = vld [vmem:[%s2370_s1 + $0x30] sm:$0xff]  ;;  %v1238_v39 = vpack.c.bf16 %v42_v36, %v41_v35 }
   0xa   :  { %1235 = vmatprep.subr.bf16.mxu0 %v1234_v26  ;;  %v1268_v38 = vpack.c.bf16 %v56_v32, %v55_v31  ;;  %v26_v40 = vld [vmem:[%s2370_s1 + $0x38] sm:$0xff]  ;;  %v73_v41 = vld [vmem:[%s2370_s1 + $0x1b0] sm:$0xff]  ;;  %v43_v46 = vld [vmem:[%s2370_s1 + $0xc0] sm:$0xff] }
   0xb   :  { %1265 = vmatpush3.bf16.msra.mxu1 %v1264_v25  ;;  %v74_v42 = vld [vmem:[%s2370_s1 + $0x1b8] sm:$0xff]  ;;  %v57_v44 = vld [vmem:[%s2370_s1 + $0x130] sm:$0xff]  ;;  %v44_v50 = vld [vmem:[%s2370_s1 + $0xc8] sm:$0xff]  ;;  %v1240_v51 = vpack.c.bf16 %v26_v40, %v25_v37 }
   0xc   :  { %1267 = vmatprep.subr.bf16.mxu1 %v1266_v34  ;;  %v1270_v43 = vpack.c.bf16 %v74_v42, %v73_v41  ;;  %v58_v45 = vld [vmem:[%s2370_s1 + $0x138] sm:$0xff]  ;;  %v75_v52 = vld [vmem:[%s2370_s1 + $0x1c0] sm:$0xff]  ;;  %v76_v53 = vld [vmem:[%s2370_s1 + $0x1c8] sm:$0xff]  ;;  %v1242_v55 = vpack.c.bf16 %v44_v50, %v43_v46 }
   0xd   :  { %1237 = vmatpush3.bf16.msra.mxu0 %v1236_v33  ;;  %v1272_v54 = vpack.c.bf16 %v58_v45, %v57_v44  ;;  %v27_v56 = vld [vmem:[%s2370_s1 + $0x40] sm:$0xff]  ;;  %v28_v57 = vld [vmem:[%s2370_s1 + $0x48] sm:$0xff]  ;;  %v1274_v59 = vpack.c.bf16 %v76_v53, %v75_v52  ;;  %v45_v61 = vld [vmem:[%s2370_s1 + $0xd0] sm:$0xff] }
   0xe   :  { %1239 = vmatprep.subr.bf16.mxu0 %v1238_v39  ;;  %v59_v58 = vld [vmem:[%s2370_s1 + $0x140] sm:$0xff]  ;;  %v60_v60 = vld [vmem:[%s2370_s1 + $0x148] sm:$0xff]  ;;  %v46_v62 = vld [vmem:[%s2370_s1 + $0xd8] sm:$0xff]  ;;  %v1244_v3 = vpack.c.bf16 %v28_v57, %v27_v56 }
   0xf   :  { %1269 = vmatpush3.bf16.msra.mxu1 %v1268_v38  ;;  %v77_v1 = vld [vmem:[%s2370_s1 + $0x1d0] sm:$0xff]  ;;  %v78_v2 = vld [vmem:[%s2370_s1 + $0x1d8] sm:$0xff]  ;;  %v1276_v4 = vpack.c.bf16 %v60_v60, %v59_v58  ;;  %v1246_v5 = vpack.c.bf16 %v46_v62, %v45_v61  ;;  %v47_v11 = vld [vmem:[%s2370_s1 + $0xe0] sm:$0xff] }
  0x10   :  { %1271 = vmatprep.subr.bf16.mxu1 %v1270_v43  ;;  %v29_v6 = vld [vmem:[%s2370_s1 + $0x50] sm:$0xff]  ;;  %v30_v7 = vld [vmem:[%s2370_s1 + $0x58] sm:$0xff]  ;;  %v1278_v9 = vpack.c.bf16 %v78_v2, %v77_v1  ;;  %v48_v12 = vld [vmem:[%s2370_s1 + $0xe8] sm:$0xff] }
  0x11   :  { %1241 = vmatpush3.bf16.msra.mxu0 %v1240_v51  ;;  %v61_v8 = vld [vmem:[%s2370_s1 + $0x150] sm:$0xff]  ;;  %v62_v10 = vld [vmem:[%s2370_s1 + $0x158] sm:$0xff]  ;;  %v79_v14 = vld [vmem:[%s2370_s1 + $0x1e0] sm:$0xff]  ;;  %v1248_v16 = vpack.c.bf16 %v30_v7, %v29_v6  ;;  %v1250_v19 = vpack.c.bf16 %v48_v12, %v47_v11 }
  0x12   :  { %1243 = vmatprep.subr.bf16.mxu0 %v1242_v55  ;;  %v80_v15 = vld [vmem:[%s2370_s1 + $0x1e8] sm:$0xff]  ;;  %v31_v17 = vld [vmem:[%s2370_s1 + $0x60] sm:$0xff]  ;;  %v1280_v18 = vpack.c.bf16 %v62_v10, %v61_v8  ;;  %v49_v25 = vld [vmem:[%s2370_s1 + $0xf0] sm:$0xff] }
  0x13   :  { %1273 = vmatpush3.bf16.msra.mxu1 %v1272_v54  ;;  %v32_v20 = vld [vmem:[%s2370_s1 + $0x68] sm:$0xff]  ;;  %v63_v21 = vld [vmem:[%s2370_s1 + $0x160] sm:$0xff]  ;;  %v1282_v23 = vpack.c.bf16 %v80_v15, %v79_v14  ;;  %v50_v26 = vld [vmem:[%s2370_s1 + $0xf8] sm:$0xff] }
  0x14   :  { %1275 = vmatprep.subr.bf16.mxu1 %v1274_v59  ;;  %v15_v22 = vld [vmem:[%s2369_s0] sm:$0xff]  ;;  %v64_v24 = vld [vmem:[%s2370_s1 + $0x168] sm:$0xff]  ;;  %v81_v29 = vld [vmem:[%s2370_s1 + $0x1f0] sm:$0xff]  ;;  %v1252_v31 = vpack.c.bf16 %v32_v20, %v31_v17  ;;  %v1254_v35 = vpack.c.bf16 %v50_v26, %v49_v25 }
  0x15   :  { %1245 = vmatpush3.bf16.msra.mxu0 %v1244_v3  ;;  %v293_v27 = vrot.slane %v15_v22, %v1684_v13  ;;  %v286_v28 = vcombine.high %v15_v22, %v15_v22  ;;  %v82_v30 = vld [vmem:[%s2370_s1 + $0x1f8] sm:$0xff]  ;;  %v1284_v34 = vpack.c.bf16 %v64_v24, %v63_v21  ;;  %v33_v36 = vld [vmem:[%s2370_s1 + $0x70] sm:$0xff]  ;;  %v99_v41 = vld [vmem:[%s2370_s1 + $0x280] sm:$0xff] }
  0x16   :  { %1247 = vmatprep.subr.bf16.mxu0 %v1246_v5  ;;  %v34_v37 = vld [vmem:[%s2370_s1 + $0x78] sm:$0xff]  ;;  %v65_v38 = vld [vmem:[%s2370_s1 + $0x170] sm:$0xff]  ;;  %v1286_v39 = vpack.c.bf16 %v82_v30, %v81_v29  ;;  %v100_v42 = vld [vmem:[%s2370_s1 + $0x288] sm:$0xff] }
  0x17   :  { %1277 = vmatpush3.bf16.msra.mxu1 %v1276_v4  ;;  %v301_v32 = vcombine.high %v293_v27, %v293_v27  ;;  %v300_v33 = vrot.slane %v286_v28, %v1684_v13  ;;  %v66_v40 = vld [vmem:[%s2370_s1 + $0x178] sm:$0xff]  ;;  %v131_v44 = vld [vmem:[%s2370_s1 + $0x380] sm:$0xff]  ;;  %v132_v45 = vld [vmem:[%s2370_s1 + $0x388] sm:$0xff]  ;;  %v1256_v46 = vpack.c.bf16 %v34_v37, %v33_v36  ;;  %v1290_v48 = vpack.c.bf16 %v100_v42, %v99_v41 }
  0x18   :  { %1279 = vmatprep.subr.bf16.mxu1 %v1278_v9  ;;  %v1288_v47 = vpack.c.bf16 %v66_v40, %v65_v38  ;;  %v83_v49 = vld [vmem:[%s2370_s1 + $0x200] sm:$0xff]  ;;  %v84_v50 = vld [vmem:[%s2370_s1 + $0x208] sm:$0xff]  ;;  %v1322_v52 = vpack.c.bf16 %v132_v45, %v131_v44  ;;  %v101_v54 = vld [vmem:[%s2370_s1 + $0x290] sm:$0xff] }
  0x19   :  { %1249 = vmatpush3.bf16.msra.mxu0 %v1248_v16  ;;  %434 = vmatprep.mubr.f32.mxu0 %v301_v32  ;;  %v302_v43 = vcombine.high %v300_v33, %v300_v33  ;;  %v115_v51 = vld [vmem:[%s2370_s1 + $0x300] sm:$0xff]  ;;  %v116_v53 = vld [vmem:[%s2370_s1 + $0x308] sm:$0xff]  ;;  %v102_v55 = vld [vmem:[%s2370_s1 + $0x298] sm:$0xff]  ;;  %v1292_v58 = vpack.c.bf16 %v84_v50, %v83_v49 }
  0x1a   :  { %1251 = vmatprep.subr.bf16.mxu0 %v1250_v19  ;;  %v133_v56 = vld [vmem:[%s2370_s1 + $0x390] sm:$0xff]  ;;  %v134_v57 = vld [vmem:[%s2370_s1 + $0x398] sm:$0xff]  ;;  %v1324_v59 = vpack.c.bf16 %v116_v53, %v115_v51  ;;  %v1294_v60 = vpack.c.bf16 %v102_v55, %v101_v54  ;;  %v103_v2 = vld [vmem:[%s2370_s1 + $0x2a0] sm:$0xff] }
  0x1b   :  { %1281 = vmatpush3.bf16.msra.mxu1 %v1280_v18  ;;  %504 = vmatprep.mubr.f32.mxu1 %v302_v43  ;;  %v85_v61 = vld [vmem:[%s2370_s1 + $0x210] sm:$0xff]  ;;  %v86_v62 = vld [vmem:[%s2370_s1 + $0x218] sm:$0xff]  ;;  %v1326_v0 = vpack.c.bf16 %v134_v57, %v133_v56  ;;  %v104_v3 = vld [vmem:[%s2370_s1 + $0x2a8] sm:$0xff] }
  0x1c   :  { %1283 = vmatprep.subr.bf16.mxu1 %v1282_v23  ;;  %v117_v63 = vld [vmem:[%s2370_s1 + $0x310] sm:$0xff]  ;;  %v118_v1 = vld [vmem:[%s2370_s1 + $0x318] sm:$0xff]  ;;  %v135_v4 = vld [vmem:[%s2370_s1 + $0x3a0] sm:$0xff]  ;;  %v1296_v6 = vpack.c.bf16 %v86_v62, %v85_v61  ;;  %v1298_v8 = vpack.c.bf16 %v104_v3, %v103_v2 }
  0x1d   :  { %1253 = vmatpush3.bf16.msra.mxu0 %v1252_v31  ;;  %v136_v5 = vld [vmem:[%s2370_s1 + $0x3a8] sm:$0xff]  ;;  %v1328_v7 = vpack.c.bf16 %v118_v1, %v117_v63  ;;  %v87_v9 = vld [vmem:[%s2370_s1 + $0x220] sm:$0xff]  ;;  %v105_v15 = vld [vmem:[%s2370_s1 + $0x2b0] sm:$0xff] }
  0x1e   :  { %1255 = vmatprep.subr.bf16.mxu0 %v1254_v35  ;;  %v88_v10 = vld [vmem:[%s2370_s1 + $0x228] sm:$0xff]  ;;  %v119_v11 = vld [vmem:[%s2370_s1 + $0x320] sm:$0xff]  ;;  %v1330_v12 = vpack.c.bf16 %v136_v5, %v135_v4  ;;  %v106_v16 = vld [vmem:[%s2370_s1 + $0x2b8] sm:$0xff] }
  0x1f   :  { %1285 = vmatpush3.bf16.msra.mxu1 %v1284_v34  ;;  %v120_v14 = vld [vmem:[%s2370_s1 + $0x328] sm:$0xff]  ;;  %v137_v17 = vld [vmem:[%s2370_s1 + $0x3b0] sm:$0xff]  ;;  %v138_v18 = vld [vmem:[%s2370_s1 + $0x3b8] sm:$0xff]  ;;  %v1300_v19 = vpack.c.bf16 %v88_v10, %v87_v9  ;;  %v1302_v21 = vpack.c.bf16 %v106_v16, %v105_v15 }
  0x20   :  { %1287 = vmatprep.subr.bf16.mxu1 %v1286_v39  ;;  %v1332_v20 = vpack.c.bf16 %v120_v14, %v119_v11  ;;  %v89_v22 = vld [vmem:[%s2370_s1 + $0x230] sm:$0xff]  ;;  %v90_v23 = vld [vmem:[%s2370_s1 + $0x238] sm:$0xff]  ;;  %v1334_v25 = vpack.c.bf16 %v138_v18, %v137_v17  ;;  %v108_v28 = vld [vmem:[%s2370_s1 + $0x2c8] sm:$0xff] }
  0x21   :  { %1257 = vmatpush3.bf16.msra.mxu0 %v1256_v46  ;;  %v121_v24 = vld [vmem:[%s2370_s1 + $0x330] sm:$0xff]  ;;  %v122_v26 = vld [vmem:[%s2370_s1 + $0x338] sm:$0xff]  ;;  %v139_v29 = vld [vmem:[%s2370_s1 + $0x3c0] sm:$0xff]  ;;  %v1304_v32 = vpack.c.bf16 %v90_v23, %v89_v22 }
  0x22   :  { %1291 = vmatprep.subr.bf16.mxu0 %v1290_v48  ;;  %v140_v30 = vld [vmem:[%s2370_s1 + $0x3c8] sm:$0xff]  ;;  %v1336_v35 = vpack.c.bf16 %v122_v26, %v121_v24  ;;  %v91_v37 = vld [vmem:[%s2370_s1 + $0x240] sm:$0xff]  ;;  %v109_v42 = vld [vmem:[%s2370_s1 + $0x2d0] sm:$0xff] }
  0x23   :  { %1289 = vmatpush3.bf16.msra.mxu1 %v1288_v47  ;;  %v16_v31 = vld [vmem:[%s2369_s0 + $0x8] sm:$0xff]  ;;  %v123_v39 = vld [vmem:[%s2370_s1 + $0x340] sm:$0xff]  ;;  %v1338_v40 = vpack.c.bf16 %v140_v30, %v139_v29  ;;  %v110_v43 = vld [vmem:[%s2370_s1 + $0x2d8] sm:$0xff] }
  0x24   :  { %1323 = vmatprep.subr.bf16.mxu1 %v1322_v52  ;;  %435 = vmatmul.mubr.f32.vlgmr.msra.gmra.mrb[0].mxu0 %v293_v27  ;;  %v107_v27 = vld [vmem:[%s2370_s1 + $0x2c0] sm:$0xff]  ;;  %v303_v34 = vcombine.high %v16_v31, %v16_v31  ;;  %v92_v38 = vld [vmem:[%s2370_s1 + $0x248] sm:$0xff]  ;;  %v141_v46 = vld [vmem:[%s2370_s1 + $0x3d0] sm:$0xff]  ;;  %v1310_v51 = vpack.c.bf16 %v110_v43, %v109_v42 }
  0x25   :  { %1293 = vmatpush3.bf16.msra.mxu0 %v1292_v58  ;;  %v1306_v36 = vpack.c.bf16 %v108_v28, %v107_v27  ;;  %v124_v41 = vld [vmem:[%s2370_s1 + $0x348] sm:$0xff]  ;;  %v142_v47 = vld [vmem:[%s2370_s1 + $0x3d8] sm:$0xff]  ;;  %v1308_v48 = vpack.c.bf16 %v92_v38, %v91_v37  ;;  %v93_v52 = vld [vmem:[%s2370_s1 + $0x250] sm:$0xff] }
  0x26   :  { %505 = vmatmul.mubr.f32.vlgmr.msra.gmra.mrb[0].mxu1 %v300_v33  ;;  %1295 = vmatprep.subr.bf16.mxu0 %v1294_v60  ;;  %v1845_v33 = vrot.slane %v16_v31, %v1684_v13  ;;  %v1868_v45 = vrot.slane %v303_v34, %v1684_v13  ;;  %v1340_v50 = vpack.c.bf16 %v124_v41, %v123_v39  ;;  %v94_v53 = vld [vmem:[%s2370_s1 + $0x258] sm:$0xff]  ;;  %v125_v54 = vld [vmem:[%s2370_s1 + $0x350] sm:$0xff]  ;;  %v111_v57 = vld [vmem:[%s2370_s1 + $0x2e0] sm:$0xff] }
  0x27   :  { %1325 = vmatpush3.bf16.msra.mxu1 %v1324_v59  ;;  %v1342_v55 = vpack.c.bf16 %v142_v47, %v141_v46  ;;  %v126_v56 = vld [vmem:[%s2370_s1 + $0x358] sm:$0xff]  ;;  %v112_v58 = vld [vmem:[%s2370_s1 + $0x2e8] sm:$0xff]  ;;  %v143_v59 = vld [vmem:[%s2370_s1 + $0x3e0] sm:$0xff]  ;;  %v1312_v61 = vpack.c.bf16 %v94_v53, %v93_v52 }
  0x28   :  { %1327 = vmatprep.subr.bf16.mxu1 %v1326_v0  ;;  %v318_v44 = vcombine.high %v1845_v33, %v1845_v33  ;;  %v319_v49 = vcombine.high %v1868_v45, %v1868_v45  ;;  %v144_v60 = vld [vmem:[%s2370_s1 + $0x3e8] sm:$0xff]  ;;  %v1344_v62 = vpack.c.bf16 %v126_v56, %v125_v54  ;;  %v1314_v63 = vpack.c.bf16 %v112_v58, %v111_v57  ;;  %v95_v0 = vld [vmem:[%s2370_s1 + $0x260] sm:$0xff]  ;;  %v113_v5 = vld [vmem:[%s2370_s1 + $0x2f0] sm:$0xff] }
  0x29   :  { %1297 = vmatpush3.bf16.msra.mxu0 %v1296_v6  ;;  %v96_v1 = vld [vmem:[%s2370_s1 + $0x268] sm:$0xff]  ;;  %v127_v2 = vld [vmem:[%s2370_s1 + $0x360] sm:$0xff]  ;;  %v1346_v3 = vpack.c.bf16 %v144_v60, %v143_v59  ;;  %v114_v6 = vld [vmem:[%s2370_s1 + $0x2f8] sm:$0xff] }
  0x2a   :  { %1299 = vmatprep.subr.bf16.mxu0 %v1298_v8  ;;  %574 = vmatprep.mubr.f32.mxu0 %v318_v44  ;;  %v128_v4 = vld [vmem:[%s2370_s1 + $0x368] sm:$0xff]  ;;  %v146_v8 = vld [vmem:[%s2370_s1 + $0x3f8] sm:$0xff]  ;;  %v1316_v9 = vpack.c.bf16 %v96_v1, %v95_v0  ;;  %v1318_v11 = vpack.c.bf16 %v114_v6, %v113_v5  ;;  %v129_v15 = vld [vmem:[%s2370_s1 + $0x370] sm:$0xff] }
  0x2b   :  { %1329 = vmatpush3.bf16.msra.mxu1 %v1328_v7  ;;  %644 = vmatprep.mubr.f32.mxu1 %v319_v49  ;;  %v145_v7 = vld [vmem:[%s2370_s1 + $0x3f0] sm:$0xff]  ;;  %v1348_v10 = vpack.c.bf16 %v128_v4, %v127_v2  ;;  %v98_v14 = vld [vmem:[%s2370_s1 + $0x278] sm:$0xff]  ;;  %v163_v18 = vld [vmem:[%s2370_s1 + $0x480] sm:$0xff] }
  0x2c   :  { %1331 = vmatprep.subr.bf16.mxu1 %v1330_v12  ;;  %v97_v12 = vld [vmem:[%s2370_s1 + $0x270] sm:$0xff]  ;;  %v1350_v16 = vpack.c.bf16 %v146_v8, %v145_v7  ;;  %v130_v17 = vld [vmem:[%s2370_s1 + $0x378] sm:$0xff]  ;;  %v147_v23 = vld [vmem:[%s2370_s1 + $0x400] sm:$0xff] }
  0x2d   :  { %1301 = vmatpush3.bf16.msra.mxu0 %v1300_v19  ;;  %v164_v19 = vld [vmem:[%s2370_s1 + $0x488] sm:$0xff]  ;;  %v1320_v22 = vpack.c.bf16 %v98_v14, %v97_v12  ;;  %v1352_v24 = vpack.c.bf16 %v130_v17, %v129_v15  ;;  %v179_v27 = vld [vmem:[%s2370_s1 + $0x500] sm:$0xff]  ;;  %v165_v30 = vld [vmem:[%s2370_s1 + $0x490] sm:$0xff] }
  0x2e   :  { %1303 = vmatprep.subr.bf16.mxu0 %v1302_v21  ;;  %v196_v21 = vld [vmem:[%s2370_s1 + $0x588] sm:$0xff]  ;;  %v166_v31 = vld [vmem:[%s2370_s1 + $0x498] sm:$0xff]  ;;  %v17_v37 = vld [vmem:[%s2369_s0 + $0x10] sm:$0xff] }
  0x2f   :  { %1333 = vmatpush3.bf16.msra.mxu1 %v1332_v20  ;;  %v195_v20 = vld [vmem:[%s2370_s1 + $0x580] sm:$0xff]  ;;  %v148_v26 = vld [vmem:[%s2370_s1 + $0x408] sm:$0xff]  ;;  %v198_v34 = vld [vmem:[%s2370_s1 + $0x598] sm:$0xff]  ;;  %v1358_v38 = vpack.c.bf16 %v166_v31, %v165_v30  ;;  %v1987_v42 = vrot.slane %v17_v37, %v1684_v13  ;;  %v320_v43 = vcombine.high %v17_v37, %v17_v37 }
  0x30   :  { %1335 = vmatprep.subr.bf16.mxu1 %v1334_v25  ;;  %v1354_v25 = vpack.c.bf16 %v164_v19, %v163_v18  ;;  %v180_v28 = vld [vmem:[%s2370_s1 + $0x508] sm:$0xff]  ;;  %v1386_v29 = vpack.c.bf16 %v196_v21, %v195_v20  ;;  %v149_v39 = vld [vmem:[%s2370_s1 + $0x410] sm:$0xff]  ;;  %v182_v46 = vld [vmem:[%s2370_s1 + $0x518] sm:$0xff] }
  0x31   :  { %1305 = vmatpush3.bf16.msra.mxu0 %v1304_v32  ;;  %v197_v32 = vld [vmem:[%s2370_s1 + $0x590] sm:$0xff]  ;;  %v167_v47 = vld [vmem:[%s2370_s1 + $0x4a0] sm:$0xff]  ;;  %v2008_v52 = vrot.slane %v320_v43, %v1684_v13  ;;  %v152_v56 = vld [vmem:[%s2370_s1 + $0x428] sm:$0xff] }
  0x32   :  { %1307 = vmatprep.subr.bf16.mxu0 %v1306_v36  ;;  %v1388_v36 = vpack.c.bf16 %v180_v28, %v179_v27  ;;  %v181_v41 = vld [vmem:[%s2370_s1 + $0x510] sm:$0xff]  ;;  %v1390_v44 = vpack.c.bf16 %v198_v34, %v197_v32  ;;  %v199_v49 = vld [vmem:[%s2370_s1 + $0x5a0] sm:$0xff]  ;;  %v184_v59 = vld [vmem:[%s2370_s1 + $0x528] sm:$0xff] }
  0x33   :  { %1337 = vmatpush3.bf16.msra.mxu1 %v1336_v35  ;;  %v1356_v35 = vpack.c.bf16 %v148_v26, %v147_v23  ;;  %v183_v57 = vld [vmem:[%s2370_s1 + $0x520] sm:$0xff]  ;;  %v169_v60 = vld [vmem:[%s2370_s1 + $0x4b0] sm:$0xff]  ;;  %v154_v4 = vld [vmem:[%s2370_s1 + $0x438] sm:$0xff] }
  0x34   :  { %1339 = vmatprep.subr.bf16.mxu1 %v1338_v40  ;;  %v150_v40 = vld [vmem:[%s2370_s1 + $0x418] sm:$0xff]  ;;  %v1396_v1 = vpack.c.bf16 %v184_v59, %v183_v57  ;;  %v185_v5 = vld [vmem:[%s2370_s1 + $0x530] sm:$0xff]  ;;  %v171_v8 = vld [vmem:[%s2370_s1 + $0x4c0] sm:$0xff] }
  0x35   :  { %1309 = vmatpush3.bf16.msra.mxu0 %v1308_v48  ;;  %v168_v48 = vld [vmem:[%s2370_s1 + $0x4a8] sm:$0xff]  ;;  %v1360_v53 = vpack.c.bf16 %v150_v40, %v149_v39  ;;  %v186_v7 = vld [vmem:[%s2370_s1 + $0x538] sm:$0xff]  ;;  %v187_v18 = vld [vmem:[%s2370_s1 + $0x540] sm:$0xff] }
  0x36   :  { %1311 = vmatprep.subr.bf16.mxu0 %v1310_v51  ;;  %v335_v51 = vcombine.high %v1987_v42, %v1987_v42  ;;  %v1362_v54 = vpack.c.bf16 %v168_v48, %v167_v47  ;;  %v1400_v14 = vpack.c.bf16 %v186_v7, %v185_v5  ;;  %v156_v17 = vld [vmem:[%s2370_s1 + $0x448] sm:$0xff]  ;;  %v173_v21 = vld [vmem:[%s2370_s1 + $0x4d0] sm:$0xff]  ;;  %v190_v32 = vld [vmem:[%s2370_s1 + $0x558] sm:$0xff] }
  0x37   :  { %1341 = vmatpush3.bf16.msra.mxu1 %v1340_v50  ;;  %v200_v50 = vld [vmem:[%s2370_s1 + $0x5a8] sm:$0xff]  ;;  %v205_v23 = vld [vmem:[%s2370_s1 + $0x5d0] sm:$0xff]  ;;  %v175_v34 = vld [vmem:[%s2370_s1 + $0x4e0] sm:$0xff] }
  0x38   :  { %1343 = vmatprep.subr.bf16.mxu1 %v1342_v55  ;;  %v151_v55 = vld [vmem:[%s2370_s1 + $0x420] sm:$0xff]  ;;  %v1394_v58 = vpack.c.bf16 %v200_v50, %v199_v49  ;;  %v188_v20 = vld [vmem:[%s2370_s1 + $0x548] sm:$0xff]  ;;  %v157_v28 = vld [vmem:[%s2370_s1 + $0x450] sm:$0xff] }
  0x39   :  { %1313 = vmatpush3.bf16.msra.mxu0 %v1312_v61  ;;  %v170_v61 = vld [vmem:[%s2370_s1 + $0x4b8] sm:$0xff]  ;;  %v1364_v0 = vpack.c.bf16 %v152_v56, %v151_v55  ;;  %v1404_v26 = vpack.c.bf16 %v188_v20, %v187_v18  ;;  %v189_v30 = vld [vmem:[%s2370_s1 + $0x550] sm:$0xff]  ;;  %v208_v37 = vld [vmem:[%s2370_s1 + $0x5e8] sm:$0xff] }
  0x3a   :  { %1315 = vmatprep.subr.bf16.mxu0 %v1314_v63  ;;  %v202_v63 = vld [vmem:[%s2370_s1 + $0x5b8] sm:$0xff]  ;;  %v1366_v2 = vpack.c.bf16 %v170_v61, %v169_v60  ;;  %v159_v39 = vld [vmem:[%s2370_s1 + $0x460] sm:$0xff]  ;;  %v1408_v40 = vpack.c.bf16 %v190_v32, %v189_v30  ;;  %v160_v43 = vld [vmem:[%s2370_s1 + $0x468] sm:$0xff] }
  0x3b   :  { %1345 = vmatpush3.bf16.msra.mxu1 %v1344_v62  ;;  %v201_v62 = vld [vmem:[%s2370_s1 + $0x5b0] sm:$0xff]  ;;  %v178_v49 = vld [vmem:[%s2370_s1 + $0x4f8] sm:$0xff] }
  0x3c   :  { %1347 = vmatprep.subr.bf16.mxu1 %v1346_v3  ;;  %v153_v3 = vld [vmem:[%s2370_s1 + $0x430] sm:$0xff]  ;;  %v1398_v6 = vpack.c.bf16 %v202_v63, %v201_v62 }
  0x3d   :  { %1317 = vmatpush3.bf16.msra.mxu0 %v1316_v9  ;;  %v172_v9 = vld [vmem:[%s2370_s1 + $0x4c8] sm:$0xff]  ;;  %v1368_v12 = vpack.c.bf16 %v154_v4, %v153_v3  ;;  %v177_v48 = vld [vmem:[%s2370_s1 + $0x4f0] sm:$0xff] }
  0x3e   :  { %1319 = vmatprep.subr.bf16.mxu0 %v1318_v11  ;;  %v204_v11 = vld [vmem:[%s2370_s1 + $0x5c8] sm:$0xff]  ;;  %v1370_v15 = vpack.c.bf16 %v172_v9, %v171_v8 }
  0x3f   :  { %1349 = vmatpush3.bf16.msra.mxu1 %v1348_v10  ;;  %v203_v10 = vld [vmem:[%s2370_s1 + $0x5c0] sm:$0xff] }
  0x40   :  { %1351 = vmatprep.subr.bf16.mxu1 %v1350_v16  ;;  %v155_v16 = vld [vmem:[%s2370_s1 + $0x440] sm:$0xff]  ;;  %v1402_v19 = vpack.c.bf16 %v204_v11, %v203_v10 }
  0x41   :  { %1321 = vmatpush3.bf16.msra.mxu0 %v1320_v22  ;;  %v174_v22 = vld [vmem:[%s2370_s1 + $0x4d8] sm:$0xff] }
  0x42   :  { %1355 = vmatprep.subr.bf16.mxu0 %v1354_v25  ;;  %v1372_v25 = vpack.c.bf16 %v156_v17, %v155_v16  ;;  %v1374_v27 = vpack.c.bf16 %v174_v22, %v173_v21 }
  0x43   :  { %1353 = vmatpush3.bf16.msra.mxu1 %v1352_v24  ;;  %v206_v24 = vld [vmem:[%s2370_s1 + $0x5d8] sm:$0xff] }
  0x44   :  { %1387 = vmatprep.subr.bf16.mxu1 %v1386_v29  ;;  %575 = vmatmul.mubr.f32.vlgmr.msra.gmra.mrb[2].mxu0 %v1845_v33  ;;  %v1392_v33 = vpack.c.bf16 %v182_v46, %v181_v41  ;;  %v158_v29 = vld [vmem:[%s2370_s1 + $0x458] sm:$0xff]  ;;  %v1406_v31 = vpack.c.bf16 %v206_v24, %v205_v23  ;;  %v192_v46 = vld [vmem:[%s2370_s1 + $0x568] sm:$0xff] }
  0x45   :  { %1357 = vmatpush3.bf16.msra.mxu0 %v1356_v35  ;;  %714 = vmatprep.mubr.f32.mxu0 %v335_v51  ;;  %v176_v35 = vld [vmem:[%s2370_s1 + $0x4e8] sm:$0xff] }
  0x46   :  { %645 = vmatmul.mubr.f32.vlgmr.msra.gmra.mrb[2].mxu1 %v1868_v45  ;;  %1359 = vmatprep.subr.bf16.mxu0 %v1358_v38  ;;  %v336_v45 = vcombine.high %v2008_v52, %v2008_v52  ;;  %v1376_v38 = vpack.c.bf16 %v158_v29, %v157_v28  ;;  %v1378_v41 = vpack.c.bf16 %v176_v35, %v175_v34 }
  0x47   :  { %1389 = vmatpush3.bf16.msra.mxu1 %v1388_v36  ;;  %v207_v36 = vld [vmem:[%s2370_s1 + $0x5e0] sm:$0xff] }
  0x48   :  { %1391 = vmatprep.subr.bf16.mxu1 %v1390_v44  ;;  %784 = vmatprep.mubr.f32.mxu1 %v336_v45  ;;  %v191_v44 = vld [vmem:[%s2370_s1 + $0x560] sm:$0xff]  ;;  %v1410_v47 = vpack.c.bf16 %v208_v37, %v207_v36 }
  0x49   :  { %1361 = vmatpush3.bf16.msra.mxu0 %v1360_v53 }
  0x4a   :  { %1363 = vmatprep.subr.bf16.mxu0 %v1362_v54 }
  0x4b   :  { %1393 = vmatpush3.bf16.msra.mxu1 %v1392_v33 }
  0x4c   :  { %1395 = vmatprep.subr.bf16.mxu1 %v1394_v58 }
  0x4d   :  { %1365 = vmatpush3.bf16.msra.mxu0 %v1364_v0 }
  0x4e   :  { %1367 = vmatprep.subr.bf16.mxu0 %v1366_v2 }
  0x4f   :  { %1397 = vmatpush3.bf16.msra.mxu1 %v1396_v1 }
  0x50   :  { %1399 = vmatprep.subr.bf16.mxu1 %v1398_v6 }
  0x51   :  { %1369 = vmatpush3.bf16.msra.mxu0 %v1368_v12 }
  0x52   :  { %1371 = vmatprep.subr.bf16.mxu0 %v1370_v15 }
  0x53   :  { %1401 = vmatpush3.bf16.msra.mxu1 %v1400_v14 }
  0x54   :  { %1403 = vmatprep.subr.bf16.mxu1 %v1402_v19 }
  0x55   :  { %1373 = vmatpush3.bf16.msra.mxu0 %v1372_v25 }
  0x56   :  { %1375 = vmatprep.subr.bf16.mxu0 %v1374_v27 }
  0x57   :  { %1405 = vmatpush3.bf16.msra.mxu1 %v1404_v26 }
  0x58   :  { %1407 = vmatprep.subr.bf16.mxu1 %v1406_v31 }
  0x59   :  { %8 = vsyncpa [#allocation3], 0  ;;  %v209_v50 = vld [vmem:[%s2370_s1 + $0x5f0] sm:$0xff]  ;;  %v210_v51 = vld [vmem:[%s2370_s1 + $0x5f8] sm:$0xff]  ;;  %1377 = vmatpush3.bf16.msra.mxu0 %v1376_v38  ;;  %v1380_v53 = vpack.c.bf16 %v160_v43, %v159_v39  ;;  %v1412_v54 = vpack.c.bf16 %v192_v46, %v191_v44  ;;  %v1382_v55 = vpack.c.bf16 %v178_v49, %v177_v48 }
  0x5a   :  { %v18_v33 = vld [vmem:[%s2369_s0 + $0x18] sm:$0xff]  ;;  %1379 = vmatprep.subr.bf16.mxu0 %v1378_v41  ;;  %v161_v56 = vld [vmem:[%s2370_s1 + $0x470] sm:$0xff]  ;;  %v1414_v58 = vpack.c.bf16 %v210_v51, %v209_v50  ;;  %v227_v60 = vld [vmem:[%s2370_s1 + $0x680] sm:$0xff] }
  0x5b   :  { %1409 = vmatpush3.bf16.msra.mxu1 %v1408_v40  ;;  %v162_v57 = vld [vmem:[%s2370_s1 + $0x478] sm:$0xff]  ;;  %v193_v45 = vld [vmem:[%s2370_s1 + $0x570] sm:$0xff]  ;;  %v228_v61 = vld [vmem:[%s2370_s1 + $0x688] sm:$0xff]  ;;  %v337_v0 = vcombine.high %v18_v33, %v18_v33  ;;  %v2179_v11 = vrot.slane %v18_v33, %v1684_v13 }
  0x5c   :  { %1411 = vmatprep.subr.bf16.mxu1 %v1410_v47  ;;  %v194_v59 = vld [vmem:[%s2370_s1 + $0x578] sm:$0xff]  ;;  %v259_v62 = vld [vmem:[%s2370_s1 + $0x780] sm:$0xff]  ;;  %v260_v63 = vld [vmem:[%s2370_s1 + $0x788] sm:$0xff]  ;;  %v1384_v1 = vpack.c.bf16 %v162_v57, %v161_v56  ;;  %v1418_v3 = vpack.c.bf16 %v228_v61, %v227_v60 }
  0x5d   :  { %1381 = vmatpush3.bf16.msra.mxu0 %v1380_v53  ;;  %v1416_v2 = vpack.c.bf16 %v194_v59, %v193_v45  ;;  %v211_v4 = vld [vmem:[%s2370_s1 + $0x600] sm:$0xff]  ;;  %v212_v5 = vld [vmem:[%s2370_s1 + $0x608] sm:$0xff]  ;;  %v1450_v7 = vpack.c.bf16 %v260_v63, %v259_v62  ;;  %v229_v9 = vld [vmem:[%s2370_s1 + $0x690] sm:$0xff]  ;;  %v2188_v15 = vrot.slane %v337_v0, %v1684_v13  ;;  %v352_v25 = vcombine.high %v2179_v11, %v2179_v11 }
  0x5e   :  { %1383 = vmatprep.subr.bf16.mxu0 %v1382_v55  ;;  %v243_v6 = vld [vmem:[%s2370_s1 + $0x700] sm:$0xff]  ;;  %v244_v8 = vld [vmem:[%s2370_s1 + $0x708] sm:$0xff]  ;;  %v230_v10 = vld [vmem:[%s2370_s1 + $0x698] sm:$0xff]  ;;  %v1420_v16 = vpack.c.bf16 %v212_v5, %v211_v4 }
  0x5f   :  { %1413 = vmatpush3.bf16.msra.mxu1 %v1412_v54  ;;  %v261_v12 = vld [vmem:[%s2370_s1 + $0x790] sm:$0xff]  ;;  %v262_v14 = vld [vmem:[%s2370_s1 + $0x798] sm:$0xff]  ;;  %v1452_v17 = vpack.c.bf16 %v244_v8, %v243_v6  ;;  %v1422_v18 = vpack.c.bf16 %v230_v10, %v229_v9  ;;  %v231_v23 = vld [vmem:[%s2370_s1 + $0x6a0] sm:$0xff]  ;;  %v353_v28 = vcombine.high %v2188_v15, %v2188_v15 }
  0x60   :  { %1415 = vmatprep.subr.bf16.mxu1 %v1414_v58  ;;  %v213_v19 = vld [vmem:[%s2370_s1 + $0x610] sm:$0xff]  ;;  %v214_v20 = vld [vmem:[%s2370_s1 + $0x618] sm:$0xff]  ;;  %v1454_v13 = vpack.c.bf16 %v262_v14, %v261_v12  ;;  %v232_v24 = vld [vmem:[%s2370_s1 + $0x6a8] sm:$0xff] }
  0x61   :  { %1385 = vmatpush3.bf16.msra.mxu0 %v1384_v1  ;;  %v245_v21 = vld [vmem:[%s2370_s1 + $0x710] sm:$0xff]  ;;  %v246_v22 = vld [vmem:[%s2370_s1 + $0x718] sm:$0xff]  ;;  %v263_v26 = vld [vmem:[%s2370_s1 + $0x7a0] sm:$0xff]  ;;  %v1424_v29 = vpack.c.bf16 %v214_v20, %v213_v19  ;;  %v1426_v31 = vpack.c.bf16 %v232_v24, %v231_v23 }
  0x62   :  { %1419 = vmatprep.subr.bf16.mxu0 %v1418_v3  ;;  %v264_v27 = vld [vmem:[%s2370_s1 + $0x7a8] sm:$0xff]  ;;  %v1456_v30 = vpack.c.bf16 %v246_v22, %v245_v21  ;;  %v247_v34 = vld [vmem:[%s2370_s1 + $0x720] sm:$0xff]  ;;  %v233_v36 = vld [vmem:[%s2370_s1 + $0x6b0] sm:$0xff] }
  0x63   :  { %1417 = vmatpush3.bf16.msra.mxu1 %v1416_v2  ;;  %v216_v32 = vld [vmem:[%s2370_s1 + $0x628] sm:$0xff]  ;;  %v1458_v35 = vpack.c.bf16 %v264_v27, %v263_v26  ;;  %v234_v37 = vld [vmem:[%s2370_s1 + $0x6b8] sm:$0xff]  ;;  %v265_v38 = vld [vmem:[%s2370_s1 + $0x7b0] sm:$0xff] }
  0x64   :  { %1451 = vmatprep.subr.bf16.mxu1 %v1450_v7  ;;  %715 = vmatmul.mubr.f32.vlgmr.msra.gmra.mrb[4].mxu0 %v1987_v42  ;;  %v215_v42 = vld [vmem:[%s2370_s1 + $0x620] sm:$0xff]  ;;  %v266_v39 = vld [vmem:[%s2370_s1 + $0x7b8] sm:$0xff]  ;;  %v1430_v43 = vpack.c.bf16 %v234_v37, %v233_v36  ;;  %v217_v44 = vld [vmem:[%s2370_s1 + $0x630] sm:$0xff] }
  0x65   :  { %1421 = vmatpush3.bf16.msra.mxu0 %v1420_v16  ;;  %854 = vmatprep.mubr.f32.mxu0 %v352_v25  ;;  %v1428_v40 = vpack.c.bf16 %v216_v32, %v215_v42  ;;  %v218_v46 = vld [vmem:[%s2370_s1 + $0x638] sm:$0xff]  ;;  %v249_v47 = vld [vmem:[%s2370_s1 + $0x730] sm:$0xff]  ;;  %v1462_v48 = vpack.c.bf16 %v266_v39, %v265_v38  ;;  %v235_v50 = vld [vmem:[%s2370_s1 + $0x6c0] sm:$0xff] }
  0x66   :  { %785 = vmatmul.mubr.f32.vlgmr.msra.gmra.mrb[4].mxu1 %v2008_v52  ;;  %1423 = vmatprep.subr.bf16.mxu0 %v1422_v18  ;;  %v248_v52 = vld [vmem:[%s2370_s1 + $0x728] sm:$0xff]  ;;  %v250_v49 = vld [vmem:[%s2370_s1 + $0x738] sm:$0xff]  ;;  %v267_v53 = vld [vmem:[%s2370_s1 + $0x7c0] sm:$0xff]  ;;  %v1432_v54 = vpack.c.bf16 %v218_v46, %v217_v44 }
  0x67   :  { %1453 = vmatpush3.bf16.msra.mxu1 %v1452_v17  ;;  %924 = vmatprep.mubr.f32.mxu1 %v353_v28  ;;  %v1460_v41 = vpack.c.bf16 %v248_v52, %v247_v34  ;;  %v236_v51 = vld [vmem:[%s2370_s1 + $0x6c8] sm:$0xff]  ;;  %v1464_v55 = vpack.c.bf16 %v250_v49, %v249_v47  ;;  %v219_v57 = vld [vmem:[%s2370_s1 + $0x640] sm:$0xff]  ;;  %v237_v61 = vld [vmem:[%s2370_s1 + $0x6d0] sm:$0xff] }
  0x68   :  { %1455 = vmatprep.subr.bf16.mxu1 %v1454_v13  ;;  %v268_v33 = vld [vmem:[%s2370_s1 + $0x7c8] sm:$0xff]  ;;  %v1434_v56 = vpack.c.bf16 %v236_v51, %v235_v50  ;;  %v251_v58 = vld [vmem:[%s2370_s1 + $0x740] sm:$0xff]  ;;  %v238_v62 = vld [vmem:[%s2370_s1 + $0x6d8] sm:$0xff] }
  0x69   :  { %1425 = vmatpush3.bf16.msra.mxu0 %v1424_v29  ;;  %v220_v45 = vld [vmem:[%s2370_s1 + $0x648] sm:$0xff]  ;;  %v1466_v59 = vpack.c.bf16 %v268_v33, %v267_v53  ;;  %v269_v63 = vld [vmem:[%s2370_s1 + $0x7d0] sm:$0xff]  ;;  %v270_v0 = vld [vmem:[%s2370_s1 + $0x7d8] sm:$0xff]  ;;  %v1438_v3 = vpack.c.bf16 %v238_v62, %v237_v61 }
  0x6a   :  { %1427 = vmatprep.subr.bf16.mxu0 %v1426_v31  ;;  %v252_v60 = vld [vmem:[%s2370_s1 + $0x748] sm:$0xff]  ;;  %v1436_v1 = vpack.c.bf16 %v220_v45, %v219_v57  ;;  %v221_v4 = vld [vmem:[%s2370_s1 + $0x650] sm:$0xff]  ;;  %v222_v5 = vld [vmem:[%s2370_s1 + $0x658] sm:$0xff]  ;;  %v1470_v7 = vpack.c.bf16 %v270_v0, %v269_v63 }
  0x6b   :  { %1457 = vmatpush3.bf16.msra.mxu1 %v1456_v30  ;;  %v1468_v2 = vpack.c.bf16 %v252_v60, %v251_v58  ;;  %v253_v6 = vld [vmem:[%s2370_s1 + $0x750] sm:$0xff]  ;;  %v254_v8 = vld [vmem:[%s2370_s1 + $0x758] sm:$0xff]  ;;  %v239_v9 = vld [vmem:[%s2370_s1 + $0x6e0] sm:$0xff]  ;;  %v1440_v16 = vpack.c.bf16 %v222_v5, %v221_v4 }
  0x6c   :  { %1459 = vmatprep.subr.bf16.mxu1 %v1458_v35  ;;  %v240_v10 = vld [vmem:[%s2370_s1 + $0x6e8] sm:$0xff]  ;;  %v271_v12 = vld [vmem:[%s2370_s1 + $0x7e0] sm:$0xff]  ;;  %v1472_v17 = vpack.c.bf16 %v254_v8, %v253_v6  ;;  %v241_v23 = vld [vmem:[%s2370_s1 + $0x6f0] sm:$0xff] }
  0x6d   :  { %1429 = vmatpush3.bf16.msra.mxu0 %v1428_v40  ;;  %v272_v14 = vld [vmem:[%s2370_s1 + $0x7e8] sm:$0xff]  ;;  %v1442_v18 = vpack.c.bf16 %v240_v10, %v239_v9  ;;  %v223_v19 = vld [vmem:[%s2370_s1 + $0x660] sm:$0xff]  ;;  %v242_v24 = vld [vmem:[%s2370_s1 + $0x6f8] sm:$0xff] }
  0x6e   :  { %1431 = vmatprep.subr.bf16.mxu0 %v1430_v43  ;;  %v224_v20 = vld [vmem:[%s2370_s1 + $0x668] sm:$0xff]  ;;  %v255_v21 = vld [vmem:[%s2370_s1 + $0x760] sm:$0xff]  ;;  %v1474_v13 = vpack.c.bf16 %v272_v14, %v271_v12  ;;  %v273_v25 = vld [vmem:[%s2370_s1 + $0x7f0] sm:$0xff]  ;;  %v1446_v29 = vpack.c.bf16 %v242_v24, %v241_v23 }
  0x6f   :  { %1461 = vmatpush3.bf16.msra.mxu1 %v1460_v41  ;;  %v256_v22 = vld [vmem:[%s2370_s1 + $0x768] sm:$0xff]  ;;  %v274_v26 = vld [vmem:[%s2370_s1 + $0x7f8] sm:$0xff]  ;;  %v1444_v27 = vpack.c.bf16 %v224_v20, %v223_v19  ;;  %v225_v30 = vld [vmem:[%s2370_s1 + $0x670] sm:$0xff] }
  0x70   :  { %1463 = vmatprep.subr.bf16.mxu1 %v1462_v48  ;;  %v1476_v28 = vpack.c.bf16 %v256_v22, %v255_v21  ;;  %v226_v31 = vld [vmem:[%s2370_s1 + $0x678] sm:$0xff]  ;;  %v1478_v42 = vpack.c.bf16 %v274_v26, %v273_v25  ;;  %v257_v32 = vld [vmem:[%s2370_s1 + $0x770] sm:$0xff]  ;;  %v945_v37 = vld [vmem:[%s2371_s2] ss:$0 sm:$0xff] }
  0x71   :  { %1433 = vmatpush3.bf16.msra.mxu0 %v1432_v54  ;;  %v258_v34 = vld [vmem:[%s2370_s1 + $0x778] sm:$0xff]  ;;  %v1448_v35 = vpack.c.bf16 %v226_v31, %v225_v30  ;;  %s1513_s1 = smov [#allocation2]  }
  0x72   :  { %1435 = vmatprep.subr.bf16.mxu0 %v1434_v56  ;;  %v1480_v52 = vpack.c.bf16 %v258_v34, %v257_v32  ;;  %s937_s2 = sshll.u32 %s1513_s1, 4  ;;  %s938_s2 = int_to_ptr.vmem [resolvable:$true] %s937_s2 }
  0x73   :  { %1465 = vmatpush3.bf16.msra.mxu1 %v1464_v55  ;;  %s1488_s16 = scalar_lea.vmem %s938_s2, 32  ;;  %p1493_p1 = scmp.lt.s32.totalorder %s938_s2, %s938_s2 }
  0x74   :  { %1467 = vmatprep.subr.bf16.mxu1 %v1466_v59  ;;  %p1489_p0 = scmp.ne.s32.totalorder %s938_s2, %s1488_s16  ;;  %p1494_p2 = scmp.lt.s32.totalorder %s1488_s16, %s1488_s16 }
  0x75   :  { %1437 = vmatpush3.bf16.msra.mxu0 %v1436_v1 }
  0x76   :  { %1439 = vmatprep.subr.bf16.mxu0 %v1438_v3  ;;  %p1495_p3 = por %p1494_p2, %p1493_p1 }
  0x77   :  { %1469 = vmatpush3.bf16.msra.mxu1 %v1468_v2 }
  0x78   :  { %1471 = vmatprep.subr.bf16.mxu1 %v1470_v7  ;;  %p1496_p4 = pnand %p1495_p3, %p1489_p0 }
  0x79   :  { %1441 = vmatpush3.bf16.msra.mxu0 %v1440_v16 }
  0x7a   :  { %1443 = vmatprep.subr.bf16.mxu0 %v1442_v18 }
  0x7b   :  { %1473 = vmatpush3.bf16.msra.mxu1 %v1472_v17 }
  0x7c   :  { %1475 = vmatprep.subr.bf16.mxu1 %v1474_v13 }
  0x7d   :  { %1445 = vmatpush3.bf16.msra.mxu0 %v1444_v27 }
  0x7e   :  { %1447 = vmatprep.subr.bf16.mxu0 %v1446_v29 }
  0x7f   :  { %1477 = vmatpush3.bf16.msra.mxu1 %v1476_v28 }
  0x80   :  { %1479 = vmatprep.subr.bf16.mxu1 %v1478_v42 }
  0x81   :  { %1449 = vmatpush3.bf16.msra.mxu0 %v1448_v35 }
  0x83   :  { %1481 = vmatpush3.bf16.msra.mxu1 %v1480_v52 }
  0x84   :  { %855 = vmatmul.mubr.f32.vlgmr.msra.gmra.mrb[6].mxu0 %v2179_v11 }
  0x86   :  { %925 = vmatmul.mubr.f32.vlgmr.msra.gmra.mrb[6].mxu1 %v2188_v15 }
  0xf7   :  { %v978_v36 = vpop.f32.mrb[0].mxu0 }
  0xf8   :  { %v979_v38 = vpop.f32.mrb[1].mxu0 }
  0xf9   :  { %v1013_v39 = vpop.f32.mrb[0].mxu1  ;;  %v980_v40 = vadd.f32 %v979_v38, %v978_v36 }
  0xfa   :  { %v1014_v41 = vpop.f32.mrb[1].mxu1 }
  0xfb   :  { %v1015_v43 = vadd.f32 %v1014_v41, %v1013_v39  ;;  %v437_v44 = vadd.f32 %v980_v40, %v945_v37 }
  0xfd   :  { %v507_v46 = vadd.f32 %v1015_v43, %v437_v44 }
 0x117   :  { %v1048_v47 = vpop.f32.mrb[2].mxu0 }
 0x118   :  { %v1049_v48 = vpop.f32.mrb[3].mxu0 }
 0x119   :  { %v1083_v49 = vpop.f32.mrb[2].mxu1  ;;  %v1050_v50 = vadd.f32 %v1049_v48, %v1048_v47 }
 0x11a   :  { %v1084_v51 = vpop.f32.mrb[3].mxu1 }
 0x11b   :  { %v1085_v11 = vadd.f32 %v1084_v51, %v1083_v49  ;;  %v577_v53 = vadd.f32 %v1050_v50, %v507_v46 }
 0x11d   :  { %v647_v15 = vadd.f32 %v1085_v11, %v577_v53 }
 0x137   :  { %v1118_v33 = vpop.f32.mrb[4].mxu0 }
 0x138   :  { %v1119_v54 = vpop.f32.mrb[5].mxu0 }
 0x139   :  { %v1153_v55 = vpop.f32.mrb[4].mxu1  ;;  %v1120_v56 = vadd.f32 %v1119_v54, %v1118_v33 }
 0x13a   :  { %v1154_v57 = vpop.f32.mrb[5].mxu1 }
 0x13b   :  { %v1155_v45 = vadd.f32 %v1154_v57, %v1153_v55  ;;  %v717_v58 = vadd.f32 %v1120_v56, %v647_v15 }
 0x13d   :  { %v787_v59 = vadd.f32 %v1155_v45, %v717_v58 }
 0x157   :  { %v1188_v60 = vpop.f32.mrb[6].mxu0 }
 0x158   :  { %v1189_v61 = vpop.f32.mrb[7].mxu0 }
 0x159   :  { %v1223_v62 = vpop.f32.mrb[6].mxu1  ;;  %v1190_v63 = vadd.f32 %v1189_v61, %v1188_v60 }
 0x15a   :  { %v1224_v0 = vpop.f32.mrb[7].mxu1 }
 0x15b   :  { %v1225_v1 = vadd.f32 %v1224_v0, %v1223_v62  ;;  %v857_v2 = vadd.f32 %v1190_v63, %v787_v59 }
 0x15d   :  { %v927_v3 = vadd.f32 %v1225_v1, %v857_v2 }
 0x15f   :  { %930 = vst [vmem:[#allocation2] sm:$0x3] %v927_v3 }
 0x160   :  { %1499 = shalt.err (!%p1496_p4)
}
 0x161   :  { %s1500_s19 = scalar_lea.hbm %s2372_s3, 32 }
 0x162   :  { %p1501_p5 = scmp.ne.s32.totalorder %s2372_s3, %s1500_s19  ;;  %p1504_p6 = scmp.lt.u32.totalorder %s1500_s19, %s2372_s3 }
 0x164   :  { %p1506_p7 = pnand %p1504_p6, %p1501_p5 }
 0x166   :  { %1509 = shalt.err (!%p1506_p7)
}
 0x167   :  { %940 = dma.vmem_to_hbm [thread:$0]  %s938_s2, 32, %s2372_s3, [#allocation3]  }
 0x168   :  { %1510 = dma.done.wait [#allocation3], 32  }
 0x169   :  { %1511 = vsyncadd [#allocation3], 4294967264 }
 0x16a   :  { %944 = vsyncpa [#allocation3], 1 }

// kernel: quantization_aware_vgg_forward.4
= control target key start
LH: loop header
LB: loop body
LE: loop exit
PB: predicated region body
PF: predicated region fallthrough
CT: control target
= control target key end

     0   :  { %vm94_vm0 = vcmask 1041408   ;;  %s5291_s1 = inlined_call_operand.vmem [shape: f32[9,128,128], index: 1, kind: input, shape index: {}]   ;;  %s5292_s0 = inlined_call_operand.vmem [shape: f32[2,10,10,128], index: 0, kind: input, shape index: {}]   ;;  %s5293_s2 = inlined_call_operand.vmem [shape: f32[1,128], index: 2, kind: input, shape index: {}]   ;;  %s5294_s3 = inlined_call_operand.vmem [shape: f32[8,4,128], index: 3, kind: output, shape index: {}]  }
   0x1   :  { %v2526_v0 = vld [vmem:[%s5291_s1 + $0x80] sm:$0xff]  ;;  %v2527_v1 = vld [vmem:[%s5291_s1 + $0x88] sm:$0xff]  ;;  %v2528_v5 = vld [vmem:[%s5291_s1 + $0x90] sm:$0xff] }
   0x2   :  { %v2574_v2 = vld [vmem:[%s5291_s1 + $0x200] sm:$0xff]  ;;  %v3447_v3 = vpack.c.bf16 %v2527_v1, %v2526_v0  ;;  %v2575_v4 = vld [vmem:[%s5291_s1 + $0x208] sm:$0xff]  ;;  %v2529_v6 = vld [vmem:[%s5291_s1 + $0x98] sm:$0xff] }
   0x3   :  { %v3575_v7 = vpack.c.bf16 %v2575_v4, %v2574_v2  ;;  %v3451_v8 = vpack.c.bf16 %v2529_v6, %v2528_v5  ;;  %v2576_v9 = vld [vmem:[%s5291_s1 + $0x210] sm:$0xff]  ;;  %v2577_v10 = vld [vmem:[%s5291_s1 + $0x218] sm:$0xff]  ;;  %v2530_v11 = vld [vmem:[%s5291_s1 + $0xa0] sm:$0xff] }
   0x4   :  { %3448 = vmatprep.subr.bf16.mxu1 %v3447_v3  ;;  %v3579_v12 = vpack.c.bf16 %v2577_v10, %v2576_v9  ;;  %v2531_v13 = vld [vmem:[%s5291_s1 + $0xa8] sm:$0xff]  ;;  %v2578_v14 = vld [vmem:[%s5291_s1 + $0x220] sm:$0xff]  ;;  %v2532_v18 = vld [vmem:[%s5291_s1 + $0xb0] sm:$0xff] }
   0x5   :  { %v2579_v15 = vld [vmem:[%s5291_s1 + $0x228] sm:$0xff]  ;;  %3576 = vmatprep.subr.bf16.mxu0 %v3575_v7  ;;  %3450 = vmatpush3.bf16.msra.mxu1 %v3447_v3  ;;  %v3455_v16 = vpack.c.bf16 %v2531_v13, %v2530_v11  ;;  %v2533_v19 = vld [vmem:[%s5291_s1 + $0xb8] sm:$0xff]  ;;  %v2580_v20 = vld [vmem:[%s5291_s1 + $0x230] sm:$0xff] }
   0x6   :  { %3578 = vmatpush3.bf16.msra.mxu0 %v3575_v7  ;;  %3452 = vmatprep.subr.bf16.mxu1 %v3451_v8  ;;  %v3583_v17 = vpack.c.bf16 %v2579_v15, %v2578_v14  ;;  %v2581_v21 = vld [vmem:[%s5291_s1 + $0x238] sm:$0xff]  ;;  %v3459_v22 = vpack.c.bf16 %v2533_v19, %v2532_v18  ;;  %v2534_v24 = vld [vmem:[%s5291_s1 + $0xc0] sm:$0xff]  ;;  %v2535_v25 = vld [vmem:[%s5291_s1 + $0xc8] sm:$0xff] }
   0x7   :  { %3580 = vmatprep.subr.bf16.mxu0 %v3579_v12  ;;  %v3587_v23 = vpack.c.bf16 %v2581_v21, %v2580_v20  ;;  %v2582_v26 = vld [vmem:[%s5291_s1 + $0x240] sm:$0xff]  ;;  %v2583_v27 = vld [vmem:[%s5291_s1 + $0x248] sm:$0xff]  ;;  %v3463_v29 = vpack.c.bf16 %v2535_v25, %v2534_v24  ;;  %v2536_v32 = vld [vmem:[%s5291_s1 + $0xd0] sm:$0xff] }
   0x8   :  { %v4025_v28 = vld [vmem:[%s5292_s0 + $0x8] sm:$0x3]  ;;  %v4030_v30 = vld [vmem:[%s5292_s0] sm:$0xff]  ;;  %v3591_v31 = vpack.c.bf16 %v2583_v27, %v2582_v26  ;;  %v2537_v33 = vld [vmem:[%s5291_s1 + $0xd8] sm:$0xff] }
   0x9   :  { %3454 = vmatpush3.bf16.msra.mxu1 %v3451_v8  ;;  %v55_v34 = vand.u32 2147483647, %v4025_v28  ;;  %v2584_v35 = vld [vmem:[%s5291_s1 + $0x250] sm:$0xff]  ;;  %v2585_v36 = vld [vmem:[%s5291_s1 + $0x258] sm:$0xff]  ;;  %v54_v37 = vand.u32 2147483647, %v4030_v30  ;;  %v3467_v38 = vpack.c.bf16 %v2537_v33, %v2536_v32 }
   0xa   :  { %3582 = vmatpush3.bf16.msra.mxu0 %v3579_v12  ;;  %3456 = vmatprep.subr.bf16.mxu1 %v3455_v16  ;;  %v2538_v39 = vld [vmem:[%s5291_s1 + $0xe0] sm:$0xff]  ;;  %v4052_v40 = vld [vmem:[%s5292_s0 + $0x18] sm:$0x3]  ;;  %v3595_v42 = vpack.c.bf16 %v2585_v36, %v2584_v35  ;;  %v2539_v43 = vld [vmem:[%s5291_s1 + $0xe8] sm:$0xff] }
   0xb   :  { %3584 = vmatprep.subr.bf16.mxu0 %v3583_v17  ;;  %v95_v41 = vsel %vm94_vm0, %v55_v34, -inf  ;;  %v2586_v44 = vld [vmem:[%s5291_s1 + $0x260] sm:$0xff]  ;;  %v2587_v45 = vld [vmem:[%s5291_s1 + $0x268] sm:$0xff]  ;;  %v4067_v46 = vld [vmem:[%s5292_s0 + $0x10] sm:$0xff]  ;;  %v57_v55 = vand.u32 2147483647, %v4052_v40  ;;  %v3471_v57 = vpack.c.bf16 %v2539_v43, %v2538_v39 }
   0xc   :  { %v4072_v47 = vld [vmem:[%s5292_s0 + $0x20] sm:$0xff]  ;;  %v4077_v48 = vld [vmem:[%s5292_s0 + $0x28] sm:$0x3]  ;;  %v2540_v49 = vld [vmem:[%s5291_s1 + $0xf0] sm:$0xff]  ;;  %v4106_v56 = vmax.f32 %v54_v37, %v95_v41  ;;  %v3599_v63 = vpack.c.bf16 %v2587_v45, %v2586_v44  ;;  %v56_v6 = vand.u32 2147483647, %v4067_v46 }
   0xd   :  { %3458 = vmatpush3.bf16.msra.mxu1 %v3455_v16  ;;  %v2541_v50 = vld [vmem:[%s5291_s1 + $0xf8] sm:$0xff]  ;;  %v4088_v51 = vld [vmem:[%s5292_s0 + $0x30] sm:$0xff]  ;;  %v4098_v53 = vld [vmem:[%s5292_s0 + $0x40] sm:$0xff]  ;;  %v58_v7 = vand.u32 2147483647, %v4072_v47  ;;  %v103_v14 = vsel %vm94_vm0, %v57_v55, -inf }
   0xe   :  { %3586 = vmatpush3.bf16.msra.mxu0 %v3583_v17  ;;  %3460 = vmatprep.subr.bf16.mxu1 %v3459_v22  ;;  %v4093_v52 = vld [vmem:[%s5292_s0 + $0x38] sm:$0x3]  ;;  %5311 = vst [vmem:[#allocation5_spill] sm:$0xff] %v4098_v53  ;;  %v4103_v54 = vld [vmem:[%s5292_s0 + $0x48] sm:$0x3]  ;;  %v2588_v58 = vld [vmem:[%s5291_s1 + $0x270] sm:$0xff]  ;;  %v3475_v15 = vpack.c.bf16 %v2541_v50, %v2540_v49 }
   0xf   :  { %3588 = vmatprep.subr.bf16.mxu0 %v3587_v23  ;;  %5312 = vst [vmem:[#allocation6_spill] sm:$0xff] %v4103_v54  ;;  %v2589_v59 = vld [vmem:[%s5291_s1 + $0x278] sm:$0xff]  ;;  %v4117_v60 = vld [vmem:[%s5292_s0 + $0x50] sm:$0xff]  ;;  %v4127_v62 = vld [vmem:[%s5292_s0 + $0x60] sm:$0xff]  ;;  %v59_v11 = vand.u32 2147483647, %v4077_v48 }
  0x10   :  { %5313 = vst [vmem:[#allocation7_spill] sm:$0xff] %v4117_v60  ;;  %v4122_v61 = vld [vmem:[%s5292_s0 + $0x58] sm:$0x3]  ;;  %5315 = vst [vmem:[#allocation9_spill] sm:$0xff] %v4127_v62  ;;  %v4132_v0 = vld [vmem:[%s5292_s0 + $0x68] sm:$0x3] }
  0x11   :  { %3462 = vmatpush3.bf16.msra.mxu1 %v3459_v22  ;;  %5314 = vst [vmem:[#allocation8_spill] sm:$0xff] %v4122_v61  ;;  %5316 = vst [vmem:[#allocation10_spill] sm:$0xff] %v4132_v0  ;;  %v4137_v1 = vld [vmem:[%s5292_s0 + $0x70] sm:$0xff]  ;;  %v4142_v2 = vld [vmem:[%s5292_s0 + $0x78] sm:$0x3]  ;;  %v97_v13 = vrot.slane %v4106_v56, 4  ;;  %v3603_v22 = vpack.c.bf16 %v2589_v59, %v2588_v58 }
  0x12   :  { %3590 = vmatpush3.bf16.msra.mxu0 %v3587_v23  ;;  %3464 = vmatprep.subr.bf16.mxu1 %v3463_v29  ;;  %5317 = vst [vmem:[#allocation11_spill] sm:$0xff] %v4137_v1  ;;  %5318 = vst [vmem:[#allocation12_spill] sm:$0xff] %v4142_v2  ;;  %v4147_v3 = vld [vmem:[%s5292_s0 + $0x80] sm:$0xff]  ;;  %v4152_v4 = vld [vmem:[%s5292_s0 + $0x88] sm:$0x3] }
  0x13   :  { %3592 = vmatprep.subr.bf16.mxu0 %v3591_v31  ;;  %5319 = vst [vmem:[#allocation13_spill] sm:$0xff] %v4152_v4  ;;  %v4157_v5 = vld [vmem:[%s5292_s0 + $0x90] sm:$0xff]  ;;  %v4164_v8 = vld [vmem:[%s5292_s0 + $0x98] sm:$0x3]  ;;  %v4169_v9 = vld [vmem:[%s5292_s0 + $0xa0] sm:$0xff]  ;;  %v98_v41 = vmax.f32 %v4106_v56, %v97_v13 }
  0x14   :  { %v4174_v10 = vld [vmem:[%s5292_s0 + $0xa8] sm:$0x3]  ;;  %v60_v12 = vand.u32 2147483647, %v4088_v51  ;;  %v4183_v16 = vld [vmem:[%s5292_s0 + $0xb0] sm:$0xff]  ;;  %v4193_v18 = vld [vmem:[%s5292_s0 + $0xc0] sm:$0xff] }
  0x15   :  { %3466 = vmatpush3.bf16.msra.mxu1 %v3463_v29  ;;  %v4188_v17 = vld [vmem:[%s5292_s0 + $0xb8] sm:$0x3]  ;;  %v61_v19 = vand.u32 2147483647, %v4093_v52  ;;  %v62_v20 = vand.u32 2147483647, %v4098_v53 }
  0x16   :  { %3594 = vmatpush3.bf16.msra.mxu0 %v3591_v31  ;;  %3468 = vmatprep.subr.bf16.mxu1 %v3467_v38  ;;  %v63_v21 = vand.u32 2147483647, %v4103_v54  ;;  %v4201_v23 = vld [vmem:[%s5292_s0 + $0xc8] sm:$0x3]  ;;  %v4206_v24 = vld [vmem:[%s5292_s0 + $0xd0] sm:$0xff]  ;;  %v4219_v31 = vld [vmem:[%s5292_s0 + $0xe0] sm:$0xff] }
  0x17   :  { %3596 = vmatprep.subr.bf16.mxu0 %v3595_v42  ;;  %v4211_v25 = vld [vmem:[%s5292_s0 + $0xd8] sm:$0x3]  ;;  %v64_v26 = vand.u32 2147483647, %v4117_v60  ;;  %v65_v27 = vand.u32 2147483647, %v4122_v61 }
  0x18   :  { %v66_v29 = vand.u32 2147483647, %v4127_v62  ;;  %5320 = vst [vmem:[#allocation14_spill] sm:$0xff] %v4219_v31  ;;  %v4224_v32 = vld [vmem:[%s5292_s0 + $0xe8] sm:$0x3]  ;;  %v4229_v33 = vld [vmem:[%s5292_s0 + $0xf0] sm:$0xff] }
  0x19   :  { %3470 = vmatpush3.bf16.msra.mxu1 %v3467_v38  ;;  %5321 = vst [vmem:[#allocation15_spill] sm:$0xff] %v4224_v32  ;;  %5322 = vst [vmem:[#allocation16_spill] sm:$0xff] %v4229_v33  ;;  %v67_v34 = vand.u32 2147483647, %v4132_v0  ;;  %v69_v36 = vand.u32 2147483647, %v4142_v2 }
  0x1a   :  { %3598 = vmatpush3.bf16.msra.mxu0 %v3595_v42  ;;  %3472 = vmatprep.subr.bf16.mxu1 %v3471_v57  ;;  %v4237_v37 = vld [vmem:[%s5292_s0 + $0xf8] sm:$0x3]  ;;  %v4242_v38 = vld [vmem:[%s5292_s0 + $0x100] sm:$0xff]  ;;  %v4247_v39 = vld [vmem:[%s5292_s0 + $0x108] sm:$0x3]  ;;  %v104_v42 = vmax.f32 %v56_v6, %v103_v14  ;;  %v99_v59 = vrot.slane %v98_v41, 2 }
  0x1b   :  { %3600 = vmatprep.subr.bf16.mxu0 %v3599_v63  ;;  %5323 = vst [vmem:[#allocation17_spill] sm:$0xff] %v4237_v37  ;;  %5324 = vst [vmem:[#allocation18_spill] sm:$0xff] %v4242_v38  ;;  %v4255_v44 = vld [vmem:[%s5292_s0 + $0x110] sm:$0xff]  ;;  %v4260_v45 = vld [vmem:[%s5292_s0 + $0x118] sm:$0x3]  ;;  %v119_v13 = vsel %vm94_vm0, %v61_v19, -inf }
  0x1c   :  { %5325 = vst [vmem:[#allocation19_spill] sm:$0xff] %v4247_v39  ;;  %5326 = vst [vmem:[#allocation20_spill] sm:$0xff] %v4260_v45  ;;  %v4265_v49 = vld [vmem:[%s5292_s0 + $0x120] sm:$0xff]  ;;  %v4273_v58 = vld [vmem:[%s5292_s0 + $0x128] sm:$0x3]  ;;  %v105_v50 = vrot.slane %v104_v42, 4 }
  0x1d   :  { %3474 = vmatpush3.bf16.msra.mxu1 %v3471_v57  ;;  %v4285_v35 = vld [vmem:[%s5292_s0 + $0x130] sm:$0xff]  ;;  %v127_v55 = vsel %vm94_vm0, %v63_v21, -inf  ;;  %v135_v6 = vsel %vm94_vm0, %v65_v27, -inf  ;;  %v120_v57 = vmax.f32 %v60_v12, %v119_v13  ;;  %v143_v21 = vsel %vm94_vm0, %v67_v34, -inf }
  0x1e   :  { %3602 = vmatpush3.bf16.msra.mxu0 %v3599_v63  ;;  %3476 = vmatprep.subr.bf16.mxu1 %v3475_v15  ;;  %v128_v56 = vmax.f32 %v62_v20, %v127_v55  ;;  %v136_v19 = vmax.f32 %v64_v26, %v135_v6  ;;  %v151_v27 = vsel %vm94_vm0, %v69_v36, -inf  ;;  %v144_v20 = vmax.f32 %v66_v29, %v143_v21 }
  0x1f   :  { %3604 = vmatprep.subr.bf16.mxu0 %v3603_v22  ;;  %v5327_v55 = vand.u32 2147483647, %v4137_v1 }
  0x20   :  { %v137_v12 = vrot.slane %v136_v19, 4  ;;  %v145_v36 = vrot.slane %v144_v20, 4 }
  0x21   :  { %3478 = vmatpush3.bf16.msra.mxu1 %v3475_v15  ;;  %v106_v15 = vmax.f32 %v104_v42, %v105_v50  ;;  %v121_v42 = vrot.slane %v120_v57, 4  ;;  %v129_v50 = vrot.slane %v128_v56, 4  ;;  %v152_v13 = vmax.f32 %v5327_v55, %v151_v27 }
  0x22   :  { %3606 = vmatpush3.bf16.msra.mxu0 %v3603_v22  ;;  %v111_v22 = vsel %vm94_vm0, %v59_v11, -inf  ;;  %v4313_v11 = vld [vmem:[%s5292_s0 + $0x138] sm:$0x3]  ;;  %v138_v61 = vmax.f32 %v136_v19, %v137_v12  ;;  %v146_v1 = vmax.f32 %v144_v20, %v145_v36 }
  0x23   :  { %v112_v43 = vmax.f32 %v58_v7, %v111_v22  ;;  %v100_v22 = vmax.f32 %v98_v41, %v99_v59  ;;  %v107_v14 = vrot.slane %v106_v15, 2  ;;  %v122_v26 = vmax.f32 %v120_v57, %v121_v42 }
  0x24   :  { %v130_v6 = vmax.f32 %v128_v56, %v129_v50  ;;  %v153_v41 = vrot.slane %v152_v13, 4  ;;  %v139_v21 = vrot.slane %v138_v61, 2  ;;  %v5329_v57 = vand.u32 2147483647, %v4147_v3 }
  0x25   :  { %v113_v7 = vrot.slane %v112_v43, 4  ;;  %v108_v0 = vmax.f32 %v106_v15, %v107_v14  ;;  %v101_v59 = vrot.slane %v100_v22, 1  ;;  %v123_v60 = vrot.slane %v122_v26, 2 }
  0x26   :  { %v131_v54 = vrot.slane %v130_v6, 2  ;;  %v154_v27 = vmax.f32 %v152_v13, %v153_v41  ;;  %v140_v19 = vmax.f32 %v138_v61, %v139_v21  ;;  %v147_v42 = vrot.slane %v146_v1, 2 }
  0x27   :  { %v114_v63 = vmax.f32 %v112_v43, %v113_v7  ;;  %v5328_v43 = vand.u32 2147483647, %v4152_v4  ;;  %v109_v55 = vrot.slane %v108_v0, 1  ;;  %v124_v2 = vmax.f32 %v122_v26, %v123_v60 }
  0x28   :  { %v132_v14 = vmax.f32 %v130_v6, %v131_v54  ;;  %v155_v50 = vrot.slane %v154_v27, 2  ;;  %v5330_v4 = vand.u32 2147483647, %v4164_v8  ;;  %v141_v20 = vrot.slane %v140_v19, 1 }
  0x29   :  { %v115_v34 = vrot.slane %v114_v63, 2  ;;  %v159_v7 = vsel %vm94_vm0, %v5328_v43, -inf  ;;  %v125_v12 = vrot.slane %v124_v2, 1  ;;  %v148_v13 = vmax.f32 %v146_v1, %v147_v42 }
  0x2a   :  { %v160_v56 = vmax.f32 %v5329_v57, %v159_v7  ;;  %v133_v62 = vrot.slane %v132_v14, 1  ;;  %v156_v60 = vmax.f32 %v154_v27, %v155_v50  ;;  %v4332_v54 = vmax.f32 %v108_v0, %v109_v55 }
  0x2b   :  { %v116_v29 = vmax.f32 %v114_v63, %v115_v34  ;;  %v167_v63 = vsel %vm94_vm0, %v5330_v4, -inf  ;;  %v4330_v34 = vmax.f32 %v100_v22, %v101_v59  ;;  %v5331_v61 = vand.u32 2147483647, %v4157_v5 }
  0x2c   :  { %v161_v53 = vrot.slane %v160_v56, 4  ;;  %v4338_v41 = vmax.f32 %v124_v2, %v125_v12  ;;  %v4340_v43 = vmax.f32 %v132_v14, %v133_v62  ;;  %v149_v8 = vrot.slane %v148_v13, 1 }
  0x2d   :  { %v117_v15 = vrot.slane %v116_v29, 1  ;;  %v168_v36 = vmax.f32 %v5331_v61, %v167_v63  ;;  %v5332_v4 = vand.u32 2147483647, %v4174_v10  ;;  %v5333_v0 = vand.u32 2147483647, %v4169_v9 }
  0x2e   :  { %v162_v6 = vmax.f32 %v160_v56, %v161_v53  ;;  %v4350_v5 = vmax.f32 %v140_v19, %v141_v20  ;;  %v157_v2 = vrot.slane %v156_v60, 1  ;;  %v5335_v62 = vand.u32 2147483647, %v4183_v16 }
  0x2f   :  { %v4334_v26 = vmax.f32 %v116_v29, %v117_v15  ;;  %v175_v22 = vsel %vm94_vm0, %v5332_v4, -inf  ;;  %v169_v1 = vrot.slane %v168_v36, 4  ;;  %v5334_v29 = vand.u32 2147483647, %v4188_v17 }
  0x30   :  { %v163_v59 = vrot.slane %v162_v6, 2  ;;  %v176_v7 = vmax.f32 %v5333_v0, %v175_v22  ;;  %v5336_v27 = vand.u32 2147483647, %v4201_v23  ;;  %v4357_v14 = vmax.f32 %v148_v13, %v149_v8 }
  0x31   :  { %v183_v53 = vsel %vm94_vm0, %v5334_v29, -inf  ;;  %v170_v57 = vmax.f32 %v168_v36, %v169_v1  ;;  %v5337_v15 = vand.u32 2147483647, %v4193_v18  ;;  %v5338_v12 = vand.u32 2147483647, %v4211_v25 }
  0x32   :  { %v184_v21 = vmax.f32 %v5335_v62, %v183_v53  ;;  %v191_v55 = vsel %vm94_vm0, %v5336_v27, -inf  ;;  %v177_v56 = vrot.slane %v176_v7, 4  ;;  %v5339_v63 = vand.u32 2147483647, %v4224_v32 }
  0x33   :  { %v192_v42 = vmax.f32 %v5337_v15, %v191_v55  ;;  %v199_v19 = vsel %vm94_vm0, %v5338_v12, -inf  ;;  %v5340_v61 = vand.u32 2147483647, %v4237_v37  ;;  %v4370_v13 = vmax.f32 %v162_v6, %v163_v59 }
  0x34   :  { %v185_v50 = vrot.slane %v184_v21, 4  ;;  %v207_v20 = vsel %vm94_vm0, %v5339_v63, -inf  ;;  %v171_v36 = vrot.slane %v170_v57, 2  ;;  %v178_v8 = vmax.f32 %v176_v7, %v177_v56 }
  0x35   :  { %v215_v4 = vsel %vm94_vm0, %v5340_v61, -inf  ;;  %v193_v22 = vrot.slane %v192_v42, 4  ;;  %v5341_v0 = vand.u32 2147483647, %v4206_v24  ;;  %v5342_v53 = vand.u32 2147483647, %v4219_v31 }
  0x36   :  { %v186_v1 = vmax.f32 %v184_v21, %v185_v50  ;;  %v5343_v27 = vand.u32 2147483647, %v4229_v33  ;;  %v4378_v15 = vmax.f32 %v156_v60, %v157_v2  ;;  %v4380_v12 = vmax.f32 %v170_v57, %v171_v36 }
  0x37   :  { %v200_v29 = vmax.f32 %v5341_v0, %v199_v19  ;;  %v208_v62 = vmax.f32 %v5342_v53, %v207_v20  ;;  %v179_v63 = vrot.slane %v178_v8, 2  ;;  %v194_v6 = vmax.f32 %v192_v42, %v193_v22 }
  0x38   :  { %v216_v55 = vmax.f32 %v5343_v27, %v215_v4  ;;  %v187_v59 = vrot.slane %v186_v1, 2  ;;  %v165_v21 = vrot.slane %v4370_v13, 1  ;;  %v5344_v0 = vand.u32 2147483647, %v4247_v39 }
  0x39   :  { %v201_v61 = vrot.slane %v200_v29, 4  ;;  %v209_v7 = vrot.slane %v208_v62, 4  ;;  %v180_v50 = vmax.f32 %v178_v8, %v179_v63  ;;  %v195_v19 = vrot.slane %v194_v6, 2 }
  0x3a   :  { %v217_v56 = vrot.slane %v216_v55, 4  ;;  %v223_v20 = vsel %vm94_vm0, %v5344_v0, -inf  ;;  %v188_v53 = vmax.f32 %v186_v1, %v187_v59  ;;  %v173_v57 = vrot.slane %v4380_v12, 1 }
  0x3b   :  { %v202_v4 = vmax.f32 %v200_v29, %v201_v61  ;;  %v210_v60 = vmax.f32 %v208_v62, %v209_v7  ;;  %v181_v36 = vrot.slane %v180_v50, 1  ;;  %v196_v42 = vmax.f32 %v194_v6, %v195_v19 }
  0x3c   :  { %v218_v2 = vmax.f32 %v216_v55, %v217_v56  ;;  %v5345_v22 = vand.u32 2147483647, %v4242_v38  ;;  %v189_v37 = vrot.slane %v188_v53, 1  ;;  %v5346_v0 = vand.u32 2147483647, %v4260_v45 }
  0x3d   :  { %v203_v33 = vrot.slane %v202_v4, 2  ;;  %v211_v32 = vrot.slane %v210_v60, 2  ;;  %v182_v63 = vmax.f32 %v180_v50, %v181_v36  ;;  %v197_v31 = vrot.slane %v196_v42, 1 }
  0x3e   :  { %v224_v27 = vmax.f32 %v5345_v22, %v223_v20  ;;  %v219_v8 = vrot.slane %v218_v2, 2  ;;  %v231_v1 = vsel %vm94_vm0, %v5346_v0, -inf  ;;  %v190_v29 = vmax.f32 %v188_v53, %v189_v37 }
  0x3f   :  { %v204_v62 = vmax.f32 %v202_v4, %v203_v33  ;;  %v212_v55 = vmax.f32 %v210_v60, %v211_v32  ;;  %v198_v61 = vmax.f32 %v196_v42, %v197_v31  ;;  %v5347_v7 = vand.u32 2147483647, %v4255_v44 }
  0x40   :  { %v225_v39 = vrot.slane %v224_v27, 4  ;;  %v220_v59 = vmax.f32 %v218_v2, %v219_v8  ;;  %v5348_v19 = vand.u32 2147483647, %v4273_v58  ;;  %v5349_v45 = vand.u32 2147483647, %v4265_v49 }
  0x41   :  { %v232_v56 = vmax.f32 %v5347_v7, %v231_v1  ;;  %v205_v50 = vrot.slane %v204_v62, 1  ;;  %v213_v36 = vrot.slane %v212_v55, 1  ;;  %v5350_v32 = vand.u32 2147483647, %v4313_v11 }
  0x42   :  { %v226_v6 = vmax.f32 %v224_v27, %v225_v39  ;;  %v239_v20 = vsel %vm94_vm0, %v5348_v19, -inf  ;;  %v221_v22 = vrot.slane %v220_v59, 1  ;;  %v255_v33 = vmax.f32 %v4330_v34, %v4334_v26  ;;  %v535_v34 = vld [vmem:[%s5291_s1] sm:$0xff] }
  0x43   :  { %v240_v38 = vmax.f32 %v5349_v45, %v239_v20  ;;  %v233_v37 = vrot.slane %v232_v56, 4  ;;  %v247_v31 = vsel %vm94_vm0, %v5350_v32, -inf  ;;  %v206_v39 = vmax.f32 %v204_v62, %v205_v50 }
  0x44   :  { %v227_v0 = vrot.slane %v226_v6, 2  ;;  %v214_v53 = vmax.f32 %v212_v55, %v213_v36  ;;  %v222_v4 = vmax.f32 %v220_v59, %v221_v22  ;;  %v5351_v27 = vand.u32 2147483647, %v4285_v35 }
  0x45   :  { %v241_v60 = vrot.slane %v240_v38, 4  ;;  %v234_v42 = vmax.f32 %v232_v56, %v233_v37  ;;  %v256_v45 = vmax.f32 %v4332_v54, %v4338_v41  ;;  %v257_v11 = vmax.f32 %v255_v33, %v4340_v43  ;;  %v2591_v54 = vld [vmem:[%s5291_s1 + $0x288] sm:$0xff] }
  0x46   :  { %v228_v2 = vmax.f32 %v226_v6, %v227_v0  ;;  %v248_v8 = vmax.f32 %v5351_v27, %v247_v31  ;;  %v264_v7 = vmax.f32 %v182_v63, %v198_v61  ;;  %v265_v19 = vmax.f32 %v190_v29, %v206_v39  ;;  %v536_v6 = vld [vmem:[%s5291_s1 + $0x8] sm:$0xff] }
  0x47   :  { %v242_v1 = vmax.f32 %v240_v38, %v241_v60  ;;  %v235_v62 = vrot.slane %v234_v42, 2  ;;  %v258_v59 = vmax.f32 %v256_v45, %v4350_v5  ;;  %v2590_v38 = vld [vmem:[%s5291_s1 + $0x280] sm:$0xff]  ;;  %v166_v41 = vmax.f32 %v4370_v13, %v165_v21 }
  0x48   :  { %v229_v26 = vrot.slane %v228_v2, 1  ;;  %v249_v55 = vrot.slane %v248_v8, 4  ;;  %v174_v43 = vmax.f32 %v4380_v12, %v173_v57  ;;  %v266_v56 = vmax.f32 %v264_v7, %v214_v53  ;;  %v538_v7 = vld [vmem:[%s5291_s1 + $0x18] sm:$0xff] }
  0x49   :  { %v243_v63 = vrot.slane %v242_v1, 2  ;;  %v236_v61 = vmax.f32 %v234_v42, %v235_v62  ;;  %v259_v50 = vmax.f32 %v257_v11, %v4357_v14  ;;  %v4425_v36 = vpack.c.bf16 %v536_v6, %v535_v34  ;;  %v537_v11 = vld [vmem:[%s5291_s1 + $0x10] sm:$0xff]  ;;  %v2593_v34 = vld [vmem:[%s5291_s1 + $0x298] sm:$0xff]  ;;  %v540_v62 = vld [vmem:[%s5291_s1 + $0x28] sm:$0xff] }
  0x4a   :  { %v230_v29 = vmax.f32 %v228_v2, %v229_v26  ;;  %v250_v5 = vmax.f32 %v248_v8, %v249_v55  ;;  %v4427_v22 = vpack.c.bf16 %v2591_v54, %v2590_v38  ;;  %v260_v32 = vmax.f32 %v258_v59, %v4378_v15  ;;  %v539_v26 = vld [vmem:[%s5291_s1 + $0x20] sm:$0xff]  ;;  %v2595_v59 = vld [vmem:[%s5291_s1 + $0x2a8] sm:$0xff]  ;;  %v541_v6 = vld [vmem:[%s5291_s1 + $0x30] sm:$0xff] }
  0x4b   :  { %v244_v20 = vmax.f32 %v242_v1, %v243_v63  ;;  %v237_v0 = vrot.slane %v236_v61, 1  ;;  %v267_v31 = vmax.f32 %v265_v19, %v222_v4  ;;  %3480 = vmatprep.subr.bf16.mxu1 %v4425_v36  ;;  %v261_v14 = vmax.f32 %v259_v50, %v166_v41  ;;  %v2592_v19 = vld [vmem:[%s5291_s1 + $0x290] sm:$0xff]  ;;  %v2594_v55 = vld [vmem:[%s5291_s1 + $0x2a0] sm:$0xff]  ;;  %v542_v38 = vld [vmem:[%s5291_s1 + $0x38] sm:$0xff] }
  0x4c   :  { %v251_v37 = vrot.slane %v250_v5, 2  ;;  %3608 = vmatprep.subr.bf16.mxu0 %v4427_v22  ;;  %v268_v57 = vmax.f32 %v266_v56, %v230_v29  ;;  %v262_v53 = vmax.f32 %v260_v32, %v174_v43  ;;  %v2596_v54 = vld [vmem:[%s5291_s1 + $0x2b0] sm:$0xff]  ;;  %v2597_v41 = vld [vmem:[%s5291_s1 + $0x2b8] sm:$0xff]  ;;  %v543_v43 = vld [vmem:[%s5291_s1 + $0x40] sm:$0xff] }
  0x4d   :  { %v245_v13 = vrot.slane %v244_v20, 1  ;;  %v238_v12 = vmax.f32 %v236_v61, %v237_v0  ;;  %v544_v63 = vld [vmem:[%s5291_s1 + $0x48] sm:$0xff]  ;;  %v2598_v29 = vld [vmem:[%s5291_s1 + $0x2c0] sm:$0xff]  ;;  %v546_v56 = vld [vmem:[%s5291_s1 + $0x58] sm:$0xff] }
  0x4e   :  { %v252_v21 = vmax.f32 %v250_v5, %v251_v37  ;;  %v263_v27 = vmax.f32 %v261_v14, %v262_v53  ;;  %v2599_v61 = vld [vmem:[%s5291_s1 + $0x2c8] sm:$0xff]  ;;  %v545_v5 = vld [vmem:[%s5291_s1 + $0x50] sm:$0xff]  ;;  %v2601_v50 = vld [vmem:[%s5291_s1 + $0x2d8] sm:$0xff]  ;;  %v4521_v14 = vpack.c.bf16 %v542_v38, %v541_v6  ;;  %v4523_v53 = vpack.c.bf16 %v2597_v41, %v2596_v54 }
  0x4f   :  { %v246_v33 = vmax.f32 %v244_v20, %v245_v13  ;;  %v269_v60 = vmax.f32 %v267_v31, %v238_v12  ;;  %v2600_v20 = vld [vmem:[%s5291_s1 + $0x2d0] sm:$0xff]  ;;  %v547_v0 = vld [vmem:[%s5291_s1 + $0x60] sm:$0xff]  ;;  %v548_v37 = vld [vmem:[%s5291_s1 + $0x68] sm:$0xff]  ;;  %v4504_v31 = vpack.c.bf16 %v538_v7, %v537_v11 }
  0x50   :  { %v253_v39 = vrot.slane %v252_v21, 1  ;;  %v2602_v32 = vld [vmem:[%s5291_s1 + $0x2e0] sm:$0xff]  ;;  %v2603_v13 = vld [vmem:[%s5291_s1 + $0x2e8] sm:$0xff]  ;;  %v549_v12 = vld [vmem:[%s5291_s1 + $0x70] sm:$0xff] }
  0x51   :  { %v270_v42 = vmax.f32 %v268_v57, %v246_v33  ;;  %v4515_v57 = vpack.c.bf16 %v2593_v34, %v2592_v19  ;;  %v4517_v33 = vpack.c.bf16 %v540_v62, %v539_v26 }
  0x52   :  { %v254_v2 = vmax.f32 %v252_v21, %v253_v39  ;;  %v550_v21 = vld [vmem:[%s5291_s1 + $0x78] sm:$0xff]  ;;  %v4519_v39 = vpack.c.bf16 %v2595_v59, %v2594_v55 }
  0x54   :  { %v271_v8 = vmax.f32 %v269_v60, %v254_v2  ;;  %v4525_v60 = vpack.c.bf16 %v544_v63, %v543_v43  ;;  %v4527_v2 = vpack.c.bf16 %v2599_v61, %v2598_v29 }
  0x56   :  { %v272_v45 = vmax.f32 %v270_v42, %v271_v8  ;;  %v4529_v42 = vpack.c.bf16 %v546_v56, %v545_v5  ;;  %v4533_v8 = vpack.c.bf16 %v2601_v50, %v2600_v20 }
  0x58   :  { %v273_v15 = vmax.f32 %v263_v27, %v272_v45  ;;  %v4535_v45 = vpack.c.bf16 %v548_v37, %v547_v0 }
  0x5a   :  { %vm274_vm1 = vcmp.gt.f32.partialorder %v273_v15, 0.0  ;;  %v276_v4 = vmul.f32 0.007874016, %v273_v15  ;;  %v4537_v15 = vpack.c.bf16 %v2603_v13, %v2602_v32 }
  0x5c   :  { %v4432_v1 = vsel %vm274_vm1, %v276_v4, 1.0  ;;  %v4539_v4 = vpack.c.bf16 %v550_v21, %v549_v12 }
  0x5d   :  { %3935 = vrcp.f32 %v4432_v1 }
  0x67   :  { %v4531_v27 = vpop.eup %3935 }
  0x68   :  { %v279_v11 = vmul.f32 %v4531_v27, %v4030_v30  ;;  %v280_v7 = vmul.f32 %v4531_v27, %v4025_v28  ;;  %v281_v19 = vmul.f32 %v4531_v27, %v4067_v46  ;;  %v282_v34 = vmul.f32 %v4531_v27, %v4052_v40 }
  0x69   :  { %v283_v26 = vmul.f32 %v4531_v27, %v4072_v47  ;;  %v284_v62 = vmul.f32 %v4531_v27, %v4077_v48  ;;  %v285_v55 = vmul.f32 %v4531_v27, %v4088_v51  ;;  %v286_v30 = vmul.f32 %v4531_v27, %v4093_v52 }
  0x6a   :  { %v3879_v59 = vround.rtne.f32 %v279_v11  ;;  %v3880_v28 = vround.rtne.f32 %v280_v7  ;;  %v3881_v6 = vround.rtne.f32 %v281_v19  ;;  %v3882_v38 = vround.rtne.f32 %v282_v34 }
  0x6b   :  { %v3883_v46 = vround.rtne.f32 %v283_v26  ;;  %v3884_v54 = vround.rtne.f32 %v284_v62  ;;  %v3885_v41 = vround.rtne.f32 %v285_v55  ;;  %v3886_v40 = vround.rtne.f32 %v286_v30  ;;  %v5352_v55 = vld [vmem:[#allocation5_spill] sm:$0xff] }
  0x6c   :  { %v359_v43 = vmax.f32 %v3879_v59, -128.0  ;;  %v360_v63 = vmax.f32 %v3880_v28, -128.0  ;;  %v361_v47 = vmax.f32 %v3881_v6, -128.0  ;;  %v362_v29 = vmax.f32 %v3882_v38, -128.0  ;;  %v5353_v59 = vld [vmem:[#allocation6_spill] sm:$0xff]  ;;  %v5354_v6 = vld [vmem:[#allocation7_spill] sm:$0xff] }
  0x6d   :  { %v363_v61 = vmax.f32 %v3883_v46, -128.0  ;;  %v364_v48 = vmax.f32 %v3884_v54, -128.0  ;;  %v365_v5 = vmax.f32 %v3885_v41, -128.0  ;;  %v366_v56 = vmax.f32 %v3886_v40, -128.0  ;;  %v5355_v46 = vld [vmem:[#allocation8_spill] sm:$0xff]  ;;  %v5356_v41 = vld [vmem:[#allocation9_spill] sm:$0xff] }
  0x6e   :  { %v399_v51 = vmin.f32 %v359_v43, 127.0  ;;  %v400_v20 = vmin.f32 %v360_v63, 127.0  ;;  %v401_v50 = vmin.f32 %v361_v47, 127.0  ;;  %v402_v52 = vmin.f32 %v362_v29, 127.0  ;;  %v5357_v43 = vld [vmem:[#allocation10_spill] sm:$0xff]  ;;  %v5358_v47 = vld [vmem:[#allocation11_spill] sm:$0xff] }
  0x6f   :  { %v403_v0 = vmin.f32 %v363_v61, 127.0  ;;  %v404_v37 = vmin.f32 %v364_v48, 127.0  ;;  %v405_v32 = vmin.f32 %v365_v5, 127.0  ;;  %v406_v13 = vmin.f32 %v366_v56, 127.0  ;;  %v5359_v61 = vld [vmem:[#allocation12_spill] sm:$0xff] }
  0x70   :  { %v4558_v12 = vmul.f32 %v399_v51, %v4432_v1  ;;  %v440_v21 = vmul.f32 %v400_v20, %v4432_v1  ;;  %v4562_v11 = vmul.f32 %v401_v50, %v4432_v1  ;;  %v442_v7 = vmul.f32 %v402_v52, %v4432_v1 }
  0x71   :  { %v4566_v19 = vmul.f32 %v403_v0, %v4432_v1  ;;  %v444_v34 = vmul.f32 %v404_v37, %v4432_v1  ;;  %v4570_v26 = vmul.f32 %v405_v32, %v4432_v1  ;;  %v446_v62 = vmul.f32 %v406_v13, %v4432_v1 }
  0x72   :  { %479 = vst [vmem:[#allocation2] sm:$0xff] %v4558_v12  ;;  %480 = vst [vmem:[#allocation2 + $0x8] sm:$0x3] %v440_v21  ;;  %v287_v30 = vmul.f32 %v4531_v27, %v5352_v55  ;;  %v288_v28 = vmul.f32 %v4531_v27, %v5353_v59  ;;  %v289_v38 = vmul.f32 %v4531_v27, %v5354_v6 }
  0x73   :  { %481 = vst [vmem:[#allocation2 + $0x10] sm:$0xff] %v4562_v11  ;;  %482 = vst [vmem:[#allocation2 + $0x18] sm:$0x3] %v442_v7  ;;  %v290_v54 = vmul.f32 %v4531_v27, %v5355_v46  ;;  %v291_v40 = vmul.f32 %v4531_v27, %v5356_v41  ;;  %v292_v63 = vmul.f32 %v4531_v27, %v5357_v43 }
  0x74   :  { %483 = vst [vmem:[#allocation2 + $0x20] sm:$0xff] %v4566_v19  ;;  %484 = vst [vmem:[#allocation2 + $0x28] sm:$0x3] %v444_v34  ;;  %v293_v29 = vmul.f32 %v4531_v27, %v5358_v47  ;;  %v294_v48 = vmul.f32 %v4531_v27, %v5359_v61  ;;  %v3887_v5 = vround.rtne.f32 %v287_v30  ;;  %v3888_v56 = vround.rtne.f32 %v288_v28 }
  0x75   :  { %485 = vst [vmem:[#allocation2 + $0x30] sm:$0xff] %v4570_v26  ;;  %486 = vst [vmem:[#allocation2 + $0x38] sm:$0x3] %v446_v62  ;;  %v3889_v51 = vround.rtne.f32 %v289_v38  ;;  %v3890_v20 = vround.rtne.f32 %v290_v54  ;;  %v3891_v50 = vround.rtne.f32 %v291_v40  ;;  %v3892_v52 = vround.rtne.f32 %v292_v63 }
  0x76   :  { %v3893_v0 = vround.rtne.f32 %v293_v29  ;;  %v3894_v37 = vround.rtne.f32 %v294_v48  ;;  %v367_v32 = vmax.f32 %v3887_v5, -128.0  ;;  %v368_v13 = vmax.f32 %v3888_v56, -128.0 }
  0x77   :  { %v369_v21 = vmax.f32 %v3889_v51, -128.0  ;;  %v370_v7 = vmax.f32 %v3890_v20, -128.0  ;;  %v371_v34 = vmax.f32 %v3891_v50, -128.0  ;;  %v372_v62 = vmax.f32 %v3892_v52, -128.0 }
  0x78   :  { %v373_v55 = vmax.f32 %v3893_v0, -128.0  ;;  %v374_v59 = vmax.f32 %v3894_v37, -128.0  ;;  %v407_v6 = vmin.f32 %v367_v32, 127.0  ;;  %v408_v46 = vmin.f32 %v368_v13, 127.0 }
  0x79   :  { %v409_v41 = vmin.f32 %v369_v21, 127.0  ;;  %v410_v43 = vmin.f32 %v370_v7, 127.0  ;;  %v551_v30 = vld [vmem:[#allocation2 + $0x1] sm:$0xff]  ;;  %v411_v38 = vmin.f32 %v371_v34, 127.0  ;;  %v412_v54 = vmin.f32 %v372_v62, 127.0 }
  0x7a   :  { %v1263_v28 = vld [vmem:[#allocation2 + $0x11] sm:$0xff]  ;;  %v413_v40 = vmin.f32 %v373_v55, 127.0  ;;  %v414_v63 = vmin.f32 %v374_v59, 127.0  ;;  %2975 = vmatprep.mubr.f32.mxu1 %v551_v30  ;;  %v4594_v29 = vmul.f32 %v407_v6, %v4432_v1  ;;  %v448_v61 = vmul.f32 %v408_v46, %v4432_v1 }
  0x7b   :  { %3199 = vmatprep.mubr.f32.mxu0 %v1263_v28  ;;  %v1264_v47 = vld [vmem:[#allocation2 + $0x21] sm:$0xff]  ;;  %v4598_v48 = vmul.f32 %v409_v41, %v4432_v1  ;;  %2976 = vmatmul.mubr.f32.vlgmr.msra.gmra.mrb[0].mxu1 %v1263_v28  ;;  %v450_v56 = vmul.f32 %v410_v43, %v4432_v1  ;;  %v4602_v51 = vmul.f32 %v411_v38, %v4432_v1 }
  0x7c   :  { %3200 = vmatmul.mubr.f32.vlgmr.msra.gmra.mrb[0].mxu0 %v1264_v47  ;;  %v1265_v5 = vld [vmem:[#allocation2 + $0x31] sm:$0xff]  ;;  %v452_v20 = vmul.f32 %v412_v54, %v4432_v1  ;;  %3482 = vmatpush3.bf16.msra.mxu1 %v4425_v36  ;;  %487 = vst [vmem:[#allocation2 + $0x40] sm:$0xff] %v4594_v29  ;;  %488 = vst [vmem:[#allocation2 + $0x48] sm:$0x3] %v448_v61  ;;  %v4610_v50 = vmul.f32 %v413_v40, %v4432_v1  ;;  %v5360_v36 = vld [vmem:[#allocation13_spill] sm:$0xff] }
  0x7d   :  { %3610 = vmatpush3.bf16.msra.mxu0 %v4427_v22  ;;  %489 = vst [vmem:[#allocation2 + $0x50] sm:$0xff] %v4598_v48  ;;  %v454_v52 = vmul.f32 %v414_v63, %v4432_v1  ;;  %v295_v0 = vmul.f32 %v4531_v27, %v4147_v3  ;;  %2978 = vmatprep.mubr.f32.mxu1 %v1264_v47  ;;  %490 = vst [vmem:[#allocation2 + $0x58] sm:$0x3] %v450_v56 }
  0x7e   :  { %3484 = vmatprep.subr.bf16.mxu1 %v4504_v31  ;;  %491 = vst [vmem:[#allocation2 + $0x60] sm:$0xff] %v4602_v51  ;;  %492 = vst [vmem:[#allocation2 + $0x68] sm:$0x3] %v452_v20  ;;  %v296_v22 = vmul.f32 %v4531_v27, %v5360_v36  ;;  %v299_v37 = vmul.f32 %v4531_v27, %v4169_v9  ;;  %v300_v32 = vmul.f32 %v4531_v27, %v4174_v10 }
  0x7f   :  { %3202 = vmatprep.mubr.f32.mxu0 %v1265_v5  ;;  %3612 = vmatprep.subr.bf16.mxu0 %v4515_v57  ;;  %493 = vst [vmem:[#allocation2 + $0x70] sm:$0xff] %v4610_v50  ;;  %494 = vst [vmem:[#allocation2 + $0x78] sm:$0x3] %v454_v52  ;;  %v3895_v3 = vround.rtne.f32 %v295_v0  ;;  %v301_v13 = vmul.f32 %v4531_v27, %v4183_v16  ;;  %v302_v21 = vmul.f32 %v4531_v27, %v4188_v17 }
  0x80   :  { %v303_v7 = vmul.f32 %v4531_v27, %v4193_v18  ;;  %2979 = vmatmul.mubr.f32.gmra.mrb[2].mxu1 %v1265_v5  ;;  %v3896_v9 = vround.rtne.f32 %v296_v22  ;;  %v3899_v34 = vround.rtne.f32 %v299_v37  ;;  %v3900_v10 = vround.rtne.f32 %v300_v32 }
  0x81   :  { %v304_v62 = vmul.f32 %v4531_v27, %v4201_v23  ;;  %3486 = vmatpush3.bf16.msra.mxu1 %v4504_v31  ;;  %3614 = vmatpush3.bf16.msra.mxu0 %v4515_v57  ;;  %v375_v55 = vmax.f32 %v3895_v3, -128.0  ;;  %v3901_v59 = vround.rtne.f32 %v301_v13  ;;  %v3902_v16 = vround.rtne.f32 %v302_v21 }
  0x82   :  { %v3903_v6 = vround.rtne.f32 %v303_v7  ;;  %3488 = vmatprep.subr.bf16.mxu1 %v4517_v33  ;;  %3616 = vmatprep.subr.bf16.mxu0 %v4519_v39  ;;  %v376_v17 = vmax.f32 %v3896_v9, -128.0  ;;  %v379_v18 = vmax.f32 %v3899_v34, -128.0  ;;  %v380_v46 = vmax.f32 %v3900_v10, -128.0  ;;  %v5361_v7 = vld [vmem:[#allocation14_spill] sm:$0xff]  ;;  %v5362_v34 = vld [vmem:[#allocation15_spill] sm:$0xff] }
  0x83   :  { %v3904_v41 = vround.rtne.f32 %v304_v62  ;;  %v415_v43 = vmin.f32 %v375_v55, 127.0  ;;  %v381_v30 = vmax.f32 %v3901_v59, -128.0  ;;  %v382_v28 = vmax.f32 %v3902_v16, -128.0  ;;  %v1266_v38 = vld [vmem:[#allocation2 + $0x41] sm:$0xff]  ;;  %v5363_v62 = vld [vmem:[#allocation16_spill] sm:$0xff] }
  0x84   :  { %v383_v23 = vmax.f32 %v3903_v6, -128.0  ;;  %v416_v31 = vmin.f32 %v376_v17, 127.0  ;;  %v419_v54 = vmin.f32 %v379_v18, 127.0  ;;  %v420_v57 = vmin.f32 %v380_v46, 127.0  ;;  %3203 = vmatmul.mubr.f32.gmra.mrb[2].mxu0 %v1266_v38  ;;  %2981 = vmatprep.mubr.f32.mxu1 %v1266_v38  ;;  %v1267_v63 = vld [vmem:[#allocation2 + $0x51] sm:$0xff]  ;;  %v5364_v59 = vld [vmem:[#allocation17_spill] sm:$0xff] }
  0x85   :  { %v384_v40 = vmax.f32 %v3904_v41, -128.0  ;;  %v4638_v47 = vmul.f32 %v415_v43, %v4432_v1  ;;  %v421_v61 = vmin.f32 %v381_v30, 127.0  ;;  %v422_v5 = vmin.f32 %v382_v28, 127.0  ;;  %3205 = vmatprep.mubr.f32.mxu0 %v1267_v63  ;;  %2982 = vmatmul.mubr.f32.gmra.mrb[4].mxu1 %v1267_v63  ;;  %v1268_v20 = vld [vmem:[#allocation2 + $0x61] sm:$0xff]  ;;  %v5366_v43 = vld [vmem:[#allocation19_spill] sm:$0xff] }
  0x86   :  { %v423_v56 = vmin.f32 %v383_v23, 127.0  ;;  %v456_v52 = vmul.f32 %v416_v31, %v4432_v1  ;;  %v4642_v0 = vmul.f32 %v419_v54, %v4432_v1  ;;  %v460_v36 = vmul.f32 %v420_v57, %v4432_v1  ;;  %3490 = vmatpush3.bf16.msra.mxu1 %v4517_v33  ;;  %3618 = vmatpush3.bf16.msra.mxu0 %v4519_v39  ;;  %v1269_v37 = vld [vmem:[#allocation2 + $0x71] sm:$0xff]  ;;  %v5365_v6 = vld [vmem:[#allocation18_spill] sm:$0xff] }
  0x87   :  { %v424_v22 = vmin.f32 %v384_v40, 127.0  ;;  %495 = vst [vmem:[#allocation2 + $0x80] sm:$0xff] %v4638_v47  ;;  %v4649_v32 = vmul.f32 %v421_v61, %v4432_v1  ;;  %v462_v3 = vmul.f32 %v422_v5, %v4432_v1  ;;  %2984 = vmatprep.mubr.f32.mxu1 %v1268_v20  ;;  %3492 = vmatprep.subr.bf16.mxu1 %v4521_v14 }
  0x88   :  { %v4653_v13 = vmul.f32 %v423_v56, %v4432_v1  ;;  %496 = vst [vmem:[#allocation2 + $0x88] sm:$0x3] %v456_v52  ;;  %499 = vst [vmem:[#allocation2 + $0xa0] sm:$0xff] %v4642_v0  ;;  %v305_v39 = vmul.f32 %v4531_v27, %v4206_v24  ;;  %v306_v21 = vmul.f32 %v4531_v27, %v4211_v25  ;;  %3206 = vmatmul.mubr.f32.gmra.mrb[4].mxu0 %v1268_v20 }
  0x89   :  { %500 = vst [vmem:[#allocation2 + $0xa8] sm:$0x3] %v460_v36  ;;  %v464_v33 = vmul.f32 %v424_v22, %v4432_v1  ;;  %3620 = vmatprep.subr.bf16.mxu0 %v4523_v53  ;;  %501 = vst [vmem:[#allocation2 + $0xb0] sm:$0xff] %v4649_v32  ;;  %v307_v9 = vmul.f32 %v4531_v27, %v5361_v7  ;;  %v308_v10 = vmul.f32 %v4531_v27, %v5362_v34 }
  0x8a   :  { %502 = vst [vmem:[#allocation2 + $0xb8] sm:$0x3] %v462_v3  ;;  %503 = vst [vmem:[#allocation2 + $0xc0] sm:$0xff] %v4653_v13  ;;  %v309_v24 = vmul.f32 %v4531_v27, %v5363_v62  ;;  %3208 = vmatprep.mubr.f32.mxu0 %v1269_v37  ;;  %2985 = vmatmul.mubr.f32.gmra.mrb[6].mxu1 %v1269_v37  ;;  %v3905_v25 = vround.rtne.f32 %v305_v39  ;;  %v3906_v55 = vround.rtne.f32 %v306_v21 }
  0x8b   :  { %504 = vst [vmem:[#allocation2 + $0xc8] sm:$0x3] %v464_v33  ;;  %v310_v16 = vmul.f32 %v4531_v27, %v5364_v59  ;;  %v311_v17 = vmul.f32 %v4531_v27, %v5365_v6  ;;  %3494 = vmatpush3.bf16.msra.mxu1 %v4521_v14  ;;  %3622 = vmatpush3.bf16.msra.mxu0 %v4523_v53  ;;  %v3907_v18 = vround.rtne.f32 %v307_v9  ;;  %v3908_v46 = vround.rtne.f32 %v308_v10  ;;  %v5367_v59 = vld [vmem:[#allocation20_spill] sm:$0xff] }
  0x8c   :  { %v3909_v41 = vround.rtne.f32 %v309_v24  ;;  %v312_v30 = vmul.f32 %v4531_v27, %v5366_v43  ;;  %3496 = vmatprep.subr.bf16.mxu1 %v4525_v60  ;;  %3624 = vmatprep.subr.bf16.mxu0 %v4527_v2  ;;  %v385_v28 = vmax.f32 %v3905_v25, -128.0  ;;  %v386_v23 = vmax.f32 %v3906_v55, -128.0 }
  0x8d   :  { %v3910_v38 = vround.rtne.f32 %v310_v16  ;;  %v3911_v31 = vround.rtne.f32 %v311_v17  ;;  %v387_v54 = vmax.f32 %v3907_v18, -128.0  ;;  %v388_v57 = vmax.f32 %v3908_v46, -128.0  ;;  %v2605_v17 = vld [vmem:[%s5291_s1 + $0x2f8] sm:$0xff] }
  0x8e   :  { %v389_v40 = vmax.f32 %v3909_v41, -128.0  ;;  %v3912_v14 = vround.rtne.f32 %v312_v30  ;;  %v425_v63 = vmin.f32 %v385_v28, 127.0  ;;  %v426_v53 = vmin.f32 %v386_v23, 127.0 }
  0x8f   :  { %v390_v61 = vmax.f32 %v3910_v38, -128.0  ;;  %v391_v5 = vmax.f32 %v3911_v31, -128.0  ;;  %v1270_v56 = vld [vmem:[#allocation2 + $0x81] sm:$0xff]  ;;  %3498 = vmatpush3.bf16.msra.mxu1 %v4525_v60  ;;  %3626 = vmatpush3.bf16.msra.mxu0 %v4527_v2  ;;  %v427_v52 = vmin.f32 %v387_v54, 127.0  ;;  %v428_v36 = vmin.f32 %v388_v57, 127.0 }
  0x90   :  { %v559_v20 = vld [vmem:[#allocation2 + $0xa1] sm:$0xff]  ;;  %v429_v22 = vmin.f32 %v389_v40, 127.0  ;;  %v392_v37 = vmax.f32 %v3912_v14, -128.0  ;;  %3209 = vmatmul.mubr.f32.gmra.mrb[6].mxu0 %v1270_v56  ;;  %v4684_v33 = vmul.f32 %v425_v63, %v4432_v1  ;;  %v466_v39 = vmul.f32 %v426_v53, %v4432_v1  ;;  %3500 = vmatprep.subr.bf16.mxu1 %v4529_v42  ;;  %v3940_v40 = vld [vmem:[%s5292_s0 + $0x98] sm:$0x3] }
  0x91   :  { %2987 = vmatprep.mubr.f32.mxu1 %v559_v20  ;;  %v1271_v3 = vld [vmem:[#allocation2 + $0xb1] sm:$0xff]  ;;  %v430_v21 = vmin.f32 %v390_v61, 127.0  ;;  %v431_v7 = vmin.f32 %v391_v5, 127.0  ;;  %v4690_v60 = vmul.f32 %v427_v52, %v4432_v1  ;;  %v468_v2 = vmul.f32 %v428_v36, %v4432_v1  ;;  %3628 = vmatprep.subr.bf16.mxu0 %v4533_v8  ;;  %v2543_v38 = vld [vmem:[%s5291_s1 + $0x108] sm:$0xff]  ;;  %v2606_v61 = vld [vmem:[%s5291_s1 + $0x300] sm:$0xff] }
  0x92   :  { %3211 = vmatprep.mubr.f32.mxu0 %v1271_v3  ;;  %2988 = vmatmul.mubr.f32.gmra.mrb[8].mxu1 %v1271_v3  ;;  %v4687_v9 = vld [vmem:[#allocation2 + $0xc1] sm:$0xff]  ;;  %v4694_v34 = vmul.f32 %v429_v22, %v4432_v1  ;;  %v432_v10 = vmin.f32 %v392_v37, 127.0  ;;  %505 = vst [vmem:[#allocation2 + $0xd0] sm:$0xff] %v4684_v33  ;;  %506 = vst [vmem:[#allocation2 + $0xd8] sm:$0x3] %v466_v39  ;;  %v313_v25 = vmul.f32 %v4531_v27, %v4255_v44 }
  0x93   :  { %2990 = vmatprep.mubr.f32.mxu1 %v4687_v9  ;;  %v470_v62 = vmul.f32 %v430_v21, %v4432_v1  ;;  %v4701_v24 = vmul.f32 %v431_v7, %v4432_v1  ;;  %3502 = vmatpush3.bf16.msra.mxu1 %v4529_v42  ;;  %507 = vst [vmem:[#allocation2 + $0xe0] sm:$0xff] %v4690_v60  ;;  %508 = vst [vmem:[#allocation2 + $0xe8] sm:$0x3] %v468_v2  ;;  %v2604_v42 = vld [vmem:[%s5291_s1 + $0x2f0] sm:$0xff] }
  0x94   :  { %509 = vst [vmem:[#allocation2 + $0xf0] sm:$0xff] %v4694_v34  ;;  %v472_v55 = vmul.f32 %v432_v10, %v4432_v1  ;;  %v314_v16 = vmul.f32 %v4531_v27, %v5367_v59  ;;  %v315_v6 = vmul.f32 %v4531_v27, %v4265_v49  ;;  %3212 = vmatmul.mubr.f32.gmra.mrb[8].mxu0 %v4687_v9  ;;  %v3913_v44 = vround.rtne.f32 %v313_v25  ;;  %v3939_v49 = vld [vmem:[%s5292_s0 + $0x90] sm:$0xff] }
  0x95   :  { %3504 = vmatprep.subr.bf16.mxu1 %v4535_v45  ;;  %510 = vst [vmem:[#allocation2 + $0xf8] sm:$0x3] %v470_v62  ;;  %511 = vst [vmem:[#allocation2 + $0x100] sm:$0xff] %v4701_v24  ;;  %v316_v18 = vmul.f32 %v4531_v27, %v4273_v58  ;;  %v297_v46 = vmul.f32 %v3939_v49, %v4531_v27  ;;  %v317_v41 = vmul.f32 %v4531_v27, %v4285_v35  ;;  %v2542_v58 = vld [vmem:[%s5291_s1 + $0x100] sm:$0xff] }
  0x96   :  { %3630 = vmatpush3.bf16.msra.mxu0 %v4533_v8  ;;  %512 = vst [vmem:[#allocation2 + $0x108] sm:$0x3] %v472_v55  ;;  %v3914_v43 = vround.rtne.f32 %v314_v16  ;;  %v3915_v30 = vround.rtne.f32 %v315_v6  ;;  %v393_v28 = vmax.f32 %v3913_v44, -128.0  ;;  %v3635_v8 = vpack.c.bf16 %v2605_v17, %v2604_v42  ;;  %v3941_v17 = vld [vmem:[%s5292_s0 + $0x138] sm:$0x3] }
  0x97   :  { %3632 = vmatprep.subr.bf16.mxu0 %v4537_v15  ;;  %v3916_v23 = vround.rtne.f32 %v316_v18  ;;  %v3897_v31 = vround.rtne.f32 %v297_v46  ;;  %v3917_v54 = vround.rtne.f32 %v317_v41  ;;  %3506 = vmatpush3.bf16.msra.mxu1 %v4535_v45  ;;  %v298_v14 = vmul.f32 %v3940_v40, %v4531_v27  ;;  %v2607_v45 = vld [vmem:[%s5291_s1 + $0x308] sm:$0xff]  ;;  %v2610_v40 = vld [vmem:[%s5291_s1 + $0x320] sm:$0xff] }
  0x98   :  { %v394_v35 = vmax.f32 %v3914_v43, -128.0  ;;  %v395_v57 = vmax.f32 %v3915_v30, -128.0  ;;  %3508 = vmatprep.subr.bf16.mxu1 %v4539_v4  ;;  %v433_v63 = vmin.f32 %v393_v28, 127.0  ;;  %v4754_v22 = vpack.c.bf16 %v2543_v38, %v2542_v58  ;;  %v4797_v43 = vld [vmem:[#allocation2 + $0x12] sm:$0xff] }
  0x99   :  { %v396_v53 = vmax.f32 %v3916_v23, -128.0  ;;  %v377_v5 = vmax.f32 %v3897_v31, -128.0  ;;  %v397_v56 = vmax.f32 %v3917_v54, -128.0  ;;  %v4751_v20 = vld [vmem:[#allocation2 + $0xd1] sm:$0xff]  ;;  %v3898_v37 = vround.rtne.f32 %v298_v14  ;;  %v4819_v54 = vld [vmem:[#allocation2 + $0x22] sm:$0xff] }
  0x9a   :  { %3634 = vmatpush3.bf16.msra.mxu0 %v4537_v15  ;;  %v434_v52 = vmin.f32 %v394_v35, 127.0  ;;  %v435_v36 = vmin.f32 %v395_v57, 127.0  ;;  %3214 = vmatprep.mubr.f32.mxu0 %v4751_v20  ;;  %v4758_v3 = vld [vmem:[#allocation2 + $0xe1] sm:$0xff]  ;;  %v4761_v39 = vmul.f32 %v433_v63, %v4432_v1  ;;  %v3639_v25 = vpack.c.bf16 %v2607_v45, %v2606_v61  ;;  %v2544_v28 = vld [vmem:[%s5291_s1 + $0x110] sm:$0xff]  ;;  %v2545_v23 = vld [vmem:[%s5291_s1 + $0x118] sm:$0xff] }
  0x9b   :  { %2991 = vmatmul.mubr.f32.gmra.mrb[10].mxu1 %v4751_v20  ;;  %v436_v21 = vmin.f32 %v396_v53, 127.0  ;;  %v417_v7 = vmin.f32 %v377_v5, 127.0  ;;  %v437_v2 = vmin.f32 %v397_v56, 127.0  ;;  %3215 = vmatmul.mubr.f32.gmra.mrb[10].mxu0 %v4758_v3  ;;  %v378_v55 = vmax.f32 %v3898_v37, -128.0  ;;  %v2608_v38 = vld [vmem:[%s5291_s1 + $0x310] sm:$0xff]  ;;  %v2609_v31 = vld [vmem:[%s5291_s1 + $0x318] sm:$0xff] }
  0x9c   :  { %2993 = vmatprep.mubr.f32.mxu1 %v4758_v3  ;;  %v4765_v15 = vld [vmem:[#allocation2 + $0xf1] sm:$0xff]  ;;  %v474_v10 = vmul.f32 %v434_v52, %v4432_v1  ;;  %v4769_v62 = vmul.f32 %v435_v36, %v4432_v1  ;;  %513 = vst [vmem:[#allocation2 + $0x110] sm:$0xff] %v4761_v39  ;;  %3636 = vmatprep.subr.bf16.mxu0 %v3635_v8  ;;  %v2547_v57 = vld [vmem:[%s5291_s1 + $0x128] sm:$0xff] }
  0x9d   :  { %3217 = vmatprep.mubr.f32.mxu0 %v4765_v15  ;;  %v4772_v59 = vld [vmem:[#allocation2 + $0x101] sm:$0xff]  ;;  %v476_v16 = vmul.f32 %v436_v21, %v4432_v1  ;;  %v4777_v6 = vmul.f32 %v417_v7, %v4432_v1  ;;  %v4780_v44 = vmul.f32 %v437_v2, %v4432_v1  ;;  %3510 = vmatpush3.bf16.msra.mxu1 %v4539_v4  ;;  %v418_v42 = vmin.f32 %v378_v55, 127.0  ;;  %v4843_v53 = vld [vmem:[#allocation2 + $0x52] sm:$0xff] }
  0x9e   :  { %514 = vst [vmem:[#allocation2 + $0x118] sm:$0x3] %v474_v10  ;;  %515 = vst [vmem:[#allocation2 + $0x120] sm:$0xff] %v4769_v62  ;;  %3638 = vmatpush3.bf16.msra.mxu0 %v3635_v8  ;;  %v318_v18 = vmul.f32 %v3941_v17, %v4531_v27  ;;  %3512 = vmatprep.subr.bf16.mxu1 %v4754_v22  ;;  %v3515_v35 = vpack.c.bf16 %v2545_v23, %v2544_v28  ;;  %v4839_v14 = vld [vmem:[#allocation2 + $0x42] sm:$0xff]  ;;  %v2548_v45 = vld [vmem:[%s5291_s1 + $0x130] sm:$0xff] }
  0x9f   :  { %2994 = vmatmul.mubr.f32.gmra.mrb[12].mxu1 %v4765_v15  ;;  %516 = vst [vmem:[#allocation2 + $0x128] sm:$0x3] %v476_v16  ;;  %497 = vst [vmem:[#allocation2 + $0x90] sm:$0xff] %v4777_v6  ;;  %3218 = vmatmul.mubr.f32.gmra.mrb[12].mxu0 %v4772_v59  ;;  %v458_v4 = vmul.f32 %v418_v42, %v4432_v1  ;;  %v3643_v8 = vpack.c.bf16 %v2609_v31, %v2608_v38  ;;  %v2549_v5 = vld [vmem:[%s5291_s1 + $0x138] sm:$0xff]  ;;  %v2612_v56 = vld [vmem:[%s5291_s1 + $0x330] sm:$0xff] }
  0xa0   :  { %517 = vst [vmem:[#allocation2 + $0x130] sm:$0xff] %v4780_v44  ;;  %2996 = vmatprep.mubr.f32.mxu1 %v4772_v59  ;;  %v3918_v49 = vround.rtne.f32 %v318_v18  ;;  %3640 = vmatprep.subr.bf16.mxu0 %v3639_v25  ;;  %v2613_v52 = vld [vmem:[%s5291_s1 + $0x338] sm:$0xff]  ;;  %v4859_v36 = vld [vmem:[#allocation2 + $0x62] sm:$0xff]  ;;  %v2552_v18 = vld [vmem:[%s5291_s1 + $0x150] sm:$0xff] }
  0xa1   :  { %498 = vst [vmem:[#allocation2 + $0x98] sm:$0x3] %v458_v4  ;;  %v4863_v37 = vld [vmem:[#allocation2 + $0x72] sm:$0xff]  ;;  %v3651_v21 = vpack.c.bf16 %v2613_v52, %v2612_v56  ;;  %v2550_v7 = vld [vmem:[%s5291_s1 + $0x140] sm:$0xff]  ;;  %v2551_v2 = vld [vmem:[%s5291_s1 + $0x148] sm:$0xff] }
  0xa2   :  { %v398_v46 = vmax.f32 %v3918_v49, -128.0  ;;  %v2614_v10 = vld [vmem:[%s5291_s1 + $0x340] sm:$0xff]  ;;  %v3527_v16 = vpack.c.bf16 %v2551_v2, %v2550_v7  ;;  %v4883_v42 = vld [vmem:[#allocation2 + $0xb2] sm:$0xff]  ;;  %v2623_v2 = vld [vmem:[%s5291_s1 + $0x388] sm:$0xff] }
  0xa3   :  { %v4879_v55 = vld [vmem:[#allocation2 + $0x82] sm:$0xff]  ;;  %v2553_v4 = vld [vmem:[%s5291_s1 + $0x158] sm:$0xff]  ;;  %v2616_v49 = vld [vmem:[%s5291_s1 + $0x350] sm:$0xff] }
  0xa4   :  { %v438_v27 = vmin.f32 %v398_v46, 127.0  ;;  %v2617_v46 = vld [vmem:[%s5291_s1 + $0x358] sm:$0xff]  ;;  %v3531_v28 = vpack.c.bf16 %v2553_v4, %v2552_v18  ;;  %v2554_v38 = vld [vmem:[%s5291_s1 + $0x160] sm:$0xff]  ;;  %v2560_v18 = vld [vmem:[%s5291_s1 + $0x190] sm:$0xff] }
  0xa5   :  { %v4795_v41 = vld [vmem:[#allocation2 + $0x111] sm:$0xff]  ;;  %v2618_v31 = vld [vmem:[%s5291_s1 + $0x360] sm:$0xff] }
  0xa6   :  { %3220 = vmatprep.mubr.f32.mxu0 %v4795_v41  ;;  %2997 = vmatmul.mubr.f32.gmra.mrb[14].mxu1 %v4795_v41  ;;  %v4801_v30 = vld [vmem:[#allocation2 + $0x121] sm:$0xff]  ;;  %v478_v58 = vmul.f32 %v438_v27, %v4432_v1  ;;  %v4822_v1 = vld [vmem:[#allocation2 + $0x32] sm:$0xff] }
  0xa7   :  { %3221 = vmatmul.mubr.f32.gmra.mrb[14].mxu0 %v4801_v30  ;;  %3031 = vmatprep.mubr.f32.mxu1 %v4558_v12  ;;  %v2546_v12 = vld [vmem:[%s5291_s1 + $0x120] sm:$0xff]  ;;  %v4903_v23 = vld [vmem:[#allocation2 + $0xd2] sm:$0xff] }
  0xa8   :  { %3255 = vmatprep.mubr.f32.mxu0 %v4797_v43  ;;  %518 = vst [vmem:[#allocation2 + $0x138] sm:$0x3] %v478_v58  ;;  %v3519_v63 = vpack.c.bf16 %v2547_v57, %v2546_v12  ;;  %v4899_v27 = vld [vmem:[#allocation2 + $0xc2] sm:$0xff]  ;;  %v3659_v58 = vpack.c.bf16 %v2617_v46, %v2616_v49  ;;  %v4923_v12 = vld [vmem:[#allocation2 + $0xf2] sm:$0xff] }
  0xa9   :  { %v4943_v56 = vld [vmem:[#allocation2 + $0x112] sm:$0xff]  ;;  %v2622_v7 = vld [vmem:[%s5291_s1 + $0x380] sm:$0xff] }
  0xaa   :  { %3032 = vmatmul.mubr.f32.vlgmr.msra.gmra.mrb[0].mxu1 %v4562_v11  ;;  %v2611_v11 = vld [vmem:[%s5291_s1 + $0x328] sm:$0xff]  ;;  %v2561_v4 = vld [vmem:[%s5291_s1 + $0x198] sm:$0xff]  ;;  %v2624_v49 = vld [vmem:[%s5291_s1 + $0x390] sm:$0xff] }
  0xab   :  { %3514 = vmatpush3.bf16.msra.mxu1 %v4754_v22  ;;  %3256 = vmatmul.mubr.f32.vlgmr.msra.gmra.mrb[0].mxu0 %v4819_v54  ;;  %v3647_v61 = vpack.c.bf16 %v2611_v11, %v2610_v40  ;;  %v3523_v22 = vpack.c.bf16 %v2549_v5, %v2548_v45  ;;  %v2556_v40 = vld [vmem:[%s5291_s1 + $0x170] sm:$0xff]  ;;  %v2557_v11 = vld [vmem:[%s5291_s1 + $0x178] sm:$0xff]  ;;  %v4939_v45 = vld [vmem:[#allocation2 + $0x102] sm:$0xff] }
  0xac   :  { %3642 = vmatpush3.bf16.msra.mxu0 %v3639_v25  ;;  %3034 = vmatprep.mubr.f32.mxu1 %v4566_v19  ;;  %v2615_v25 = vld [vmem:[%s5291_s1 + $0x348] sm:$0xff]  ;;  %v3539_v5 = vpack.c.bf16 %v2557_v11, %v2556_v40  ;;  %v2625_v46 = vld [vmem:[%s5291_s1 + $0x398] sm:$0xff] }
  0xad   :  { %3516 = vmatprep.subr.bf16.mxu1 %v3515_v35  ;;  %3258 = vmatprep.mubr.f32.mxu0 %v4822_v1  ;;  %v3655_v17 = vpack.c.bf16 %v2615_v25, %v2614_v10  ;;  %v4959_v10 = vld [vmem:[#allocation2 + $0x122] sm:$0xff] }
  0xae   :  { %3644 = vmatprep.subr.bf16.mxu0 %v3643_v8  ;;  %3035 = vmatmul.mubr.f32.gmra.mrb[2].mxu1 %v4570_v26  ;;  %v874_v25 = vld [vmem:[#allocation2 + $0x2] sm:$0xff] }
  0xaf   :  { %3518 = vmatpush3.bf16.msra.mxu1 %v3515_v35  ;;  %3259 = vmatmul.mubr.f32.gmra.mrb[2].mxu0 %v4839_v14  ;;  %v4919_v35 = vld [vmem:[#allocation2 + $0xe2] sm:$0xff] }
  0xb0   :  { %3646 = vmatpush3.bf16.msra.mxu0 %v3643_v8  ;;  %3037 = vmatprep.mubr.f32.mxu1 %v4594_v29 }
  0xb1   :  { %3520 = vmatprep.subr.bf16.mxu1 %v3519_v63  ;;  %3261 = vmatprep.mubr.f32.mxu0 %v4843_v53 }
  0xb2   :  { %3648 = vmatprep.subr.bf16.mxu0 %v3647_v61  ;;  %3038 = vmatmul.mubr.f32.gmra.mrb[4].mxu1 %v4598_v48 }
  0xb3   :  { %3522 = vmatpush3.bf16.msra.mxu1 %v3519_v63  ;;  %3262 = vmatmul.mubr.f32.gmra.mrb[4].mxu0 %v4859_v36  ;;  %v2620_v63 = vld [vmem:[%s5291_s1 + $0x370] sm:$0xff] }
  0xb4   :  { %3650 = vmatpush3.bf16.msra.mxu0 %v3647_v61  ;;  %3040 = vmatprep.mubr.f32.mxu1 %v4602_v51  ;;  %v2621_v61 = vld [vmem:[%s5291_s1 + $0x378] sm:$0xff] }
  0xb5   :  { %3524 = vmatprep.subr.bf16.mxu1 %v3523_v22  ;;  %3264 = vmatprep.mubr.f32.mxu0 %v4863_v37  ;;  %v3667_v52 = vpack.c.bf16 %v2621_v61, %v2620_v63  ;;  %v2567_v63 = vld [vmem:[%s5291_s1 + $0x1c8] sm:$0xff] }
  0xb6   :  { %3652 = vmatprep.subr.bf16.mxu0 %v3651_v21  ;;  %3041 = vmatmul.mubr.f32.gmra.mrb[6].mxu1 %v4610_v50  ;;  %v2631_v61 = vld [vmem:[%s5291_s1 + $0x3c8] sm:$0xff] }
  0xb7   :  { %3526 = vmatpush3.bf16.msra.mxu1 %v3523_v22  ;;  %3265 = vmatmul.mubr.f32.gmra.mrb[6].mxu0 %v4879_v55  ;;  %v2558_v22 = vld [vmem:[%s5291_s1 + $0x180] sm:$0xff] }
  0xb8   :  { %3654 = vmatpush3.bf16.msra.mxu0 %v3651_v21  ;;  %3043 = vmatprep.mubr.f32.mxu1 %v4642_v0  ;;  %v2555_v0 = vld [vmem:[%s5291_s1 + $0x168] sm:$0xff] }
  0xb9   :  { %3528 = vmatprep.subr.bf16.mxu1 %v3527_v16  ;;  %3267 = vmatprep.mubr.f32.mxu0 %v4883_v42  ;;  %v3535_v8 = vpack.c.bf16 %v2555_v0, %v2554_v38  ;;  %v2559_v21 = vld [vmem:[%s5291_s1 + $0x188] sm:$0xff]  ;;  %v2562_v38 = vld [vmem:[%s5291_s1 + $0x1a0] sm:$0xff] }
  0xba   :  { %3656 = vmatprep.subr.bf16.mxu0 %v3655_v17  ;;  %3044 = vmatmul.mubr.f32.gmra.mrb[8].mxu1 %v4649_v32  ;;  %v2619_v32 = vld [vmem:[%s5291_s1 + $0x368] sm:$0xff] }
  0xbb   :  { %3530 = vmatpush3.bf16.msra.mxu1 %v3527_v16  ;;  %3268 = vmatmul.mubr.f32.gmra.mrb[8].mxu0 %v4899_v27  ;;  %v3663_v57 = vpack.c.bf16 %v2619_v32, %v2618_v31  ;;  %v3543_v16 = vpack.c.bf16 %v2559_v21, %v2558_v22  ;;  %v2563_v0 = vld [vmem:[%s5291_s1 + $0x1a8] sm:$0xff]  ;;  %v2568_v22 = vld [vmem:[%s5291_s1 + $0x1d0] sm:$0xff]  ;;  %v2569_v21 = vld [vmem:[%s5291_s1 + $0x1d8] sm:$0xff] }
  0xbc   :  { %3658 = vmatpush3.bf16.msra.mxu0 %v3655_v17  ;;  %3046 = vmatprep.mubr.f32.mxu1 %v4653_v13  ;;  %v3671_v17 = vpack.c.bf16 %v2623_v2, %v2622_v7  ;;  %v3551_v31 = vpack.c.bf16 %v2563_v0, %v2562_v38  ;;  %v2633_v7 = vld [vmem:[%s5291_s1 + $0x3d8] sm:$0xff]  ;;  %v3563_v2 = vpack.c.bf16 %v2569_v21, %v2568_v22  ;;  %v1850_v22 = vld [vmem:[#allocation2 + $0x61] sm:$0xff]  ;;  %v2644_v21 = vld [vmem:[%s5291_s1 + $0x430] sm:$0xff] }
  0xbd   :  { %3532 = vmatprep.subr.bf16.mxu1 %v3531_v28  ;;  %3270 = vmatprep.mubr.f32.mxu0 %v4903_v23 }
  0xbe   :  { %3660 = vmatprep.subr.bf16.mxu0 %v3659_v58  ;;  %3047 = vmatmul.mubr.f32.gmra.mrb[10].mxu1 %v4684_v33 }
  0xbf   :  { %3534 = vmatpush3.bf16.msra.mxu1 %v3531_v28  ;;  %3271 = vmatmul.mubr.f32.gmra.mrb[10].mxu0 %v4919_v35  ;;  %v3547_v28 = vpack.c.bf16 %v2561_v4, %v2560_v18 }
  0xc0   :  { %3662 = vmatpush3.bf16.msra.mxu0 %v3659_v58  ;;  %3049 = vmatprep.mubr.f32.mxu1 %v4690_v60  ;;  %v3675_v58 = vpack.c.bf16 %v2625_v46, %v2624_v49  ;;  %v2572_v49 = vld [vmem:[%s5291_s1 + $0x1f0] sm:$0xff]  ;;  %v2573_v46 = vld [vmem:[%s5291_s1 + $0x1f8] sm:$0xff] }
  0xc1   :  { %3536 = vmatprep.subr.bf16.mxu1 %v3535_v8  ;;  %3273 = vmatprep.mubr.f32.mxu0 %v4923_v12  ;;  %v3571_v38 = vpack.c.bf16 %v2573_v46, %v2572_v49  ;;  %v1077_v49 = vld [vmem:[#allocation2 + $0xb0] sm:$0xff] }
  0xc2   :  { %3664 = vmatprep.subr.bf16.mxu0 %v3663_v57  ;;  %3050 = vmatmul.mubr.f32.gmra.mrb[12].mxu1 %v4694_v34 }
  0xc3   :  { %3538 = vmatpush3.bf16.msra.mxu1 %v3535_v8  ;;  %3274 = vmatmul.mubr.f32.gmra.mrb[12].mxu0 %v4939_v45  ;;  %v2565_v8 = vld [vmem:[%s5291_s1 + $0x1b8] sm:$0xff] }
  0xc4   :  { %3666 = vmatpush3.bf16.msra.mxu0 %v3663_v57  ;;  %3052 = vmatprep.mubr.f32.mxu1 %v4701_v24  ;;  %v2629_v57 = vld [vmem:[%s5291_s1 + $0x3b8] sm:$0xff] }
  0xc5   :  { %3540 = vmatprep.subr.bf16.mxu1 %v3539_v5  ;;  %3276 = vmatprep.mubr.f32.mxu0 %v4943_v56 }
  0xc6   :  { %3668 = vmatprep.subr.bf16.mxu0 %v3667_v52  ;;  %3053 = vmatmul.mubr.f32.gmra.mrb[14].mxu1 %v4761_v39 }
  0xc7   :  { %3542 = vmatpush3.bf16.msra.mxu1 %v3539_v5  ;;  %3277 = vmatmul.mubr.f32.gmra.mrb[14].mxu0 %v4959_v10  ;;  %v882_v5 = vld [vmem:[#allocation2 + $0xa2] sm:$0xff] }
  0xc8   :  { %3670 = vmatpush3.bf16.msra.mxu0 %v3667_v52  ;;  %3087 = vmatprep.mubr.f32.mxu1 %v874_v25 }
  0xc9   :  { %3544 = vmatprep.subr.bf16.mxu1 %v3543_v16  ;;  %3311 = vmatprep.mubr.f32.mxu0 %v4566_v19  ;;  %v2626_v19 = vld [vmem:[%s5291_s1 + $0x3a0] sm:$0xff] }
  0xca   :  { %3672 = vmatprep.subr.bf16.mxu0 %v3671_v17  ;;  %3088 = vmatmul.mubr.f32.vlgmr.msra.gmra.mrb[0].mxu1 %v4797_v43  ;;  %v2627_v43 = vld [vmem:[%s5291_s1 + $0x3a8] sm:$0xff] }
  0xcb   :  { %3546 = vmatpush3.bf16.msra.mxu1 %v3543_v16  ;;  %3312 = vmatmul.mubr.f32.vlgmr.msra.gmra.mrb[0].mxu0 %v4570_v26  ;;  %v3679_v32 = vpack.c.bf16 %v2627_v43, %v2626_v19  ;;  %v2564_v26 = vld [vmem:[%s5291_s1 + $0x1b0] sm:$0xff]  ;;  %v2571_v16 = vld [vmem:[%s5291_s1 + $0x1e8] sm:$0xff]  ;;  %v2638_v19 = vld [vmem:[%s5291_s1 + $0x400] sm:$0xff] }
  0xcc   :  { %3674 = vmatpush3.bf16.msra.mxu0 %v3671_v17  ;;  %3090 = vmatprep.mubr.f32.mxu1 %v4819_v54  ;;  %v3555_v40 = vpack.c.bf16 %v2565_v8, %v2564_v26  ;;  %v2634_v17 = vld [vmem:[%s5291_s1 + $0x3e0] sm:$0xff]  ;;  %v2639_v43 = vld [vmem:[%s5291_s1 + $0x408] sm:$0xff]  ;;  %v2640_v8 = vld [vmem:[%s5291_s1 + $0x410] sm:$0xff] }
  0xcd   :  { %3548 = vmatprep.subr.bf16.mxu1 %v3547_v28  ;;  %3314 = vmatprep.mubr.f32.mxu0 %v4594_v29  ;;  %v2628_v29 = vld [vmem:[%s5291_s1 + $0x3b0] sm:$0xff]  ;;  %v1846_v26 = vld [vmem:[#allocation2 + $0x21] sm:$0xff] }
  0xce   :  { %3676 = vmatprep.subr.bf16.mxu0 %v3675_v58  ;;  %3091 = vmatmul.mubr.f32.gmra.mrb[2].mxu1 %v4822_v1  ;;  %v3683_v11 = vpack.c.bf16 %v2629_v57, %v2628_v29  ;;  %v2641_v29 = vld [vmem:[%s5291_s1 + $0x418] sm:$0xff]  ;;  %v1070_v57 = vld [vmem:[#allocation2 + $0x20] sm:$0xff] }
  0xcf   :  { %3550 = vmatpush3.bf16.msra.mxu1 %v3547_v28  ;;  %3315 = vmatmul.mubr.f32.gmra.mrb[2].mxu0 %v4598_v48  ;;  %v2566_v48 = vld [vmem:[%s5291_s1 + $0x1c0] sm:$0xff]  ;;  %v2636_v28 = vld [vmem:[%s5291_s1 + $0x3f0] sm:$0xff] }
  0xd0   :  { %3678 = vmatpush3.bf16.msra.mxu0 %v3675_v58  ;;  %3093 = vmatprep.mubr.f32.mxu1 %v4839_v14  ;;  %v3559_v52 = vpack.c.bf16 %v2567_v63, %v2566_v48  ;;  %v2637_v58 = vld [vmem:[%s5291_s1 + $0x3f8] sm:$0xff]  ;;  %v3707_v48 = vpack.c.bf16 %v2641_v29, %v2640_v8  ;;  %v1848_v63 = vld [vmem:[#allocation2 + $0x41] sm:$0xff] }
  0xd1   :  { %3552 = vmatprep.subr.bf16.mxu1 %v3551_v31  ;;  %3317 = vmatprep.mubr.f32.mxu0 %v4602_v51  ;;  %v2630_v51 = vld [vmem:[%s5291_s1 + $0x3c0] sm:$0xff]  ;;  %v3699_v0 = vpack.c.bf16 %v2637_v58, %v2636_v28  ;;  %v2648_v28 = vld [vmem:[%s5291_s1 + $0x450] sm:$0xff]  ;;  %v2649_v58 = vld [vmem:[%s5291_s1 + $0x458] sm:$0xff] }
  0xd2   :  { %3680 = vmatprep.subr.bf16.mxu0 %v3679_v32  ;;  %3094 = vmatmul.mubr.f32.gmra.mrb[4].mxu1 %v4843_v53 }
  0xd3   :  { %3554 = vmatpush3.bf16.msra.mxu1 %v3551_v31  ;;  %3318 = vmatmul.mubr.f32.gmra.mrb[4].mxu0 %v4610_v50  ;;  %v3687_v50 = vpack.c.bf16 %v2631_v61, %v2630_v51  ;;  %v1069_v31 = vld [vmem:[#allocation2 + $0x10] sm:$0xff]  ;;  %v2642_v51 = vld [vmem:[%s5291_s1 + $0x420] sm:$0xff]  ;;  %v2643_v61 = vld [vmem:[%s5291_s1 + $0x428] sm:$0xff] }
  0xd4   :  { %3682 = vmatpush3.bf16.msra.mxu0 %v3679_v32  ;;  %3096 = vmatprep.mubr.f32.mxu1 %v4859_v36  ;;  %v3703_v32 = vpack.c.bf16 %v2639_v43, %v2638_v19  ;;  %v2651_v19 = vld [vmem:[%s5291_s1 + $0x468] sm:$0xff]  ;;  %v2653_v43 = vld [vmem:[%s5291_s1 + $0x478] sm:$0xff] }
  0xd5   :  { %3556 = vmatprep.subr.bf16.mxu1 %v3555_v40  ;;  %3320 = vmatprep.mubr.f32.mxu0 %v4638_v47  ;;  %v2632_v47 = vld [vmem:[%s5291_s1 + $0x3d0] sm:$0xff] }
  0xd6   :  { %3684 = vmatprep.subr.bf16.mxu0 %v3683_v11  ;;  %3097 = vmatmul.mubr.f32.gmra.mrb[6].mxu1 %v4863_v37  ;;  %v3691_v25 = vpack.c.bf16 %v2633_v7, %v2632_v47  ;;  %v2645_v47 = vld [vmem:[%s5291_s1 + $0x438] sm:$0xff]  ;;  %v1074_v7 = vld [vmem:[#allocation2 + $0x60] sm:$0xff] }
  0xd7   :  { %3558 = vmatpush3.bf16.msra.mxu1 %v3555_v40  ;;  %3321 = vmatmul.mubr.f32.gmra.mrb[6].mxu0 %v4777_v6  ;;  %v2570_v6 = vld [vmem:[%s5291_s1 + $0x1e0] sm:$0xff]  ;;  %v1847_v40 = vld [vmem:[#allocation2 + $0x31] sm:$0xff] }
  0xd8   :  { %3686 = vmatpush3.bf16.msra.mxu0 %v3683_v11  ;;  %3099 = vmatprep.mubr.f32.mxu1 %v882_v5  ;;  %v3567_v18 = vpack.c.bf16 %v2571_v16, %v2570_v6  ;;  %v1071_v11 = vld [vmem:[#allocation2 + $0x30] sm:$0xff]  ;;  %v3715_v6 = vpack.c.bf16 %v2645_v47, %v2644_v21  ;;  %v1852_v16 = vld [vmem:[#allocation2 + $0x81] sm:$0xff] }
  0xd9   :  { %3560 = vmatprep.subr.bf16.mxu1 %v3559_v52  ;;  %3323 = vmatprep.mubr.f32.mxu0 %v4653_v13  ;;  %v1849_v5 = vld [vmem:[#allocation2 + $0x51] sm:$0xff] }
  0xda   :  { %3688 = vmatprep.subr.bf16.mxu0 %v3687_v50  ;;  %3100 = vmatmul.mubr.f32.gmra.mrb[8].mxu1 %v4883_v42  ;;  %v2635_v42 = vld [vmem:[%s5291_s1 + $0x3e8] sm:$0xff] }
  0xdb   :  { %3562 = vmatpush3.bf16.msra.mxu1 %v3559_v52  ;;  %3324 = vmatmul.mubr.f32.gmra.mrb[8].mxu0 %v4684_v33  ;;  %v3695_v4 = vpack.c.bf16 %v2635_v42, %v2634_v17  ;;  %v1073_v52 = vld [vmem:[#allocation2 + $0x50] sm:$0xff]  ;;  %v2646_v17 = vld [vmem:[%s5291_s1 + $0x440] sm:$0xff]  ;;  %v2647_v42 = vld [vmem:[%s5291_s1 + $0x448] sm:$0xff] }
  0xdc   :  { %3690 = vmatpush3.bf16.msra.mxu0 %v3687_v50  ;;  %3102 = vmatprep.mubr.f32.mxu1 %v4899_v27  ;;  %v3711_v50 = vpack.c.bf16 %v2643_v61, %v2642_v51  ;;  %v3719_v46 = vpack.c.bf16 %v2647_v42, %v2646_v17  ;;  %v5163_v61 = vld [vmem:[%s5293_s2] ss:$0 sm:$0xff] }
  0xdd   :  { %3564 = vmatprep.subr.bf16.mxu1 %v3563_v2  ;;  %3326 = vmatprep.mubr.f32.mxu0 %v4690_v60 }
  0xde   :  { %3692 = vmatprep.subr.bf16.mxu0 %v3691_v25  ;;  %3103 = vmatmul.mubr.f32.gmra.mrb[10].mxu1 %v4903_v23 }
  0xdf   :  { %3566 = vmatpush3.bf16.msra.mxu1 %v3563_v2  ;;  %3327 = vmatmul.mubr.f32.gmra.mrb[10].mxu0 %v4694_v34  ;;  %v1851_v2 = vld [vmem:[#allocation2 + $0x71] sm:$0xff] }
  0xe0   :  { %3694 = vmatpush3.bf16.msra.mxu0 %v3691_v25  ;;  %3105 = vmatprep.mubr.f32.mxu1 %v4919_v35  ;;  %v1075_v25 = vld [vmem:[#allocation2 + $0x70] sm:$0xff] }
  0xe1   :  { %3568 = vmatprep.subr.bf16.mxu1 %v3567_v18  ;;  %3329 = vmatprep.mubr.f32.mxu0 %v4701_v24 }
  0xe2   :  { %3696 = vmatprep.subr.bf16.mxu0 %v3695_v4  ;;  %3106 = vmatmul.mubr.f32.gmra.mrb[12].mxu1 %v4923_v12 }
  0xe3   :  { %3570 = vmatpush3.bf16.msra.mxu1 %v3567_v18  ;;  %3330 = vmatmul.mubr.f32.gmra.mrb[12].mxu0 %v4761_v39  ;;  %v1076_v18 = vld [vmem:[#allocation2 + $0x80] sm:$0xff] }
  0xe4   :  { %3698 = vmatpush3.bf16.msra.mxu0 %v3695_v4  ;;  %3108 = vmatprep.mubr.f32.mxu1 %v4939_v45  ;;  %v1853_v4 = vld [vmem:[#allocation2 + $0x91] sm:$0xff] }
  0xe5   :  { %3572 = vmatprep.subr.bf16.mxu1 %v3571_v38  ;;  %3332 = vmatprep.mubr.f32.mxu0 %v4769_v62 }
  0xe6   :  { %3700 = vmatprep.subr.bf16.mxu0 %v3699_v0  ;;  %3109 = vmatmul.mubr.f32.gmra.mrb[14].mxu1 %v4943_v56 }
  0xe7   :  { %3574 = vmatpush3.bf16.msra.mxu1 %v3571_v38  ;;  %3333 = vmatmul.mubr.f32.gmra.mrb[14].mxu0 %v4780_v44  ;;  %v1072_v44 = vld [vmem:[#allocation2 + $0x40] sm:$0xff]  ;;  %v3723_v38 = vpack.c.bf16 %v2649_v58, %v2648_v28 }
  0xe8   :  { %3702 = vmatpush3.bf16.msra.mxu0 %v3699_v0  ;;  %3143 = vmatprep.mubr.f32.mxu1 %v1069_v31  ;;  %v2650_v0 = vld [vmem:[%s5291_s1 + $0x460] sm:$0xff] }
  0xe9   :  { %3367 = vmatprep.mubr.f32.mxu0 %v1846_v26  ;;  %3704 = vmatprep.subr.bf16.mxu0 %v3703_v32 }
  0xea   :  { %3735 = vmatprep.subr.bf16.mxu1 %v3703_v32  ;;  %3144 = vmatmul.mubr.f32.vlgmr.msra.gmra.mrb[0].mxu1 %v1070_v57 }
  0xeb   :  { %3368 = vmatmul.mubr.f32.vlgmr.msra.gmra.mrb[0].mxu0 %v1847_v40  ;;  %3743 = vmatpush3.bf16.msra.mxu1 %v3703_v32 }
  0xec   :  { %3706 = vmatpush3.bf16.msra.mxu0 %v3703_v32  ;;  %3146 = vmatprep.mubr.f32.mxu1 %v1071_v11 }
  0xed   :  { %3370 = vmatprep.mubr.f32.mxu0 %v1848_v63  ;;  %3708 = vmatprep.subr.bf16.mxu0 %v3707_v48 }
  0xee   :  { %3736 = vmatprep.subr.bf16.mxu1 %v3707_v48  ;;  %3147 = vmatmul.mubr.f32.gmra.mrb[2].mxu1 %v1072_v44 }
  0xef   :  { %3371 = vmatmul.mubr.f32.gmra.mrb[2].mxu0 %v1849_v5  ;;  %3744 = vmatpush3.bf16.msra.mxu1 %v3707_v48 }
  0xf0   :  { %3710 = vmatpush3.bf16.msra.mxu0 %v3707_v48  ;;  %3149 = vmatprep.mubr.f32.mxu1 %v1073_v52 }
  0xf1   :  { %3373 = vmatprep.mubr.f32.mxu0 %v1850_v22  ;;  %3712 = vmatprep.subr.bf16.mxu0 %v3711_v50 }
  0xf2   :  { %3737 = vmatprep.subr.bf16.mxu1 %v3711_v50  ;;  %3150 = vmatmul.mubr.f32.gmra.mrb[4].mxu1 %v1074_v7 }
  0xf3   :  { %3374 = vmatmul.mubr.f32.gmra.mrb[4].mxu0 %v1851_v2  ;;  %3745 = vmatpush3.bf16.msra.mxu1 %v3711_v50 }
  0xf4   :  { %3714 = vmatpush3.bf16.msra.mxu0 %v3711_v50  ;;  %3152 = vmatprep.mubr.f32.mxu1 %v1075_v25 }
  0xf5   :  { %3376 = vmatprep.mubr.f32.mxu0 %v1852_v16  ;;  %3716 = vmatprep.subr.bf16.mxu0 %v3715_v6 }
  0xf6   :  { %3738 = vmatprep.subr.bf16.mxu1 %v3715_v6  ;;  %3153 = vmatmul.mubr.f32.gmra.mrb[6].mxu1 %v1076_v18 }
  0xf7   :  { %3377 = vmatmul.mubr.f32.gmra.mrb[6].mxu0 %v1853_v4  ;;  %3746 = vmatpush3.bf16.msra.mxu1 %v3715_v6 }
  0xf8   :  { %3718 = vmatpush3.bf16.msra.mxu0 %v3715_v6  ;;  %3155 = vmatprep.mubr.f32.mxu1 %v1077_v49 }
  0xf9   :  { %3379 = vmatprep.mubr.f32.mxu0 %v4687_v9  ;;  %3720 = vmatprep.subr.bf16.mxu0 %v3719_v46  ;;  %v3727_v9 = vpack.c.bf16 %v2651_v19, %v2650_v0 }
  0xfa   :  { %3739 = vmatprep.subr.bf16.mxu1 %v3719_v46  ;;  %3156 = vmatmul.mubr.f32.gmra.mrb[8].mxu1 %v4653_v13  ;;  %v2652_v13 = vld [vmem:[%s5291_s1 + $0x470] sm:$0xff] }
  0xfb   :  { %3380 = vmatmul.mubr.f32.gmra.mrb[8].mxu0 %v4751_v20  ;;  %3747 = vmatpush3.bf16.msra.mxu1 %v3719_v46 }
  0xfc   :  { %3722 = vmatpush3.bf16.msra.mxu0 %v3719_v46  ;;  %3158 = vmatprep.mubr.f32.mxu1 %v4684_v33  ;;  %v3731_v33 = vpack.c.bf16 %v2653_v43, %v2652_v13 }
  0xfd   :  { %3382 = vmatprep.mubr.f32.mxu0 %v4758_v3  ;;  %3724 = vmatprep.subr.bf16.mxu0 %v3723_v38 }
  0xfe   :  { %3740 = vmatprep.subr.bf16.mxu1 %v3723_v38  ;;  %3159 = vmatmul.mubr.f32.gmra.mrb[10].mxu1 %v4690_v60  ;;  %v1861_v60 = vld [vmem:[#allocation2 + $0x131] sm:$0xff] }
  0xff   :  { %3383 = vmatmul.mubr.f32.gmra.mrb[10].mxu0 %v4765_v15  ;;  %3748 = vmatpush3.bf16.msra.mxu1 %v3723_v38 }
 0x100   :  { %3726 = vmatpush3.bf16.msra.mxu0 %v3723_v38  ;;  %3161 = vmatprep.mubr.f32.mxu1 %v4694_v34  ;;  %v2055_v34 = vld [vmem:[#allocation2 + $0x132] sm:$0xff] }
 0x101   :  { %3385 = vmatprep.mubr.f32.mxu0 %v4772_v59  ;;  %3728 = vmatprep.subr.bf16.mxu0 %v3727_v9 }
 0x102   :  { %3741 = vmatprep.subr.bf16.mxu1 %v3727_v9  ;;  %3162 = vmatmul.mubr.f32.gmra.mrb[12].mxu1 %v4701_v24  ;;  %v2047_v24 = vld [vmem:[#allocation2 + $0x92] sm:$0xff] }
 0x103   :  { %3386 = vmatmul.mubr.f32.gmra.mrb[12].mxu0 %v4795_v41  ;;  %3749 = vmatpush3.bf16.msra.mxu1 %v3727_v9 }
 0x104   :  { %3730 = vmatpush3.bf16.msra.mxu0 %v3727_v9  ;;  %3164 = vmatprep.mubr.f32.mxu1 %v4761_v39 }
 0x105   :  { %3388 = vmatprep.mubr.f32.mxu0 %v4801_v30  ;;  %3732 = vmatprep.subr.bf16.mxu0 %v3731_v33 }
 0x106   :  { %3742 = vmatprep.subr.bf16.mxu1 %v3731_v33  ;;  %3165 = vmatmul.mubr.f32.gmra.mrb[14].mxu1 %v4769_v62 }
 0x107   :  { %3389 = vmatmul.mubr.f32.gmra.mrb[14].mxu0 %v1861_v60  ;;  %3750 = vmatpush3.bf16.msra.mxu1 %v3731_v33 }
 0x108   :  { %3734 = vmatpush3.bf16.msra.mxu0 %v3731_v33  ;;  %3423 = vmatprep.mubr.f32.mxu0 %v4819_v54 }
 0x109   :  { %3435 = vmatprep.mubr.f32.mxu1 %v4899_v27 }
 0x10a   :  { %3436 = vmatmul.mubr.f32.vlgmr.msra.gmra.mrb[16].mxu1 %v4903_v23 }
 0x10b   :  { %3424 = vmatmul.mubr.f32.vlgmr.msra.gmra.mrb[0].mxu0 %v4822_v1  ;;  %3438 = vmatprep.mubr.f32.mxu1 %v4919_v35 }
 0x10c   :  { %3426 = vmatprep.mubr.f32.mxu0 %v4839_v14 }
 0x10e   :  { %3439 = vmatmul.mubr.f32.gmra.mrb[18].mxu1 %v4923_v12 }
 0x10f   :  { %3427 = vmatmul.mubr.f32.gmra.mrb[2].mxu0 %v4843_v53  ;;  %3441 = vmatprep.mubr.f32.mxu1 %v4939_v45 }
 0x110   :  { %3429 = vmatprep.mubr.f32.mxu0 %v4859_v36 }
 0x112   :  { %3442 = vmatmul.mubr.f32.gmra.mrb[20].mxu1 %v4943_v56 }
 0x113   :  { %3430 = vmatmul.mubr.f32.gmra.mrb[4].mxu0 %v4863_v37  ;;  %3444 = vmatprep.mubr.f32.mxu1 %v4959_v10 }
 0x114   :  { %3432 = vmatprep.mubr.f32.mxu0 %v4879_v55 }
 0x116   :  { %3445 = vmatmul.mubr.f32.gmra.mrb[22].mxu1 %v2055_v34 }
 0x117   :  { %3433 = vmatmul.mubr.f32.gmra.mrb[6].mxu0 %v2047_v24 }
 0x1bd   :  { %v3145_v20 = vpop.f32.mrb[0].mxu1 }
 0x1be   :  { %v1168_v3 = vpop.f32.mrb[1].mxu1 }
 0x1c1   :  { %v3148_v39 = vpop.f32.mrb[2].mxu1 }
 0x1c2   :  { %v1178_v15 = vpop.f32.mrb[3].mxu1 }
 0x1c5   :  { %v3151_v62 = vpop.f32.mrb[4].mxu1 }
 0x1c6   :  { %v5154_v59 = vpop.f32.mrb[5].mxu1 }
 0x1c9   :  { %v5156_v41 = vpop.f32.mrb[6].mxu1 }
 0x1ca   :  { %v5158_v30 = vpop.f32.mrb[7].mxu1 }
 0x1cd   :  { %v3157_v54 = vpop.f32.mrb[8].mxu1 }
 0x1ce   :  { %v3381_v1 = vpop.f32.mrb[8].mxu0  ;;  %v1208_v14 = vpop.f32.mrb[9].mxu1 }
 0x1cf   :  { %v3759_v53 = vadd.f32 %v3381_v1, %v3157_v54  ;;  %v1985_v36 = vpop.f32.mrb[9].mxu0 }
 0x1d0   :  { %v3761_v37 = vadd.f32 %v1985_v36, %v1208_v14 }
 0x1d1   :  { %v3160_v55 = vpop.f32.mrb[10].mxu1 }
 0x1d2   :  { %v3384_v27 = vpop.f32.mrb[10].mxu0  ;;  %v1218_v23 = vpop.f32.mrb[11].mxu1 }
 0x1d3   :  { %v3763_v35 = vadd.f32 %v3384_v27, %v3160_v55  ;;  %v1995_v12 = vpop.f32.mrb[11].mxu0 }
 0x1d4   :  { %v3765_v45 = vadd.f32 %v1995_v12, %v1218_v23 }
 0x1d5   :  { %v3163_v56 = vpop.f32.mrb[12].mxu1 }
 0x1d6   :  { %v3387_v10 = vpop.f32.mrb[12].mxu0  ;;  %v1228_v31 = vpop.f32.mrb[13].mxu1 }
 0x1d7   :  { %v3767_v32 = vadd.f32 %v3387_v10, %v3163_v56  ;;  %v2005_v26 = vpop.f32.mrb[13].mxu0 }
 0x1d8   :  { %v3769_v8 = vadd.f32 %v2005_v26, %v1228_v31 }
 0x1d9   :  { %v3166_v29 = vpop.f32.mrb[14].mxu1 }
 0x1da   :  { %v3390_v57 = vpop.f32.mrb[14].mxu0  ;;  %v1238_v40 = vpop.f32.mrb[15].mxu1 }
 0x1db   :  { %v3771_v11 = vadd.f32 %v3390_v57, %v3166_v29  ;;  %v2015_v48 = vpop.f32.mrb[15].mxu0 }
 0x1dc   :  { %v3773_v63 = vadd.f32 %v2015_v48, %v1238_v40 }
 0x1dd   :  { %v3437_v51 = vpop.f32.mrb[16].mxu1 }
 0x1de   :  { %v3425_v44 = vpop.f32.mrb[0].mxu0  ;;  %v3760_v5 = vadd.f32 %v3759_v53, %v3437_v51  ;;  %v2179_v52 = vpop.f32.mrb[17].mxu1 }
 0x1df   :  { %v3751_v50 = vadd.f32 %v3425_v44, %v3145_v20  ;;  %v2139_v22 = vpop.f32.mrb[1].mxu0  ;;  %v3762_v21 = vadd.f32 %v3761_v37, %v2179_v52 }
 0x1e0   :  { %v3752_v47 = vadd.f32 %v2139_v22, %v1168_v3  ;;  %v5166_v7 = vadd.f32 %v3760_v5, %v5163_v61 }
 0x1e1   :  { %v3440_v2 = vpop.f32.mrb[18].mxu1  ;;  %v5169_v25 = vadd.f32 %v3751_v50, %v5163_v61  ;;  %v5180_v19 = vadd.f32 %v3762_v21, %v5163_v61 }
 0x1e2   :  { %v3428_v6 = vpop.f32.mrb[2].mxu0  ;;  %v3764_v16 = vadd.f32 %v3763_v35, %v3440_v2  ;;  %v2189_v17 = vpop.f32.mrb[19].mxu1  ;;  %v2266_v42 = vand.u32 2147483647, %v5166_v7  ;;  %v5173_v18 = vadd.f32 %v3752_v47, %v5163_v61 }
 0x1e3   :  { %v3753_v4 = vadd.f32 %v3428_v6, %v3148_v39  ;;  %v2149_v49 = vpop.f32.mrb[3].mxu0  ;;  %v3766_v46 = vadd.f32 %v3765_v45, %v2189_v17  ;;  %v2258_v28 = vand.u32 2147483647, %v5169_v25  ;;  %v2265_v36 = vand.u32 2147483647, %v5180_v19 }
 0x1e4   :  { %v3754_v58 = vadd.f32 %v2149_v49, %v1178_v15  ;;  %2291 = vmax.xlane.f32.xlu1 %v2266_v42  ;;  %v5183_v9 = vadd.f32 %v3764_v16, %v5163_v61  ;;  %v2257_v20 = vand.u32 2147483647, %v5173_v18 }
 0x1e5   :  { %v5177_v38 = vadd.f32 %v3753_v4, %v5163_v61  ;;  %2275 = vmax.xlane.f32.xlu0 %v2258_v28  ;;  %v3443_v0 = vpop.f32.mrb[20].mxu1  ;;  %v5189_v54 = vadd.f32 %v3766_v46, %v5163_v61 }
 0x1e6   :  { %v3431_v13 = vpop.f32.mrb[4].mxu0  ;;  %v3768_v43 = vadd.f32 %v3767_v32, %v3443_v0  ;;  %v2199_v33 = vpop.f32.mrb[21].mxu1 }
 0x1e7   :  { %v3755_v60 = vadd.f32 %v3431_v13, %v3151_v62  ;;  %v2159_v34 = vpop.f32.mrb[5].mxu0  ;;  %v3770_v24 = vadd.f32 %v3769_v8, %v2199_v33  ;;  %v2260_v3 = vand.u32 2147483647, %v5177_v38  ;;  %v5193_v62 = vadd.f32 %v3754_v58, %v5163_v61 }
 0x1e8   :  { %v3756_v39 = vadd.f32 %v2159_v34, %v5154_v59  ;;  %v2268_v59 = vand.u32 2147483647, %v5183_v9  ;;  %v2267_v56 = vand.u32 2147483647, %v5189_v54 }
 0x1e9   :  { %2273 = vmax.xlane.f32.xlu0 %v2257_v20  ;;  %2279 = vmax.xlane.f32.xlu1 %v2260_v3  ;;  %v3446_v15 = vpop.f32.mrb[22].mxu1  ;;  %v5199_v35 = vadd.f32 %v3755_v60, %v5163_v61  ;;  %v2259_v45 = vand.u32 2147483647, %v5193_v62  ;;  %v5210_v10 = vadd.f32 %v3770_v24, %v5163_v61 }
 0x1ea   :  { %v3434_v1 = vpop.f32.mrb[6].mxu0  ;;  %v3772_v14 = vadd.f32 %v3771_v11, %v3446_v15  ;;  %v2209_v53 = vpop.f32.mrb[23].mxu1  ;;  %v5202_v12 = vadd.f32 %v3756_v39, %v5163_v61 }
 0x1eb   :  { %v3757_v37 = vadd.f32 %v3434_v1, %v5156_v41  ;;  %v2169_v55 = vpop.f32.mrb[7].mxu0  ;;  %v3774_v27 = vadd.f32 %v3773_v63, %v2209_v53  ;;  %v5207_v41 = vadd.f32 %v3768_v43, %v5163_v61  ;;  %v2269_v29 = vand.u32 2147483647, %v5210_v10 }
 0x1ec   :  { %v3758_v23 = vadd.f32 %v2169_v55, %v5158_v30  ;;  %v2262_v30 = vand.u32 2147483647, %v5199_v35  ;;  %v2261_v31 = vand.u32 2147483647, %v5202_v12  ;;  %v5223_v57 = vadd.f32 %v3772_v14, %v5163_v61 }
 0x1ed   :  { %2289 = vmax.xlane.f32.xlu0 %v2265_v36  ;;  %2295 = vmax.xlane.f32.xlu1 %v2268_v59  ;;  %v5215_v32 = vadd.f32 %v3757_v37, %v5163_v61  ;;  %v2270_v8 = vand.u32 2147483647, %v5207_v41  ;;  %v5226_v40 = vadd.f32 %v3774_v27, %v5163_v61 }
 0x1ee   :  { %v5218_v26 = vadd.f32 %v3758_v23, %v5163_v61  ;;  %v2272_v63 = vand.u32 2147483647, %v5223_v57 }
 0x1ef   :  { %v2264_v11 = vand.u32 2147483647, %v5215_v32  ;;  %v2271_v51 = vand.u32 2147483647, %v5226_v40 }
 0x1f0   :  { %v2263_v48 = vand.u32 2147483647, %v5218_v26 }
 0x1f1   :  { %2277 = vmax.xlane.f32.xlu1 %v2259_v45  ;;  %2293 = vmax.xlane.f32.xlu0 %v2267_v56 }
 0x1f5   :  { %2283 = vmax.xlane.f32.xlu1 %v2262_v30  ;;  %2281 = vmax.xlane.f32.xlu0 %v2261_v31 }
 0x1f9   :  { %2299 = vmax.xlane.f32.xlu1 %v2270_v8  ;;  %2297 = vmax.xlane.f32.xlu0 %v2269_v29 }
 0x1fd   :  { %2287 = vmax.xlane.f32.xlu1 %v2264_v11  ;;  %2285 = vmax.xlane.f32.xlu0 %v2263_v48 }
 0x201   :  { %2303 = vmax.xlane.f32.xlu1 %v2272_v63  ;;  %2301 = vmax.xlane.f32.xlu0 %v2271_v51 }
 0x271   :  { %v2292_v44 = vpop.xlane.xlu1 %2291 }
 0x272   :  { %v2276_v5 = vpop.xlane.xlu0 %2275 }
 0x276   :  { %v2274_v52 = vpop.xlane.xlu0 %2273  ;;  %v2280_v50 = vpop.xlane.xlu1 %2279 }
 0x27a   :  { %v2290_v22 = vpop.xlane.xlu0 %2289  ;;  %v2296_v21 = vpop.xlane.xlu1 %2295 }
 0x27e   :  { %v2278_v61 = vpop.xlane.xlu1 %2277  ;;  %v2294_v47 = vpop.xlane.xlu0 %2293 }
 0x282   :  { %v2284_v2 = vpop.xlane.xlu1 %2283  ;;  %v2282_v6 = vpop.xlane.xlu0 %2281 }
 0x283   :  { %v2306_v16 = vmax.f32 %v2276_v5, %v2284_v2  ;;  %v2305_v17 = vmax.f32 %v2274_v52, %v2282_v6 }
 0x285   :  { %v2310_v49 = vmax.f32 %v2306_v16, %v2292_v44  ;;  %v2309_v46 = vmax.f32 %v2305_v17, %v2290_v22 }
 0x286   :  { %v2300_v42 = vpop.xlane.xlu1 %2299  ;;  %v2298_v4 = vpop.xlane.xlu0 %2297 }
 0x287   :  { %v2314_v43 = vmax.f32 %v2310_v49, %v2300_v42  ;;  %v2313_v33 = vmax.f32 %v2309_v46, %v2298_v4 }
 0x289   :  { %v2317_v15 = vmax.f32 %v2313_v33, %v2314_v43 }
 0x28a   :  { %v2288_v28 = vpop.xlane.xlu1 %2287  ;;  %v2286_v58 = vpop.xlane.xlu0 %2285 }
 0x28b   :  { %v2308_v0 = vmax.f32 %v2280_v50, %v2288_v28  ;;  %v2307_v13 = vmax.f32 %v2278_v61, %v2286_v58 }
 0x28d   :  { %v2312_v60 = vmax.f32 %v2308_v0, %v2296_v21  ;;  %v2311_v34 = vmax.f32 %v2307_v13, %v2294_v47 }
 0x28e   :  { %v2304_v24 = vpop.xlane.xlu1 %2303  ;;  %v2302_v20 = vpop.xlane.xlu0 %2301 }
 0x28f   :  { %v2316_v3 = vmax.f32 %v2312_v60, %v2304_v24  ;;  %v2315_v39 = vmax.f32 %v2311_v34, %v2302_v20 }
 0x291   :  { %v2318_v1 = vmax.f32 %v2315_v39, %v2316_v3 }
 0x293   :  { %v2319_v14 = vmax.f32 %v2317_v15, %v2318_v1 }
 0x295   :  { %v2320_v53 = vrot.slane %v2319_v14, 4 }
 0x297   :  { %v2321_v36 = vmax.f32 %v2319_v14, %v2320_v53 }
 0x299   :  { %v2322_v37 = vrot.slane %v2321_v36, 2 }
 0x29b   :  { %v2323_v55 = vmax.f32 %v2321_v36, %v2322_v37 }
 0x29d   :  { %v2324_v27 = vrot.slane %v2323_v55, 1 }
 0x29f   :  { %v2325_v59 = vmax.f32 %v2323_v55, %v2324_v27 }
 0x2a1   :  { %vm2326_vm2 = vcmp.gt.f32.partialorder %v2325_v59, 0.0  ;;  %v2327_v23 = vmul.f32 0.007874016, %v2325_v59 }
 0x2a3   :  { %v5232_v45 = vsel %vm2326_vm2, %v2327_v23, 1.0 }
 0x2a4   :  { %3937 = vrcp.f32 %v5232_v45 }
 0x2ae   :  { %v3938_v56 = vpop.eup %3937 }
 0x2af   :  { %v2330_v30 = vmul.f32 %v3938_v56, %v5173_v18  ;;  %v2331_v31 = vmul.f32 %v3938_v56, %v5169_v25  ;;  %v2332_v8 = vmul.f32 %v3938_v56, %v5193_v62  ;;  %v2333_v29 = vmul.f32 %v3938_v56, %v5177_v38 }
 0x2b0   :  { %v2334_v11 = vmul.f32 %v3938_v56, %v5202_v12  ;;  %v2335_v48 = vmul.f32 %v3938_v56, %v5199_v35  ;;  %v2336_v63 = vmul.f32 %v3938_v56, %v5218_v26  ;;  %v2337_v51 = vmul.f32 %v3938_v56, %v5215_v32 }
 0x2b1   :  { %v2338_v44 = vmul.f32 %v3938_v56, %v5180_v19  ;;  %v2339_v5 = vmul.f32 %v3938_v56, %v5166_v7  ;;  %v2340_v18 = vmul.f32 %v3938_v56, %v5189_v54  ;;  %v2341_v25 = vmul.f32 %v3938_v56, %v5183_v9 }
 0x2b2   :  { %v2342_v62 = vmul.f32 %v3938_v56, %v5210_v10  ;;  %v2343_v38 = vmul.f32 %v3938_v56, %v5207_v41  ;;  %v2344_v12 = vmul.f32 %v3938_v56, %v5226_v40  ;;  %v2345_v35 = vmul.f32 %v3938_v56, %v5223_v57 }
 0x2b3   :  { %v3919_v52 = vround.rtne.f32 %v2330_v30  ;;  %v3920_v26 = vround.rtne.f32 %v2331_v31  ;;  %v3921_v50 = vround.rtne.f32 %v2332_v8  ;;  %v3922_v32 = vround.rtne.f32 %v2333_v29 }
 0x2b4   :  { %v3923_v22 = vround.rtne.f32 %v2334_v11  ;;  %v3924_v19 = vround.rtne.f32 %v2335_v48  ;;  %v3925_v21 = vround.rtne.f32 %v2336_v63  ;;  %v3926_v7 = vround.rtne.f32 %v2337_v51 }
 0x2b5   :  { %v3927_v61 = vround.rtne.f32 %v2338_v44  ;;  %v3928_v54 = vround.rtne.f32 %v2339_v5  ;;  %v3929_v47 = vround.rtne.f32 %v2340_v18  ;;  %v3930_v9 = vround.rtne.f32 %v2341_v25 }
 0x2b6   :  { %v3931_v2 = vround.rtne.f32 %v2342_v62  ;;  %v3932_v10 = vround.rtne.f32 %v2343_v38  ;;  %v3933_v6 = vround.rtne.f32 %v2344_v12  ;;  %v3934_v41 = vround.rtne.f32 %v2345_v35 }
 0x2b7   :  { %v2362_v16 = vmax.f32 %v3919_v52, -128.0  ;;  %v2363_v40 = vmax.f32 %v3920_v26, -128.0  ;;  %v2364_v17 = vmax.f32 %v3921_v50, -128.0  ;;  %v2365_v57 = vmax.f32 %v3922_v32, -128.0 }
 0x2b8   :  { %v2366_v42 = vmax.f32 %v3923_v22, -128.0  ;;  %v2367_v4 = vmax.f32 %v3924_v19, -128.0  ;;  %v2368_v49 = vmax.f32 %v3925_v21, -128.0  ;;  %v2369_v46 = vmax.f32 %v3926_v7, -128.0 }
 0x2b9   :  { %v2370_v28 = vmax.f32 %v3927_v61, -128.0  ;;  %v2371_v58 = vmax.f32 %v3928_v54, -128.0  ;;  %v2372_v0 = vmax.f32 %v3929_v47, -128.0  ;;  %v2373_v13 = vmax.f32 %v3930_v9, -128.0 }
 0x2ba   :  { %v2374_v43 = vmax.f32 %v3931_v2, -128.0  ;;  %v2375_v33 = vmax.f32 %v3932_v10, -128.0  ;;  %v2376_v60 = vmax.f32 %v3933_v6, -128.0  ;;  %v2377_v34 = vmax.f32 %v3934_v41, -128.0 }
 0x2bb   :  { %v2378_v24 = vmin.f32 %v2362_v16, 127.0  ;;  %v2379_v20 = vmin.f32 %v2363_v40, 127.0  ;;  %v2380_v3 = vmin.f32 %v2364_v17, 127.0  ;;  %v2381_v39 = vmin.f32 %v2365_v57, 127.0 }
 0x2bc   :  { %v2382_v15 = vmin.f32 %v2366_v42, 127.0  ;;  %v2383_v1 = vmin.f32 %v2367_v4, 127.0  ;;  %v2384_v14 = vmin.f32 %v2368_v49, 127.0  ;;  %v2385_v53 = vmin.f32 %v2369_v46, 127.0 }
 0x2bd   :  { %v2386_v36 = vmin.f32 %v2370_v28, 127.0  ;;  %v2387_v37 = vmin.f32 %v2371_v58, 127.0  ;;  %v2388_v55 = vmin.f32 %v2372_v0, 127.0  ;;  %v2389_v27 = vmin.f32 %v2373_v13, 127.0 }
 0x2be   :  { %v2390_v59 = vmin.f32 %v2374_v43, 127.0  ;;  %v2391_v23 = vmin.f32 %v2375_v33, 127.0  ;;  %v2392_v56 = vmin.f32 %v2376_v60, 127.0  ;;  %v2393_v30 = vmin.f32 %v2377_v34, 127.0 }
 0x2bf   :  { %v2394_v31 = vmul.f32 %v2378_v24, %v5232_v45  ;;  %v2395_v8 = vmul.f32 %v2379_v20, %v5232_v45  ;;  %v2396_v29 = vmul.f32 %v2380_v3, %v5232_v45  ;;  %v2397_v11 = vmul.f32 %v2381_v39, %v5232_v45 }
 0x2c0   :  { %v2398_v48 = vmul.f32 %v2382_v15, %v5232_v45  ;;  %v2399_v63 = vmul.f32 %v2383_v1, %v5232_v45  ;;  %v2400_v51 = vmul.f32 %v2384_v14, %v5232_v45  ;;  %v2401_v44 = vmul.f32 %v2385_v53, %v5232_v45 }
 0x2c1   :  { %v2402_v5 = vmul.f32 %v2386_v36, %v5232_v45  ;;  %v2403_v18 = vmul.f32 %v2387_v37, %v5232_v45  ;;  %v2404_v25 = vmul.f32 %v2388_v55, %v5232_v45  ;;  %v2405_v62 = vmul.f32 %v2389_v27, %v5232_v45 }
 0x2c2   :  { %v2406_v38 = vmul.f32 %v2390_v59, %v5232_v45  ;;  %v2407_v12 = vmul.f32 %v2391_v23, %v5232_v45  ;;  %v2408_v35 = vmul.f32 %v2392_v56, %v5232_v45  ;;  %v2409_v52 = vmul.f32 %v2393_v30, %v5232_v45 }
 0x2c3   :  { %v2410_v26 = vmax.f32 %v2394_v31, 0.0  ;;  %v2411_v50 = vmax.f32 %v2395_v8, 0.0  ;;  %v2412_v32 = vmax.f32 %v2396_v29, 0.0  ;;  %v2413_v22 = vmax.f32 %v2397_v11, 0.0 }
 0x2c4   :  { %v2414_v19 = vmax.f32 %v2398_v48, 0.0  ;;  %v2415_v21 = vmax.f32 %v2399_v63, 0.0  ;;  %v2416_v7 = vmax.f32 %v2400_v51, 0.0  ;;  %v2417_v61 = vmax.f32 %v2401_v44, 0.0 }
 0x2c5   :  { %v2418_v54 = vmax.f32 %v2402_v5, 0.0  ;;  %v2419_v47 = vmax.f32 %v2403_v18, 0.0  ;;  %v2420_v9 = vmax.f32 %v2404_v25, 0.0  ;;  %v2421_v2 = vmax.f32 %v2405_v62, 0.0 }
 0x2c6   :  { %v2422_v10 = vmax.f32 %v2406_v38, 0.0  ;;  %v2423_v6 = vmax.f32 %v2407_v12, 0.0  ;;  %v2424_v41 = vmax.f32 %v2408_v35, 0.0  ;;  %v2425_v16 = vmax.f32 %v2409_v52, 0.0 }
 0x2c7   :  { %v2459_v40 = vmax.f32 %v2410_v26, %v2411_v50  ;;  %v2460_v17 = vmax.f32 %v2412_v32, %v2413_v22  ;;  %v2461_v57 = vmax.f32 %v2414_v19, %v2415_v21  ;;  %v2462_v45 = vmax.f32 %v2416_v7, %v2417_v61 }
 0x2c8   :  { %v2463_v42 = vmax.f32 %v2418_v54, %v2419_v47  ;;  %v2464_v4 = vmax.f32 %v2420_v9, %v2421_v2  ;;  %v2465_v49 = vmax.f32 %v2422_v10, %v2423_v6  ;;  %v2466_v46 = vmax.f32 %v2424_v41, %v2425_v16 }
 0x2c9   :  { %2467 = vst [vmem:[#allocation4] sm:$0xff] %v2459_v40  ;;  %2468 = vst [vmem:[#allocation4 + $0x8] sm:$0xff] %v2460_v17 }
 0x2ca   :  { %2469 = vst [vmem:[#allocation4 + $0x10] sm:$0xff] %v2461_v57  ;;  %2470 = vst [vmem:[#allocation4 + $0x18] sm:$0xff] %v2462_v45 }
 0x2cb   :  { %2471 = vst [vmem:[#allocation4 + $0x20] sm:$0xff] %v2463_v42  ;;  %2472 = vst [vmem:[#allocation4 + $0x28] sm:$0xff] %v2464_v4 }
 0x2cc   :  { %2473 = vst [vmem:[#allocation4 + $0x30] sm:$0xff] %v2465_v49  ;;  %2474 = vst [vmem:[#allocation4 + $0x38] sm:$0xff] %v2466_v46 }
 0x2d0   :  { %v2475_v28 = vld [vmem:[#allocation4] ss:$2 sm:$0xf]  ;;  %v2477_v58 = vld [vmem:[#allocation4 + $0x8] ss:$2 sm:$0xf] }
 0x2d1   :  { %v2479_v0 = vld [vmem:[#allocation4 + $0x10] ss:$2 sm:$0xf]  ;;  %v2481_v13 = vld [vmem:[#allocation4 + $0x18] ss:$2 sm:$0xf] }
 0x2d2   :  { %v2483_v43 = vld [vmem:[#allocation4 + $0x20] ss:$2 sm:$0xf]  ;;  %v2485_v33 = vld [vmem:[#allocation4 + $0x28] ss:$2 sm:$0xf] }
 0x2d3   :  { %v2487_v60 = vld [vmem:[#allocation4 + $0x30] ss:$2 sm:$0xf]  ;;  %v2489_v34 = vld [vmem:[#allocation4 + $0x38] ss:$2 sm:$0xf] }
 0x2d4   :  { %v2491_v24 = vld [vmem:[#allocation4 + $0x1] ss:$2 sm:$0xf]  ;;  %v2493_v20 = vld [vmem:[#allocation4 + $0x9] ss:$2 sm:$0xf] }
 0x2d5   :  { %v2495_v3 = vld [vmem:[#allocation4 + $0x11] ss:$2 sm:$0xf]  ;;  %v2497_v39 = vld [vmem:[#allocation4 + $0x19] ss:$2 sm:$0xf]  ;;  %v2506_v15 = vmax.f32 %v2475_v28, %v2491_v24  ;;  %v2507_v1 = vmax.f32 %v2477_v58, %v2493_v20 }
 0x2d6   :  { %v2499_v14 = vld [vmem:[#allocation4 + $0x21] ss:$2 sm:$0xf]  ;;  %v2501_v53 = vld [vmem:[#allocation4 + $0x29] ss:$2 sm:$0xf]  ;;  %v2508_v36 = vmax.f32 %v2479_v0, %v2495_v3  ;;  %v2509_v37 = vmax.f32 %v2481_v13, %v2497_v39 }
 0x2d7   :  { %v2503_v55 = vld [vmem:[#allocation4 + $0x31] ss:$2 sm:$0xf]  ;;  %v2505_v27 = vld [vmem:[#allocation4 + $0x39] ss:$2 sm:$0xf]  ;;  %v2510_v59 = vmax.f32 %v2483_v43, %v2499_v14  ;;  %v2511_v23 = vmax.f32 %v2485_v33, %v2501_v53 }
 0x2d8   :  { %2514 = vst [vmem:[%s5294_s3] sm:$0xf] %v2506_v15  ;;  %2515 = vst [vmem:[%s5294_s3 + $0x4] sm:$0xf] %v2507_v1  ;;  %v2512_v56 = vmax.f32 %v2487_v60, %v2503_v55  ;;  %v2513_v30 = vmax.f32 %v2489_v34, %v2505_v27 }
 0x2d9   :  { %2516 = vst [vmem:[%s5294_s3 + $0x8] sm:$0xf] %v2508_v36  ;;  %2517 = vst [vmem:[%s5294_s3 + $0xc] sm:$0xf] %v2509_v37 }
 0x2da   :  { %2518 = vst [vmem:[%s5294_s3 + $0x10] sm:$0xf] %v2510_v59  ;;  %2519 = vst [vmem:[%s5294_s3 + $0x14] sm:$0xf] %v2511_v23 }
 0x2db   :  { %2520 = vst [vmem:[%s5294_s3 + $0x18] sm:$0xf] %v2512_v56  ;;  %2521 = vst [vmem:[%s5294_s3 + $0x1c] sm:$0xf] %v2513_v30 }

// kernel: quantization_aware_vgg_forward.3
= control target key start
LH: loop header
LB: loop body
LE: loop exit
PB: predicated region body
PF: predicated region fallthrough
CT: control target
= control target key end

     0   :  { %vm231_vm0 = vcmask 1041408   ;;  %s14060_s1 = inlined_call_operand.vmem [shape: f32[9,128,128], index: 1, kind: input, shape index: {}]   ;;  %s14061_s0 = inlined_call_operand.vmem [shape: f32[2,18,18,128], index: 0, kind: input, shape index: {}]   ;;  %s14062_s2 = inlined_call_operand.vmem [shape: f32[1,128], index: 2, kind: input, shape index: {}]   ;;  %s14063_s3 = inlined_call_operand.vmem [shape: f32[16,8,128], index: 3, kind: output, shape index: {}]  }
   0x1   :  { %v6946_v0 = vld [vmem:[%s14060_s1 + $0x200] sm:$0xff]  ;;  %v6947_v1 = vld [vmem:[%s14060_s1 + $0x208] sm:$0xff]  ;;  %v6948_v5 = vld [vmem:[%s14060_s1 + $0x210] sm:$0xff] }
   0x2   :  { %v6898_v2 = vld [vmem:[%s14060_s1 + $0x80] sm:$0xff]  ;;  %v10034_v3 = vpack.c.bf16 %v6947_v1, %v6946_v0  ;;  %v6899_v4 = vld [vmem:[%s14060_s1 + $0x88] sm:$0xff]  ;;  %v6949_v6 = vld [vmem:[%s14060_s1 + $0x218] sm:$0xff] }
   0x3   :  { %v8899_v7 = vpack.c.bf16 %v6899_v4, %v6898_v2  ;;  %v10045_v8 = vpack.c.bf16 %v6949_v6, %v6948_v5  ;;  %v6900_v9 = vld [vmem:[%s14060_s1 + $0x90] sm:$0xff]  ;;  %v6901_v10 = vld [vmem:[%s14060_s1 + $0x98] sm:$0xff]  ;;  %v6950_v11 = vld [vmem:[%s14060_s1 + $0x220] sm:$0xff] }
   0x4   :  { %14241 = vst [vmem:[#allocation5_spill] sm:$0xff] %v10034_v3  ;;  %9028 = vmatprep.subr.bf16.mxu0 %v10034_v3  ;;  %v8903_v12 = vpack.c.bf16 %v6901_v10, %v6900_v9  ;;  %v6951_v13 = vld [vmem:[%s14060_s1 + $0x228] sm:$0xff]  ;;  %v6902_v14 = vld [vmem:[%s14060_s1 + $0xa0] sm:$0xff]  ;;  %v6952_v18 = vld [vmem:[%s14060_s1 + $0x230] sm:$0xff] }
   0x5   :  { %14242 = vst [vmem:[#allocation6_spill] sm:$0xff] %v10045_v8  ;;  %v6903_v15 = vld [vmem:[%s14060_s1 + $0xa8] sm:$0xff]  ;;  %8900 = vmatprep.subr.bf16.mxu1 %v8899_v7  ;;  %9030 = vmatpush3.bf16.msra.mxu0 %v10034_v3  ;;  %v10068_v16 = vpack.c.bf16 %v6951_v13, %v6950_v11  ;;  %v6953_v19 = vld [vmem:[%s14060_s1 + $0x238] sm:$0xff]  ;;  %v6904_v20 = vld [vmem:[%s14060_s1 + $0xb0] sm:$0xff] }
   0x6   :  { %8902 = vmatpush3.bf16.msra.mxu1 %v8899_v7  ;;  %9032 = vmatprep.subr.bf16.mxu0 %v10045_v8  ;;  %v8907_v17 = vpack.c.bf16 %v6903_v15, %v6902_v14  ;;  %v6905_v21 = vld [vmem:[%s14060_s1 + $0xb8] sm:$0xff]  ;;  %v10084_v22 = vpack.c.bf16 %v6953_v19, %v6952_v18  ;;  %v6954_v24 = vld [vmem:[%s14060_s1 + $0x240] sm:$0xff]  ;;  %v6955_v25 = vld [vmem:[%s14060_s1 + $0x248] sm:$0xff] }
   0x7   :  { %14243 = vst [vmem:[#allocation7_spill] sm:$0xff] %v10068_v16  ;;  %8904 = vmatprep.subr.bf16.mxu1 %v8903_v12  ;;  %v8911_v23 = vpack.c.bf16 %v6905_v21, %v6904_v20  ;;  %v6906_v26 = vld [vmem:[%s14060_s1 + $0xc0] sm:$0xff]  ;;  %v6907_v27 = vld [vmem:[%s14060_s1 + $0xc8] sm:$0xff]  ;;  %v10100_v28 = vpack.c.bf16 %v6955_v25, %v6954_v24  ;;  %v6956_v30 = vld [vmem:[%s14060_s1 + $0x250] sm:$0xff] }
   0x8   :  { %14244 = vst [vmem:[#allocation8_spill] sm:$0xff] %v10084_v22  ;;  %v8915_v29 = vpack.c.bf16 %v6907_v27, %v6906_v26  ;;  %v6957_v31 = vld [vmem:[%s14060_s1 + $0x258] sm:$0xff]  ;;  %v6908_v32 = vld [vmem:[%s14060_s1 + $0xd0] sm:$0xff]  ;;  %v6958_v36 = vld [vmem:[%s14060_s1 + $0x260] sm:$0xff] }
   0x9   :  { %9034 = vmatpush3.bf16.msra.mxu0 %v10045_v8  ;;  %14245 = vst [vmem:[#allocation9_spill] sm:$0xff] %v10100_v28  ;;  %v6909_v33 = vld [vmem:[%s14060_s1 + $0xd8] sm:$0xff]  ;;  %v10116_v34 = vpack.c.bf16 %v6957_v31, %v6956_v30  ;;  %v6959_v37 = vld [vmem:[%s14060_s1 + $0x268] sm:$0xff]  ;;  %v6910_v38 = vld [vmem:[%s14060_s1 + $0xe0] sm:$0xff] }
   0xa   :  { %8906 = vmatpush3.bf16.msra.mxu1 %v8903_v12  ;;  %9036 = vmatprep.subr.bf16.mxu0 %v10068_v16  ;;  %v8919_v35 = vpack.c.bf16 %v6909_v33, %v6908_v32  ;;  %v6911_v39 = vld [vmem:[%s14060_s1 + $0xe8] sm:$0xff]  ;;  %v10132_v40 = vpack.c.bf16 %v6959_v37, %v6958_v36  ;;  %v6960_v42 = vld [vmem:[%s14060_s1 + $0x270] sm:$0xff]  ;;  %v6961_v43 = vld [vmem:[%s14060_s1 + $0x278] sm:$0xff] }
   0xb   :  { %8908 = vmatprep.subr.bf16.mxu1 %v8907_v17  ;;  %14246 = vst [vmem:[#allocation10_spill] sm:$0xff] %v10116_v34  ;;  %v8923_v41 = vpack.c.bf16 %v6911_v39, %v6910_v38  ;;  %v6912_v44 = vld [vmem:[%s14060_s1 + $0xf0] sm:$0xff]  ;;  %v6913_v45 = vld [vmem:[%s14060_s1 + $0xf8] sm:$0xff]  ;;  %v10148_v46 = vpack.c.bf16 %v6961_v43, %v6960_v42  ;;  %v14_v48 = vld [vmem:[%s14061_s0] sm:$0xff] }
   0xc   :  { %14247 = vst [vmem:[#allocation11_spill] sm:$0xff] %v10132_v40  ;;  %v8927_v47 = vpack.c.bf16 %v6913_v45, %v6912_v44  ;;  %v15_v49 = vld [vmem:[%s14061_s0 + $0x8] sm:$0xff]  ;;  %v10162_v50 = vld [vmem:[%s14061_s0 + $0x10] sm:$0x3]  ;;  %v17_v51 = vld [vmem:[%s14061_s0 + $0x18] sm:$0xff] }
   0xd   :  { %9038 = vmatpush3.bf16.msra.mxu0 %v10068_v16  ;;  %14248 = vst [vmem:[#allocation12_spill] sm:$0xff] %v10148_v46  ;;  %v122_v52 = vand.u32 2147483647, %v14_v48  ;;  %v18_v53 = vld [vmem:[%s14061_s0 + $0x20] sm:$0xff]  ;;  %v10173_v54 = vld [vmem:[%s14061_s0 + $0x28] sm:$0x3] }
   0xe   :  { %8910 = vmatpush3.bf16.msra.mxu1 %v8907_v17  ;;  %9040 = vmatprep.subr.bf16.mxu0 %v10084_v22  ;;  %v20_v55 = vld [vmem:[%s14061_s0 + $0x30] sm:$0xff]  ;;  %v123_v56 = vand.u32 2147483647, %v15_v49  ;;  %v21_v57 = vld [vmem:[%s14061_s0 + $0x38] sm:$0xff]  ;;  %v10184_v58 = vld [vmem:[%s14061_s0 + $0x40] sm:$0x3] }
   0xf   :  { %8912 = vmatprep.subr.bf16.mxu1 %v8911_v23  ;;  %v23_v59 = vld [vmem:[%s14061_s0 + $0x48] sm:$0xff]  ;;  %v124_v60 = vand.u32 2147483647, %v10162_v50  ;;  %v24_v61 = vld [vmem:[%s14061_s0 + $0x50] sm:$0xff]  ;;  %v10196_v62 = vld [vmem:[%s14061_s0 + $0x58] sm:$0x3] }
  0x10   :  { %v26_v63 = vld [vmem:[%s14061_s0 + $0x60] sm:$0xff]  ;;  %v125_v0 = vand.u32 2147483647, %v17_v51  ;;  %v27_v1 = vld [vmem:[%s14061_s0 + $0x68] sm:$0xff]  ;;  %v10207_v2 = vld [vmem:[%s14061_s0 + $0x70] sm:$0x3]  ;;  %v10292_v37 = vmax.f32.f32 %v122_v52, %v123_v56 }
  0x11   :  { %9042 = vmatpush3.bf16.msra.mxu0 %v10084_v22  ;;  %v10212_v4 = vld [vmem:[%s14061_s0 + $0x78] sm:$0xff]  ;;  %v126_v5 = vand.u32 2147483647, %v18_v53  ;;  %v30_v6 = vld [vmem:[%s14061_s0 + $0x80] sm:$0xff]  ;;  %v10220_v7 = vld [vmem:[%s14061_s0 + $0x88] sm:$0x3] }
  0x12   :  { %8914 = vmatpush3.bf16.msra.mxu1 %v8911_v23  ;;  %9044 = vmatprep.subr.bf16.mxu0 %v10100_v28  ;;  %v10225_v9 = vld [vmem:[%s14061_s0 + $0x90] sm:$0xff]  ;;  %v10231_v11 = vld [vmem:[%s14061_s0 + $0x98] sm:$0xff]  ;;  %v10236_v12 = vld [vmem:[%s14061_s0 + $0xa0] sm:$0x3]  ;;  %v128_v14 = vand.u32 2147483647, %v20_v55 }
  0x13   :  { %8916 = vmatprep.subr.bf16.mxu1 %v8915_v29  ;;  %v10241_v13 = vld [vmem:[%s14061_s0 + $0xa8] sm:$0xff]  ;;  %v10246_v15 = vld [vmem:[%s14061_s0 + $0xb0] sm:$0xff]  ;;  %v10251_v17 = vld [vmem:[%s14061_s0 + $0xb8] sm:$0x3]  ;;  %v129_v19 = vand.u32 2147483647, %v21_v57  ;;  %v10311_v45 = vmax.f32.f32 %v125_v0, %v126_v5 }
  0x14   :  { %v10256_v18 = vld [vmem:[%s14061_s0 + $0xc0] sm:$0xff]  ;;  %v131_v21 = vand.u32 2147483647, %v23_v59  ;;  %v10262_v23 = vld [vmem:[%s14061_s0 + $0xc8] sm:$0xff]  ;;  %v10267_v24 = vld [vmem:[%s14061_s0 + $0xd0] sm:$0x3] }
  0x15   :  { %9046 = vmatpush3.bf16.msra.mxu0 %v10100_v28  ;;  %v10272_v25 = vld [vmem:[%s14061_s0 + $0xd8] sm:$0xff]  ;;  %v132_v26 = vand.u32 2147483647, %v24_v61  ;;  %v10278_v30 = vld [vmem:[%s14061_s0 + $0xe0] sm:$0xff]  ;;  %v10283_v31 = vld [vmem:[%s14061_s0 + $0xe8] sm:$0x3]  ;;  %v10326_v53 = vmax.f32.f32 %v128_v14, %v129_v19 }
  0x16   :  { %8918 = vmatpush3.bf16.msra.mxu1 %v8915_v29  ;;  %9048 = vmatprep.subr.bf16.mxu0 %v10116_v34  ;;  %v134_v29 = vand.u32 2147483647, %v26_v63  ;;  %v10288_v32 = vld [vmem:[%s14061_s0 + $0xf0] sm:$0xff]  ;;  %v135_v33 = vand.u32 2147483647, %v27_v1  ;;  %v10297_v38 = vld [vmem:[%s14061_s0 + $0xf8] sm:$0xff] }
  0x17   :  { %8920 = vmatprep.subr.bf16.mxu1 %v8919_v35  ;;  %v137_v36 = vand.u32 2147483647, %v10212_v4  ;;  %v10302_v39 = vld [vmem:[%s14061_s0 + $0x100] sm:$0x3]  ;;  %v138_v42 = vand.u32 2147483647, %v30_v6  ;;  %v10346_v0 = vmax.f32.f32 %v131_v21, %v132_v26 }
  0x18   :  { %v140_v44 = vand.u32 2147483647, %v10225_v9  ;;  %v10321_v48 = vld [vmem:[%s14061_s0 + $0x118] sm:$0x3]  ;;  %v141_v49 = vand.u32 2147483647, %v10231_v11 }
  0x19   :  { %9050 = vmatpush3.bf16.msra.mxu0 %v10116_v34  ;;  %v143_v52 = vand.u32 2147483647, %v10241_v13  ;;  %v10331_v55 = vld [vmem:[%s14061_s0 + $0x120] sm:$0xff]  ;;  %v10336_v56 = vld [vmem:[%s14061_s0 + $0x128] sm:$0xff]  ;;  %v10341_v57 = vld [vmem:[%s14061_s0 + $0x130] sm:$0x3]  ;;  %v10366_v13 = vmax.f32.f32 %v134_v29, %v135_v33 }
  0x1a   :  { %8922 = vmatpush3.bf16.msra.mxu1 %v8919_v35  ;;  %9052 = vmatprep.subr.bf16.mxu0 %v10132_v40  ;;  %v144_v59 = vand.u32 2147483647, %v10246_v15  ;;  %v146_v63 = vand.u32 2147483647, %v10256_v18  ;;  %v10351_v1 = vld [vmem:[%s14061_s0 + $0x138] sm:$0xff]  ;;  %v10356_v4 = vld [vmem:[%s14061_s0 + $0x140] sm:$0xff] }
  0x1b   :  { %8924 = vmatprep.subr.bf16.mxu1 %v8923_v41  ;;  %v10361_v5 = vld [vmem:[%s14061_s0 + $0x148] sm:$0x3]  ;;  %v147_v6 = vand.u32 2147483647, %v10262_v23  ;;  %v149_v11 = vand.u32 2147483647, %v10272_v25  ;;  %v10386_v25 = vmax.f32.f32 %v137_v36, %v138_v42  ;;  %v10406_v42 = vmax.f32.f32 %v140_v44, %v141_v49 }
  0x1c   :  { %v10371_v14 = vld [vmem:[%s14061_s0 + $0x150] sm:$0xff]  ;;  %v10376_v15 = vld [vmem:[%s14061_s0 + $0x158] sm:$0xff]  ;;  %v10381_v18 = vld [vmem:[%s14061_s0 + $0x160] sm:$0x3]  ;;  %v150_v19 = vand.u32 2147483647, %v10278_v30  ;;  %v10428_v49 = vmax.f32.f32 %v143_v52, %v144_v59 }
  0x1d   :  { %9054 = vmatpush3.bf16.msra.mxu0 %v10132_v40  ;;  %14249 = vst [vmem:[#allocation13_spill] sm:$0xff] %v10381_v18  ;;  %v152_v23 = vand.u32 2147483647, %v10288_v32  ;;  %v10391_v26 = vld [vmem:[%s14061_s0 + $0x168] sm:$0xff]  ;;  %v10396_v29 = vld [vmem:[%s14061_s0 + $0x170] sm:$0xff]  ;;  %v10411_v21 = vld [vmem:[%s14061_s0 + $0x180] sm:$0xff]  ;;  %v10448_v59 = vmax.f32.f32 %v146_v63, %v147_v6 }
  0x1e   :  { %8926 = vmatpush3.bf16.msra.mxu1 %v8923_v41  ;;  %9056 = vmatprep.subr.bf16.mxu0 %v10148_v46  ;;  %v10307_v41 = vld [vmem:[%s14061_s0 + $0x108] sm:$0xff]  ;;  %v10401_v30 = vld [vmem:[%s14061_s0 + $0x178] sm:$0x3]  ;;  %v153_v33 = vand.u32 2147483647, %v10297_v38  ;;  %v232_v44 = vsel %vm231_vm0, %v124_v60, -inf  ;;  %v10468_v52 = vmax.f32.f32 %v149_v11, %v150_v19 }
  0x1f   :  { %8928 = vmatprep.subr.bf16.mxu1 %v8927_v47  ;;  %14250 = vst [vmem:[#allocation14_spill] sm:$0xff] %v10401_v30  ;;  %v155_v36 = vand.u32 2147483647, %v10307_v41  ;;  %v10416_v9 = vld [vmem:[%s14061_s0 + $0x188] sm:$0xff]  ;;  %v10421_v38 = vld [vmem:[%s14061_s0 + $0x190] sm:$0x3]  ;;  %v10509_v19 = vmax.f32 %v10292_v37, %v232_v44 }
  0x20   :  { %14251 = vst [vmem:[#allocation15_spill] sm:$0xff] %v10421_v38  ;;  %v10433_v27 = vld [vmem:[%s14061_s0 + $0x198] sm:$0xff]  ;;  %v10438_v61 = vld [vmem:[%s14061_s0 + $0x1a0] sm:$0xff]  ;;  %v158_v50 = vand.u32 2147483647, %v10331_v55  ;;  %v10453_v41 = vld [vmem:[%s14061_s0 + $0x1b0] sm:$0xff]  ;;  %v10488_v6 = vmax.f32.f32 %v152_v23, %v153_v33 }
  0x21   :  { %9058 = vmatpush3.bf16.msra.mxu0 %v10148_v46  ;;  %v159_v60 = vand.u32 2147483647, %v10336_v56  ;;  %v10458_v20 = vld [vmem:[%s14061_s0 + $0x1b8] sm:$0xff]  ;;  %v10463_v55 = vld [vmem:[%s14061_s0 + $0x1c0] sm:$0x3]  ;;  %v10473_v51 = vld [vmem:[%s14061_s0 + $0x1c8] sm:$0xff] }
  0x22   :  { %8930 = vmatpush3.bf16.msra.mxu1 %v8927_v47  ;;  %v10316_v47 = vld [vmem:[%s14061_s0 + $0x110] sm:$0xff]  ;;  %14253 = vst [vmem:[#allocation17_spill] sm:$0xff] %v10463_v55  ;;  %v161_v56 = vand.u32 2147483647, %v10351_v1  ;;  %v162_v63 = vand.u32 2147483647, %v10356_v4 }
  0x23   :  { %v156_v32 = vand.u32 2147483647, %v10316_v47  ;;  %v10443_v47 = vld [vmem:[%s14061_s0 + $0x1a8] sm:$0x3]  ;;  %v10478_v43 = vld [vmem:[%s14061_s0 + $0x1d0] sm:$0xff]  ;;  %v10493_v10 = vld [vmem:[%s14061_s0 + $0x1e0] sm:$0xff]  ;;  %v10549_v44 = vmax.f32.f32 %v158_v50, %v159_v60 }
  0x24   :  { %14252 = vst [vmem:[#allocation16_spill] sm:$0xff] %v10443_v47  ;;  %v10483_v1 = vld [vmem:[%s14061_s0 + $0x1d8] sm:$0x3]  ;;  %v164_v4 = vand.u32 2147483647, %v10371_v14  ;;  %v10498_v35 = vld [vmem:[%s14061_s0 + $0x1e8] sm:$0xff] }
  0x25   :  { %14254 = vst [vmem:[#allocation18_spill] sm:$0xff] %v10483_v1  ;;  %v165_v11 = vand.u32 2147483647, %v10376_v15  ;;  %v10503_v14 = vld [vmem:[%s14061_s0 + $0x1f0] sm:$0x3]  ;;  %v10514_v46 = vld [vmem:[%s14061_s0 + $0x1f8] sm:$0xff]  ;;  %v10529_v33 = vmax.f32.f32 %v155_v36, %v156_v32  ;;  %v10569_v36 = vmax.f32.f32 %v161_v56, %v162_v63 }
  0x26   :  { %14255 = vst [vmem:[#allocation19_spill] sm:$0xff] %v10503_v14  ;;  %v167_v15 = vand.u32 2147483647, %v10391_v26  ;;  %v168_v23 = vand.u32 2147483647, %v10396_v29  ;;  %v10519_v40 = vld [vmem:[%s14061_s0 + $0x200] sm:$0xff] }
  0x27   :  { %v10524_v26 = vld [vmem:[%s14061_s0 + $0x208] sm:$0x3]  ;;  %v170_v29 = vand.u32 2147483647, %v10411_v21  ;;  %v171_v37 = vand.u32 2147483647, %v10416_v9  ;;  %v10589_v60 = vmax.f32.f32 %v164_v4, %v165_v11 }
  0x28   :  { %14256 = vst [vmem:[#allocation20_spill] sm:$0xff] %v10524_v26  ;;  %v10534_v34 = vld [vmem:[%s14061_s0 + $0x210] sm:$0xff]  ;;  %v10539_v28 = vld [vmem:[%s14061_s0 + $0x218] sm:$0xff]  ;;  %v10544_v21 = vld [vmem:[%s14061_s0 + $0x220] sm:$0x3]  ;;  %v10609_v63 = vmax.f32.f32 %v167_v15, %v168_v23 }
  0x29   :  { %14257 = vst [vmem:[#allocation21_spill] sm:$0xff] %v10544_v21  ;;  %v173_v9 = vand.u32 2147483647, %v10433_v27  ;;  %v174_v32 = vand.u32 2147483647, %v10438_v61  ;;  %v10554_v22 = vld [vmem:[%s14061_s0 + $0x228] sm:$0xff]  ;;  %v10627_v23 = vmax.f32.f32 %v170_v29, %v171_v37 }
  0x2a   :  { %v10559_v16 = vld [vmem:[%s14061_s0 + $0x230] sm:$0xff]  ;;  %v10564_v27 = vld [vmem:[%s14061_s0 + $0x238] sm:$0x3]  ;;  %v176_v61 = vand.u32 2147483647, %v10453_v41  ;;  %v10574_v8 = vld [vmem:[%s14061_s0 + $0x240] sm:$0xff] }
  0x2b   :  { %14258 = vst [vmem:[#allocation22_spill] sm:$0xff] %v10564_v27  ;;  %v177_v50 = vand.u32 2147483647, %v10458_v20  ;;  %v10579_v3 = vld [vmem:[%s14061_s0 + $0x248] sm:$0xff]  ;;  %v10584_v41 = vld [vmem:[%s14061_s0 + $0x250] sm:$0x3]  ;;  %v10641_v29 = vmax.f32.f32 %v173_v9, %v174_v32 }
  0x2c   :  { %14259 = vst [vmem:[#allocation23_spill] sm:$0xff] %v10584_v41  ;;  %v179_v20 = vand.u32 2147483647, %v10473_v51  ;;  %v180_v56 = vand.u32 2147483647, %v10478_v43  ;;  %14260 = vst [vmem:[#allocation24_spill] sm:$0xff] %v10589_v60 }
  0x2d   :  { %v10594_v55 = vld [vmem:[%s14061_s0 + $0x258] sm:$0xff]  ;;  %v10599_v47 = vld [vmem:[%s14061_s0 + $0x260] sm:$0xff]  ;;  %v10604_v51 = vld [vmem:[%s14061_s0 + $0x268] sm:$0x3]  ;;  %v182_v43 = vand.u32 2147483647, %v10493_v10  ;;  %v10657_v32 = vmax.f32.f32 %v176_v61, %v177_v50 }
  0x2e   :  { %14261 = vst [vmem:[#allocation25_spill] sm:$0xff] %v10604_v51  ;;  %v183_v4 = vand.u32 2147483647, %v10498_v35  ;;  %14262 = vst [vmem:[#allocation26_spill] sm:$0xff] %v10609_v63  ;;  %v10614_v1 = vld [vmem:[%s14061_s0 + $0x270] sm:$0xff]  ;;  %v93_v38 = vld [vmem:[%s14061_s0 + $0x278] sm:$0xff]  ;;  %v10673_v50 = vmax.f32.f32 %v179_v20, %v180_v56 }
  0x2f   :  { %v10622_v30 = vld [vmem:[%s14061_s0 + $0x288] sm:$0xff]  ;;  %v185_v10 = vand.u32 2147483647, %v10514_v46  ;;  %v186_v35 = vand.u32 2147483647, %v10519_v40  ;;  %14263 = vst [vmem:[#allocation27_spill] sm:$0xff] %v10627_v23 }
  0x30   :  { %v96_v11 = vld [vmem:[%s14061_s0 + $0x290] sm:$0xff]  ;;  %v98_v14 = vld [vmem:[%s14061_s0 + $0x2a0] sm:$0xff]  ;;  %v99_v63 = vld [vmem:[%s14061_s0 + $0x2a8] sm:$0xff]  ;;  %v188_v46 = vand.u32 2147483647, %v10534_v34  ;;  %14264 = vst [vmem:[#allocation28_spill] sm:$0xff] %v10641_v29  ;;  %v10688_v60 = vmax.f32.f32 %v182_v43, %v183_v4 }
  0x31   :  { %v189_v40 = vand.u32 2147483647, %v10539_v28  ;;  %v10646_v37 = vld [vmem:[%s14061_s0 + $0x280] sm:$0x3]  ;;  %v101_v26 = vld [vmem:[%s14061_s0 + $0x2b8] sm:$0xff]  ;;  %14265 = vst [vmem:[#allocation29_spill] sm:$0xff] %v10657_v32 }
  0x32   :  { %v102_v23 = vld [vmem:[%s14061_s0 + $0x2c0] sm:$0xff]  ;;  %v191_v34 = vand.u32 2147483647, %v10554_v22  ;;  %v192_v28 = vand.u32 2147483647, %v10559_v16  ;;  %v104_v21 = vld [vmem:[%s14061_s0 + $0x2d0] sm:$0xff] }
  0x33   :  { %v10662_v15 = vld [vmem:[%s14061_s0 + $0x298] sm:$0x3]  ;;  %v194_v22 = vand.u32 2147483647, %v10574_v8  ;;  %v195_v16 = vand.u32 2147483647, %v10579_v3 }
  0x34   :  { %v105_v29 = vld [vmem:[%s14061_s0 + $0x2d8] sm:$0xff]  ;;  %14266 = vst [vmem:[#allocation30_spill] sm:$0xff] %v10673_v50  ;;  %v10678_v9 = vld [vmem:[%s14061_s0 + $0x2b0] sm:$0x3]  ;;  %v10683_v27 = vld [vmem:[%s14061_s0 + $0x2c8] sm:$0x3]  ;;  %v10700_v50 = vmax.f32.f32 %v185_v10, %v186_v35  ;;  %v10728_v18 = vmax.f32.f32 %v191_v34, %v192_v28 }
  0x35   :  { %v197_v32 = vand.u32 2147483647, %v10594_v55  ;;  %v198_v8 = vand.u32 2147483647, %v10599_v47  ;;  %14267 = vst [vmem:[#allocation31_spill] sm:$0xff] %v10688_v60  ;;  %v107_v56 = vld [vmem:[%s14061_s0 + $0x2e8] sm:$0xff] }
  0x36   :  { %v10693_v20 = vld [vmem:[%s14061_s0 + $0x2e0] sm:$0x3]  ;;  %v200_v61 = vand.u32 2147483647, %v10614_v1  ;;  %v201_v41 = vand.u32 2147483647, %v93_v38 }
  0x37   :  { %v203_v55 = vand.u32 2147483647, %v10622_v30  ;;  %14268 = vst [vmem:[#allocation32_spill] sm:$0xff] %v10700_v50  ;;  %v108_v47 = vld [vmem:[%s14061_s0 + $0x2f0] sm:$0xff]  ;;  %v10708_v43 = vld [vmem:[%s14061_s0 + $0x2f8] sm:$0x3]  ;;  %v10715_v30 = vmax.f32.f32 %v188_v46, %v189_v40  ;;  %v10731_v46 = vmax.f32.f32 %v194_v22, %v195_v16  ;;  %v10745_v34 = vmax.f32.f32 %v197_v32, %v198_v8 }
  0x38   :  { %v10713_v4 = vld [vmem:[%s14061_s0 + $0x300] sm:$0xff]  ;;  %v204_v1 = vand.u32 2147483647, %v96_v11  ;;  %v206_v38 = vand.u32 2147483647, %v98_v14  ;;  %v10720_v10 = vld [vmem:[%s14061_s0 + $0x308] sm:$0xff] }
  0x39   :  { %v207_v3 = vand.u32 2147483647, %v99_v63  ;;  %14269 = vst [vmem:[#allocation33_spill] sm:$0xff] %v10715_v30  ;;  %v10725_v35 = vld [vmem:[%s14061_s0 + $0x310] sm:$0x3]  ;;  %v10736_v40 = vld [vmem:[%s14061_s0 + $0x318] sm:$0xff] }
  0x3a   :  { %v209_v50 = vand.u32 2147483647, %v101_v26  ;;  %v210_v60 = vand.u32 2147483647, %v102_v23  ;;  %v212_v63 = vand.u32 2147483647, %v104_v21  ;;  %v10747_v21 = vmax.f32.f32 %v200_v61, %v201_v41 }
  0x3b   :  { %v213_v11 = vand.u32 2147483647, %v105_v29  ;;  %v10741_v30 = vld [vmem:[%s14061_s0 + $0x320] sm:$0xff]  ;;  %v10752_v29 = vld [vmem:[%s14061_s0 + $0x328] sm:$0x3]  ;;  %v10755_v16 = vmax.f32.f32 %v203_v55, %v204_v1  ;;  %v10757_v14 = vmax.f32.f32 %v206_v38, %v207_v3 }
  0x3c   :  { %v215_v22 = vand.u32 2147483647, %v107_v56  ;;  %v216_v51 = vand.u32 2147483647, %v108_v47  ;;  %v218_v32 = vand.u32 2147483647, %v10713_v4  ;;  %v10761_v8 = vmax.f32.f32 %v209_v50, %v210_v60 }
  0x3d   :  { %v219_v41 = vand.u32 2147483647, %v10720_v10  ;;  %v14270_v23 = vand.u32 2147483647, %v10207_v2  ;;  %v10768_v56 = vmax.f32.f32 %v212_v63, %v213_v11  ;;  %v14271_v3 = vand.u32 2147483647, %v10173_v54 }
  0x3e   :  { %v14272_v4 = vand.u32 2147483647, %v10220_v7  ;;  %v14273_v50 = vand.u32 2147483647, %v10236_v12  ;;  %v10792_v7 = vld [vmem:[%s14061_s0 + $0x338] sm:$0xff] }
  0x3f   :  { %v268_v28 = vsel %vm231_vm0, %v14270_v23, -inf  ;;  %v241_v55 = vsel %vm231_vm0, %v14271_v3, -inf  ;;  %v14274_v12 = vand.u32 2147483647, %v10184_v58  ;;  %v10804_v3 = vld [vmem:[%s14061_s0 + $0x340] sm:$0x3]  ;;  %v10808_v58 = vmax.f32.f32 %v215_v22, %v216_v51 }
  0x40   :  { %v269_v47 = vmax.f32 %v10366_v13, %v268_v28  ;;  %v277_v60 = vsel %vm231_vm0, %v14272_v4, -inf  ;;  %v286_v1 = vsel %vm231_vm0, %v14273_v50, -inf  ;;  %v10787_v13 = vld [vmem:[%s14061_s0 + $0x330] sm:$0xff]  ;;  %v14275_v28 = vand.u32 2147483647, %v10251_v17 }
  0x41   :  { %v278_v54 = vmax.f32 %v10386_v25, %v277_v60  ;;  %v250_v63 = vsel %vm231_vm0, %v14274_v12, -inf  ;;  %v287_v23 = vmax.f32 %v10406_v42, %v286_v1  ;;  %v234_v4 = vrot.slane %v10509_v19, 4 }
  0x42   :  { %v270_v11 = vrot.slane %v269_v47, 4  ;;  %v295_v25 = vsel %vm231_vm0, %v14275_v28, -inf  ;;  %v242_v60 = vmax.f32 %v10311_v45, %v241_v55  ;;  %v14276_v12 = vand.u32 2147483647, %v10196_v62  ;;  %v10822_v45 = vld [vmem:[%s14061_s0 + $0x348] sm:$0xff]  ;;  %v10827_v62 = vld [vmem:[%s14061_s0 + $0x350] sm:$0xff] }
  0x43   :  { %v279_v50 = vrot.slane %v278_v54, 4  ;;  %v288_v17 = vrot.slane %v287_v23, 4  ;;  %v296_v28 = vmax.f32 %v10428_v49, %v295_v25  ;;  %v10817_v26 = vmax.f32 %v10326_v53, %v250_v63 }
  0x44   :  { %v259_v42 = vsel %vm231_vm0, %v14276_v12, -inf  ;;  %v271_v1 = vmax.f32 %v269_v47, %v270_v11  ;;  %v10831_v47 = vmax.f32 %v10509_v19, %v234_v4  ;;  %v243_v53 = vrot.slane %v242_v60, 4 }
  0x45   :  { %v280_v2 = vmax.f32 %v278_v54, %v279_v50  ;;  %v289_v22 = vmax.f32 %v287_v23, %v288_v17  ;;  %v297_v55 = vrot.slane %v296_v28, 4  ;;  %v10834_v54 = vmax.f32 %v10346_v0, %v259_v42 }
  0x46   :  { %v272_v51 = vrot.slane %v271_v1, 2  ;;  %v10836_v12 = vmax.f32.f32 %v218_v32, %v219_v41  ;;  %v252_v23 = vrot.slane %v10817_v26, 4  ;;  %v14277_v38 = vand.u32 2147483647, %v10267_v24 }
  0x47   :  { %v281_v63 = vrot.slane %v280_v2, 2  ;;  %v290_v25 = vrot.slane %v289_v22, 2  ;;  %v298_v50 = vmax.f32 %v296_v28, %v297_v55  ;;  %v14279_v24 = vand.u32 2147483647, %v10302_v39 }
  0x48   :  { %v273_v11 = vmax.f32 %v271_v1, %v272_v51  ;;  %v304_v0 = vsel %vm231_vm0, %v14277_v38, -inf  ;;  %v10845_v1 = vmax.f32 %v242_v60, %v243_v53  ;;  %v14280_v60 = vand.u32 2147483647, %v10321_v48 }
  0x49   :  { %v282_v17 = vmax.f32 %v280_v2, %v281_v63  ;;  %v291_v19 = vmax.f32 %v289_v22, %v290_v25  ;;  %v299_v4 = vrot.slane %v298_v50, 2  ;;  %v305_v10 = vmax.f32 %v10448_v59, %v304_v0 }
  0x4a   :  { %v274_v61 = vrot.slane %v273_v11, 1  ;;  %v14278_v22 = vand.u32 2147483647, %v10283_v31  ;;  %v322_v38 = vsel %vm231_vm0, %v14279_v24, -inf  ;;  %v331_v53 = vsel %vm231_vm0, %v14280_v60, -inf }
  0x4b   :  { %v283_v41 = vrot.slane %v282_v17, 1  ;;  %v292_v51 = vrot.slane %v291_v19, 1  ;;  %v300_v55 = vmax.f32 %v298_v50, %v299_v4  ;;  %v323_v59 = vmax.f32 %v10488_v6, %v322_v38 }
  0x4c   :  { %v275_v28 = vmax.f32 %v273_v11, %v274_v61  ;;  %v313_v63 = vsel %vm231_vm0, %v14278_v22, -inf  ;;  %v306_v61 = vrot.slane %v305_v10, 4  ;;  %v332_v31 = vmax.f32 %v10529_v33, %v331_v53 }
  0x4d   :  { %v284_v2 = vmax.f32 %v282_v17, %v283_v41  ;;  %v293_v25 = vmax.f32 %v291_v19, %v292_v51  ;;  %v301_v49 = vrot.slane %v300_v55, 1  ;;  %v314_v11 = vmax.f32 %v10468_v52, %v313_v63 }
  0x4e   :  { %v14281_v17 = vand.u32 2147483647, %v10341_v57  ;;  %v307_v0 = vmax.f32 %v305_v10, %v306_v61  ;;  %v324_v19 = vrot.slane %v323_v59, 4  ;;  %v333_v51 = vrot.slane %v332_v31, 4 }
  0x4f   :  { %v557_v50 = vmax.f32 %v284_v2, %v275_v28  ;;  %v302_v4 = vmax.f32 %v300_v55, %v301_v49  ;;  %v315_v41 = vrot.slane %v314_v11, 4  ;;  %v14282_v24 = vand.u32 2147483647, %v10361_v5  ;;  %v14283_v49 = vld [vmem:[#allocation13_spill] sm:$0xff] }
  0x50   :  { %v340_v39 = vsel %vm231_vm0, %v14281_v17, -inf  ;;  %v308_v28 = vrot.slane %v307_v0, 2  ;;  %v325_v63 = vmax.f32 %v323_v59, %v324_v19  ;;  %v334_v38 = vmax.f32 %v332_v31, %v333_v51 }
  0x51   :  { %v341_v48 = vmax.f32 %v10549_v44, %v340_v39  ;;  %v558_v22 = vmax.f32 %v293_v25, %v557_v50  ;;  %v349_v52 = vsel %vm231_vm0, %v14282_v24, -inf  ;;  %v316_v6 = vmax.f32 %v314_v11, %v315_v41  ;;  %v14285_v50 = vld [vmem:[#allocation24_spill] sm:$0xff]  ;;  %v14286_v39 = vld [vmem:[#allocation14_spill] sm:$0xff] }
  0x52   :  { %v350_v33 = vmax.f32 %v10569_v36, %v349_v52  ;;  %v14284_v10 = vand.u32 2147483647, %v14283_v49  ;;  %v309_v44 = vmax.f32 %v307_v0, %v308_v28  ;;  %v326_v61 = vrot.slane %v325_v63, 2  ;;  %v14288_v24 = vld [vmem:[#allocation26_spill] sm:$0xff] }
  0x53   :  { %v342_v2 = vrot.slane %v341_v48, 4  ;;  %v559_v57 = vmax.f32 %v302_v4, %v558_v22  ;;  %v317_v60 = vrot.slane %v316_v6, 2  ;;  %v335_v5 = vrot.slane %v334_v38, 2 }
  0x54   :  { %v358_v55 = vsel %vm231_vm0, %v14284_v10, -inf  ;;  %v351_v25 = vrot.slane %v350_v33, 4  ;;  %v14287_v11 = vand.u32 2147483647, %v14286_v39  ;;  %v310_v36 = vrot.slane %v309_v44, 1 }
  0x55   :  { %v343_v53 = vmax.f32 %v341_v48, %v342_v2  ;;  %v359_v17 = vmax.f32 %v14285_v50, %v358_v55  ;;  %v318_v4 = vmax.f32 %v316_v6, %v317_v60  ;;  %v327_v22 = vmax.f32 %v325_v63, %v326_v61 }
  0x56   :  { %v367_v41 = vsel %vm231_vm0, %v14287_v11, -inf  ;;  %v352_v31 = vmax.f32 %v350_v33, %v351_v25  ;;  %v336_v19 = vmax.f32 %v334_v38, %v335_v5  ;;  %v311_v52 = vmax.f32 %v309_v44, %v310_v36 }
  0x57   :  { %v344_v59 = vrot.slane %v343_v53, 2  ;;  %v360_v51 = vrot.slane %v359_v17, 4  ;;  %v368_v0 = vmax.f32 %v14288_v24, %v367_v41  ;;  %v319_v48 = vrot.slane %v318_v4, 1  ;;  %v14295_v24 = vld [vmem:[#allocation17_spill] sm:$0xff] }
  0x58   :  { %v353_v2 = vrot.slane %v352_v31, 2  ;;  %v328_v49 = vrot.slane %v327_v22, 1  ;;  %v337_v10 = vrot.slane %v336_v19, 1  ;;  %v560_v39 = vmax.f32 %v311_v52, %v559_v57  ;;  %v14291_v57 = vld [vmem:[#allocation27_spill] sm:$0xff] }
  0x59   :  { %v345_v28 = vmax.f32 %v343_v53, %v344_v59  ;;  %v361_v55 = vmax.f32 %v359_v17, %v360_v51  ;;  %v369_v50 = vrot.slane %v368_v0, 4  ;;  %v320_v42 = vmax.f32 %v318_v4, %v319_v48  ;;  %v14289_v53 = vld [vmem:[#allocation15_spill] sm:$0xff]  ;;  %v14292_v4 = vld [vmem:[#allocation16_spill] sm:$0xff] }
  0x5a   :  { %v354_v32 = vmax.f32 %v352_v31, %v353_v2  ;;  %v253_v6 = vmax.f32 %v10817_v26, %v252_v23  ;;  %v329_v33 = vmax.f32 %v327_v22, %v328_v49  ;;  %v338_v44 = vmax.f32 %v336_v19, %v337_v10  ;;  %v14294_v23 = vld [vmem:[#allocation28_spill] sm:$0xff]  ;;  %v14297_v2 = vld [vmem:[#allocation29_spill] sm:$0xff] }
  0x5b   :  { %v346_v11 = vrot.slane %v345_v28, 1  ;;  %v362_v63 = vrot.slane %v361_v55, 2  ;;  %v370_v38 = vmax.f32 %v368_v0, %v369_v50  ;;  %v561_v60 = vmax.f32 %v320_v42, %v560_v39 }
  0x5c   :  { %v355_v25 = vrot.slane %v354_v32, 1  ;;  %v14290_v61 = vand.u32 2147483647, %v14289_v53  ;;  %v14293_v59 = vand.u32 2147483647, %v14292_v4  ;;  %v14298_v10 = vrot.slane %v10834_v54, 4 }
  0x5d   :  { %v363_v17 = vmax.f32 %v361_v55, %v362_v63  ;;  %v371_v41 = vrot.slane %v370_v38, 2  ;;  %v562_v51 = vmax.f32 %v329_v33, %v561_v60  ;;  %v347_v26 = vmax.f32 %v345_v28, %v346_v11  ;;  %v14300_v53 = vld [vmem:[#allocation18_spill] sm:$0xff] }
  0x5e   :  { %v376_v5 = vsel %vm231_vm0, %v14290_v61, -inf  ;;  %v385_v31 = vsel %vm231_vm0, %v14293_v59, -inf  ;;  %v14296_v42 = vand.u32 2147483647, %v14295_v24  ;;  %v262_v55 = vmax.f32 %v10834_v54, %v14298_v10  ;;  %v14305_v24 = vld [vmem:[#allocation20_spill] sm:$0xff] }
  0x5f   :  { %v377_v36 = vmax.f32 %v14291_v57, %v376_v5  ;;  %v386_v22 = vmax.f32 %v14294_v23, %v385_v31  ;;  %v364_v0 = vrot.slane %v363_v17, 1  ;;  %v372_v52 = vmax.f32 %v370_v38, %v371_v41  ;;  %v14304_v23 = vld [vmem:[#allocation30_spill] sm:$0xff] }
  0x60   :  { %v394_v19 = vsel %vm231_vm0, %v14296_v42, -inf  ;;  %v563_v50 = vmax.f32 %v338_v44, %v562_v51  ;;  %v356_v39 = vmax.f32 %v354_v32, %v355_v25  ;;  %v14299_v28 = vrot.slane %v10831_v47, 2  ;;  %v14302_v25 = vld [vmem:[#allocation19_spill] sm:$0xff] }
  0x61   :  { %v378_v48 = vrot.slane %v377_v36, 4  ;;  %v395_v49 = vmax.f32 %v14297_v2, %v394_v19  ;;  %v387_v63 = vrot.slane %v386_v22, 4  ;;  %v373_v33 = vrot.slane %v372_v52, 1 }
  0x62   :  { %v10898_v11 = vmax.f32 %v10831_v47, %v14299_v28  ;;  %v14301_v61 = vand.u32 2147483647, %v14300_v53  ;;  %v564_v5 = vmax.f32 %v347_v26, %v563_v50  ;;  %v365_v41 = vmax.f32 %v363_v17, %v364_v0  ;;  %v10914_v17 = vld [vmem:[%s14061_s0 + $0x358] sm:$0x3]  ;;  %v14309_v28 = vld [vmem:[#allocation31_spill] sm:$0xff] }
  0x63   :  { %v379_v60 = vmax.f32 %v377_v36, %v378_v48  ;;  %v388_v57 = vmax.f32 %v386_v22, %v387_v63  ;;  %v396_v4 = vrot.slane %v395_v49, 4  ;;  %v245_v54 = vrot.slane %v10845_v1, 2  ;;  %v14307_v48 = vld [vmem:[#allocation21_spill] sm:$0xff] }
  0x64   :  { %v403_v38 = vsel %vm231_vm0, %v14301_v61, -inf  ;;  %v254_v44 = vrot.slane %v253_v6, 2  ;;  %v14303_v59 = vand.u32 2147483647, %v14302_v25  ;;  %v565_v47 = vmax.f32 %v356_v39, %v564_v5  ;;  %v14310_v5 = vld [vmem:[#allocation32_spill] sm:$0xff] }
  0x65   :  { %v380_v32 = vrot.slane %v379_v60, 2  ;;  %v389_v51 = vrot.slane %v388_v57, 2  ;;  %v404_v36 = vmax.f32 %v14304_v23, %v403_v38  ;;  %v14306_v42 = vand.u32 2147483647, %v14305_v24  ;;  %v14314_v24 = vld [vmem:[#allocation22_spill] sm:$0xff] }
  0x66   :  { %v412_v31 = vsel %vm231_vm0, %v14303_v59, -inf  ;;  %v263_v26 = vrot.slane %v262_v55, 2  ;;  %v374_v22 = vmax.f32 %v372_v52, %v373_v33  ;;  %v14308_v2 = vand.u32 2147483647, %v14307_v48  ;;  %v14311_v59 = vld [vmem:[#allocation33_spill] sm:$0xff] }
  0x67   :  { %v421_v19 = vsel %vm231_vm0, %v14306_v42, -inf  ;;  %v381_v0 = vmax.f32 %v379_v60, %v380_v32  ;;  %v566_v50 = vmax.f32 %v365_v41, %v565_v47  ;;  %v390_v39 = vmax.f32 %v388_v57, %v389_v51 }
  0x68   :  { %v430_v10 = vsel %vm231_vm0, %v14308_v2, -inf  ;;  %v397_v63 = vmax.f32 %v395_v49, %v396_v4  ;;  %v413_v53 = vmax.f32 %v14309_v28, %v412_v31  ;;  %v10921_v61 = vmax.f32 %v10845_v1, %v245_v54  ;;  %v14316_v2 = vld [vmem:[#allocation23_spill] sm:$0xff] }
  0x69   :  { %v382_v38 = vrot.slane %v381_v0, 1  ;;  %v422_v25 = vmax.f32 %v14310_v5, %v421_v19  ;;  %v431_v23 = vmax.f32 %v14311_v59, %v430_v10  ;;  %v229_v52 = vand.u32 2147483647, %v10914_v17  ;;  %v6963_v17 = vld [vmem:[%s14060_s1 + $0x288] sm:$0xff] }
  0x6a   :  { %v10926_v33 = vmax.f32 %v253_v6, %v254_v44  ;;  %v405_v60 = vrot.slane %v404_v36, 4  ;;  %v14312_v32 = vand.u32 2147483647, %v10741_v30  ;;  %v14313_v41 = vand.u32 2147483647, %v10736_v40 }
  0x6b   :  { %v567_v57 = vmax.f32 %v374_v22, %v566_v50  ;;  %v383_v4 = vmax.f32 %v381_v0, %v382_v38  ;;  %v391_v1 = vrot.slane %v390_v39, 1  ;;  %v432_v54 = vrot.slane %v431_v23, 4 }
  0x6c   :  { %v10932_v49 = vmax.f32.f32 %v14313_v41, %v14312_v32  ;;  %v238_v31 = vrot.slane %v10898_v11, 1  ;;  %v398_v47 = vrot.slane %v397_v63, 2  ;;  %v414_v51 = vrot.slane %v413_v53, 4 }
  0x6d   :  { %v14315_v42 = vand.u32 2147483647, %v14314_v24  ;;  %v247_v44 = vrot.slane %v10921_v61, 1  ;;  %v10939_v19 = vmax.f32 %v262_v55, %v263_v26  ;;  %v423_v30 = vrot.slane %v422_v25, 4 }
  0x6e   :  { %v433_v40 = vmax.f32 %v431_v23, %v432_v54  ;;  %v256_v48 = vrot.slane %v10926_v33, 1  ;;  %v10942_v22 = vmax.f32 %v404_v36, %v405_v60  ;;  %v14317_v10 = vand.u32 2147483647, %v14316_v2  ;;  %v14318_v23 = vld [vmem:[#allocation25_spill] sm:$0xff] }
  0x6f   :  { %v439_v6 = vsel %vm231_vm0, %v14315_v42, -inf  ;;  %v568_v28 = vmax.f32 %v383_v4, %v567_v57  ;;  %v392_v38 = vmax.f32 %v390_v39, %v391_v1  ;;  %v10949_v32 = vmax.f32 %v397_v63, %v398_v47 }
  0x70   :  { %v440_v0 = vmax.f32 %v10728_v18, %v439_v6  ;;  %v448_v50 = vsel %vm231_vm0, %v14317_v10, -inf  ;;  %v434_v5 = vrot.slane %v433_v40, 2  ;;  %v10951_v55 = vmax.f32 %v413_v53, %v414_v51 }
  0x71   :  { %v449_v59 = vmax.f32 %v10731_v46, %v448_v50  ;;  %v14319_v41 = vand.u32 2147483647, %v14318_v23  ;;  %v10956_v60 = vmax.f32 %v422_v25, %v423_v30  ;;  %v14320_v39 = vand.u32 2147483647, %v10646_v37 }
  0x72   :  { %v441_v26 = vrot.slane %v440_v0, 4  ;;  %v435_v18 = vmax.f32 %v433_v40, %v434_v5  ;;  %v14321_v63 = vand.u32 2147483647, %v10662_v15  ;;  %v14322_v4 = vand.u32 2147483647, %v10678_v9 }
  0x73   :  { %v457_v36 = vsel %vm231_vm0, %v14319_v41, -inf  ;;  %v450_v54 = vrot.slane %v449_v59, 4  ;;  %v466_v46 = vsel %vm231_vm0, %v14320_v39, -inf  ;;  %v569_v47 = vmax.f32 %v392_v38, %v568_v28 }
  0x74   :  { %v458_v24 = vmax.f32 %v10745_v34, %v457_v36  ;;  %v442_v57 = vmax.f32 %v440_v0, %v441_v26  ;;  %v475_v53 = vsel %vm231_vm0, %v14321_v63, -inf  ;;  %v484_v1 = vsel %vm231_vm0, %v14322_v4, -inf }
  0x75   :  { %v436_v25 = vrot.slane %v435_v18, 1  ;;  %v451_v51 = vmax.f32 %v449_v59, %v450_v54  ;;  %v467_v34 = vmax.f32 %v10747_v21, %v466_v46  ;;  %v476_v30 = vmax.f32 %v10755_v16, %v475_v53 }
  0x76   :  { %v459_v42 = vrot.slane %v458_v24, 4  ;;  %v443_v6 = vrot.slane %v442_v57, 2  ;;  %v485_v37 = vmax.f32 %v10757_v14, %v484_v1  ;;  %v14323_v2 = vand.u32 2147483647, %v10683_v27 }
  0x77   :  { %v437_v40 = vmax.f32 %v435_v18, %v436_v25  ;;  %v452_v0 = vrot.slane %v451_v51, 2  ;;  %v468_v50 = vrot.slane %v467_v34, 4  ;;  %v477_v28 = vrot.slane %v476_v30, 4 }
  0x78   :  { %v460_v15 = vmax.f32 %v458_v24, %v459_v42  ;;  %v493_v9 = vsel %vm231_vm0, %v14323_v2, -inf  ;;  %v444_v10 = vmax.f32 %v442_v57, %v443_v6  ;;  %v486_v38 = vrot.slane %v485_v37, 4 }
  0x79   :  { %v570_v5 = vmax.f32 %v437_v40, %v569_v47  ;;  %v453_v59 = vmax.f32 %v451_v51, %v452_v0  ;;  %v494_v21 = vmax.f32 %v10761_v8, %v493_v9  ;;  %v469_v16 = vmax.f32 %v467_v34, %v468_v50 }
  0x7a   :  { %v461_v26 = vrot.slane %v460_v15, 2  ;;  %v445_v23 = vrot.slane %v444_v10, 1  ;;  %v478_v41 = vmax.f32 %v476_v30, %v477_v28  ;;  %v487_v14 = vmax.f32 %v485_v37, %v486_v38 }
  0x7b   :  { %v454_v36 = vrot.slane %v453_v59, 1  ;;  %v495_v54 = vrot.slane %v494_v21, 4  ;;  %v14324_v27 = vand.u32 2147483647, %v10693_v20  ;;  %v470_v39 = vrot.slane %v469_v16, 2 }
  0x7c   :  { %v462_v18 = vmax.f32 %v460_v15, %v461_v26  ;;  %v446_v57 = vmax.f32 %v444_v10, %v445_v23  ;;  %v479_v46 = vrot.slane %v478_v41, 2  ;;  %v488_v63 = vrot.slane %v487_v14, 2 }
  0x7d   :  { %v502_v24 = vsel %vm231_vm0, %v14324_v27, -inf  ;;  %v455_v53 = vmax.f32 %v453_v59, %v454_v36  ;;  %v496_v1 = vmax.f32 %v494_v21, %v495_v54  ;;  %v471_v25 = vmax.f32 %v469_v16, %v470_v39 }
  0x7e   :  { %v463_v4 = vrot.slane %v462_v18, 1  ;;  %v503_v8 = vmax.f32 %v10768_v56, %v502_v24  ;;  %v571_v47 = vmax.f32 %v446_v57, %v570_v5  ;;  %v480_v51 = vmax.f32 %v478_v41, %v479_v46 }
  0x7f   :  { %v489_v42 = vmax.f32 %v487_v14, %v488_v63  ;;  %v497_v34 = vrot.slane %v496_v1, 2  ;;  %v14325_v20 = vand.u32 2147483647, %v10708_v43  ;;  %v472_v0 = vrot.slane %v471_v25, 1 }
  0x80   :  { %v464_v6 = vmax.f32 %v462_v18, %v463_v4  ;;  %v504_v30 = vrot.slane %v503_v8, 4  ;;  %v574_v40 = vmax.f32 %v455_v53, %v571_v47  ;;  %v481_v15 = vrot.slane %v480_v51, 1 }
  0x81   :  { %v511_v37 = vsel %vm231_vm0, %v14325_v20, -inf  ;;  %v490_v2 = vrot.slane %v489_v42, 1  ;;  %v498_v9 = vmax.f32 %v496_v1, %v497_v34  ;;  %v14326_v56 = vand.u32 2147483647, %v10725_v35 }
  0x82   :  { %v505_v10 = vmax.f32 %v503_v8, %v504_v30  ;;  %v512_v50 = vmax.f32 %v10808_v58, %v511_v37  ;;  %v575_v38 = vmax.f32 %v464_v6, %v574_v40  ;;  %v473_v5 = vmax.f32 %v471_v25, %v472_v0  ;;  %v6962_v40 = vld [vmem:[%s14060_s1 + $0x280] sm:$0xff] }
  0x83   :  { %v520_v28 = vsel %vm231_vm0, %v14326_v56, -inf  ;;  %v482_v59 = vmax.f32 %v480_v51, %v481_v15  ;;  %v491_v26 = vmax.f32 %v489_v42, %v490_v2  ;;  %v499_v21 = vrot.slane %v498_v9, 1 }
  0x84   :  { %v506_v43 = vrot.slane %v505_v10, 2  ;;  %v513_v23 = vrot.slane %v512_v50, 4  ;;  %v521_v16 = vmax.f32 %v10836_v12, %v520_v28  ;;  %v576_v41 = vmax.f32 %v473_v5, %v575_v38 }
  0x85   :  { %v14327_v14 = vand.u32 2147483647, %v10752_v29  ;;  %v14328_v58 = vand.u32 2147483647, %v10792_v7  ;;  %v14329_v35 = vand.u32 2147483647, %v10787_v13  ;;  %v500_v24 = vmax.f32 %v498_v9, %v499_v21 }
  0x86   :  { %v14330_v54 = vand.u32 2147483647, %v10804_v3  ;;  %v507_v57 = vmax.f32 %v505_v10, %v506_v43  ;;  %v514_v39 = vmax.f32 %v512_v50, %v513_v23  ;;  %v522_v46 = vrot.slane %v521_v16, 4  ;;  %v1307_v9 = vld [vmem:[%s14060_s1] sm:$0xff]  ;;  %v1308_v10 = vld [vmem:[%s14060_s1 + $0x8] sm:$0xff] }
  0x87   :  { %v529_v36 = vsel %vm231_vm0, %v14327_v14, -inf  ;;  %v537_v18 = vmax.f32.f32 %v14329_v35, %v14328_v58  ;;  %v577_v63 = vmax.f32 %v482_v59, %v576_v41  ;;  %v14331_v29 = vand.u32 2147483647, %v10827_v62 }
  0x88   :  { %v538_v27 = vsel %vm231_vm0, %v14330_v54, -inf  ;;  %v530_v12 = vmax.f32 %v10932_v49, %v529_v36  ;;  %v14332_v4 = vand.u32 2147483647, %v10822_v45  ;;  %v508_v1 = vrot.slane %v507_v57, 1 }
  0x89   :  { %v539_v53 = vmax.f32 %v537_v18, %v538_v27  ;;  %v515_v13 = vrot.slane %v514_v39, 2  ;;  %v523_v8 = vmax.f32 %v521_v16, %v522_v46  ;;  %v547_v3 = vsel %vm231_vm0, %v229_v52, -inf }
  0x8a   :  { %v546_v7 = vmax.f32.f32 %v14332_v4, %v14331_v29  ;;  %v578_v47 = vmax.f32 %v491_v26, %v577_v63  ;;  %v531_v25 = vrot.slane %v530_v12, 4  ;;  %v416_v6 = vrot.slane %v10951_v55, 2 }
  0x8b   :  { %v540_v51 = vrot.slane %v539_v53, 4  ;;  %v509_v49 = vmax.f32 %v507_v57, %v508_v1  ;;  %v516_v34 = vmax.f32 %v514_v39, %v515_v13  ;;  %v524_v30 = vrot.slane %v523_v8, 2 }
  0x8c   :  { %v548_v42 = vmax.f32 %v546_v7, %v547_v3  ;;  %v579_v62 = vmax.f32 %v500_v24, %v578_v47  ;;  %v532_v20 = vmax.f32 %v530_v12, %v531_v25  ;;  %v407_v52 = vrot.slane %v10942_v22, 2 }
  0x8d   :  { %v541_v45 = vmax.f32 %v539_v53, %v540_v51  ;;  %v425_v0 = vrot.slane %v10956_v60, 2  ;;  %v517_v15 = vrot.slane %v516_v34, 1  ;;  %v525_v2 = vmax.f32 %v523_v8, %v524_v30  ;;  %v6965_v30 = vld [vmem:[%s14060_s1 + $0x298] sm:$0xff] }
  0x8e   :  { %v549_v37 = vrot.slane %v548_v42, 4  ;;  %v580_v50 = vmax.f32 %v509_v49, %v579_v62  ;;  %v533_v56 = vrot.slane %v532_v20, 2  ;;  %v417_v5 = vmax.f32 %v10951_v55, %v416_v6  ;;  %v6966_v62 = vld [vmem:[%s14060_s1 + $0x2a0] sm:$0xff] }
  0x8f   :  { %v542_v28 = vrot.slane %v541_v45, 2  ;;  %v518_v59 = vmax.f32 %v516_v34, %v517_v15  ;;  %v526_v26 = vrot.slane %v525_v2, 1  ;;  %v11021_v21 = vpack.c.bf16 %v6963_v17, %v6962_v40  ;;  %v6968_v40 = vld [vmem:[%s14060_s1 + $0x2b0] sm:$0xff]  ;;  %v6969_v17 = vld [vmem:[%s14060_s1 + $0x2b8] sm:$0xff]  ;;  %v1311_v15 = vld [vmem:[%s14060_s1 + $0x20] sm:$0xff] }
  0x90   :  { %v550_v38 = vmax.f32 %v548_v42, %v549_v37  ;;  %v534_v43 = vmax.f32 %v532_v20, %v533_v56  ;;  %v11023_v41 = vpack.c.bf16 %v1308_v10, %v1307_v9  ;;  %v265_v14 = vrot.slane %v10939_v19, 1  ;;  %v6967_v20 = vld [vmem:[%s14060_s1 + $0x2a8] sm:$0xff]  ;;  %v1310_v37 = vld [vmem:[%s14060_s1 + $0x18] sm:$0xff]  ;;  %v6972_v9 = vld [vmem:[%s14060_s1 + $0x2d0] sm:$0xff] }
  0x91   :  { %v543_v23 = vmax.f32 %v541_v45, %v542_v28  ;;  %v408_v36 = vmax.f32 %v10942_v22, %v407_v52  ;;  %v581_v58 = vmax.f32 %v518_v59, %v580_v50  ;;  %v527_v35 = vmax.f32 %v525_v2, %v526_v26  ;;  %9060 = vmatprep.subr.bf16.mxu0 %v11021_v21  ;;  %v1309_v45 = vld [vmem:[%s14060_s1 + $0x10] sm:$0xff]  ;;  %v6970_v52 = vld [vmem:[%s14060_s1 + $0x2c0] sm:$0xff]  ;;  %v1312_v2 = vld [vmem:[%s14060_s1 + $0x28] sm:$0xff] }
  0x92   :  { %v551_v16 = vrot.slane %v550_v38, 2  ;;  %v426_v18 = vmax.f32 %v10956_v60, %v425_v0  ;;  %v535_v55 = vrot.slane %v534_v43, 1  ;;  %8932 = vmatprep.subr.bf16.mxu1 %v11023_v41  ;;  %v239_v24 = vmax.f32 %v10898_v11, %v238_v31  ;;  %v6971_v0 = vld [vmem:[%s14060_s1 + $0x2c8] sm:$0xff]  ;;  %v6973_v10 = vld [vmem:[%s14060_s1 + $0x2d8] sm:$0xff]  ;;  %v6974_v50 = vld [vmem:[%s14060_s1 + $0x2e0] sm:$0xff] }
  0x93   :  { %v544_v54 = vrot.slane %v543_v23, 1  ;;  %v257_v57 = vmax.f32 %v10926_v33, %v256_v48  ;;  %v400_v22 = vrot.slane %v10949_v32, 1  ;;  %v582_v39 = vmax.f32 %v527_v35, %v581_v58  ;;  %v6975_v56 = vld [vmem:[%s14060_s1 + $0x2e8] sm:$0xff]  ;;  %v1313_v28 = vld [vmem:[%s14060_s1 + $0x30] sm:$0xff]  ;;  %v6977_v59 = vld [vmem:[%s14060_s1 + $0x2f8] sm:$0xff] }
  0x94   :  { %v552_v27 = vmax.f32 %v550_v38, %v551_v16  ;;  %v418_v46 = vrot.slane %v417_v5, 1  ;;  %v536_v63 = vmax.f32 %v534_v43, %v535_v55  ;;  %v248_v53 = vmax.f32 %v10921_v61, %v247_v44  ;;  %v1314_v38 = vld [vmem:[%s14060_s1 + $0x38] sm:$0xff]  ;;  %v6978_v26 = vld [vmem:[%s14060_s1 + $0x300] sm:$0xff]  ;;  %v6979_v43 = vld [vmem:[%s14060_s1 + $0x308] sm:$0xff] }
  0x95   :  { %v545_v12 = vmax.f32 %v543_v23, %v544_v54  ;;  %v266_v29 = vmax.f32 %v10939_v19, %v265_v14  ;;  %v409_v4 = vrot.slane %v408_v36, 1  ;;  %v427_v7 = vrot.slane %v426_v18, 1  ;;  %v1315_v23 = vld [vmem:[%s14060_s1 + $0x40] sm:$0xff]  ;;  %v1316_v16 = vld [vmem:[%s14060_s1 + $0x48] sm:$0xff]  ;;  %v6980_v14 = vld [vmem:[%s14060_s1 + $0x310] sm:$0xff] }
  0x96   :  { %v553_v60 = vrot.slane %v552_v27, 1  ;;  %v583_v11 = vmax.f32 %v536_v63, %v582_v39  ;;  %v401_v1 = vmax.f32 %v10949_v32, %v400_v22  ;;  %v419_v33 = vmax.f32 %v417_v5, %v418_v46  ;;  %v6964_v32 = vld [vmem:[%s14060_s1 + $0x290] sm:$0xff]  ;;  %v1318_v35 = vld [vmem:[%s14060_s1 + $0x58] sm:$0xff]  ;;  %v1319_v22 = vld [vmem:[%s14060_s1 + $0x60] sm:$0xff] }
  0x97   :  { %v555_v13 = vmax.f32 %v239_v24, %v257_v57  ;;  %v410_v8 = vmax.f32 %v408_v36, %v409_v4  ;;  %v428_v3 = vmax.f32 %v426_v18, %v427_v7  ;;  %v556_v25 = vmax.f32 %v248_v53, %v266_v29  ;;  %v6976_v5 = vld [vmem:[%s14060_s1 + $0x2f0] sm:$0xff]  ;;  %v6981_v36 = vld [vmem:[%s14060_s1 + $0x318] sm:$0xff]  ;;  %v6982_v18 = vld [vmem:[%s14060_s1 + $0x320] sm:$0xff] }
  0x98   :  { %v554_v31 = vmax.f32 %v552_v27, %v553_v60  ;;  %v584_v48 = vmax.f32 %v545_v12, %v583_v11  ;;  %v572_v42 = vmax.f32 %v401_v1, %v419_v33  ;;  %v1317_v58 = vld [vmem:[%s14060_s1 + $0x50] sm:$0xff]  ;;  %v11132_v55 = vpack.c.bf16 %v6965_v30, %v6964_v32  ;;  %v6983_v57 = vld [vmem:[%s14060_s1 + $0x328] sm:$0xff] }
  0x99   :  { %v573_v49 = vmax.f32 %v410_v8, %v428_v3  ;;  %v11134_v54 = vpack.c.bf16 %v6967_v20, %v6966_v62  ;;  %v11136_v27 = vpack.c.bf16 %v1310_v37, %v1309_v45  ;;  %v11138_v24 = vpack.c.bf16 %v6969_v17, %v6968_v40  ;;  %v1320_v39 = vld [vmem:[%s14060_s1 + $0x68] sm:$0xff]  ;;  %v9897_v32 = vld [vmem:[%s14061_s0 + $0x30] sm:$0xff]  ;;  %v9898_v62 = vld [vmem:[%s14061_s0 + $0x38] sm:$0xff] }
  0x9a   :  { %v585_v47 = vmax.f32 %v554_v31, %v584_v48  ;;  %v11149_v46 = vpack.c.bf16 %v6971_v0, %v6970_v52  ;;  %v11151_v63 = vpack.c.bf16 %v1312_v2, %v1311_v15  ;;  %v11153_v12 = vpack.c.bf16 %v6973_v10, %v6972_v9  ;;  %v9892_v3 = vld [vmem:[%s14061_s0 + $0x8] sm:$0xff] }
  0x9b   :  { %v11155_v60 = vpack.c.bf16 %v6975_v56, %v6974_v50  ;;  %v11157_v53 = vpack.c.bf16 %v1314_v38, %v1313_v28  ;;  %v11159_v29 = vpack.c.bf16 %v6977_v59, %v6976_v5  ;;  %v11161_v4 = vpack.c.bf16 %v6979_v43, %v6978_v26 }
  0x9c   :  { %v586_v51 = vmax.f32 %v555_v13, %v585_v47  ;;  %v11163_v7 = vpack.c.bf16 %v1316_v16, %v1315_v23  ;;  %v11167_v31 = vpack.c.bf16 %v6981_v36, %v6980_v14  ;;  %v11169_v1 = vpack.c.bf16 %v1318_v35, %v1317_v58  ;;  %v9891_v13 = vld [vmem:[%s14061_s0] sm:$0xff] }
  0x9d   :  { %v11171_v33 = vpack.c.bf16 %v6983_v57, %v6982_v18  ;;  %v11173_v48 = vpack.c.bf16 %v1320_v39, %v1319_v22 }
  0x9e   :  { %v587_v6 = vmax.f32 %v556_v25, %v586_v51  ;;  %v9893_v25 = vld [vmem:[%s14061_s0 + $0x18] sm:$0xff] }
  0xa0   :  { %v588_v61 = vmax.f32 %v572_v42, %v587_v6  ;;  %v9894_v42 = vld [vmem:[%s14061_s0 + $0x20] sm:$0xff] }
  0xa2   :  { %v589_v44 = vmax.f32 %v573_v49, %v588_v61  ;;  %v9895_v49 = vld [vmem:[%s14061_s0 + $0x10] sm:$0x3] }
  0xa4   :  { %vm590_vm1 = vcmp.gt.f32.partialorder %v589_v44, 0.0  ;;  %v592_v19 = vmul.f32 0.007874016, %v589_v44  ;;  %v9896_v44 = vld [vmem:[%s14061_s0 + $0x28] sm:$0x3] }
  0xa6   :  { %v11042_v34 = vsel %vm590_vm1, %v592_v19, 1.0 }
  0xa7   :  { %9887 = vrcp.f32 %v11042_v34 }
  0xb1   :  { %v11165_v11 = vpop.eup %9887 }
  0xb2   :  { %v595_v8 = vmul.f32 %v9891_v13, %v11165_v11  ;;  %v596_v47 = vmul.f32 %v9892_v3, %v11165_v11  ;;  %v598_v51 = vmul.f32 %v9893_v25, %v11165_v11  ;;  %v599_v6 = vmul.f32 %v9894_v42, %v11165_v11  ;;  %v9899_v25 = vld [vmem:[%s14061_s0 + $0x40] sm:$0x3]  ;;  %v9900_v42 = vld [vmem:[%s14061_s0 + $0x48] sm:$0xff] }
  0xb3   :  { %v597_v61 = vmul.f32 %v9895_v49, %v11165_v11  ;;  %v600_v19 = vmul.f32 %v9896_v44, %v11165_v11  ;;  %v601_v30 = vmul.f32 %v9897_v32, %v11165_v11  ;;  %v602_v20 = vmul.f32 %v9898_v62, %v11165_v11  ;;  %v9901_v49 = vld [vmem:[%s14061_s0 + $0x50] sm:$0xff]  ;;  %v9902_v44 = vld [vmem:[%s14061_s0 + $0x58] sm:$0x3]  ;;  %v9903_v32 = vld [vmem:[%s14061_s0 + $0x60] sm:$0xff] }
  0xb4   :  { %v9715_v45 = vround.rtne.f32 %v595_v8  ;;  %v9716_v37 = vround.rtne.f32 %v596_v47  ;;  %v9718_v40 = vround.rtne.f32 %v598_v51  ;;  %v9719_v17 = vround.rtne.f32 %v599_v6  ;;  %v9904_v62 = vld [vmem:[%s14061_s0 + $0x68] sm:$0xff] }
  0xb5   :  { %v9717_v52 = vround.rtne.f32 %v597_v61  ;;  %v9720_v0 = vround.rtne.f32 %v600_v19  ;;  %v9721_v15 = vround.rtne.f32 %v601_v30  ;;  %v9722_v2 = vround.rtne.f32 %v602_v20 }
  0xb6   :  { %v811_v9 = vmax.f32 %v9715_v45, -128.0  ;;  %v812_v10 = vmax.f32 %v9716_v37, -128.0  ;;  %v814_v50 = vmax.f32 %v9718_v40, -128.0  ;;  %v815_v56 = vmax.f32 %v9719_v17, -128.0  ;;  %v9905_v45 = vld [vmem:[%s14061_s0 + $0x70] sm:$0x3] }
  0xb7   :  { %v813_v28 = vmax.f32 %v9717_v52, -128.0  ;;  %v816_v38 = vmax.f32 %v9720_v0, -128.0  ;;  %v817_v5 = vmax.f32 %v9721_v15, -128.0  ;;  %v818_v59 = vmax.f32 %v9722_v2, -128.0  ;;  %v9906_v40 = vld [vmem:[%s14061_s0 + $0x78] sm:$0xff] }
  0xb8   :  { %v919_v26 = vmin.f32 %v811_v9, 127.0  ;;  %v920_v43 = vmin.f32 %v812_v10, 127.0  ;;  %v922_v23 = vmin.f32 %v814_v50, 127.0  ;;  %v923_v16 = vmin.f32 %v815_v56, 127.0  ;;  %v9907_v56 = vld [vmem:[%s14061_s0 + $0x80] sm:$0xff] }
  0xb9   :  { %v921_v14 = vmin.f32 %v813_v28, 127.0  ;;  %v924_v36 = vmin.f32 %v816_v38, 127.0  ;;  %v925_v58 = vmin.f32 %v817_v5, 127.0  ;;  %v926_v35 = vmin.f32 %v818_v59, 127.0 }
  0xba   :  { %v1027_v18 = vmul.f32 %v919_v26, %v11042_v34  ;;  %v1028_v57 = vmul.f32 %v920_v43, %v11042_v34  ;;  %v1030_v22 = vmul.f32 %v922_v23, %v11042_v34  ;;  %v1031_v39 = vmul.f32 %v923_v16, %v11042_v34 }
  0xbb   :  { %v1029_v13 = vmul.f32 %v921_v14, %v11042_v34  ;;  %v1032_v8 = vmul.f32 %v924_v36, %v11042_v34  ;;  %v1033_v3 = vmul.f32 %v925_v58, %v11042_v34  ;;  %v1034_v47 = vmul.f32 %v926_v35, %v11042_v34 }
  0xbc   :  { %1135 = vst [vmem:[#allocation2] sm:$0xff] %v1027_v18  ;;  %1136 = vst [vmem:[#allocation2 + $0x8] sm:$0xff] %v1028_v57  ;;  %v603_v51 = vmul.f32 %v9899_v25, %v11165_v11  ;;  %v604_v6 = vmul.f32 %v9900_v42, %v11165_v11  ;;  %v605_v61 = vmul.f32 %v9901_v49, %v11165_v11 }
  0xbd   :  { %1138 = vst [vmem:[#allocation2 + $0x18] sm:$0xff] %v1030_v22  ;;  %1139 = vst [vmem:[#allocation2 + $0x20] sm:$0xff] %v1031_v39  ;;  %v606_v19 = vmul.f32 %v9902_v44, %v11165_v11  ;;  %v607_v30 = vmul.f32 %v9903_v32, %v11165_v11  ;;  %v608_v20 = vmul.f32 %v9904_v62, %v11165_v11 }
  0xbe   :  { %1137 = vst [vmem:[#allocation2 + $0x10] sm:$0x3] %v1029_v13  ;;  %1140 = vst [vmem:[#allocation2 + $0x28] sm:$0x3] %v1032_v8  ;;  %v609_v37 = vmul.f32 %v9905_v45, %v11165_v11  ;;  %v610_v17 = vmul.f32 %v9906_v40, %v11165_v11  ;;  %v9723_v52 = vround.rtne.f32 %v603_v51  ;;  %v9724_v0 = vround.rtne.f32 %v604_v6  ;;  %v9908_v45 = vld [vmem:[%s14061_s0 + $0x88] sm:$0x3] }
  0xbf   :  { %1141 = vst [vmem:[#allocation2 + $0x30] sm:$0xff] %v1033_v3  ;;  %1142 = vst [vmem:[#allocation2 + $0x38] sm:$0xff] %v1034_v47  ;;  %v9725_v15 = vround.rtne.f32 %v605_v61  ;;  %v9726_v2 = vround.rtne.f32 %v606_v19  ;;  %v9727_v9 = vround.rtne.f32 %v607_v30  ;;  %v9728_v10 = vround.rtne.f32 %v608_v20  ;;  %v9909_v40 = vld [vmem:[%s14061_s0 + $0x90] sm:$0xff] }
  0xc0   :  { %v9729_v50 = vround.rtne.f32 %v609_v37  ;;  %v611_v28 = vmul.f32 %v9907_v56, %v11165_v11  ;;  %v819_v38 = vmax.f32 %v9723_v52, -128.0  ;;  %v820_v5 = vmax.f32 %v9724_v0, -128.0  ;;  %v9910_v52 = vld [vmem:[%s14061_s0 + $0x98] sm:$0xff] }
  0xc1   :  { %v821_v59 = vmax.f32 %v9725_v15, -128.0  ;;  %v822_v26 = vmax.f32 %v9726_v2, -128.0  ;;  %v823_v43 = vmax.f32 %v9727_v9, -128.0  ;;  %v824_v23 = vmax.f32 %v9728_v10, -128.0  ;;  %v9911_v15 = vld [vmem:[%s14061_s0 + $0xa0] sm:$0x3] }
  0xc2   :  { %v825_v16 = vmax.f32 %v9729_v50, -128.0  ;;  %v9730_v14 = vround.rtne.f32 %v610_v17  ;;  %v927_v36 = vmin.f32 %v819_v38, 127.0  ;;  %v928_v58 = vmin.f32 %v820_v5, 127.0 }
  0xc3   :  { %v929_v35 = vmin.f32 %v821_v59, 127.0  ;;  %v930_v18 = vmin.f32 %v822_v26, 127.0  ;;  %v1323_v57 = vld [vmem:[#allocation2 + $0x1] sm:$0xff]  ;;  %v931_v39 = vmin.f32 %v823_v43, 127.0  ;;  %v932_v13 = vmin.f32 %v824_v23, 127.0 }
  0xc4   :  { %v3235_v22 = vld [vmem:[#allocation2 + $0x19] sm:$0xff]  ;;  %v933_v8 = vmin.f32 %v825_v16, 127.0  ;;  %v9731_v3 = vround.rtne.f32 %v611_v28  ;;  %7779 = vmatprep.mubr.f32.mxu1 %v1323_v57  ;;  %v1035_v42 = vmul.f32 %v927_v36, %v11042_v34  ;;  %v1036_v6 = vmul.f32 %v928_v58, %v11042_v34  ;;  %v9913_v28 = vld [vmem:[%s14061_s0 + $0xb0] sm:$0xff] }
  0xc5   :  { %8291 = vmatprep.mubr.f32.mxu0 %v3235_v22  ;;  %v1324_v47 = vld [vmem:[#allocation2 + $0x9] sm:$0xff]  ;;  %v3236_v25 = vld [vmem:[#allocation2 + $0x21] sm:$0xff]  ;;  %v1037_v49 = vmul.f32 %v929_v35, %v11042_v34  ;;  %v826_v61 = vmax.f32 %v9730_v14, -128.0  ;;  %v1038_v44 = vmul.f32 %v930_v18, %v11042_v34  ;;  %v1039_v19 = vmul.f32 %v931_v39, %v11042_v34  ;;  %v9914_v36 = vld [vmem:[%s14061_s0 + $0xb8] sm:$0x3] }
  0xc6   :  { %v3237_v51 = vld [vmem:[#allocation2 + $0x31] sm:$0xff]  ;;  %7780 = vmatmul.mubr.f32.vlgmr.msra.gmra.mrb[0].mxu1 %v1324_v47  ;;  %8292 = vmatmul.mubr.f32.vlgmr.msra.gmra.mrb[0].mxu0 %v3236_v25  ;;  %v1040_v32 = vmul.f32 %v932_v13, %v11042_v34  ;;  %v827_v30 = vmax.f32 %v9731_v3, -128.0  ;;  %1143 = vst [vmem:[#allocation2 + $0x40] sm:$0x3] %v1035_v42  ;;  %1144 = vst [vmem:[#allocation2 + $0x48] sm:$0xff] %v1036_v6  ;;  %v1041_v62 = vmul.f32 %v933_v8, %v11042_v34  ;;  %v9916_v6 = vld [vmem:[%s14061_s0 + $0xc8] sm:$0xff] }
  0xc7   :  { %9062 = vmatpush3.bf16.msra.mxu0 %v11021_v21  ;;  %7782 = vmatprep.mubr.f32.mxu1 %v3235_v22  ;;  %1145 = vst [vmem:[#allocation2 + $0x50] sm:$0xff] %v1037_v49  ;;  %v934_v20 = vmin.f32 %v826_v61, 127.0  ;;  %v612_v37 = vmul.f32 %v9908_v45, %v11165_v11  ;;  %v613_v17 = vmul.f32 %v9909_v40, %v11165_v11  ;;  %1146 = vst [vmem:[#allocation2 + $0x58] sm:$0x3] %v1038_v44 }
  0xc8   :  { %8934 = vmatpush3.bf16.msra.mxu1 %v11023_v41  ;;  %8294 = vmatprep.mubr.f32.mxu0 %v3237_v51  ;;  %1147 = vst [vmem:[#allocation2 + $0x60] sm:$0xff] %v1039_v19  ;;  %1148 = vst [vmem:[#allocation2 + $0x68] sm:$0xff] %v1040_v32  ;;  %v935_v21 = vmin.f32 %v827_v30, 127.0  ;;  %v614_v0 = vmul.f32 %v9910_v52, %v11165_v11  ;;  %v615_v2 = vmul.f32 %v9911_v15, %v11165_v11  ;;  %v9912_v41 = vld [vmem:[%s14061_s0 + $0xa8] sm:$0xff] }
  0xc9   :  { %v616_v9 = vmul.f32 %v9912_v41, %v11165_v11  ;;  %9064 = vmatprep.subr.bf16.mxu0 %v11132_v55  ;;  %1149 = vst [vmem:[#allocation2 + $0x70] sm:$0x3] %v1041_v62  ;;  %v1042_v10 = vmul.f32 %v934_v20, %v11042_v34  ;;  %v9732_v50 = vround.rtne.f32 %v612_v37  ;;  %8936 = vmatprep.subr.bf16.mxu1 %v11136_v27  ;;  %v9733_v56 = vround.rtne.f32 %v613_v17 }
  0xca   :  { %v617_v38 = vmul.f32 %v9913_v28, %v11165_v11  ;;  %7783 = vmatmul.mubr.f32.gmra.mrb[2].mxu1 %v3236_v25  ;;  %v1043_v5 = vmul.f32 %v935_v21, %v11042_v34  ;;  %v9734_v59 = vround.rtne.f32 %v614_v0  ;;  %v9735_v26 = vround.rtne.f32 %v615_v2  ;;  %v9917_v0 = vld [vmem:[%s14061_s0 + $0xd0] sm:$0x3] }
  0xcb   :  { %v9736_v43 = vround.rtne.f32 %v616_v9  ;;  %7785 = vmatprep.mubr.f32.mxu1 %v3237_v51  ;;  %9066 = vmatpush3.bf16.msra.mxu0 %v11132_v55  ;;  %1150 = vst [vmem:[#allocation2 + $0x78] sm:$0xff] %v1042_v10  ;;  %v828_v23 = vmax.f32 %v9732_v50, -128.0  ;;  %v829_v16 = vmax.f32 %v9733_v56, -128.0  ;;  %v618_v58 = vmul.f32 %v9914_v36, %v11165_v11  ;;  %v9915_v55 = vld [vmem:[%s14061_s0 + $0xc0] sm:$0xff] }
  0xcc   :  { %v9737_v14 = vround.rtne.f32 %v617_v38  ;;  %1151 = vst [vmem:[#allocation2 + $0x80] sm:$0xff] %v1043_v5  ;;  %9068 = vmatprep.subr.bf16.mxu0 %v11134_v54  ;;  %8938 = vmatpush3.bf16.msra.mxu1 %v11136_v27  ;;  %v830_v35 = vmax.f32 %v9734_v59, -128.0  ;;  %v831_v18 = vmax.f32 %v9735_v26, -128.0  ;;  %v619_v22 = vmul.f32 %v9915_v55, %v11165_v11  ;;  %v9919_v9 = vld [vmem:[%s14061_s0 + $0xe0] sm:$0xff]  ;;  %v9921_v5 = vld [vmem:[%s14061_s0 + $0xf0] sm:$0xff] }
  0xcd   :  { %v832_v57 = vmax.f32 %v9736_v43, -128.0  ;;  %v936_v39 = vmin.f32 %v828_v23, 127.0  ;;  %v937_v13 = vmin.f32 %v829_v16, 127.0  ;;  %v9738_v3 = vround.rtne.f32 %v618_v58  ;;  %8940 = vmatprep.subr.bf16.mxu1 %v11151_v63  ;;  %v3238_v47 = vld [vmem:[#allocation2 + $0x39] sm:$0xff] }
  0xce   :  { %v833_v8 = vmax.f32 %v9737_v14, -128.0  ;;  %v3239_v25 = vld [vmem:[#allocation2 + $0x49] sm:$0xff]  ;;  %v938_v51 = vmin.f32 %v830_v35, 127.0  ;;  %v939_v42 = vmin.f32 %v831_v18, 127.0  ;;  %v620_v49 = vmul.f32 %v9916_v6, %v11165_v11  ;;  %8295 = vmatmul.mubr.f32.gmra.mrb[2].mxu0 %v3238_v47  ;;  %7786 = vmatmul.mubr.f32.gmra.mrb[4].mxu1 %v3238_v47  ;;  %v3240_v30 = vld [vmem:[#allocation2 + $0x51] sm:$0xff] }
  0xcf   :  { %v940_v27 = vmin.f32 %v832_v57, 127.0  ;;  %v1044_v61 = vmul.f32 %v936_v39, %v11042_v34  ;;  %v1045_v44 = vmul.f32 %v937_v13, %v11042_v34  ;;  %v834_v32 = vmax.f32 %v9738_v3, -128.0  ;;  %8297 = vmatprep.mubr.f32.mxu0 %v3239_v25  ;;  %7788 = vmatprep.mubr.f32.mxu1 %v3239_v25  ;;  %v3241_v40 = vld [vmem:[#allocation2 + $0x61] sm:$0xff]  ;;  %v9922_v18 = vld [vmem:[%s14061_s0 + $0xf8] sm:$0xff] }
  0xd0   :  { %v941_v19 = vmin.f32 %v833_v8, 127.0  ;;  %v1046_v62 = vmul.f32 %v938_v51, %v11042_v34  ;;  %v1047_v20 = vmul.f32 %v939_v42, %v11042_v34  ;;  %v9739_v37 = vround.rtne.f32 %v619_v22  ;;  %9070 = vmatpush3.bf16.msra.mxu0 %v11134_v54  ;;  %8942 = vmatpush3.bf16.msra.mxu1 %v11151_v63  ;;  %v9918_v54 = vld [vmem:[%s14061_s0 + $0xd8] sm:$0xff]  ;;  %v9920_v63 = vld [vmem:[%s14061_s0 + $0xe8] sm:$0x3]  ;;  %v9923_v6 = vld [vmem:[%s14061_s0 + $0x100] sm:$0x3] }
  0xd1   :  { %v1048_v45 = vmul.f32 %v940_v27, %v11042_v34  ;;  %1152 = vst [vmem:[#allocation2 + $0x88] sm:$0x3] %v1044_v61  ;;  %1153 = vst [vmem:[#allocation2 + $0x90] sm:$0xff] %v1045_v44  ;;  %v942_v21 = vmin.f32 %v834_v32, 127.0  ;;  %v9740_v52 = vround.rtne.f32 %v620_v49  ;;  %v621_v15 = vmul.f32 %v9917_v0, %v11165_v11  ;;  %9072 = vmatprep.subr.bf16.mxu0 %v11138_v24  ;;  %v3242_v26 = vld [vmem:[#allocation2 + $0x69] sm:$0xff] }
  0xd2   :  { %v1049_v17 = vmul.f32 %v941_v19, %v11042_v34  ;;  %1154 = vst [vmem:[#allocation2 + $0x98] sm:$0xff] %v1046_v62  ;;  %1155 = vst [vmem:[#allocation2 + $0xa0] sm:$0x3] %v1047_v20  ;;  %v835_v2 = vmax.f32 %v9739_v37, -128.0  ;;  %v622_v41 = vmul.f32 %v9918_v54, %v11165_v11  ;;  %v623_v10 = vmul.f32 %v9919_v9, %v11165_v11 }
  0xd3   :  { %1156 = vst [vmem:[#allocation2 + $0xa8] sm:$0xff] %v1048_v45  ;;  %v624_v50 = vmul.f32 %v9920_v63, %v11165_v11  ;;  %8944 = vmatprep.subr.bf16.mxu1 %v11157_v53  ;;  %8298 = vmatmul.mubr.f32.gmra.mrb[4].mxu0 %v3240_v30  ;;  %v1050_v56 = vmul.f32 %v942_v21, %v11042_v34  ;;  %v836_v28 = vmax.f32 %v9740_v52, -128.0  ;;  %v9741_v38 = vround.rtne.f32 %v621_v15  ;;  %v3243_v36 = vld [vmem:[#allocation2 + $0x79] sm:$0xff] }
  0xd4   :  { %7789 = vmatmul.mubr.f32.gmra.mrb[6].mxu1 %v3240_v30  ;;  %1157 = vst [vmem:[#allocation2 + $0xb0] sm:$0xff] %v1049_v17  ;;  %v625_v59 = vmul.f32 %v9921_v5, %v11165_v11  ;;  %8300 = vmatprep.mubr.f32.mxu0 %v3241_v40  ;;  %v943_v43 = vmin.f32 %v835_v2, 127.0  ;;  %v9742_v23 = vround.rtne.f32 %v622_v41  ;;  %v9743_v16 = vround.rtne.f32 %v623_v10  ;;  %v9924_v30 = vld [vmem:[%s14061_s0 + $0x108] sm:$0xff]  ;;  %v9926_v2 = vld [vmem:[%s14061_s0 + $0x118] sm:$0x3]  ;;  %v9927_v41 = vld [vmem:[%s14061_s0 + $0x120] sm:$0xff] }
  0xd5   :  { %7791 = vmatprep.mubr.f32.mxu1 %v3241_v40  ;;  %v9744_v14 = vround.rtne.f32 %v624_v50  ;;  %1158 = vst [vmem:[#allocation2 + $0xb8] sm:$0x3] %v1050_v56  ;;  %9074 = vmatpush3.bf16.msra.mxu0 %v11138_v24  ;;  %v944_v58 = vmin.f32 %v836_v28, 127.0  ;;  %v837_v35 = vmax.f32 %v9741_v38, -128.0  ;;  %v626_v57 = vmul.f32 %v9922_v18, %v11165_v11  ;;  %v9928_v10 = vld [vmem:[%s14061_s0 + $0x128] sm:$0xff] }
  0xd6   :  { %v9745_v55 = vround.rtne.f32 %v625_v59  ;;  %8946 = vmatpush3.bf16.msra.mxu1 %v11157_v53  ;;  %v1051_v22 = vmul.f32 %v943_v43, %v11042_v34  ;;  %v838_v39 = vmax.f32 %v9742_v23, -128.0  ;;  %v839_v13 = vmax.f32 %v9743_v16, -128.0  ;;  %9076 = vmatprep.subr.bf16.mxu0 %v11149_v46  ;;  %v9929_v5 = vld [vmem:[%s14061_s0 + $0x130] sm:$0x3] }
  0xd7   :  { %v840_v8 = vmax.f32 %v9744_v14, -128.0  ;;  %8948 = vmatprep.subr.bf16.mxu1 %v11163_v7  ;;  %8301 = vmatmul.mubr.f32.gmra.mrb[6].mxu0 %v3242_v26  ;;  %v1052_v24 = vmul.f32 %v944_v58, %v11042_v34  ;;  %v945_v3 = vmin.f32 %v837_v35, 127.0  ;;  %v9746_v47 = vround.rtne.f32 %v626_v57  ;;  %v9930_v58 = vld [vmem:[%s14061_s0 + $0x138] sm:$0xff] }
  0xd8   :  { %7792 = vmatmul.mubr.f32.gmra.mrb[8].mxu1 %v3242_v26  ;;  %v841_v25 = vmax.f32 %v9745_v55, -128.0  ;;  %8303 = vmatprep.mubr.f32.mxu0 %v3243_v36  ;;  %v3244_v51 = vld [vmem:[#allocation2 + $0x81] sm:$0xff]  ;;  %1159 = vst [vmem:[#allocation2 + $0xc0] sm:$0xff] %v1051_v22  ;;  %v946_v53 = vmin.f32 %v838_v39, 127.0  ;;  %v947_v42 = vmin.f32 %v839_v13, 127.0  ;;  %v627_v49 = vmul.f32 %v9923_v6, %v11165_v11 }
  0xd9   :  { %7794 = vmatprep.mubr.f32.mxu1 %v3243_v36  ;;  %v948_v27 = vmin.f32 %v840_v8, 127.0  ;;  %v3245_v61 = vld [vmem:[#allocation2 + $0x91] sm:$0xff]  ;;  %1160 = vst [vmem:[#allocation2 + $0xc8] sm:$0xff] %v1052_v24  ;;  %v1053_v44 = vmul.f32 %v945_v3, %v11042_v34  ;;  %9078 = vmatpush3.bf16.msra.mxu0 %v11149_v46  ;;  %v842_v19 = vmax.f32 %v9746_v47, -128.0  ;;  %v628_v62 = vmul.f32 %v9924_v30, %v11165_v11  ;;  %v3246_v0 = vld [vmem:[#allocation2 + $0x99] sm:$0xff] }
  0xda   :  { %v949_v32 = vmin.f32 %v841_v25, 127.0  ;;  %8950 = vmatpush3.bf16.msra.mxu1 %v11163_v7  ;;  %v1054_v20 = vmul.f32 %v946_v53, %v11042_v34  ;;  %v1055_v45 = vmul.f32 %v947_v42, %v11042_v34  ;;  %v9747_v40 = vround.rtne.f32 %v627_v49  ;;  %9080 = vmatprep.subr.bf16.mxu0 %v11153_v12  ;;  %v9925_v7 = vld [vmem:[%s14061_s0 + $0x110] sm:$0xff]  ;;  %v9931_v3 = vld [vmem:[%s14061_s0 + $0x140] sm:$0xff] }
  0xdb   :  { %v1056_v37 = vmul.f32 %v948_v27, %v11042_v34  ;;  %8952 = vmatprep.subr.bf16.mxu1 %v11169_v1  ;;  %8304 = vmatmul.mubr.f32.gmra.mrb[8].mxu0 %v3244_v51  ;;  %1161 = vst [vmem:[#allocation2 + $0xd0] sm:$0x3] %v1053_v44  ;;  %v950_v46 = vmin.f32 %v842_v19, 127.0  ;;  %v629_v21 = vmul.f32 %v9925_v7, %v11165_v11  ;;  %v9748_v52 = vround.rtne.f32 %v628_v62  ;;  %v3247_v50 = vld [vmem:[#allocation2 + $0xa9] sm:$0xff]  ;;  %v9934_v7 = vld [vmem:[%s14061_s0 + $0x158] sm:$0xff] }
  0xdc   :  { %7795 = vmatmul.mubr.f32.gmra.mrb[10].mxu1 %v3244_v51  ;;  %v1057_v17 = vmul.f32 %v949_v32, %v11042_v34  ;;  %8306 = vmatprep.mubr.f32.mxu0 %v3245_v61  ;;  %1162 = vst [vmem:[#allocation2 + $0xd8] sm:$0xff] %v1054_v20  ;;  %1163 = vst [vmem:[#allocation2 + $0xe0] sm:$0xff] %v1055_v45  ;;  %v843_v15 = vmax.f32 %v9747_v40, -128.0  ;;  %v630_v54 = vmul.f32 %v9926_v2, %v11165_v11  ;;  %v3248_v35 = vld [vmem:[#allocation2 + $0xb1] sm:$0xff] }
  0xdd   :  { %7797 = vmatprep.mubr.f32.mxu1 %v3245_v61  ;;  %1164 = vst [vmem:[#allocation2 + $0xe8] sm:$0x3] %v1056_v37  ;;  %v631_v9 = vmul.f32 %v9927_v41, %v11165_v11  ;;  %v632_v63 = vmul.f32 %v9928_v10, %v11165_v11  ;;  %v1058_v56 = vmul.f32 %v950_v46, %v11042_v34  ;;  %v9749_v28 = vround.rtne.f32 %v629_v21  ;;  %v9933_v40 = vld [vmem:[%s14061_s0 + $0x150] sm:$0xff] }
  0xde   :  { %1165 = vst [vmem:[#allocation2 + $0xf0] sm:$0xff] %v1057_v17  ;;  %v844_v38 = vmax.f32 %v9748_v52, -128.0  ;;  %9082 = vmatpush3.bf16.msra.mxu0 %v11153_v12  ;;  %v633_v59 = vmul.f32 %v9929_v5, %v11165_v11  ;;  %8954 = vmatpush3.bf16.msra.mxu1 %v11169_v1  ;;  %v951_v26 = vmin.f32 %v843_v15, 127.0  ;;  %v9750_v43 = vround.rtne.f32 %v630_v54  ;;  %v9935_v52 = vld [vmem:[%s14061_s0 + $0x160] sm:$0x3] }
  0xdf   :  { %v9751_v23 = vround.rtne.f32 %v631_v9  ;;  %v9752_v16 = vround.rtne.f32 %v632_v63  ;;  %9084 = vmatprep.subr.bf16.mxu0 %v11155_v60  ;;  %8956 = vmatprep.subr.bf16.mxu1 %v11173_v48  ;;  %1166 = vst [vmem:[#allocation2 + $0xf8] sm:$0xff] %v1058_v56  ;;  %v845_v12 = vmax.f32 %v9749_v28, -128.0  ;;  %v634_v1 = vmul.f32 %v9930_v58, %v11165_v11  ;;  %v9937_v9 = vld [vmem:[%s14061_s0 + $0x170] sm:$0xff] }
  0xe0   :  { %8307 = vmatmul.mubr.f32.gmra.mrb[10].mxu0 %v3246_v0  ;;  %7798 = vmatmul.mubr.f32.gmra.mrb[12].mxu1 %v3246_v0  ;;  %v952_v14 = vmin.f32 %v844_v38, 127.0  ;;  %v9753_v36 = vround.rtne.f32 %v633_v59  ;;  %v1059_v18 = vmul.f32 %v951_v26, %v11042_v34  ;;  %v846_v57 = vmax.f32 %v9750_v43, -128.0  ;;  %v3249_v39 = vld [vmem:[#allocation2 + $0xc1] sm:$0xff] }
  0xe1   :  { %8309 = vmatprep.mubr.f32.mxu0 %v3247_v50  ;;  %7800 = vmatprep.mubr.f32.mxu1 %v3247_v50  ;;  %v847_v55 = vmax.f32 %v9751_v23, -128.0  ;;  %v848_v22 = vmax.f32 %v9752_v16, -128.0  ;;  %v953_v13 = vmin.f32 %v845_v12, 127.0  ;;  %v635_v47 = vmul.f32 %v9931_v3, %v11165_v11 }
  0xe2   :  { %v1060_v8 = vmul.f32 %v952_v14, %v11042_v34  ;;  %v849_v24 = vmax.f32 %v9753_v36, -128.0  ;;  %9086 = vmatpush3.bf16.msra.mxu0 %v11155_v60  ;;  %8958 = vmatpush3.bf16.msra.mxu1 %v11173_v48  ;;  %1167 = vst [vmem:[#allocation2 + $0x100] sm:$0x3] %v1059_v18  ;;  %v954_v25 = vmin.f32 %v846_v57, 127.0  ;;  %v9754_v42 = vround.rtne.f32 %v634_v1  ;;  %v9932_v60 = vld [vmem:[%s14061_s0 + $0x148] sm:$0x3] }
  0xe3   :  { %v955_v51 = vmin.f32 %v847_v55, 127.0  ;;  %v956_v53 = vmin.f32 %v848_v22, 127.0  ;;  %9088 = vmatprep.subr.bf16.mxu0 %v11159_v29  ;;  %v1061_v27 = vmul.f32 %v953_v13, %v11042_v34  ;;  %v9755_v49 = vround.rtne.f32 %v635_v47  ;;  %v3250_v61 = vld [vmem:[#allocation2 + $0xc9] sm:$0xff]  ;;  %v3251_v62 = vld [vmem:[#allocation2 + $0xd9] sm:$0xff] }
  0xe4   :  { %8310 = vmatmul.mubr.f32.gmra.mrb[12].mxu0 %v3248_v35  ;;  %7801 = vmatmul.mubr.f32.gmra.mrb[14].mxu1 %v3248_v35  ;;  %1168 = vst [vmem:[#allocation2 + $0x108] sm:$0xff] %v1060_v8  ;;  %v957_v6 = vmin.f32 %v849_v24, 127.0  ;;  %v636_v48 = vmul.f32 %v9932_v60, %v11165_v11  ;;  %v1062_v44 = vmul.f32 %v954_v25, %v11042_v34  ;;  %v850_v30 = vmax.f32 %v9754_v42, -128.0  ;;  %v3252_v63 = vld [vmem:[#allocation2 + $0xe1] sm:$0xff]  ;;  %v9938_v36 = vld [vmem:[%s14061_s0 + $0x178] sm:$0x3] }
  0xe5   :  { %8312 = vmatprep.mubr.f32.mxu0 %v3249_v39  ;;  %7803 = vmatprep.mubr.f32.mxu1 %v3249_v39  ;;  %v1063_v19 = vmul.f32 %v955_v51, %v11042_v34  ;;  %v1064_v32 = vmul.f32 %v956_v53, %v11042_v34  ;;  %1169 = vst [vmem:[#allocation2 + $0x110] sm:$0xff] %v1061_v27  ;;  %v851_v45 = vmax.f32 %v9755_v49, -128.0  ;;  %v9939_v57 = vld [vmem:[%s14061_s0 + $0x180] sm:$0xff]  ;;  %v9940_v51 = vld [vmem:[%s14061_s0 + $0x188] sm:$0xff] }
  0xe6   :  { %v1065_v20 = vmul.f32 %v957_v6, %v11042_v34  ;;  %v9756_v37 = vround.rtne.f32 %v636_v48  ;;  %v637_v46 = vmul.f32 %v9933_v40, %v11165_v11  ;;  %9090 = vmatpush3.bf16.msra.mxu0 %v11159_v29  ;;  %1170 = vst [vmem:[#allocation2 + $0x118] sm:$0x3] %v1062_v44  ;;  %v958_v17 = vmin.f32 %v850_v30, 127.0  ;;  %v9936_v29 = vld [vmem:[%s14061_s0 + $0x168] sm:$0xff]  ;;  %v3253_v5 = vld [vmem:[#allocation2 + $0xf1] sm:$0xff] }
  0xe7   :  { %1171 = vst [vmem:[#allocation2 + $0x120] sm:$0xff] %v1063_v19  ;;  %1172 = vst [vmem:[#allocation2 + $0x128] sm:$0xff] %v1064_v32  ;;  %v638_v21 = vmul.f32 %v9934_v7, %v11165_v11  ;;  %v639_v0 = vmul.f32 %v9935_v52, %v11165_v11  ;;  %v640_v15 = vmul.f32 %v9936_v29, %v11165_v11  ;;  %9092 = vmatprep.subr.bf16.mxu0 %v11161_v4  ;;  %v9941_v19 = vld [vmem:[%s14061_s0 + $0x190] sm:$0x3]  ;;  %v9945_v29 = vld [vmem:[%s14061_s0 + $0x1c8] sm:$0xff] }
  0xe8   :  { %8313 = vmatmul.mubr.f32.gmra.mrb[14].mxu0 %v3250_v61  ;;  %7804 = vmatmul.mubr.f32.gmra.mrb[16].mxu1 %v3250_v61  ;;  %1173 = vst [vmem:[#allocation2 + $0x130] sm:$0x3] %v1065_v20  ;;  %v959_v2 = vmin.f32 %v851_v45, 127.0  ;;  %v852_v54 = vmax.f32 %v9756_v37, -128.0  ;;  %v9757_v41 = vround.rtne.f32 %v637_v46  ;;  %v641_v10 = vmul.f32 %v9937_v9, %v11165_v11  ;;  %v9942_v20 = vld [vmem:[%s14061_s0 + $0x1b0] sm:$0xff]  ;;  %v9943_v37 = vld [vmem:[%s14061_s0 + $0x1b8] sm:$0xff] }
  0xe9   :  { %8315 = vmatprep.mubr.f32.mxu0 %v3251_v62  ;;  %7806 = vmatprep.mubr.f32.mxu1 %v3251_v62  ;;  %v1066_v50 = vmul.f32 %v958_v17, %v11042_v34  ;;  %v9758_v56 = vround.rtne.f32 %v638_v21  ;;  %v9759_v28 = vround.rtne.f32 %v639_v0  ;;  %v9760_v38 = vround.rtne.f32 %v640_v15  ;;  %v3254_v22 = vld [vmem:[#allocation2 + $0xf9] sm:$0xff] }
  0xea   :  { %v1067_v59 = vmul.f32 %v959_v2, %v11042_v34  ;;  %v960_v26 = vmin.f32 %v852_v54, 127.0  ;;  %v853_v43 = vmax.f32 %v9757_v41, -128.0  ;;  %v9761_v23 = vround.rtne.f32 %v641_v10  ;;  %v9944_v46 = vld [vmem:[%s14061_s0 + $0x1c0] sm:$0x3] }
  0xeb   :  { %1174 = vst [vmem:[#allocation2 + $0x138] sm:$0xff] %v1066_v50  ;;  %v854_v16 = vmax.f32 %v9758_v56, -128.0  ;;  %v855_v12 = vmax.f32 %v9759_v28, -128.0  ;;  %v856_v14 = vmax.f32 %v9760_v38, -128.0  ;;  %v642_v58 = vmul.f32 %v9938_v36, %v11165_v11  ;;  %v9946_v56 = vld [vmem:[%s14061_s0 + $0x1d0] sm:$0xff] }
  0xec   :  { %8316 = vmatmul.mubr.f32.gmra.mrb[16].mxu0 %v3252_v63  ;;  %7807 = vmatmul.mubr.f32.gmra.mrb[18].mxu1 %v3252_v63  ;;  %1175 = vst [vmem:[#allocation2 + $0x140] sm:$0xff] %v1067_v59  ;;  %v1068_v1 = vmul.f32 %v960_v26, %v11042_v34  ;;  %v961_v35 = vmin.f32 %v853_v43, 127.0  ;;  %v857_v18 = vmax.f32 %v9761_v23, -128.0  ;;  %v643_v55 = vmul.f32 %v9939_v57, %v11165_v11  ;;  %v3255_v3 = vld [vmem:[#allocation2 + $0x109] sm:$0xff]  ;;  %v9947_v36 = vld [vmem:[%s14061_s0 + $0x1d8] sm:$0x3] }
  0xed   :  { %8318 = vmatprep.mubr.f32.mxu0 %v3253_v5  ;;  %7809 = vmatprep.mubr.f32.mxu1 %v3253_v5  ;;  %v962_v39 = vmin.f32 %v854_v16, 127.0  ;;  %v963_v13 = vmin.f32 %v855_v12, 127.0  ;;  %v964_v8 = vmin.f32 %v856_v14, 127.0  ;;  %v9762_v24 = vround.rtne.f32 %v642_v58  ;;  %v3256_v30 = vld [vmem:[#allocation2 + $0x111] sm:$0xff] }
  0xee   :  { %1176 = vst [vmem:[#allocation2 + $0x148] sm:$0x3] %v1068_v1  ;;  %v1069_v47 = vmul.f32 %v961_v35, %v11042_v34  ;;  %v965_v25 = vmin.f32 %v857_v18, 127.0  ;;  %v644_v53 = vmul.f32 %v9940_v51, %v11165_v11  ;;  %v9763_v42 = vround.rtne.f32 %v643_v55  ;;  %v3257_v7 = vld [vmem:[#allocation2 + $0x121] sm:$0xff] }
  0xef   :  { %v1070_v27 = vmul.f32 %v962_v39, %v11042_v34  ;;  %v1071_v6 = vmul.f32 %v963_v13, %v11042_v34  ;;  %v1072_v49 = vmul.f32 %v964_v8, %v11042_v34  ;;  %v858_v60 = vmax.f32 %v9762_v24, -128.0  ;;  %v3258_v38 = vld [vmem:[#allocation2 + $0x129] sm:$0xff]  ;;  %v9948_v13 = vld [vmem:[%s14061_s0 + $0x1e0] sm:$0xff] }
  0xf0   :  { %8319 = vmatmul.mubr.f32.gmra.mrb[18].mxu0 %v3254_v22  ;;  %7810 = vmatmul.mubr.f32.gmra.mrb[20].mxu1 %v3254_v22  ;;  %1177 = vst [vmem:[#allocation2 + $0x150] sm:$0xff] %v1069_v47  ;;  %v1073_v48 = vmul.f32 %v965_v25, %v11042_v34  ;;  %v9764_v61 = vround.rtne.f32 %v644_v53  ;;  %v859_v44 = vmax.f32 %v9763_v42, -128.0  ;;  %v645_v32 = vmul.f32 %v9941_v19, %v11165_v11  ;;  %v9951_v19 = vld [vmem:[%s14061_s0 + $0x1f8] sm:$0xff] }
  0xf1   :  { %8321 = vmatprep.mubr.f32.mxu0 %v3255_v3  ;;  %7812 = vmatprep.mubr.f32.mxu1 %v3255_v3  ;;  %1178 = vst [vmem:[#allocation2 + $0x158] sm:$0xff] %v1070_v27  ;;  %1179 = vst [vmem:[#allocation2 + $0x160] sm:$0x3] %v1071_v6  ;;  %v966_v62 = vmin.f32 %v858_v60, 127.0  ;;  %v649_v45 = vmul.f32 %v9942_v20, %v11165_v11  ;;  %v650_v40 = vmul.f32 %v9943_v37, %v11165_v11  ;;  %v9949_v6 = vld [vmem:[%s14061_s0 + $0x1e8] sm:$0xff] }
  0xf2   :  { %1180 = vst [vmem:[#allocation2 + $0x168] sm:$0xff] %v1072_v49  ;;  %v651_v17 = vmul.f32 %v9944_v46, %v11165_v11  ;;  %1181 = vst [vmem:[#allocation2 + $0x170] sm:$0xff] %v1073_v48  ;;  %v860_v21 = vmax.f32 %v9764_v61, -128.0  ;;  %v967_v52 = vmin.f32 %v859_v44, 127.0  ;;  %v9765_v0 = vround.rtne.f32 %v645_v32  ;;  %v9950_v61 = vld [vmem:[%s14061_s0 + $0x1f0] sm:$0x3] }
  0xf3   :  { %v652_v15 = vmul.f32 %v9945_v29, %v11165_v11  ;;  %v1074_v2 = vmul.f32 %v966_v62, %v11042_v34  ;;  %v9769_v54 = vround.rtne.f32 %v649_v45  ;;  %v9770_v41 = vround.rtne.f32 %v650_v40  ;;  %v3259_v23 = vld [vmem:[#allocation2 + $0x139] sm:$0xff] }
  0xf4   :  { %v9771_v9 = vround.rtne.f32 %v651_v17  ;;  %8322 = vmatmul.mubr.f32.gmra.mrb[20].mxu0 %v3256_v30  ;;  %7813 = vmatmul.mubr.f32.gmra.mrb[22].mxu1 %v3256_v30  ;;  %v968_v10 = vmin.f32 %v860_v21, 127.0  ;;  %v1075_v63 = vmul.f32 %v967_v52, %v11042_v34  ;;  %v861_v50 = vmax.f32 %v9765_v0, -128.0  ;;  %v9952_v30 = vld [vmem:[%s14061_s0 + $0x200] sm:$0xff]  ;;  %v9953_v52 = vld [vmem:[%s14061_s0 + $0x208] sm:$0x3] }
  0xf5   :  { %v653_v28 = vmul.f32 %v9946_v56, %v11165_v11  ;;  %8324 = vmatprep.mubr.f32.mxu0 %v3257_v7  ;;  %7815 = vmatprep.mubr.f32.mxu1 %v3257_v7  ;;  %1182 = vst [vmem:[#allocation2 + $0x178] sm:$0x3] %v1074_v2  ;;  %v865_v5 = vmax.f32 %v9769_v54, -128.0  ;;  %v866_v59 = vmax.f32 %v9770_v41, -128.0  ;;  %v9772_v43 = vround.rtne.f32 %v652_v15  ;;  %v3260_v24 = vld [vmem:[#allocation2 + $0x141] sm:$0xff]  ;;  %v9954_v41 = vld [vmem:[%s14061_s0 + $0x210] sm:$0xff] }
  0xf6   :  { %v867_v26 = vmax.f32 %v9771_v9, -128.0  ;;  %v1076_v16 = vmul.f32 %v968_v10, %v11042_v34  ;;  %1183 = vst [vmem:[#allocation2 + $0x180] sm:$0xff] %v1075_v63  ;;  %v969_v12 = vmin.f32 %v861_v50, 127.0  ;;  %v654_v58 = vmul.f32 %v9947_v36, %v11165_v11 }
  0xf7   :  { %v9773_v14 = vround.rtne.f32 %v653_v28  ;;  %v973_v1 = vmin.f32 %v865_v5, 127.0  ;;  %v974_v35 = vmin.f32 %v866_v59, 127.0  ;;  %v868_v57 = vmax.f32 %v9772_v43, -128.0  ;;  %v9955_v5 = vld [vmem:[%s14061_s0 + $0x218] sm:$0xff] }
  0xf8   :  { %v975_v18 = vmin.f32 %v867_v26, 127.0  ;;  %8325 = vmatmul.mubr.f32.gmra.mrb[22].mxu0 %v3258_v38  ;;  %7816 = vmatmul.mubr.f32.gmra.mrb[24].mxu1 %v3258_v38  ;;  %1184 = vst [vmem:[#allocation2 + $0x188] sm:$0xff] %v1076_v16  ;;  %v1077_v55 = vmul.f32 %v969_v12, %v11042_v34  ;;  %v9774_v39 = vround.rtne.f32 %v654_v58  ;;  %v655_v8 = vmul.f32 %v9948_v13, %v11165_v11  ;;  %v3261_v53 = vld [vmem:[#allocation2 + $0x151] sm:$0xff]  ;;  %v3262_v46 = vld [vmem:[#allocation2 + $0x159] sm:$0xff] }
  0xf9   :  { %v869_v22 = vmax.f32 %v9773_v14, -128.0  ;;  %8327 = vmatprep.mubr.f32.mxu0 %v3259_v23  ;;  %7818 = vmatprep.mubr.f32.mxu1 %v3259_v23  ;;  %v1081_v3 = vmul.f32 %v973_v1, %v11042_v34  ;;  %v1082_v47 = vmul.f32 %v974_v35, %v11042_v34  ;;  %v976_v51 = vmin.f32 %v868_v57, 127.0  ;;  %v3263_v29 = vld [vmem:[#allocation2 + $0x169] sm:$0xff]  ;;  %v9956_v57 = vld [vmem:[%s14061_s0 + $0x220] sm:$0x3] }
  0xfa   :  { %v1083_v25 = vmul.f32 %v975_v18, %v11042_v34  ;;  %1185 = vst [vmem:[#allocation2 + $0x190] sm:$0x3] %v1077_v55  ;;  %v870_v27 = vmax.f32 %v9774_v39, -128.0  ;;  %v656_v49 = vmul.f32 %v9949_v6, %v11165_v11  ;;  %v9775_v60 = vround.rtne.f32 %v655_v8  ;;  %v9958_v6 = vld [vmem:[%s14061_s0 + $0x230] sm:$0xff] }
  0xfb   :  { %v977_v42 = vmin.f32 %v869_v22, 127.0  ;;  %1189 = vst [vmem:[#allocation2 + $0x1b0] sm:$0xff] %v1081_v3  ;;  %1190 = vst [vmem:[#allocation2 + $0x1b8] sm:$0xff] %v1082_v47  ;;  %v1084_v48 = vmul.f32 %v976_v51, %v11042_v34  ;;  %v657_v44 = vmul.f32 %v9950_v61, %v11165_v11  ;;  %v658_v32 = vmul.f32 %v9951_v19, %v11165_v11  ;;  %v3765_v61 = vld [vmem:[#allocation2 + $0x1a] sm:$0xff] }
  0xfc   :  { %1191 = vst [vmem:[#allocation2 + $0x1c0] sm:$0x3] %v1083_v25  ;;  %v659_v62 = vmul.f32 %v9952_v30, %v11165_v11  ;;  %8328 = vmatmul.mubr.f32.gmra.mrb[24].mxu0 %v3260_v24  ;;  %7819 = vmatmul.mubr.f32.gmra.mrb[26].mxu1 %v3260_v24  ;;  %v978_v45 = vmin.f32 %v870_v27, 127.0  ;;  %v9776_v37 = vround.rtne.f32 %v656_v49  ;;  %v871_v40 = vmax.f32 %v9775_v60, -128.0  ;;  %v3264_v43 = vld [vmem:[#allocation2 + $0x171] sm:$0xff]  ;;  %v9957_v25 = vld [vmem:[%s14061_s0 + $0x228] sm:$0xff] }
  0xfd   :  { %v1085_v20 = vmul.f32 %v977_v42, %v11042_v34  ;;  %8330 = vmatprep.mubr.f32.mxu0 %v3261_v53  ;;  %7821 = vmatprep.mubr.f32.mxu1 %v3261_v53  ;;  %1192 = vst [vmem:[#allocation2 + $0x1c8] sm:$0xff] %v1084_v48  ;;  %v9777_v17 = vround.rtne.f32 %v657_v44  ;;  %v9778_v7 = vround.rtne.f32 %v658_v32  ;;  %v660_v0 = vmul.f32 %v9953_v52, %v11165_v11  ;;  %v9959_v60 = vld [vmem:[%s14061_s0 + $0x238] sm:$0x3] }
  0xfe   :  { %v9779_v21 = vround.rtne.f32 %v659_v62  ;;  %v1086_v15 = vmul.f32 %v978_v45, %v11042_v34  ;;  %v872_v2 = vmax.f32 %v9776_v37, -128.0  ;;  %v979_v54 = vmin.f32 %v871_v40, 127.0  ;;  %v9960_v37 = vld [vmem:[%s14061_s0 + $0x240] sm:$0xff] }
  0xff   :  { %1193 = vst [vmem:[#allocation2 + $0x1d0] sm:$0xff] %v1085_v20  ;;  %v661_v9 = vmul.f32 %v9954_v41, %v11165_v11  ;;  %v873_v10 = vmax.f32 %v9777_v17, -128.0  ;;  %v874_v63 = vmax.f32 %v9778_v7, -128.0  ;;  %v9780_v56 = vround.rtne.f32 %v660_v0  ;;  %v3265_v36 = vld [vmem:[#allocation2 + $0x181] sm:$0xff]  ;;  %v9962_v0 = vld [vmem:[%s14061_s0 + $0x250] sm:$0x3] }
 0x100   :  { %v875_v50 = vmax.f32 %v9779_v21, -128.0  ;;  %8331 = vmatmul.mubr.f32.gmra.mrb[26].mxu0 %v3262_v46  ;;  %7822 = vmatmul.mubr.f32.gmra.mrb[28].mxu1 %v3262_v46  ;;  %1194 = vst [vmem:[#allocation2 + $0x1d8] sm:$0x3] %v1086_v15  ;;  %v980_v28 = vmin.f32 %v872_v2, 127.0  ;;  %v1087_v38 = vmul.f32 %v979_v54, %v11042_v34  ;;  %v662_v59 = vmul.f32 %v9955_v5, %v11165_v11  ;;  %v9961_v46 = vld [vmem:[%s14061_s0 + $0x248] sm:$0xff] }
 0x101   :  { %v9781_v26 = vround.rtne.f32 %v661_v9  ;;  %8333 = vmatprep.mubr.f32.mxu0 %v3263_v29  ;;  %7824 = vmatprep.mubr.f32.mxu1 %v3263_v29  ;;  %v981_v23 = vmin.f32 %v873_v10, 127.0  ;;  %v982_v16 = vmin.f32 %v874_v63, 127.0  ;;  %v876_v14 = vmax.f32 %v9780_v56, -128.0  ;;  %v3266_v53 = vld [vmem:[#allocation2 + $0x189] sm:$0xff]  ;;  %v3767_v63 = vld [vmem:[#allocation2 + $0x32] sm:$0xff] }
 0x102   :  { %v983_v12 = vmin.f32 %v875_v50, 127.0  ;;  %v1355_v58 = vld [vmem:[#allocation2 + $0x1b1] sm:$0xff]  ;;  %v1088_v1 = vmul.f32 %v980_v28, %v11042_v34  ;;  %1195 = vst [vmem:[#allocation2 + $0x1e0] sm:$0xff] %v1087_v38  ;;  %v9782_v35 = vround.rtne.f32 %v662_v59  ;;  %v663_v55 = vmul.f32 %v9956_v57, %v11165_v11  ;;  %v3766_v15 = vld [vmem:[#allocation2 + $0x22] sm:$0xff] }
 0x103   :  { %v877_v18 = vmax.f32 %v9781_v26, -128.0  ;;  %v1089_v22 = vmul.f32 %v981_v23, %v11042_v34  ;;  %v1090_v39 = vmul.f32 %v982_v16, %v11042_v34  ;;  %v984_v8 = vmin.f32 %v876_v14, 127.0  ;;  %v1356_v42 = vld [vmem:[#allocation2 + $0x1b9] sm:$0xff] }
 0x104   :  { %v1091_v13 = vmul.f32 %v983_v12, %v11042_v34  ;;  %8334 = vmatmul.mubr.f32.gmra.mrb[28].mxu0 %v3264_v43  ;;  %7825 = vmatmul.mubr.f32.gmra.mrb[30].mxu1 %v3264_v43  ;;  %1196 = vst [vmem:[#allocation2 + $0x1e8] sm:$0xff] %v1088_v1  ;;  %v878_v24 = vmax.f32 %v9782_v35, -128.0  ;;  %v9783_v47 = vround.rtne.f32 %v663_v55  ;;  %v664_v51 = vmul.f32 %v9957_v25, %v11165_v11  ;;  %v9963_v38 = vld [vmem:[%s14061_s0 + $0x258] sm:$0xff] }
 0x105   :  { %v985_v3 = vmin.f32 %v877_v18, 127.0  ;;  %8336 = vmatprep.mubr.f32.mxu0 %v3265_v36  ;;  %7827 = vmatprep.mubr.f32.mxu1 %v1355_v58  ;;  %1197 = vst [vmem:[#allocation2 + $0x1f0] sm:$0x3] %v1089_v22  ;;  %1198 = vst [vmem:[#allocation2 + $0x1f8] sm:$0xff] %v1090_v39  ;;  %v1092_v27 = vmul.f32 %v984_v8, %v11042_v34  ;;  %v665_v49 = vmul.f32 %v9958_v6, %v11165_v11  ;;  %v9964_v36 = vld [vmem:[%s14061_s0 + $0x260] sm:$0xff]  ;;  %v9967_v6 = vld [vmem:[%s14061_s0 + $0x278] sm:$0xff] }
 0x106   :  { %1199 = vst [vmem:[#allocation2 + $0x200] sm:$0xff] %v1091_v13  ;;  %v666_v48 = vmul.f32 %v9959_v60, %v11165_v11  ;;  %v1357_v44 = vld [vmem:[#allocation2 + $0x1c9] sm:$0xff]  ;;  %v986_v19 = vmin.f32 %v878_v24, 127.0  ;;  %v879_v30 = vmax.f32 %v9783_v47, -128.0  ;;  %v9784_v62 = vround.rtne.f32 %v664_v51  ;;  %v3768_v35 = vld [vmem:[#allocation2 + $0x3a] sm:$0xff] }
 0x107   :  { %v1093_v32 = vmul.f32 %v985_v3, %v11042_v34  ;;  %1200 = vst [vmem:[#allocation2 + $0x208] sm:$0x3] %v1092_v27  ;;  %v9785_v20 = vround.rtne.f32 %v665_v49  ;;  %v667_v40 = vmul.f32 %v9960_v37, %v11165_v11  ;;  %v668_v17 = vmul.f32 %v9961_v46, %v11165_v11  ;;  %v1358_v2 = vld [vmem:[#allocation2 + $0x1d1] sm:$0xff]  ;;  %v9969_v37 = vld [vmem:[%s14061_s0 + $0x288] sm:$0xff] }
 0x108   :  { %v9786_v45 = vround.rtne.f32 %v666_v48  ;;  %8337 = vmatmul.mubr.f32.gmra.mrb[30].mxu0 %v3266_v53  ;;  %7828 = vmatmul.mubr.f32.gmra.mrb[32].mxu1 %v1356_v42  ;;  %v1094_v7 = vmul.f32 %v986_v19, %v11042_v34  ;;  %v987_v21 = vmin.f32 %v879_v30, 127.0  ;;  %v880_v52 = vmax.f32 %v9784_v62, -128.0  ;;  %v3769_v13 = vld [vmem:[#allocation2 + $0x4a] sm:$0xff]  ;;  %v3770_v19 = vld [vmem:[#allocation2 + $0x52] sm:$0xff]  ;;  %v3771_v46 = vld [vmem:[#allocation2 + $0x62] sm:$0xff] }
 0x109   :  { %1201 = vst [vmem:[#allocation2 + $0x210] sm:$0xff] %v1093_v32  ;;  %v669_v29 = vmul.f32 %v9962_v0, %v11165_v11  ;;  %8419 = vmatprep.mubr.f32.mxu0 %v3765_v61  ;;  %7830 = vmatprep.mubr.f32.mxu1 %v1357_v44  ;;  %v881_v54 = vmax.f32 %v9785_v20, -128.0  ;;  %v9787_v9 = vround.rtne.f32 %v667_v40  ;;  %v9788_v10 = vround.rtne.f32 %v668_v17  ;;  %v9966_v42 = vld [vmem:[%s14061_s0 + $0x270] sm:$0xff]  ;;  %v9968_v20 = vld [vmem:[%s14061_s0 + $0x280] sm:$0x3] }
 0x10a   :  { %v882_v41 = vmax.f32 %v9786_v45, -128.0  ;;  %1202 = vst [vmem:[#allocation2 + $0x218] sm:$0xff] %v1094_v7  ;;  %v1095_v50 = vmul.f32 %v987_v21, %v11042_v34  ;;  %v988_v56 = vmin.f32 %v880_v52, 127.0  ;;  %v670_v5 = vmul.f32 %v9963_v38, %v11165_v11  ;;  %v9970_v0 = vld [vmem:[%s14061_s0 + $0x290] sm:$0xff] }
 0x10b   :  { %v9789_v28 = vround.rtne.f32 %v669_v29  ;;  %v1359_v59 = vld [vmem:[#allocation2 + $0x1e1] sm:$0xff]  ;;  %v989_v26 = vmin.f32 %v881_v54, 127.0  ;;  %v883_v23 = vmax.f32 %v9787_v9, -128.0  ;;  %v884_v16 = vmax.f32 %v9788_v10, -128.0 }
 0x10c   :  { %v990_v43 = vmin.f32 %v882_v41, 127.0  ;;  %8420 = vmatmul.mubr.f32.vlgmr.msra.gmra.mrb[0].mxu0 %v3766_v15  ;;  %7831 = vmatmul.mubr.f32.gmra.mrb[34].mxu1 %v1358_v2  ;;  %1203 = vst [vmem:[#allocation2 + $0x220] sm:$0x3] %v1095_v50  ;;  %v1096_v12 = vmul.f32 %v988_v56, %v11042_v34  ;;  %v671_v58 = vmul.f32 %v9964_v36, %v11165_v11  ;;  %v9790_v1 = vround.rtne.f32 %v670_v5  ;;  %v1360_v18 = vld [vmem:[#allocation2 + $0x1e9] sm:$0xff]  ;;  %v9972_v36 = vld [vmem:[%s14061_s0 + $0x2a0] sm:$0xff] }
 0x10d   :  { %v885_v14 = vmax.f32 %v9789_v28, -128.0  ;;  %9094 = vmatpush3.bf16.msra.mxu0 %v11161_v4  ;;  %8422 = vmatprep.mubr.f32.mxu0 %v3767_v63  ;;  %v1097_v57 = vmul.f32 %v989_v26, %v11042_v34  ;;  %v991_v22 = vmin.f32 %v883_v23, 127.0  ;;  %v992_v39 = vmin.f32 %v884_v16, 127.0  ;;  %v1361_v8 = vld [vmem:[#allocation2 + $0x1f9] sm:$0xff]  ;;  %v9965_v4 = vld [vmem:[%s14061_s0 + $0x268] sm:$0x3] }
 0x10e   :  { %v1098_v55 = vmul.f32 %v990_v43, %v11042_v34  ;;  %7833 = vmatprep.mubr.f32.mxu1 %v1359_v59  ;;  %9096 = vmatprep.subr.bf16.mxu0 %v11167_v31  ;;  %1204 = vst [vmem:[#allocation2 + $0x228] sm:$0xff] %v1096_v12  ;;  %v9791_v3 = vround.rtne.f32 %v671_v58  ;;  %v886_v47 = vmax.f32 %v9790_v1, -128.0  ;;  %v672_v25 = vmul.f32 %v9965_v4, %v11165_v11  ;;  %v1362_v32 = vld [vmem:[#allocation2 + $0x201] sm:$0xff]  ;;  %v9971_v63 = vld [vmem:[%s14061_s0 + $0x298] sm:$0x3]  ;;  %v3772_v56 = vld [vmem:[#allocation2 + $0x6a] sm:$0xff] }
 0x10f   :  { %v993_v24 = vmin.f32 %v885_v14, 127.0  ;;  %1205 = vst [vmem:[#allocation2 + $0x230] sm:$0xff] %v1097_v57  ;;  %v1099_v51 = vmul.f32 %v991_v22, %v11042_v34  ;;  %v1100_v53 = vmul.f32 %v992_v39, %v11042_v34  ;;  %v673_v27 = vmul.f32 %v9966_v42, %v11165_v11  ;;  %v3773_v43 = vld [vmem:[#allocation2 + $0x7a] sm:$0xff]  ;;  %v9974_v4 = vld [vmem:[%s14061_s0 + $0x2b0] sm:$0x3] }
 0x110   :  { %1206 = vst [vmem:[#allocation2 + $0x238] sm:$0x3] %v1098_v55  ;;  %v674_v49 = vmul.f32 %v9967_v6, %v11165_v11  ;;  %8423 = vmatmul.mubr.f32.gmra.mrb[2].mxu0 %v3768_v35  ;;  %7834 = vmatmul.mubr.f32.gmra.mrb[36].mxu1 %v1360_v18  ;;  %v887_v48 = vmax.f32 %v9791_v3, -128.0  ;;  %v994_v61 = vmin.f32 %v886_v47, 127.0  ;;  %v9792_v44 = vround.rtne.f32 %v672_v25 }
 0x111   :  { %v1101_v60 = vmul.f32 %v993_v24, %v11042_v34  ;;  %8425 = vmatprep.mubr.f32.mxu0 %v3769_v13  ;;  %7836 = vmatprep.mubr.f32.mxu1 %v1361_v8  ;;  %1207 = vst [vmem:[#allocation2 + $0x240] sm:$0xff] %v1099_v51  ;;  %1208 = vst [vmem:[#allocation2 + $0x248] sm:$0xff] %v1100_v53  ;;  %v9793_v30 = vround.rtne.f32 %v673_v27  ;;  %v675_v45 = vmul.f32 %v9968_v20, %v11165_v11  ;;  %v1363_v17 = vld [vmem:[#allocation2 + $0x211] sm:$0xff]  ;;  %v3774_v8 = vld [vmem:[#allocation2 + $0x82] sm:$0xff] }
 0x112   :  { %v9794_v62 = vround.rtne.f32 %v674_v49  ;;  %v676_v40 = vmul.f32 %v9969_v37, %v11165_v11  ;;  %9098 = vmatpush3.bf16.msra.mxu0 %v11167_v31  ;;  %v995_v7 = vmin.f32 %v887_v48, 127.0  ;;  %v1102_v21 = vmul.f32 %v994_v61, %v11042_v34  ;;  %v3775_v51 = vld [vmem:[#allocation2 + $0x92] sm:$0xff] }
 0x113   :  { %1209 = vst [vmem:[#allocation2 + $0x250] sm:$0x3] %v1101_v60  ;;  %v888_v52 = vmax.f32 %v9792_v44, -128.0  ;;  %v677_v29 = vmul.f32 %v9970_v0, %v11165_v11  ;;  %v889_v15 = vmax.f32 %v9793_v30, -128.0  ;;  %9100 = vmatprep.subr.bf16.mxu0 %v11171_v33  ;;  %v9795_v54 = vround.rtne.f32 %v675_v45  ;;  %v1364_v28 = vld [vmem:[#allocation2 + $0x219] sm:$0xff]  ;;  %v9978_v37 = vld [vmem:[%s14061_s0 + $0x2d0] sm:$0xff] }
 0x114   :  { %v890_v2 = vmax.f32 %v9794_v62, -128.0  ;;  %v9796_v41 = vround.rtne.f32 %v676_v40  ;;  %8426 = vmatmul.mubr.f32.gmra.mrb[4].mxu0 %v3770_v19  ;;  %7837 = vmatmul.mubr.f32.gmra.mrb[38].mxu1 %v1362_v32  ;;  %v1103_v31 = vmul.f32 %v995_v7, %v11042_v34  ;;  %1210 = vst [vmem:[#allocation2 + $0x258] sm:$0xff] %v1102_v21  ;;  %v678_v50 = vmul.f32 %v9971_v63, %v11165_v11  ;;  %v9975_v48 = vld [vmem:[%s14061_s0 + $0x2b8] sm:$0xff]  ;;  %v9976_v44 = vld [vmem:[%s14061_s0 + $0x2c0] sm:$0xff]  ;;  %v9977_v32 = vld [vmem:[%s14061_s0 + $0x2c8] sm:$0x3] }
 0x115   :  { %v996_v9 = vmin.f32 %v888_v52, 127.0  ;;  %v9797_v10 = vround.rtne.f32 %v677_v29  ;;  %8428 = vmatprep.mubr.f32.mxu0 %v3771_v46  ;;  %7839 = vmatprep.mubr.f32.mxu1 %v1363_v17  ;;  %v997_v38 = vmin.f32 %v889_v15, 127.0  ;;  %v891_v59 = vmax.f32 %v9795_v54, -128.0  ;;  %v6984_v46 = vld [vmem:[%s14060_s1 + $0x330] sm:$0xff]  ;;  %v3776_v17 = vld [vmem:[#allocation2 + $0x9a] sm:$0xff] }
 0x116   :  { %v998_v5 = vmin.f32 %v890_v2, 127.0  ;;  %v892_v26 = vmax.f32 %v9796_v41, -128.0  ;;  %v1365_v23 = vld [vmem:[#allocation2 + $0x229] sm:$0xff]  ;;  %1211 = vst [vmem:[#allocation2 + $0x260] sm:$0xff] %v1103_v31  ;;  %9102 = vmatpush3.bf16.msra.mxu0 %v11171_v33  ;;  %v9798_v14 = vround.rtne.f32 %v678_v50  ;;  %v679_v58 = vmul.f32 %v9972_v36, %v11165_v11  ;;  %v6985_v15 = vld [vmem:[%s14060_s1 + $0x338] sm:$0xff] }
 0x117   :  { %v1104_v16 = vmul.f32 %v996_v9, %v11042_v34  ;;  %v893_v12 = vmax.f32 %v9797_v10, -128.0  ;;  %v1105_v1 = vmul.f32 %v997_v38, %v11042_v34  ;;  %v999_v18 = vmin.f32 %v891_v59, 127.0  ;;  %v9973_v33 = vld [vmem:[%s14061_s0 + $0x2a8] sm:$0xff]  ;;  %v1366_v24 = vld [vmem:[#allocation2 + $0x231] sm:$0xff] }
 0x118   :  { %v1106_v35 = vmul.f32 %v998_v5, %v11042_v34  ;;  %v1000_v57 = vmin.f32 %v892_v26, 127.0  ;;  %8429 = vmatmul.mubr.f32.gmra.mrb[6].mxu0 %v3772_v56  ;;  %7840 = vmatmul.mubr.f32.gmra.mrb[40].mxu1 %v1364_v28  ;;  %v894_v22 = vmax.f32 %v9798_v14, -128.0  ;;  %v680_v39 = vmul.f32 %v9973_v33, %v11165_v11  ;;  %v1367_v53 = vld [vmem:[#allocation2 + $0x241] sm:$0xff]  ;;  %v3777_v2 = vld [vmem:[#allocation2 + $0xaa] sm:$0xff]  ;;  %v9979_v9 = vld [vmem:[%s14061_s0 + $0x2d8] sm:$0xff] }
 0x119   :  { %1212 = vst [vmem:[#allocation2 + $0x268] sm:$0x3] %v1104_v16  ;;  %v1001_v55 = vmin.f32 %v893_v12, 127.0  ;;  %v9799_v13 = vround.rtne.f32 %v679_v58  ;;  %8431 = vmatprep.mubr.f32.mxu0 %v3773_v43  ;;  %7842 = vmatprep.mubr.f32.mxu1 %v1365_v23  ;;  %1213 = vst [vmem:[#allocation2 + $0x270] sm:$0xff] %v1105_v1  ;;  %v1107_v3 = vmul.f32 %v999_v18, %v11042_v34  ;;  %v1321_v5 = vld [vmem:[%s14060_s1 + $0x70] sm:$0xff]  ;;  %v1322_v59 = vld [vmem:[%s14060_s1 + $0x78] sm:$0xff] }
 0x11a   :  { %1214 = vst [vmem:[#allocation2 + $0x278] sm:$0xff] %v1106_v35  ;;  %v1108_v47 = vmul.f32 %v1000_v57, %v11042_v34  ;;  %v681_v25 = vmul.f32 %v9974_v4, %v11165_v11  ;;  %v1002_v27 = vmin.f32 %v894_v22, 127.0  ;;  %v9800_v6 = vround.rtne.f32 %v680_v39  ;;  %v1368_v7 = vld [vmem:[#allocation2 + $0x249] sm:$0xff]  ;;  %v3778_v12 = vld [vmem:[#allocation2 + $0xb2] sm:$0xff]  ;;  %v9980_v33 = vld [vmem:[%s14061_s0 + $0x2e0] sm:$0x3] }
 0x11b   :  { %v1109_v42 = vmul.f32 %v1001_v55, %v11042_v34  ;;  %v895_v49 = vmax.f32 %v9799_v13, -128.0  ;;  %1215 = vst [vmem:[#allocation2 + $0x280] sm:$0x3] %v1107_v3  ;;  %v682_v61 = vmul.f32 %v9975_v48, %v11165_v11  ;;  %v683_v19 = vmul.f32 %v9976_v44, %v11165_v11  ;;  %v3779_v18 = vld [vmem:[#allocation2 + $0xc2] sm:$0xff]  ;;  %v9983_v48 = vld [vmem:[%s14061_s0 + $0x2f8] sm:$0x3] }
 0x11c   :  { %1216 = vst [vmem:[#allocation2 + $0x288] sm:$0xff] %v1108_v47  ;;  %v9801_v60 = vround.rtne.f32 %v681_v25  ;;  %v684_v30 = vmul.f32 %v9977_v32, %v11165_v11  ;;  %8432 = vmatmul.mubr.f32.gmra.mrb[8].mxu0 %v3774_v8  ;;  %7843 = vmatmul.mubr.f32.gmra.mrb[42].mxu1 %v1366_v24  ;;  %v1110_v62 = vmul.f32 %v1002_v27, %v11042_v34  ;;  %v896_v20 = vmax.f32 %v9800_v6, -128.0  ;;  %v9981_v47 = vld [vmem:[%s14061_s0 + $0x2e8] sm:$0xff]  ;;  %v9984_v44 = vld [vmem:[%s14061_s0 + $0x300] sm:$0xff] }
 0x11d   :  { %1217 = vst [vmem:[#allocation2 + $0x290] sm:$0xff] %v1109_v42  ;;  %v1003_v45 = vmin.f32 %v895_v49, 127.0  ;;  %v685_v40 = vmul.f32 %v9978_v37, %v11165_v11  ;;  %8434 = vmatprep.mubr.f32.mxu0 %v3775_v51  ;;  %7845 = vmatprep.mubr.f32.mxu1 %v1367_v53  ;;  %v9802_v52 = vround.rtne.f32 %v682_v61  ;;  %v9803_v0 = vround.rtne.f32 %v683_v19  ;;  %v1369_v54 = vld [vmem:[#allocation2 + $0x259] sm:$0xff]  ;;  %v9982_v42 = vld [vmem:[%s14061_s0 + $0x2f0] sm:$0xff]  ;;  %v9985_v32 = vld [vmem:[%s14061_s0 + $0x308] sm:$0xff] }
 0x11e   :  { %v897_v21 = vmax.f32 %v9801_v60, -128.0  ;;  %v9804_v29 = vround.rtne.f32 %v684_v30  ;;  %1218 = vst [vmem:[#allocation2 + $0x298] sm:$0x3] %v1110_v62  ;;  %v1004_v41 = vmin.f32 %v896_v20, 127.0  ;;  %v686_v10 = vmul.f32 %v9979_v9, %v11165_v11  ;;  %v3780_v6 = vld [vmem:[#allocation2 + $0xca] sm:$0xff]  ;;  %v3781_v62 = vld [vmem:[#allocation2 + $0xda] sm:$0xff] }
 0x11f   :  { %v11649_v31 = vmul.f32 %v1003_v45, %v11042_v34  ;;  %v9805_v63 = vround.rtne.f32 %v685_v40  ;;  %v898_v56 = vmax.f32 %v9802_v52, -128.0  ;;  %v899_v28 = vmax.f32 %v9803_v0, -128.0  ;;  %v3782_v9 = vld [vmem:[#allocation2 + $0xe2] sm:$0xff] }
 0x120   :  { %v1005_v50 = vmin.f32 %v897_v21, 127.0  ;;  %v900_v38 = vmax.f32 %v9804_v29, -128.0  ;;  %8435 = vmatmul.mubr.f32.gmra.mrb[10].mxu0 %v3776_v17  ;;  %7846 = vmatmul.mubr.f32.gmra.mrb[44].mxu1 %v1368_v7  ;;  %v11662_v26 = vmul.f32 %v1004_v41, %v11042_v34  ;;  %v9806_v43 = vround.rtne.f32 %v686_v10  ;;  %v1370_v14 = vld [vmem:[#allocation2 + $0x261] sm:$0xff] }
 0x121   :  { %1219 = vst [vmem:[#allocation2 + $0x2a0] sm:$0xff] %v11649_v31  ;;  %v901_v23 = vmax.f32 %v9805_v63, -128.0  ;;  %v9103_v16 = vpack.c.bf16 %v6985_v15, %v6984_v46  ;;  %8437 = vmatprep.mubr.f32.mxu0 %v3777_v2  ;;  %7848 = vmatprep.mubr.f32.mxu1 %v1369_v54  ;;  %v1006_v58 = vmin.f32 %v898_v56, 127.0  ;;  %v1007_v1 = vmin.f32 %v899_v28, 127.0  ;;  %v1371_v57 = vld [vmem:[#allocation2 + $0x271] sm:$0xff] }
 0x122   :  { %v1113_v36 = vmul.f32 %v1005_v50, %v11042_v34  ;;  %v1008_v35 = vmin.f32 %v900_v38, 127.0  ;;  %1220 = vst [vmem:[#allocation2 + $0x2a8] sm:$0xff] %v11662_v26  ;;  %v902_v55 = vmax.f32 %v9806_v43, -128.0  ;;  %v687_v39 = vmul.f32 %v9980_v33, %v11165_v11  ;;  %v1372_v49 = vld [vmem:[#allocation2 + $0x279] sm:$0xff]  ;;  %v9986_v46 = vld [vmem:[%s14061_s0 + $0x310] sm:$0x3] }
 0x123   :  { %v1009_v22 = vmin.f32 %v901_v23, 127.0  ;;  %9104 = vmatprep.subr.bf16.mxu0 %v9103_v16  ;;  %v8959_v13 = vpack.c.bf16 %v1322_v59, %v1321_v5  ;;  %v11672_v8 = vmul.f32 %v1006_v58, %v11042_v34  ;;  %v11675_v24 = vmul.f32 %v1007_v1, %v11042_v34  ;;  %v9987_v54 = vld [vmem:[%s14061_s0 + $0x318] sm:$0xff]  ;;  %v6987_v33 = vld [vmem:[%s14060_s1 + $0x348] sm:$0xff] }
 0x124   :  { %1221 = vst [vmem:[#allocation2 + $0x2b0] sm:$0x3] %v1113_v36  ;;  %v1116_v3 = vmul.f32 %v1008_v35, %v11042_v34  ;;  %9106 = vmatpush3.bf16.msra.mxu0 %v9103_v16  ;;  %v688_v4 = vmul.f32 %v9981_v47, %v11165_v11  ;;  %7849 = vmatmul.mubr.f32.gmra.mrb[46].mxu1 %v1370_v14  ;;  %v1010_v25 = vmin.f32 %v902_v55, 127.0  ;;  %v9807_v53 = vround.rtne.f32 %v687_v39  ;;  %v1373_v20 = vld [vmem:[#allocation2 + $0x289] sm:$0xff]  ;;  %v3783_v38 = vld [vmem:[#allocation2 + $0xf2] sm:$0xff]  ;;  %v9988_v16 = vld [vmem:[%s14061_s0 + $0x320] sm:$0xff] }
 0x125   :  { %8438 = vmatmul.mubr.f32.gmra.mrb[12].mxu0 %v3778_v12  ;;  %v11683_v51 = vmul.f32 %v1009_v22, %v11042_v34  ;;  %v689_v27 = vmul.f32 %v9982_v42, %v11165_v11  ;;  %7851 = vmatprep.mubr.f32.mxu1 %v1371_v57  ;;  %1222 = vst [vmem:[#allocation2 + $0x2b8] sm:$0xff] %v11672_v8  ;;  %1223 = vst [vmem:[#allocation2 + $0x2c0] sm:$0xff] %v11675_v24  ;;  %v1374_v10 = vld [vmem:[#allocation2 + $0x291] sm:$0xff]  ;;  %v6986_v35 = vld [vmem:[%s14060_s1 + $0x340] sm:$0xff] }
 0x126   :  { %8440 = vmatprep.mubr.f32.mxu0 %v3779_v18  ;;  %1224 = vst [vmem:[#allocation2 + $0x2c8] sm:$0x3] %v1116_v3  ;;  %v9808_v60 = vround.rtne.f32 %v688_v4  ;;  %v690_v61 = vmul.f32 %v9983_v48, %v11165_v11  ;;  %v691_v19 = vmul.f32 %v9984_v44, %v11165_v11  ;;  %v692_v30 = vmul.f32 %v9985_v32, %v11165_v11  ;;  %v6914_v39 = vld [vmem:[%s14060_s1 + $0x100] sm:$0xff]  ;;  %v6988_v42 = vld [vmem:[%s14060_s1 + $0x350] sm:$0xff] }
 0x127   :  { %v11704_v45 = vmul.f32 %v1010_v25, %v11042_v34  ;;  %1225 = vst [vmem:[#allocation2 + $0x2d0] sm:$0xff] %v11683_v51  ;;  %v903_v37 = vmax.f32 %v9807_v53, -128.0  ;;  %8960 = vmatprep.subr.bf16.mxu1 %v8959_v13  ;;  %v9809_v40 = vround.rtne.f32 %v689_v27  ;;  %v693_v17 = vmul.f32 %v9986_v46, %v11165_v11  ;;  %v3784_v3 = vld [vmem:[#allocation2 + $0xfa] sm:$0xff]  ;;  %v3785_v27 = vld [vmem:[#allocation2 + $0x10a] sm:$0xff] }
 0x128   :  { %v904_v7 = vmax.f32 %v9808_v60, -128.0  ;;  %8962 = vmatpush3.bf16.msra.mxu1 %v8959_v13  ;;  %v9810_v21 = vround.rtne.f32 %v690_v61  ;;  %v9811_v52 = vround.rtne.f32 %v691_v19  ;;  %v9812_v0 = vround.rtne.f32 %v692_v30  ;;  %v6915_v13 = vld [vmem:[%s14060_s1 + $0x108] sm:$0xff]  ;;  %v6989_v19 = vld [vmem:[%s14060_s1 + $0x358] sm:$0xff] }
 0x129   :  { %8441 = vmatmul.mubr.f32.gmra.mrb[14].mxu0 %v3780_v6  ;;  %7852 = vmatmul.mubr.f32.gmra.mrb[48].mxu1 %v1372_v49  ;;  %1226 = vst [vmem:[#allocation2 + $0x2d8] sm:$0xff] %v11704_v45  ;;  %v1011_v29 = vmin.f32 %v903_v37, 127.0  ;;  %v905_v15 = vmax.f32 %v9809_v40, -128.0  ;;  %v9813_v2 = vround.rtne.f32 %v693_v17  ;;  %v694_v41 = vmul.f32 %v9987_v54, %v11165_v11  ;;  %v1375_v5 = vld [vmem:[#allocation2 + $0x2a1] sm:$0xff]  ;;  %v3786_v40 = vld [vmem:[#allocation2 + $0x112] sm:$0xff] }
 0x12a   :  { %8443 = vmatprep.mubr.f32.mxu0 %v3781_v62  ;;  %7854 = vmatprep.mubr.f32.mxu1 %v1373_v20  ;;  %v1012_v63 = vmin.f32 %v904_v7, 127.0  ;;  %v906_v50 = vmax.f32 %v9810_v21, -128.0  ;;  %v907_v56 = vmax.f32 %v9811_v52, -128.0  ;;  %v908_v28 = vmax.f32 %v9812_v0, -128.0  ;;  %v9989_v61 = vld [vmem:[%s14061_s0 + $0x328] sm:$0x3] }
 0x12b   :  { %v1119_v59 = vmul.f32 %v1011_v29, %v11042_v34  ;;  %v1013_v43 = vmin.f32 %v905_v15, 127.0  ;;  %v909_v23 = vmax.f32 %v9813_v2, -128.0  ;;  %v695_v12 = vmul.f32 %v9988_v16, %v11165_v11  ;;  %v1376_v47 = vld [vmem:[#allocation2 + $0x2a9] sm:$0xff]  ;;  %v6990_v54 = vld [vmem:[%s14060_s1 + $0x360] sm:$0xff] }
 0x12c   :  { %v11722_v14 = vmul.f32 %v1012_v63, %v11042_v34  ;;  %v1014_v36 = vmin.f32 %v906_v50, 127.0  ;;  %v1015_v58 = vmin.f32 %v907_v56, 127.0  ;;  %v1016_v1 = vmin.f32 %v908_v28, 127.0  ;;  %v1377_v6 = vld [vmem:[#allocation2 + $0x2b9] sm:$0xff]  ;;  %v3787_v7 = vld [vmem:[#allocation2 + $0x122] sm:$0xff]  ;;  %v9990_v15 = vld [vmem:[%s14061_s0 + $0x330] sm:$0xff] }
 0x12d   :  { %8444 = vmatmul.mubr.f32.gmra.mrb[16].mxu0 %v3782_v9  ;;  %7855 = vmatmul.mubr.f32.gmra.mrb[50].mxu1 %v1374_v10  ;;  %1227 = vst [vmem:[#allocation2 + $0x2e0] sm:$0x3] %v1119_v59  ;;  %v11728_v18 = vmul.f32 %v1013_v43, %v11042_v34  ;;  %v1017_v57 = vmin.f32 %v909_v23, 127.0  ;;  %v9814_v55 = vround.rtne.f32 %v694_v41  ;;  %v9815_v22 = vround.rtne.f32 %v695_v12  ;;  %v1378_v46 = vld [vmem:[#allocation2 + $0x2c1] sm:$0xff]  ;;  %v9991_v9 = vld [vmem:[%s14061_s0 + $0x338] sm:$0xff] }
 0x12e   :  { %8446 = vmatprep.mubr.f32.mxu0 %v3783_v38  ;;  %7857 = vmatprep.mubr.f32.mxu1 %v1375_v5  ;;  %1228 = vst [vmem:[#allocation2 + $0x2e8] sm:$0xff] %v11722_v14  ;;  %v1122_v4 = vmul.f32 %v1014_v36, %v11042_v34  ;;  %v11742_v25 = vmul.f32 %v1015_v58, %v11042_v34  ;;  %v6991_v41 = vld [vmem:[%s14060_s1 + $0x368] sm:$0xff]  ;;  %v9992_v63 = vld [vmem:[%s14061_s0 + $0x340] sm:$0x3] }
 0x12f   :  { %v11745_v53 = vmul.f32 %v1016_v1, %v11042_v34  ;;  %1229 = vst [vmem:[#allocation2 + $0x2f0] sm:$0xff] %v11728_v18  ;;  %v1125_v49 = vmul.f32 %v1017_v57, %v11042_v34  ;;  %v910_v60 = vmax.f32 %v9814_v55, -128.0  ;;  %v911_v48 = vmax.f32 %v9815_v22, -128.0  ;;  %v3788_v38 = vld [vmem:[#allocation2 + $0x12a] sm:$0xff]  ;;  %v3789_v23 = vld [vmem:[#allocation2 + $0x13a] sm:$0xff] }
 0x130   :  { %v696_v44 = vmul.f32 %v9989_v61, %v11165_v11  ;;  %1230 = vst [vmem:[#allocation2 + $0x2f8] sm:$0x3] %v1122_v4  ;;  %1231 = vst [vmem:[#allocation2 + $0x300] sm:$0xff] %v11742_v25  ;;  %v9107_v32 = vpack.c.bf16 %v6987_v33, %v6986_v35  ;;  %v11761_v30 = vpack.c.bf16 %v6915_v13, %v6914_v39  ;;  %v1379_v21 = vld [vmem:[#allocation2 + $0x2d1] sm:$0xff]  ;;  %v3790_v33 = vld [vmem:[#allocation2 + $0x142] sm:$0xff] }
 0x131   :  { %1232 = vst [vmem:[#allocation2 + $0x308] sm:$0xff] %v11745_v53  ;;  %8447 = vmatmul.mubr.f32.gmra.mrb[18].mxu0 %v3784_v3  ;;  %7858 = vmatmul.mubr.f32.gmra.mrb[52].mxu1 %v1376_v47  ;;  %1233 = vst [vmem:[#allocation2 + $0x310] sm:$0x3] %v1125_v49  ;;  %v1018_v62 = vmin.f32 %v910_v60, 127.0  ;;  %v1019_v20 = vmin.f32 %v911_v48, 127.0  ;;  %v9111_v17 = vpack.c.bf16 %v6989_v19, %v6988_v42  ;;  %v6992_v1 = vld [vmem:[%s14060_s1 + $0x370] sm:$0xff] }
 0x132   :  { %v9816_v37 = vround.rtne.f32 %v696_v44  ;;  %8449 = vmatprep.mubr.f32.mxu0 %v3785_v27  ;;  %7860 = vmatprep.mubr.f32.mxu1 %v1377_v6  ;;  %v697_v2 = vmul.f32 %v9990_v15, %v11165_v11  ;;  %v698_v10 = vmul.f32 %v9991_v9, %v11165_v11  ;;  %v699_v50 = vmul.f32 %v9992_v63, %v11165_v11  ;;  %v6993_v35 = vld [vmem:[%s14060_s1 + $0x378] sm:$0xff]  ;;  %v6994_v60 = vld [vmem:[%s14060_s1 + $0x380] sm:$0xff]  ;;  %v6995_v48 = vld [vmem:[%s14060_s1 + $0x388] sm:$0xff] }
 0x133   :  { %v11764_v52 = vmul.f32 %v1018_v62, %v11042_v34  ;;  %v11767_v0 = vmul.f32 %v1019_v20, %v11042_v34  ;;  %9108 = vmatprep.subr.bf16.mxu0 %v9107_v32  ;;  %8964 = vmatprep.subr.bf16.mxu1 %v11761_v30  ;;  %v9115_v36 = vpack.c.bf16 %v6991_v41, %v6990_v54  ;;  %v3791_v47 = vld [vmem:[#allocation2 + $0x152] sm:$0xff]  ;;  %v3792_v61 = vld [vmem:[#allocation2 + $0x15a] sm:$0xff]  ;;  %v3793_v62 = vld [vmem:[#allocation2 + $0x16a] sm:$0xff] }
 0x134   :  { %v912_v29 = vmax.f32 %v9816_v37, -128.0  ;;  %9110 = vmatpush3.bf16.msra.mxu0 %v9107_v32  ;;  %v9817_v28 = vround.rtne.f32 %v697_v2  ;;  %v1380_v5 = vld [vmem:[#allocation2 + $0x2d9] sm:$0xff]  ;;  %v9818_v59 = vround.rtne.f32 %v698_v10  ;;  %v9819_v43 = vround.rtne.f32 %v699_v50  ;;  %v3795_v2 = vld [vmem:[#allocation2 + $0x182] sm:$0xff]  ;;  %v6916_v10 = vld [vmem:[%s14060_s1 + $0x110] sm:$0xff] }
 0x135   :  { %8450 = vmatmul.mubr.f32.gmra.mrb[20].mxu0 %v3786_v40  ;;  %7861 = vmatmul.mubr.f32.gmra.mrb[54].mxu1 %v1378_v46  ;;  %1234 = vst [vmem:[#allocation2 + $0x318] sm:$0xff] %v11764_v52  ;;  %1235 = vst [vmem:[#allocation2 + $0x320] sm:$0xff] %v11767_v0  ;;  %v9119_v42 = vpack.c.bf16 %v6993_v35, %v6992_v1  ;;  %v9993_v19 = vld [vmem:[%s14061_s0 + $0x198] sm:$0xff]  ;;  %v11816_v37 = vpack.c.bf16 %v6995_v48, %v6994_v60  ;;  %v9994_v40 = vld [vmem:[%s14061_s0 + $0x1a0] sm:$0xff] }
 0x136   :  { %v1020_v56 = vmin.f32 %v912_v29, 127.0  ;;  %8452 = vmatprep.mubr.f32.mxu0 %v3787_v7  ;;  %7863 = vmatprep.mubr.f32.mxu1 %v1379_v21  ;;  %v1381_v16 = vld [vmem:[#allocation2 + $0x2e9] sm:$0xff]  ;;  %v913_v58 = vmax.f32 %v9817_v28, -128.0  ;;  %v914_v57 = vmax.f32 %v9818_v59, -128.0  ;;  %v915_v55 = vmax.f32 %v9819_v43, -128.0  ;;  %v3794_v21 = vld [vmem:[#allocation2 + $0x172] sm:$0xff] }
 0x137   :  { %9112 = vmatprep.subr.bf16.mxu0 %v9111_v17  ;;  %v1382_v39 = vld [vmem:[#allocation2 + $0x2f1] sm:$0xff]  ;;  %v646_v32 = vmul.f32 %v9993_v19, %v11165_v11  ;;  %v647_v46 = vmul.f32 %v9994_v40, %v11165_v11  ;;  %v1243_v54 = vld [vmem:[#allocation2] sm:$0xff]  ;;  %v1244_v28 = vld [vmem:[#allocation2 + $0x8] sm:$0xff] }
 0x138   :  { %v1128_v12 = vmul.f32 %v1020_v56, %v11042_v34  ;;  %9114 = vmatpush3.bf16.msra.mxu0 %v9111_v17  ;;  %v1021_v22 = vmin.f32 %v913_v58, 127.0  ;;  %v1022_v13 = vmin.f32 %v914_v57, 127.0  ;;  %v1023_v3 = vmin.f32 %v915_v55, 127.0  ;;  %v1383_v4 = vld [vmem:[#allocation2 + $0x301] sm:$0xff]  ;;  %v1384_v44 = vld [vmem:[#allocation2 + $0x309] sm:$0xff]  ;;  %v6917_v63 = vld [vmem:[%s14060_s1 + $0x118] sm:$0xff] }
 0x139   :  { %8453 = vmatmul.mubr.f32.gmra.mrb[22].mxu0 %v3788_v38  ;;  %7864 = vmatmul.mubr.f32.gmra.mrb[56].mxu1 %v1380_v5  ;;  %v9766_v17 = vround.rtne.f32 %v646_v32  ;;  %v9767_v7 = vround.rtne.f32 %v647_v46  ;;  %v3796_v56 = vld [vmem:[#allocation2 + $0x18a] sm:$0xff]  ;;  %v1245_v59 = vld [vmem:[#allocation2 + $0x18] sm:$0xff]  ;;  %v1246_v58 = vld [vmem:[#allocation2 + $0x20] sm:$0xff] }
 0x13a   :  { %1236 = vst [vmem:[#allocation2 + $0x328] sm:$0x3] %v1128_v12  ;;  %8455 = vmatprep.mubr.f32.mxu0 %v3789_v23  ;;  %7866 = vmatprep.mubr.f32.mxu1 %v1381_v16  ;;  %v11798_v27 = vmul.f32 %v1021_v22, %v11042_v34  ;;  %v11801_v6 = vmul.f32 %v1022_v13, %v11042_v34  ;;  %v3797_v5 = vld [vmem:[#allocation2 + $0x1ca] sm:$0xff]  ;;  %v6918_v16 = vld [vmem:[%s14060_s1 + $0x120] sm:$0xff]  ;;  %v6921_v22 = vld [vmem:[%s14060_s1 + $0x138] sm:$0xff] }
 0x13b   :  { %9116 = vmatprep.subr.bf16.mxu0 %v9115_v36  ;;  %v1131_v49 = vmul.f32 %v1023_v3, %v11042_v34  ;;  %v862_v15 = vmax.f32 %v9766_v17, -128.0  ;;  %v863_v41 = vmax.f32 %v9767_v7, -128.0  ;;  %v8967_v23 = vpack.c.bf16 %v6917_v63, %v6916_v10  ;;  %v6919_v12 = vld [vmem:[%s14060_s1 + $0x128] sm:$0xff]  ;;  %v11844_v35 = vld [vmem:[#allocation2 + $0x30] sm:$0xff]  ;;  %v11867_v48 = vld [vmem:[#allocation2 + $0x60] sm:$0xff] }
 0x13c   :  { %9118 = vmatpush3.bf16.msra.mxu0 %v9115_v36  ;;  %1237 = vst [vmem:[#allocation2 + $0x330] sm:$0xff] %v11798_v27  ;;  %1238 = vst [vmem:[#allocation2 + $0x338] sm:$0xff] %v11801_v6  ;;  %v1385_v20 = vld [vmem:[#allocation2 + $0x319] sm:$0xff]  ;;  %v3799_v1 = vld [vmem:[#allocation2 + $0x1e2] sm:$0xff]  ;;  %v8971_v57 = vpack.c.bf16 %v6919_v12, %v6918_v16 }
 0x13d   :  { %8456 = vmatmul.mubr.f32.gmra.mrb[24].mxu0 %v3790_v33  ;;  %7867 = vmatmul.mubr.f32.gmra.mrb[58].mxu1 %v1382_v39  ;;  %1239 = vst [vmem:[#allocation2 + $0x340] sm:$0x3] %v1131_v49  ;;  %v970_v9 = vmin.f32 %v862_v15, 127.0  ;;  %v971_v50 = vmin.f32 %v863_v41, 127.0  ;;  %v3798_v36 = vld [vmem:[#allocation2 + $0x1d2] sm:$0xff]  ;;  %v3800_v33 = vld [vmem:[#allocation2 + $0x1ea] sm:$0xff] }
 0x13e   :  { %8458 = vmatprep.mubr.f32.mxu0 %v3791_v47  ;;  %7869 = vmatprep.mubr.f32.mxu1 %v1383_v4  ;;  %v6920_v55 = vld [vmem:[%s14060_s1 + $0x130] sm:$0xff]  ;;  %v3801_v39 = vld [vmem:[#allocation2 + $0x1fa] sm:$0xff]  ;;  %v11855_v13 = vld [vmem:[#allocation2 + $0x48] sm:$0xff] }
 0x13f   :  { %9120 = vmatprep.subr.bf16.mxu0 %v9119_v42  ;;  %v11830_v38 = vmul.f32 %v970_v9, %v11042_v34  ;;  %v11833_v43 = vmul.f32 %v971_v50, %v11042_v34  ;;  %v8975_v3 = vpack.c.bf16 %v6921_v22, %v6920_v55  ;;  %v6922_v47 = vld [vmem:[%s14060_s1 + $0x140] sm:$0xff]  ;;  %v6923_v4 = vld [vmem:[%s14060_s1 + $0x148] sm:$0xff]  ;;  %v11865_v49 = vld [vmem:[#allocation2 + $0x50] sm:$0xff] }
 0x140   :  { %9122 = vmatpush3.bf16.msra.mxu0 %v9119_v42  ;;  %v3802_v42 = vld [vmem:[#allocation2 + $0x202] sm:$0xff]  ;;  %v3803_v60 = vld [vmem:[#allocation2 + $0x212] sm:$0xff]  ;;  %v3804_v32 = vld [vmem:[#allocation2 + $0x21a] sm:$0xff] }
 0x141   :  { %8459 = vmatmul.mubr.f32.gmra.mrb[26].mxu0 %v3792_v61  ;;  %7870 = vmatmul.mubr.f32.gmra.mrb[60].mxu1 %v1384_v44  ;;  %v1386_v29 = vld [vmem:[#allocation2 + $0x321] sm:$0xff]  ;;  %1186 = vst [vmem:[#allocation2 + $0x198] sm:$0xff] %v11830_v38  ;;  %1187 = vst [vmem:[#allocation2 + $0x1a0] sm:$0xff] %v11833_v43  ;;  %v8979_v61 = vpack.c.bf16 %v6923_v4, %v6922_v47  ;;  %v6924_v44 = vld [vmem:[%s14060_s1 + $0x150] sm:$0xff] }
 0x142   :  { %8461 = vmatprep.mubr.f32.mxu0 %v3793_v62  ;;  %7872 = vmatprep.mubr.f32.mxu1 %v1385_v20  ;;  %v6925_v19 = vld [vmem:[%s14060_s1 + $0x158] sm:$0xff]  ;;  %v11877_v62 = vld [vmem:[#allocation2 + $0x68] sm:$0xff]  ;;  %v6926_v17 = vld [vmem:[%s14060_s1 + $0x160] sm:$0xff] }
 0x143   :  { %9124 = vmatprep.subr.bf16.mxu0 %v11816_v37  ;;  %v3805_v20 = vld [vmem:[#allocation2 + $0x22a] sm:$0xff]  ;;  %v11879_v40 = vld [vmem:[#allocation2 + $0x78] sm:$0xff]  ;;  %v8983_v46 = vpack.c.bf16 %v6925_v19, %v6924_v44  ;;  %v3807_v15 = vld [vmem:[#allocation2 + $0x242] sm:$0xff] }
 0x144   :  { %v6927_v7 = vld [vmem:[%s14060_s1 + $0x168] sm:$0xff]  ;;  %v6928_v41 = vld [vmem:[%s14060_s1 + $0x170] sm:$0xff]  ;;  %v6929_v9 = vld [vmem:[%s14060_s1 + $0x178] sm:$0xff] }
 0x145   :  { %8462 = vmatmul.mubr.f32.gmra.mrb[28].mxu0 %v3794_v21  ;;  %7873 = vmatmul.mubr.f32.gmra.mrb[62].mxu1 %v1386_v29  ;;  %v3806_v21 = vld [vmem:[#allocation2 + $0x232] sm:$0xff]  ;;  %v11889_v29 = vld [vmem:[#allocation2 + $0x80] sm:$0xff]  ;;  %v3808_v10 = vld [vmem:[#allocation2 + $0x24a] sm:$0xff] }
 0x146   :  { %8464 = vmatprep.mubr.f32.mxu0 %v3795_v2  ;;  %7907 = vmatprep.mubr.f32.mxu1 %v1243_v54  ;;  %v11891_v2 = vld [vmem:[#allocation2 + $0x90] sm:$0xff]  ;;  %v8987_v54 = vpack.c.bf16 %v6927_v7, %v6926_v17  ;;  %v11901_v63 = vld [vmem:[#allocation2 + $0x98] sm:$0xff]  ;;  %v3818_v44 = vld [vmem:[#allocation2 + $0x2c2] sm:$0xff] }
 0x147   :  { %v3809_v50 = vld [vmem:[#allocation2 + $0x25a] sm:$0xff]  ;;  %v11913_v16 = vld [vmem:[#allocation2 + $0xb0] sm:$0xff]  ;;  %v11946_v17 = vld [vmem:[#allocation2 + $0x128] sm:$0xff] }
 0x148   :  { %v3811_v12 = vld [vmem:[#allocation2 + $0x272] sm:$0xff]  ;;  %v3813_v55 = vld [vmem:[#allocation2 + $0x28a] sm:$0xff] }
 0x149   :  { %8465 = vmatmul.mubr.f32.gmra.mrb[30].mxu0 %v3796_v56  ;;  %7908 = vmatmul.mubr.f32.vlgmr.msra.gmra.mrb[0].mxu1 %v1244_v28  ;;  %v11903_v56 = vld [vmem:[#allocation2 + $0xa8] sm:$0xff]  ;;  %v8991_v28 = vpack.c.bf16 %v6929_v9, %v6928_v41  ;;  %v11923_v22 = vld [vmem:[#allocation2 + $0xd8] sm:$0xff]  ;;  %v11930_v47 = vld [vmem:[#allocation2 + $0xf0] sm:$0xff] }
 0x14a   :  { %8467 = vmatprep.mubr.f32.mxu0 %v3797_v5  ;;  %7910 = vmatprep.mubr.f32.mxu1 %v1245_v59  ;;  %v6930_v5 = vld [vmem:[%s14060_s1 + $0x180] sm:$0xff]  ;;  %v6931_v59 = vld [vmem:[%s14060_s1 + $0x188] sm:$0xff]  ;;  %v11940_v19 = vld [vmem:[#allocation2 + $0x110] sm:$0xff] }
 0x14b   :  { %8966 = vmatpush3.bf16.msra.mxu1 %v11761_v30  ;;  %v11853_v30 = vld [vmem:[#allocation2 + $0x38] sm:$0xff]  ;;  %v3816_v4 = vld [vmem:[#allocation2 + $0x2aa] sm:$0xff]  ;;  %v3823_v41 = vld [vmem:[#allocation2 + $0x302] sm:$0xff] }
 0x14c   :  { %8968 = vmatprep.subr.bf16.mxu1 %v8967_v23  ;;  %v3821_v7 = vld [vmem:[#allocation2 + $0x2ea] sm:$0xff] }
 0x14d   :  { %8468 = vmatmul.mubr.f32.gmra.mrb[32].mxu0 %v3798_v36  ;;  %7911 = vmatmul.mubr.f32.gmra.mrb[2].mxu1 %v1246_v58  ;;  %v11915_v36 = vld [vmem:[#allocation2 + $0xc0] sm:$0xff]  ;;  %v11917_v58 = vpack.c.bf16 %v6931_v59, %v6930_v5  ;;  %v11954_v9 = vld [vmem:[#allocation2 + $0x150] sm:$0xff] }
 0x14e   :  { %8470 = vmatprep.mubr.f32.mxu0 %v3799_v1  ;;  %7913 = vmatprep.mubr.f32.mxu1 %v11844_v35  ;;  %v3812_v1 = vld [vmem:[#allocation2 + $0x27a] sm:$0xff] }
 0x14f   :  { %8970 = vmatpush3.bf16.msra.mxu1 %v8967_v23  ;;  %v3810_v23 = vld [vmem:[#allocation2 + $0x262] sm:$0xff]  ;;  %v3825_v59 = vld [vmem:[#allocation2 + $0x31a] sm:$0xff] }
 0x150   :  { %8972 = vmatprep.subr.bf16.mxu1 %v8971_v57 }
 0x151   :  { %8471 = vmatmul.mubr.f32.gmra.mrb[34].mxu0 %v3800_v33  ;;  %7914 = vmatmul.mubr.f32.gmra.mrb[4].mxu1 %v11853_v30  ;;  %v3814_v33 = vld [vmem:[#allocation2 + $0x292] sm:$0xff] }
 0x152   :  { %8473 = vmatprep.mubr.f32.mxu0 %v3801_v39  ;;  %7916 = vmatprep.mubr.f32.mxu1 %v11855_v13  ;;  %v11928_v39 = vld [vmem:[#allocation2 + $0xe0] sm:$0xff] }
 0x153   :  { %8974 = vmatpush3.bf16.msra.mxu1 %v8971_v57  ;;  %v11921_v57 = vld [vmem:[#allocation2 + $0xc8] sm:$0xff] }
 0x154   :  { %8976 = vmatprep.subr.bf16.mxu1 %v8975_v3 }
 0x155   :  { %8474 = vmatmul.mubr.f32.gmra.mrb[36].mxu0 %v3802_v42  ;;  %7917 = vmatmul.mubr.f32.gmra.mrb[6].mxu1 %v11865_v49  ;;  %v11934_v42 = vld [vmem:[#allocation2 + $0xf8] sm:$0xff] }
 0x156   :  { %8476 = vmatprep.mubr.f32.mxu0 %v3803_v60  ;;  %7919 = vmatprep.mubr.f32.mxu1 %v11867_v48  ;;  %v3817_v60 = vld [vmem:[#allocation2 + $0x2ba] sm:$0xff] }
 0x157   :  { %8978 = vmatpush3.bf16.msra.mxu1 %v8975_v3  ;;  %v3815_v3 = vld [vmem:[#allocation2 + $0x2a2] sm:$0xff] }
 0x158   :  { %8980 = vmatprep.subr.bf16.mxu1 %v8979_v61 }
 0x159   :  { %8477 = vmatmul.mubr.f32.gmra.mrb[38].mxu0 %v3804_v32  ;;  %7920 = vmatmul.mubr.f32.gmra.mrb[8].mxu1 %v11877_v62  ;;  %v3819_v32 = vld [vmem:[#allocation2 + $0x2d2] sm:$0xff] }
 0x15a   :  { %8479 = vmatprep.mubr.f32.mxu0 %v3805_v20  ;;  %7922 = vmatprep.mubr.f32.mxu1 %v11879_v40  ;;  %v11942_v20 = vld [vmem:[#allocation2 + $0x120] sm:$0xff] }
 0x15b   :  { %8982 = vmatpush3.bf16.msra.mxu1 %v8979_v61  ;;  %v11936_v61 = vld [vmem:[#allocation2 + $0x108] sm:$0xff] }
 0x15c   :  { %8984 = vmatprep.subr.bf16.mxu1 %v8983_v46 }
 0x15d   :  { %8480 = vmatmul.mubr.f32.gmra.mrb[40].mxu0 %v3806_v21  ;;  %7923 = vmatmul.mubr.f32.gmra.mrb[10].mxu1 %v11889_v29  ;;  %v11948_v21 = vld [vmem:[#allocation2 + $0x138] sm:$0xff] }
 0x15e   :  { %8482 = vmatprep.mubr.f32.mxu0 %v3807_v15  ;;  %7925 = vmatprep.mubr.f32.mxu1 %v11891_v2  ;;  %v3822_v15 = vld [vmem:[#allocation2 + $0x2f2] sm:$0xff] }
 0x15f   :  { %8986 = vmatpush3.bf16.msra.mxu1 %v8983_v46  ;;  %v3820_v46 = vld [vmem:[#allocation2 + $0x2da] sm:$0xff] }
 0x160   :  { %8988 = vmatprep.subr.bf16.mxu1 %v8987_v54 }
 0x161   :  { %8483 = vmatmul.mubr.f32.gmra.mrb[42].mxu0 %v3808_v10  ;;  %7926 = vmatmul.mubr.f32.gmra.mrb[12].mxu1 %v11901_v63  ;;  %v3824_v10 = vld [vmem:[#allocation2 + $0x30a] sm:$0xff] }
 0x162   :  { %8485 = vmatprep.mubr.f32.mxu0 %v3809_v50  ;;  %7928 = vmatprep.mubr.f32.mxu1 %v11903_v56  ;;  %v11958_v50 = vld [vmem:[#allocation2 + $0x158] sm:$0xff] }
 0x163   :  { %8990 = vmatpush3.bf16.msra.mxu1 %v8987_v54  ;;  %v11952_v54 = vld [vmem:[#allocation2 + $0x140] sm:$0xff] }
 0x164   :  { %8992 = vmatprep.subr.bf16.mxu1 %v8991_v28 }
 0x165   :  { %8486 = vmatmul.mubr.f32.gmra.mrb[44].mxu0 %v3810_v23  ;;  %7929 = vmatmul.mubr.f32.gmra.mrb[14].mxu1 %v11913_v16  ;;  %v11964_v23 = vld [vmem:[#allocation2 + $0x168] sm:$0xff] }
 0x166   :  { %8488 = vmatprep.mubr.f32.mxu0 %v3811_v12  ;;  %7931 = vmatprep.mubr.f32.mxu1 %v11915_v36  ;;  %v9996_v12 = vld [vmem:[%s14061_s0 + $0x350] sm:$0xff] }
 0x167   :  { %8994 = vmatpush3.bf16.msra.mxu1 %v8991_v28  ;;  %v9995_v28 = vld [vmem:[%s14061_s0 + $0x348] sm:$0xff] }
 0x168   :  { %8996 = vmatprep.subr.bf16.mxu1 %v11917_v58  ;;  %v700_v5 = vmul.f32 %v9995_v28, %v11165_v11 }
 0x169   :  { %8489 = vmatmul.mubr.f32.gmra.mrb[46].mxu0 %v3812_v1  ;;  %7932 = vmatmul.mubr.f32.gmra.mrb[16].mxu1 %v11921_v57  ;;  %v701_v1 = vmul.f32 %v9996_v12, %v11165_v11  ;;  %v6996_v12 = vld [vmem:[%s14060_s1 + $0x390] sm:$0xff] }
 0x16a   :  { %8491 = vmatprep.mubr.f32.mxu0 %v3813_v55  ;;  %7934 = vmatprep.mubr.f32.mxu1 %v11923_v22  ;;  %v9820_v55 = vround.rtne.f32 %v700_v5  ;;  %v1277_v5 = vld [vmem:[#allocation2 + $0x1c8] sm:$0xff] }
 0x16d   :  { %8492 = vmatmul.mubr.f32.gmra.mrb[48].mxu0 %v3814_v33  ;;  %7935 = vmatmul.mubr.f32.gmra.mrb[18].mxu1 %v11928_v39  ;;  %v9821_v33 = vround.rtne.f32 %v701_v1  ;;  %v6997_v1 = vld [vmem:[%s14060_s1 + $0x398] sm:$0xff] }
 0x16e   :  { %8494 = vmatprep.mubr.f32.mxu0 %v3815_v3  ;;  %7937 = vmatprep.mubr.f32.mxu1 %v11930_v47  ;;  %v3826_v3 = vld [vmem:[#allocation2 + $0x322] sm:$0xff] }
 0x171   :  { %8495 = vmatmul.mubr.f32.gmra.mrb[50].mxu0 %v3816_v4  ;;  %7938 = vmatmul.mubr.f32.gmra.mrb[20].mxu1 %v11934_v42  ;;  %v11972_v4 = vld [vmem:[#allocation2 + $0x170] sm:$0xff] }
 0x172   :  { %8497 = vmatprep.mubr.f32.mxu0 %v3817_v60  ;;  %7940 = vmatprep.mubr.f32.mxu1 %v11936_v61  ;;  %v916_v60 = vmax.f32 %v9820_v55, -128.0  ;;  %v1278_v55 = vld [vmem:[#allocation2 + $0x1d0] sm:$0xff] }
 0x175   :  { %8498 = vmatmul.mubr.f32.gmra.mrb[52].mxu0 %v3818_v44  ;;  %7941 = vmatmul.mubr.f32.gmra.mrb[22].mxu1 %v11940_v19  ;;  %v3827_v44 = vld [vmem:[#allocation2 + $0x332] sm:$0xff] }
 0x176   :  { %8500 = vmatprep.mubr.f32.mxu0 %v3819_v32  ;;  %7943 = vmatprep.mubr.f32.mxu1 %v11942_v20  ;;  %v1275_v32 = vld [vmem:[#allocation2 + $0x1b0] sm:$0xff] }
 0x179   :  { %8501 = vmatmul.mubr.f32.gmra.mrb[54].mxu0 %v3820_v46  ;;  %7944 = vmatmul.mubr.f32.gmra.mrb[24].mxu1 %v11946_v17  ;;  %v917_v46 = vmax.f32 %v9821_v33, -128.0  ;;  %v9127_v33 = vpack.c.bf16 %v6997_v1, %v6996_v12  ;;  %v12044_v12 = vld [vmem:[#allocation2 + $0x230] sm:$0xff]  ;;  %v12046_v1 = vld [vmem:[#allocation2 + $0x240] sm:$0xff] }
 0x17a   :  { %8503 = vmatprep.mubr.f32.mxu0 %v3821_v7  ;;  %7946 = vmatprep.mubr.f32.mxu1 %v11948_v21  ;;  %v1024_v7 = vmin.f32 %v916_v60, 127.0  ;;  %v6998_v60 = vld [vmem:[%s14060_s1 + $0x3a0] sm:$0xff] }
 0x17c   :  { %v11976_v28 = vmul.f32 %v1024_v7, %v11042_v34  ;;  %v12018_v7 = vld [vmem:[#allocation2 + $0x210] sm:$0xff] }
 0x17d   :  { %8504 = vmatmul.mubr.f32.gmra.mrb[56].mxu0 %v3822_v15  ;;  %7947 = vmatmul.mubr.f32.gmra.mrb[26].mxu1 %v11952_v54  ;;  %v1025_v15 = vmin.f32 %v917_v46, 127.0  ;;  %v7000_v46 = vld [vmem:[%s14060_s1 + $0x3b0] sm:$0xff] }
 0x17e   :  { %8506 = vmatprep.mubr.f32.mxu0 %v3823_v41  ;;  %7949 = vmatprep.mubr.f32.mxu1 %v11954_v9  ;;  %v3828_v41 = vld [vmem:[#allocation2 + $0x33a] sm:$0xff]  ;;  %1240 = vst [vmem:[#allocation2 + $0x348] sm:$0xff] %v11976_v28 }
 0x181   :  { %8507 = vmatmul.mubr.f32.gmra.mrb[58].mxu0 %v3824_v10  ;;  %7950 = vmatmul.mubr.f32.gmra.mrb[28].mxu1 %v11958_v50  ;;  %v1276_v10 = vld [vmem:[#allocation2 + $0x1b8] sm:$0xff] }
 0x182   :  { %8509 = vmatprep.mubr.f32.mxu0 %v3825_v59  ;;  %7952 = vmatprep.mubr.f32.mxu1 %v11964_v23  ;;  %v11979_v59 = vmul.f32 %v1025_v15, %v11042_v34  ;;  %v7002_v15 = vld [vmem:[%s14060_s1 + $0x3c0] sm:$0xff] }
 0x184   :  { %1241 = vst [vmem:[#allocation2 + $0x350] sm:$0xff] %v11979_v59 }
 0x185   :  { %8510 = vmatmul.mubr.f32.gmra.mrb[60].mxu0 %v3826_v3  ;;  %7953 = vmatmul.mubr.f32.gmra.mrb[30].mxu1 %v11972_v4  ;;  %v11990_v3 = vld [vmem:[#allocation2 + $0x1e0] sm:$0xff] }
 0x186   :  { %8512 = vmatprep.mubr.f32.mxu0 %v3827_v44  ;;  %7955 = vmatprep.mubr.f32.mxu1 %v1275_v32  ;;  %v6999_v44 = vld [vmem:[%s14060_s1 + $0x3a8] sm:$0xff]  ;;  %v12004_v32 = vld [vmem:[#allocation2 + $0x1f8] sm:$0xff] }
 0x189   :  { %8513 = vmatmul.mubr.f32.gmra.mrb[62].mxu0 %v3828_v41  ;;  %7956 = vmatmul.mubr.f32.gmra.mrb[32].mxu1 %v1276_v10  ;;  %v12030_v41 = vld [vmem:[#allocation2 + $0x218] sm:$0xff]  ;;  %v12032_v10 = vld [vmem:[#allocation2 + $0x228] sm:$0xff] }
 0x18a   :  { %8547 = vmatprep.mubr.f32.mxu0 %v11844_v35  ;;  %7958 = vmatprep.mubr.f32.mxu1 %v1277_v5  ;;  %v12001_v35 = vld [vmem:[#allocation2 + $0x1e8] sm:$0xff]  ;;  %v7004_v5 = vld [vmem:[%s14060_s1 + $0x3d0] sm:$0xff] }
 0x18d   :  { %8548 = vmatmul.mubr.f32.vlgmr.msra.gmra.mrb[0].mxu0 %v11853_v30  ;;  %7959 = vmatmul.mubr.f32.gmra.mrb[34].mxu1 %v1278_v55  ;;  %v9131_v30 = vpack.c.bf16 %v6999_v44, %v6998_v60  ;;  %v7006_v55 = vld [vmem:[%s14060_s1 + $0x3e0] sm:$0xff]  ;;  %v7009_v44 = vld [vmem:[%s14060_s1 + $0x3f8] sm:$0xff] }
 0x18e   :  { %9126 = vmatpush3.bf16.msra.mxu0 %v11816_v37  ;;  %8550 = vmatprep.mubr.f32.mxu0 %v11855_v13  ;;  %v7001_v37 = vld [vmem:[%s14060_s1 + $0x3b8] sm:$0xff]  ;;  %v12016_v13 = vld [vmem:[#allocation2 + $0x200] sm:$0xff] }
 0x18f   :  { %7961 = vmatprep.mubr.f32.mxu1 %v11990_v3  ;;  %9128 = vmatprep.subr.bf16.mxu0 %v9127_v33 }
 0x191   :  { %8551 = vmatmul.mubr.f32.gmra.mrb[2].mxu0 %v11865_v49  ;;  %7962 = vmatmul.mubr.f32.gmra.mrb[36].mxu1 %v12001_v35  ;;  %v9135_v49 = vpack.c.bf16 %v7001_v37, %v7000_v46  ;;  %v7010_v46 = vld [vmem:[%s14060_s1 + $0x400] sm:$0xff]  ;;  %v7011_v37 = vld [vmem:[%s14060_s1 + $0x408] sm:$0xff] }
 0x192   :  { %8553 = vmatprep.mubr.f32.mxu0 %v11867_v48  ;;  %7964 = vmatprep.mubr.f32.mxu1 %v12004_v32  ;;  %v7003_v48 = vld [vmem:[%s14060_s1 + $0x3c8] sm:$0xff] }
 0x193   :  { %9130 = vmatpush3.bf16.msra.mxu0 %v9127_v33  ;;  %v12058_v33 = vld [vmem:[#allocation2 + $0x248] sm:$0xff] }
 0x194   :  { %9132 = vmatprep.subr.bf16.mxu0 %v9131_v30 }
 0x195   :  { %8554 = vmatmul.mubr.f32.gmra.mrb[4].mxu0 %v11877_v62  ;;  %7965 = vmatmul.mubr.f32.gmra.mrb[38].mxu1 %v12016_v13  ;;  %v9139_v62 = vpack.c.bf16 %v7003_v48, %v7002_v15  ;;  %v10001_v15 = vld [vmem:[#allocation2 + $0x288] sm:$0xff] }
 0x196   :  { %8556 = vmatprep.mubr.f32.mxu0 %v11879_v40  ;;  %7967 = vmatprep.mubr.f32.mxu1 %v12018_v7  ;;  %v7005_v40 = vld [vmem:[%s14060_s1 + $0x3d8] sm:$0xff] }
 0x197   :  { %9134 = vmatpush3.bf16.msra.mxu0 %v9131_v30 }
 0x198   :  { %9136 = vmatprep.subr.bf16.mxu0 %v9135_v49 }
 0x199   :  { %8557 = vmatmul.mubr.f32.gmra.mrb[6].mxu0 %v11889_v29  ;;  %7968 = vmatmul.mubr.f32.gmra.mrb[40].mxu1 %v12030_v41  ;;  %v9143_v29 = vpack.c.bf16 %v7005_v40, %v7004_v5  ;;  %v12181_v5 = vld [vmem:[#allocation2 + $0x258] sm:$0xff] }
 0x19a   :  { %8559 = vmatprep.mubr.f32.mxu0 %v11891_v2  ;;  %7970 = vmatprep.mubr.f32.mxu1 %v12032_v10  ;;  %v7007_v2 = vld [vmem:[%s14060_s1 + $0x3e8] sm:$0xff]  ;;  %v12183_v40 = vld [vmem:[#allocation2 + $0x92] sm:$0xff] }
 0x19b   :  { %9138 = vmatpush3.bf16.msra.mxu0 %v9135_v49  ;;  %v9147_v60 = vpack.c.bf16 %v7007_v2, %v7006_v55  ;;  %v12077_v49 = vpack.c.bf16 %v7011_v37, %v7010_v46  ;;  %v12194_v55 = vld [vmem:[#allocation2 + $0x260] sm:$0xff]  ;;  %v12218_v46 = vld [vmem:[#allocation2 + $0x290] sm:$0xff] }
 0x19c   :  { %9140 = vmatprep.subr.bf16.mxu0 %v9139_v62  ;;  %v12197_v2 = vld [vmem:[#allocation2 + $0x9a] sm:$0xff]  ;;  %v12221_v37 = vld [vmem:[#allocation2 + $0xca] sm:$0xff] }
 0x19d   :  { %8560 = vmatmul.mubr.f32.gmra.mrb[8].mxu0 %v11901_v63  ;;  %7971 = vmatmul.mubr.f32.gmra.mrb[42].mxu1 %v12044_v12  ;;  %v7008_v63 = vld [vmem:[%s14060_s1 + $0x3f0] sm:$0xff] }
 0x19e   :  { %8562 = vmatprep.mubr.f32.mxu0 %v11903_v56  ;;  %7973 = vmatprep.mubr.f32.mxu1 %v12046_v1  ;;  %v9997_v56 = vld [vmem:[#allocation2 + $0x258] sm:$0xff]  ;;  %v9151_v30 = vpack.c.bf16 %v7009_v44, %v7008_v63 }
 0x19f   :  { %9142 = vmatpush3.bf16.msra.mxu0 %v9139_v62  ;;  %v12179_v62 = vld [vmem:[#allocation2 + $0x82] sm:$0xff]  ;;  %v12206_v44 = vld [vmem:[#allocation2 + $0x278] sm:$0xff] }
 0x1a0   :  { %9144 = vmatprep.subr.bf16.mxu0 %v9143_v29 }
 0x1a1   :  { %8563 = vmatmul.mubr.f32.gmra.mrb[10].mxu0 %v11913_v16  ;;  %7974 = vmatmul.mubr.f32.gmra.mrb[44].mxu1 %v12058_v33  ;;  %v9998_v16 = vld [vmem:[#allocation2 + $0x260] sm:$0xff] }
 0x1a2   :  { %8565 = vmatprep.mubr.f32.mxu0 %v11915_v36  ;;  %7976 = vmatprep.mubr.f32.mxu1 %v9997_v56  ;;  %v9999_v36 = vld [vmem:[#allocation2 + $0x270] sm:$0xff] }
 0x1a3   :  { %9146 = vmatpush3.bf16.msra.mxu0 %v9143_v29  ;;  %v6944_v29 = vld [vmem:[%s14060_s1 + $0x1f0] sm:$0xff] }
 0x1a4   :  { %9148 = vmatprep.subr.bf16.mxu0 %v9147_v60  ;;  %v12209_v56 = vld [vmem:[#allocation2 + $0xb2] sm:$0xff] }
 0x1a5   :  { %8566 = vmatmul.mubr.f32.gmra.mrb[12].mxu0 %v11921_v57  ;;  %7977 = vmatmul.mubr.f32.gmra.mrb[46].mxu1 %v9998_v16  ;;  %v10000_v57 = vld [vmem:[#allocation2 + $0x278] sm:$0xff]  ;;  %v12213_v16 = vld [vmem:[#allocation2 + $0xc2] sm:$0xff] }
 0x1a6   :  { %8568 = vmatprep.mubr.f32.mxu0 %v11923_v22  ;;  %7979 = vmatprep.mubr.f32.mxu1 %v9999_v36  ;;  %v10002_v22 = vld [vmem:[#allocation2 + $0x290] sm:$0xff]  ;;  %v12223_v36 = vld [vmem:[#allocation2 + $0x2a0] sm:$0xff] }
 0x1a7   :  { %9150 = vmatpush3.bf16.msra.mxu0 %v9147_v60  ;;  %v12199_v60 = vld [vmem:[#allocation2 + $0x270] sm:$0xff] }
 0x1a8   :  { %9152 = vmatprep.subr.bf16.mxu0 %v9151_v30 }
 0x1a9   :  { %8569 = vmatmul.mubr.f32.gmra.mrb[14].mxu0 %v11928_v39  ;;  %7980 = vmatmul.mubr.f32.gmra.mrb[48].mxu1 %v10000_v57  ;;  %v12225_v57 = vld [vmem:[#allocation2 + $0xda] sm:$0xff] }
 0x1aa   :  { %8571 = vmatprep.mubr.f32.mxu0 %v11930_v47  ;;  %7982 = vmatprep.mubr.f32.mxu1 %v10001_v15  ;;  %v14333_v15 = vld [vmem:[#allocation5_spill] sm:$0xff] }
 0x1ab   :  { %9154 = vmatpush3.bf16.msra.mxu0 %v9151_v30  ;;  %v12211_v30 = vld [vmem:[#allocation2 + $0x288] sm:$0xff] }
 0x1ac   :  { %9156 = vmatprep.subr.bf16.mxu0 %v12077_v49 }
 0x1ad   :  { %8572 = vmatmul.mubr.f32.gmra.mrb[16].mxu0 %v11934_v42  ;;  %7983 = vmatmul.mubr.f32.gmra.mrb[50].mxu1 %v10002_v22  ;;  %v2176_v42 = vld [vmem:[#allocation2 + $0x1a] sm:$0xff]  ;;  %v12231_v22 = vld [vmem:[#allocation2 + $0x2a8] sm:$0xff] }
 0x1ae   :  { %8574 = vmatprep.mubr.f32.mxu0 %v11936_v61  ;;  %7985 = vmatprep.mubr.f32.mxu1 %v11649_v31  ;;  %v10003_v31 = vld [vmem:[%s14061_s0 + $0x1a8] sm:$0x3] }
 0x1af   :  { %v648_v39 = vmul.f32 %v10003_v31, %v11165_v11  ;;  %v12234_v31 = vld [vmem:[#allocation2 + $0xe2] sm:$0xff] }
 0x1b1   :  { %8575 = vmatmul.mubr.f32.gmra.mrb[18].mxu0 %v11940_v19  ;;  %7986 = vmatmul.mubr.f32.gmra.mrb[52].mxu1 %v11662_v26  ;;  %v9768_v26 = vround.rtne.f32 %v648_v39  ;;  %v2177_v19 = vld [vmem:[#allocation2 + $0x22] sm:$0xff]  ;;  %v12236_v39 = vld [vmem:[#allocation2 + $0x2b8] sm:$0xff] }
 0x1b2   :  { %8577 = vmatprep.mubr.f32.mxu0 %v11942_v20  ;;  %7988 = vmatprep.mubr.f32.mxu1 %v11672_v8 }
 0x1b3   :  { %v864_v8 = vmax.f32 %v9768_v26, -128.0  ;;  %v12238_v26 = vld [vmem:[#allocation2 + $0xf2] sm:$0xff] }
 0x1b5   :  { %8578 = vmatmul.mubr.f32.gmra.mrb[20].mxu0 %v11946_v17  ;;  %7989 = vmatmul.mubr.f32.gmra.mrb[54].mxu1 %v11675_v24  ;;  %v972_v24 = vmin.f32 %v864_v8, 127.0  ;;  %v6937_v17 = vld [vmem:[%s14060_s1 + $0x1b8] sm:$0xff]  ;;  %v12243_v8 = vld [vmem:[#allocation2 + $0x2c0] sm:$0xff] }
 0x1b6   :  { %8580 = vmatprep.mubr.f32.mxu0 %v11948_v21  ;;  %7991 = vmatprep.mubr.f32.mxu1 %v11683_v51  ;;  %v4324_v51 = vld [vmem:[#allocation2 + $0x180] sm:$0xff]  ;;  %v12139_v21 = vld [vmem:[#allocation2 + $0x4a] sm:$0xff] }
 0x1b7   :  { %v1080_v47 = vmul.f32 %v972_v24, %v11042_v34  ;;  %v12246_v24 = vld [vmem:[#allocation2 + $0xfa] sm:$0xff] }
 0x1b9   :  { %8581 = vmatmul.mubr.f32.gmra.mrb[22].mxu0 %v11952_v54  ;;  %7992 = vmatmul.mubr.f32.gmra.mrb[56].mxu1 %v11704_v45  ;;  %1188 = vst [vmem:[#allocation2 + $0x1a8] sm:$0x3] %v1080_v47  ;;  %v4325_v45 = vld [vmem:[#allocation2 + $0x188] sm:$0xff] }
 0x1ba   :  { %8583 = vmatprep.mubr.f32.mxu0 %v11954_v9  ;;  %7994 = vmatprep.mubr.f32.mxu1 %v11722_v14  ;;  %v2174_v14 = vld [vmem:[#allocation2 + $0x2] sm:$0xff]  ;;  %v12250_v47 = vld [vmem:[#allocation2 + $0x10a] sm:$0xff] }
 0x1bb   :  { %v6938_v9 = vld [vmem:[%s14060_s1 + $0x1c0] sm:$0xff] }
 0x1bd   :  { %8584 = vmatmul.mubr.f32.gmra.mrb[24].mxu0 %v11958_v50  ;;  %7995 = vmatmul.mubr.f32.gmra.mrb[58].mxu1 %v11728_v18  ;;  %v6932_v18 = vld [vmem:[%s14060_s1 + $0x190] sm:$0xff]  ;;  %v6939_v50 = vld [vmem:[%s14060_s1 + $0x1c8] sm:$0xff] }
 0x1be   :  { %8586 = vmatprep.mubr.f32.mxu0 %v11964_v23  ;;  %7997 = vmatprep.mubr.f32.mxu1 %v11742_v25  ;;  %v6933_v25 = vld [vmem:[%s14060_s1 + $0x198] sm:$0xff] }
 0x1bf   :  { %v8999_v61 = vpack.c.bf16 %v6933_v25, %v6932_v18  ;;  %v12151_v23 = vld [vmem:[#allocation2 + $0x52] sm:$0xff]  ;;  %v12260_v18 = vld [vmem:[#allocation2 + $0x2e8] sm:$0xff] }
 0x1c0   :  { %v12262_v25 = vld [vmem:[#allocation2 + $0x122] sm:$0xff] }
 0x1c1   :  { %8587 = vmatmul.mubr.f32.gmra.mrb[26].mxu0 %v11972_v4  ;;  %7998 = vmatmul.mubr.f32.gmra.mrb[60].mxu1 %v11745_v53  ;;  %v2175_v53 = vld [vmem:[#allocation2 + $0xa] sm:$0xff]  ;;  %v12153_v4 = vld [vmem:[#allocation2 + $0x62] sm:$0xff] }
 0x1c2   :  { %8589 = vmatprep.mubr.f32.mxu0 %v4324_v51  ;;  %8000 = vmatprep.mubr.f32.mxu1 %v11764_v52  ;;  %v6934_v52 = vld [vmem:[%s14060_s1 + $0x1a0] sm:$0xff]  ;;  %v12248_v51 = vld [vmem:[#allocation2 + $0x2d0] sm:$0xff] }
 0x1c5   :  { %8590 = vmatmul.mubr.f32.gmra.mrb[28].mxu0 %v4325_v45  ;;  %8001 = vmatmul.mubr.f32.gmra.mrb[62].mxu1 %v11767_v0  ;;  %v6935_v0 = vld [vmem:[%s14060_s1 + $0x1a8] sm:$0xff]  ;;  %v12255_v45 = vld [vmem:[#allocation2 + $0x2d8] sm:$0xff] }
 0x1c6   :  { %8592 = vmatprep.mubr.f32.mxu0 %v11830_v38  ;;  %8035 = vmatprep.mubr.f32.mxu1 %v2174_v14  ;;  %v12126_v38 = vld [vmem:[#allocation2 + $0x32] sm:$0xff]  ;;  %v9003_v20 = vpack.c.bf16 %v6935_v0, %v6934_v52  ;;  %v12274_v52 = vld [vmem:[#allocation2 + $0x13a] sm:$0xff] }
 0x1c7   :  { %v12258_v14 = vld [vmem:[#allocation2 + $0x112] sm:$0xff] }
 0x1c8   :  { %v10004_v0 = vld [vmem:[%s14061_s0 + $0x358] sm:$0x3] }
 0x1c9   :  { %8593 = vmatmul.mubr.f32.gmra.mrb[30].mxu0 %v11833_v43  ;;  %8036 = vmatmul.mubr.f32.vlgmr.msra.gmra.mrb[0].mxu1 %v2175_v53  ;;  %v6936_v43 = vld [vmem:[%s14060_s1 + $0x1b0] sm:$0xff] }
 0x1ca   :  { %8595 = vmatprep.mubr.f32.mxu0 %v11990_v3  ;;  %8038 = vmatprep.mubr.f32.mxu1 %v2176_v42  ;;  %v9007_v54 = vpack.c.bf16 %v6937_v17, %v6936_v43  ;;  %v9011_v3 = vpack.c.bf16 %v6939_v50, %v6938_v9  ;;  %v12267_v53 = vld [vmem:[#allocation2 + $0x2f0] sm:$0xff]  ;;  %v12283_v43 = vld [vmem:[#allocation2 + $0x308] sm:$0xff] }
 0x1cb   :  { %8998 = vmatpush3.bf16.msra.mxu1 %v11917_v58  ;;  %v12137_v58 = vld [vmem:[#allocation2 + $0x3a] sm:$0xff]  ;;  %v12270_v42 = vld [vmem:[#allocation2 + $0x12a] sm:$0xff]  ;;  %v12286_v17 = vld [vmem:[#allocation2 + $0x142] sm:$0xff] }
 0x1cc   :  { %9000 = vmatprep.subr.bf16.mxu1 %v8999_v61  ;;  %v12290_v9 = vld [vmem:[#allocation2 + $0x152] sm:$0xff] }
 0x1cd   :  { %8596 = vmatmul.mubr.f32.gmra.mrb[32].mxu0 %v12001_v35  ;;  %8039 = vmatmul.mubr.f32.gmra.mrb[2].mxu1 %v2177_v19  ;;  %v6940_v35 = vld [vmem:[%s14060_s1 + $0x1d0] sm:$0xff]  ;;  %v702_v19 = vmul.f32 %v10004_v0, %v11165_v11 }
 0x1ce   :  { %8598 = vmatprep.mubr.f32.mxu0 %v12004_v32  ;;  %8041 = vmatprep.mubr.f32.mxu1 %v12126_v38  ;;  %v6941_v32 = vld [vmem:[%s14060_s1 + $0x1d8] sm:$0xff] }
 0x1cf   :  { %9002 = vmatpush3.bf16.msra.mxu1 %v8999_v61  ;;  %v9015_v48 = vpack.c.bf16 %v6941_v32, %v6940_v35  ;;  %v12272_v61 = vld [vmem:[#allocation2 + $0x300] sm:$0xff]  ;;  %v12300_v32 = vld [vmem:[#allocation2 + $0x16a] sm:$0xff] }
 0x1d0   :  { %9004 = vmatprep.subr.bf16.mxu1 %v9003_v20  ;;  %v12298_v35 = vld [vmem:[#allocation2 + $0x15a] sm:$0xff] }
 0x1d1   :  { %8599 = vmatmul.mubr.f32.gmra.mrb[34].mxu0 %v12016_v13  ;;  %8042 = vmatmul.mubr.f32.gmra.mrb[4].mxu1 %v12137_v58  ;;  %v12165_v13 = vld [vmem:[#allocation2 + $0x6a] sm:$0xff] }
 0x1d2   :  { %8601 = vmatprep.mubr.f32.mxu0 %v12018_v7  ;;  %8044 = vmatprep.mubr.f32.mxu1 %v12139_v21  ;;  %v12167_v7 = vld [vmem:[#allocation2 + $0x7a] sm:$0xff] }
 0x1d3   :  { %9006 = vmatpush3.bf16.msra.mxu1 %v9003_v20  ;;  %v9822_v20 = vround.rtne.f32 %v702_v19  ;;  %v12319_v19 = vld [vmem:[#allocation2 + $0x1e2] sm:$0xff] }
 0x1d4   :  { %9008 = vmatprep.subr.bf16.mxu1 %v9007_v54 }
 0x1d5   :  { %8602 = vmatmul.mubr.f32.gmra.mrb[36].mxu0 %v12030_v41  ;;  %8045 = vmatmul.mubr.f32.gmra.mrb[6].mxu1 %v12151_v23  ;;  %v6942_v41 = vld [vmem:[%s14060_s1 + $0x1e0] sm:$0xff]  ;;  %v918_v50 = vmax.f32 %v9822_v20, -128.0 }
 0x1d6   :  { %8604 = vmatprep.mubr.f32.mxu0 %v12032_v10  ;;  %8047 = vmatprep.mubr.f32.mxu1 %v12153_v4  ;;  %v6943_v10 = vld [vmem:[%s14060_s1 + $0x1e8] sm:$0xff]  ;;  %v7014_v20 = vld [vmem:[%s14060_s1 + $0x420] sm:$0xff] }
 0x1d7   :  { %9010 = vmatpush3.bf16.msra.mxu1 %v9007_v54  ;;  %v12288_v54 = vld [vmem:[#allocation2 + $0x318] sm:$0xff]  ;;  %v1026_v11 = vmin.f32 %v918_v50, 127.0  ;;  %v7015_v50 = vld [vmem:[%s14060_s1 + $0x428] sm:$0xff] }
 0x1d8   :  { %9012 = vmatprep.subr.bf16.mxu1 %v9011_v3 }
 0x1d9   :  { %8605 = vmatmul.mubr.f32.gmra.mrb[38].mxu0 %v12044_v12  ;;  %8048 = vmatmul.mubr.f32.gmra.mrb[8].mxu1 %v12165_v13  ;;  %v9019_v12 = vpack.c.bf16 %v6943_v10, %v6942_v41  ;;  %v12307_v41 = vld [vmem:[#allocation2 + $0x172] sm:$0xff] }
 0x1da   :  { %8607 = vmatprep.mubr.f32.mxu0 %v12046_v1  ;;  %8050 = vmatprep.mubr.f32.mxu1 %v12167_v7  ;;  %v6945_v1 = vld [vmem:[%s14060_s1 + $0x1f8] sm:$0xff] }
 0x1db   :  { %9014 = vmatpush3.bf16.msra.mxu1 %v9011_v3  ;;  %v9023_v63 = vpack.c.bf16 %v6945_v1, %v6944_v29  ;;  %v12295_v3 = vld [vmem:[#allocation2 + $0x320] sm:$0xff]  ;;  %v2206_v10 = vld [vmem:[#allocation2 + $0x1b2] sm:$0xff]  ;;  %v2208_v29 = vld [vmem:[#allocation2 + $0x1ca] sm:$0xff] }
 0x1dc   :  { %9016 = vmatprep.subr.bf16.mxu1 %v9015_v48  ;;  %v7012_v1 = vld [vmem:[%s14060_s1 + $0x410] sm:$0xff] }
 0x1dd   :  { %8608 = vmatmul.mubr.f32.gmra.mrb[40].mxu0 %v12058_v33  ;;  %8051 = vmatmul.mubr.f32.gmra.mrb[10].mxu1 %v12179_v62  ;;  %v12201_v33 = vld [vmem:[#allocation2 + $0xaa] sm:$0xff] }
 0x1de   :  { %8610 = vmatprep.mubr.f32.mxu0 %v12181_v5  ;;  %8053 = vmatprep.mubr.f32.mxu1 %v12183_v40 }
 0x1df   :  { %9018 = vmatpush3.bf16.msra.mxu1 %v9015_v48  ;;  %v1134_v48 = vmul.f32 %v1026_v11, %v11042_v34  ;;  %v2207_v34 = vld [vmem:[#allocation2 + $0x1ba] sm:$0xff]  ;;  %v12328_v11 = vld [vmem:[#allocation2 + $0x1ea] sm:$0xff] }
 0x1e0   :  { %9020 = vmatprep.subr.bf16.mxu1 %v9019_v12 }
 0x1e1   :  { %8611 = vmatmul.mubr.f32.gmra.mrb[42].mxu0 %v12194_v55  ;;  %8054 = vmatmul.mubr.f32.gmra.mrb[12].mxu1 %v12197_v2  ;;  %1242 = vst [vmem:[#allocation2 + $0x358] sm:$0x3] %v1134_v48  ;;  %v4830_v48 = vld [vmem:[#allocation2 + $0x61] sm:$0xff] }
 0x1e2   :  { %8613 = vmatprep.mubr.f32.mxu0 %v12199_v60  ;;  %8056 = vmatprep.mubr.f32.mxu1 %v12201_v33 }
 0x1e3   :  { %9022 = vmatpush3.bf16.msra.mxu1 %v9019_v12  ;;  %v4826_v12 = vld [vmem:[#allocation2 + $0x31] sm:$0xff] }
 0x1e4   :  { %9024 = vmatprep.subr.bf16.mxu1 %v9023_v63 }
 0x1e5   :  { %8614 = vmatmul.mubr.f32.gmra.mrb[44].mxu0 %v12206_v44  ;;  %8057 = vmatmul.mubr.f32.gmra.mrb[14].mxu1 %v12209_v56 }
 0x1e6   :  { %8616 = vmatprep.mubr.f32.mxu0 %v12211_v30  ;;  %8059 = vmatprep.mubr.f32.mxu1 %v12213_v16 }
 0x1e7   :  { %9026 = vmatpush3.bf16.msra.mxu1 %v9023_v63  ;;  %v2209_v63 = vld [vmem:[#allocation2 + $0x1d2] sm:$0xff] }
 0x1e8   :  { %9187 = vmatprep.subr.bf16.mxu1 %v14333_v15 }
 0x1e9   :  { %8617 = vmatmul.mubr.f32.gmra.mrb[46].mxu0 %v12218_v46  ;;  %8060 = vmatmul.mubr.f32.gmra.mrb[16].mxu1 %v12221_v37 }
 0x1ea   :  { %8619 = vmatprep.mubr.f32.mxu0 %v12223_v36  ;;  %8062 = vmatprep.mubr.f32.mxu1 %v12225_v57 }
 0x1ed   :  { %8620 = vmatmul.mubr.f32.gmra.mrb[48].mxu0 %v12231_v22  ;;  %8063 = vmatmul.mubr.f32.gmra.mrb[18].mxu1 %v12234_v31 }
 0x1ee   :  { %8622 = vmatprep.mubr.f32.mxu0 %v12236_v39  ;;  %8065 = vmatprep.mubr.f32.mxu1 %v12238_v26 }
 0x1f1   :  { %8623 = vmatmul.mubr.f32.gmra.mrb[50].mxu0 %v12243_v8  ;;  %8066 = vmatmul.mubr.f32.gmra.mrb[20].mxu1 %v12246_v24 }
 0x1f2   :  { %8625 = vmatprep.mubr.f32.mxu0 %v12248_v51  ;;  %8068 = vmatprep.mubr.f32.mxu1 %v12250_v47 }
 0x1f5   :  { %8626 = vmatmul.mubr.f32.gmra.mrb[52].mxu0 %v12255_v45  ;;  %8069 = vmatmul.mubr.f32.gmra.mrb[22].mxu1 %v12258_v14 }
 0x1f6   :  { %8628 = vmatprep.mubr.f32.mxu0 %v12260_v18  ;;  %8071 = vmatprep.mubr.f32.mxu1 %v12262_v25 }
 0x1f9   :  { %8629 = vmatmul.mubr.f32.gmra.mrb[54].mxu0 %v12267_v53  ;;  %8072 = vmatmul.mubr.f32.gmra.mrb[24].mxu1 %v12270_v42 }
 0x1fa   :  { %8631 = vmatprep.mubr.f32.mxu0 %v12272_v61  ;;  %8074 = vmatprep.mubr.f32.mxu1 %v12274_v52 }
 0x1fd   :  { %8632 = vmatmul.mubr.f32.gmra.mrb[56].mxu0 %v12283_v43  ;;  %8075 = vmatmul.mubr.f32.gmra.mrb[26].mxu1 %v12286_v17 }
 0x1fe   :  { %8634 = vmatprep.mubr.f32.mxu0 %v12288_v54  ;;  %8077 = vmatprep.mubr.f32.mxu1 %v12290_v9 }
 0x201   :  { %8635 = vmatmul.mubr.f32.gmra.mrb[58].mxu0 %v12295_v3  ;;  %8078 = vmatmul.mubr.f32.gmra.mrb[28].mxu1 %v12298_v35 }
 0x202   :  { %8637 = vmatprep.mubr.f32.mxu0 %v11798_v27  ;;  %8080 = vmatprep.mubr.f32.mxu1 %v12300_v32  ;;  %v7013_v27 = vld [vmem:[%s14060_s1 + $0x418] sm:$0xff] }
 0x203   :  { %v9159_v0 = vpack.c.bf16 %v7013_v27, %v7012_v1  ;;  %v12341_v1 = vld [vmem:[#allocation2 + $0x202] sm:$0xff]  ;;  %v4832_v27 = vld [vmem:[#allocation2 + $0x79] sm:$0xff] }
 0x204   :  { %14334 = vst [vmem:[#allocation13_spill] sm:$0xff] %v12341_v1 }
 0x205   :  { %8638 = vmatmul.mubr.f32.gmra.mrb[60].mxu0 %v11801_v6  ;;  %8081 = vmatmul.mubr.f32.gmra.mrb[30].mxu1 %v12307_v41  ;;  %v4827_v6 = vld [vmem:[#allocation2 + $0x39] sm:$0xff] }
 0x206   :  { %8640 = vmatprep.mubr.f32.mxu0 %v11976_v28  ;;  %8083 = vmatprep.mubr.f32.mxu1 %v2206_v10  ;;  %v4828_v28 = vld [vmem:[#allocation2 + $0x49] sm:$0xff]  ;;  %v12331_v10 = vld [vmem:[#allocation2 + $0x1fa] sm:$0xff] }
 0x209   :  { %8641 = vmatmul.mubr.f32.gmra.mrb[62].mxu0 %v11979_v59  ;;  %8084 = vmatmul.mubr.f32.gmra.mrb[32].mxu1 %v2207_v34  ;;  %v4829_v59 = vld [vmem:[#allocation2 + $0x51] sm:$0xff]  ;;  %v9163_v34 = vpack.c.bf16 %v7015_v50, %v7014_v20  ;;  %v7019_v20 = vld [vmem:[%s14060_s1 + $0x448] sm:$0xff] }
 0x20a   :  { %8675 = vmatprep.mubr.f32.mxu0 %v4826_v12  ;;  %8086 = vmatprep.mubr.f32.mxu1 %v2208_v29  ;;  %v7016_v12 = vld [vmem:[%s14060_s1 + $0x430] sm:$0xff]  ;;  %v4833_v50 = vld [vmem:[#allocation2 + $0x81] sm:$0xff] }
 0x20b   :  { %v4831_v29 = vld [vmem:[#allocation2 + $0x69] sm:$0xff] }
 0x20d   :  { %8676 = vmatmul.mubr.f32.vlgmr.msra.gmra.mrb[0].mxu0 %v4827_v6  ;;  %8087 = vmatmul.mubr.f32.gmra.mrb[34].mxu1 %v2209_v63  ;;  %v12343_v6 = vld [vmem:[#allocation2 + $0x212] sm:$0xff] }
 0x20e   :  { %9158 = vmatpush3.bf16.msra.mxu0 %v12077_v49  ;;  %8678 = vmatprep.mubr.f32.mxu0 %v4828_v28  ;;  %v7017_v49 = vld [vmem:[%s14060_s1 + $0x438] sm:$0xff]  ;;  %14335 = vst [vmem:[#allocation24_spill] sm:$0xff] %v12343_v6  ;;  %v7018_v28 = vld [vmem:[%s14060_s1 + $0x440] sm:$0xff] }
 0x20f   :  { %8089 = vmatprep.mubr.f32.mxu1 %v12319_v19  ;;  %9160 = vmatprep.subr.bf16.mxu0 %v9159_v0  ;;  %v9167_v63 = vpack.c.bf16 %v7017_v49, %v7016_v12  ;;  %v9171_v12 = vpack.c.bf16 %v7019_v20, %v7018_v28  ;;  %v7020_v49 = vld [vmem:[%s14060_s1 + $0x450] sm:$0xff]  ;;  %v7022_v20 = vld [vmem:[%s14060_s1 + $0x460] sm:$0xff] }
 0x211   :  { %8679 = vmatmul.mubr.f32.gmra.mrb[2].mxu0 %v4829_v59  ;;  %8090 = vmatmul.mubr.f32.gmra.mrb[36].mxu1 %v12328_v11  ;;  %v12353_v59 = vld [vmem:[#allocation2 + $0x21a] sm:$0xff] }
 0x212   :  { %8681 = vmatprep.mubr.f32.mxu0 %v4830_v48  ;;  %8092 = vmatprep.mubr.f32.mxu1 %v12331_v10  ;;  %14336 = vst [vmem:[#allocation14_spill] sm:$0xff] %v12353_v59  ;;  %v12355_v48 = vld [vmem:[#allocation2 + $0x22a] sm:$0xff] }
 0x213   :  { %9162 = vmatpush3.bf16.msra.mxu0 %v9159_v0  ;;  %v4834_v0 = vld [vmem:[#allocation2 + $0x91] sm:$0xff]  ;;  %14337 = vst [vmem:[#allocation26_spill] sm:$0xff] %v12355_v48 }
 0x214   :  { %9164 = vmatprep.subr.bf16.mxu0 %v9163_v34 }
 0x215   :  { %8682 = vmatmul.mubr.f32.gmra.mrb[4].mxu0 %v4831_v29  ;;  %8093 = vmatmul.mubr.f32.gmra.mrb[38].mxu1 %v12341_v1  ;;  %v7021_v29 = vld [vmem:[%s14060_s1 + $0x458] sm:$0xff]  ;;  %v12367_v1 = vld [vmem:[#allocation2 + $0x242] sm:$0xff] }
 0x216   :  { %8684 = vmatprep.mubr.f32.mxu0 %v4832_v27  ;;  %8095 = vmatprep.mubr.f32.mxu1 %v12343_v6  ;;  %v4835_v27 = vld [vmem:[#allocation2 + $0x99] sm:$0xff]  ;;  %14339 = vst [vmem:[#allocation27_spill] sm:$0xff] %v12367_v1  ;;  %v9175_v28 = vpack.c.bf16 %v7021_v29, %v7020_v49  ;;  %v7024_v29 = vld [vmem:[%s14060_s1 + $0x470] sm:$0xff] }
 0x217   :  { %9166 = vmatpush3.bf16.msra.mxu0 %v9163_v34  ;;  %v12365_v6 = vld [vmem:[#allocation2 + $0x232] sm:$0xff]  ;;  %v4836_v34 = vld [vmem:[#allocation2 + $0xa9] sm:$0xff] }
 0x218   :  { %9168 = vmatprep.subr.bf16.mxu0 %v9167_v63  ;;  %14338 = vst [vmem:[#allocation15_spill] sm:$0xff] %v12365_v6 }
 0x219   :  { %8685 = vmatmul.mubr.f32.gmra.mrb[6].mxu0 %v4833_v50  ;;  %8096 = vmatmul.mubr.f32.gmra.mrb[40].mxu1 %v12353_v59  ;;  %v7023_v50 = vld [vmem:[%s14060_s1 + $0x468] sm:$0xff]  ;;  %v12379_v59 = vld [vmem:[#allocation2 + $0x25a] sm:$0xff] }
 0x21a   :  { %8687 = vmatprep.mubr.f32.mxu0 %v4834_v0  ;;  %8098 = vmatprep.mubr.f32.mxu1 %v12355_v48  ;;  %v4837_v0 = vld [vmem:[#allocation2 + $0xb1] sm:$0xff]  ;;  %14341 = vst [vmem:[#allocation28_spill] sm:$0xff] %v12379_v59  ;;  %v9179_v49 = vpack.c.bf16 %v7023_v50, %v7022_v20  ;;  %v4841_v50 = vld [vmem:[#allocation2 + $0xe1] sm:$0xff] }
 0x21b   :  { %9170 = vmatpush3.bf16.msra.mxu0 %v9167_v63  ;;  %v12377_v48 = vld [vmem:[#allocation2 + $0x24a] sm:$0xff]  ;;  %v4838_v63 = vld [vmem:[#allocation2 + $0xc1] sm:$0xff] }
 0x21c   :  { %9172 = vmatprep.subr.bf16.mxu0 %v9171_v12  ;;  %14340 = vst [vmem:[#allocation16_spill] sm:$0xff] %v12377_v48 }
 0x21d   :  { %8688 = vmatmul.mubr.f32.gmra.mrb[8].mxu0 %v4835_v27  ;;  %8099 = vmatmul.mubr.f32.gmra.mrb[42].mxu1 %v12365_v6  ;;  %v7025_v27 = vld [vmem:[%s14060_s1 + $0x478] sm:$0xff] }
 0x21e   :  { %8690 = vmatprep.mubr.f32.mxu0 %v4836_v34  ;;  %8101 = vmatprep.mubr.f32.mxu1 %v12367_v1  ;;  %v4839_v34 = vld [vmem:[#allocation2 + $0xc9] sm:$0xff]  ;;  %v12391_v6 = vld [vmem:[#allocation2 + $0x272] sm:$0xff]  ;;  %v9183_v20 = vpack.c.bf16 %v7025_v27, %v7024_v29 }
 0x21f   :  { %9174 = vmatpush3.bf16.msra.mxu0 %v9171_v12  ;;  %v12389_v1 = vld [vmem:[#allocation2 + $0x262] sm:$0xff]  ;;  %v4840_v12 = vld [vmem:[#allocation2 + $0xd9] sm:$0xff]  ;;  %14343 = vst [vmem:[#allocation29_spill] sm:$0xff] %v12391_v6 }
 0x220   :  { %9176 = vmatprep.subr.bf16.mxu0 %v9175_v28  ;;  %14342 = vst [vmem:[#allocation17_spill] sm:$0xff] %v12389_v1  ;;  %v12401_v29 = vld [vmem:[#allocation2 + $0x292] sm:$0xff]  ;;  %v4844_v27 = vld [vmem:[#allocation2 + $0x109] sm:$0xff] }
 0x221   :  { %8691 = vmatmul.mubr.f32.gmra.mrb[10].mxu0 %v4837_v0  ;;  %8102 = vmatmul.mubr.f32.gmra.mrb[44].mxu1 %v12377_v48  ;;  %v12395_v0 = vld [vmem:[#allocation2 + $0x27a] sm:$0xff]  ;;  %v12397_v48 = vld [vmem:[#allocation2 + $0x28a] sm:$0xff]  ;;  %14346 = vst [vmem:[#allocation30_spill] sm:$0xff] %v12401_v29 }
 0x222   :  { %8693 = vmatprep.mubr.f32.mxu0 %v4838_v63  ;;  %8104 = vmatprep.mubr.f32.mxu1 %v12379_v59  ;;  %14344 = vst [vmem:[#allocation18_spill] sm:$0xff] %v12395_v0  ;;  %v4842_v63 = vld [vmem:[#allocation2 + $0xf1] sm:$0xff]  ;;  %14345 = vst [vmem:[#allocation19_spill] sm:$0xff] %v12397_v48  ;;  %v12469_v59 = vld [vmem:[#allocation2 + $0x241] sm:$0xff] }
 0x223   :  { %9178 = vmatpush3.bf16.msra.mxu0 %v9175_v28  ;;  %v4843_v28 = vld [vmem:[#allocation2 + $0xf9] sm:$0xff]  ;;  %14366 = vst [vmem:[#allocation38_spill] sm:$0xff] %v12469_v59 }
 0x224   :  { %9180 = vmatprep.subr.bf16.mxu0 %v9179_v49 }
 0x225   :  { %8694 = vmatmul.mubr.f32.gmra.mrb[12].mxu0 %v4839_v34  ;;  %8105 = vmatmul.mubr.f32.gmra.mrb[46].mxu1 %v12389_v1  ;;  %v12403_v34 = vld [vmem:[#allocation2 + $0x2a2] sm:$0xff]  ;;  %v14364_v1 = vld [vmem:[#allocation8_spill] sm:$0xff] }
 0x226   :  { %8696 = vmatprep.mubr.f32.mxu0 %v4840_v12  ;;  %8107 = vmatprep.mubr.f32.mxu1 %v12391_v6  ;;  %14347 = vst [vmem:[#allocation20_spill] sm:$0xff] %v12403_v34  ;;  %v4845_v12 = vld [vmem:[#allocation2 + $0x111] sm:$0xff]  ;;  %v12461_v6 = vld [vmem:[#allocation2 + $0x229] sm:$0xff] }
 0x227   :  { %9182 = vmatpush3.bf16.msra.mxu0 %v9179_v49  ;;  %v12407_v49 = vld [vmem:[#allocation2 + $0x2aa] sm:$0xff]  ;;  %14363 = vst [vmem:[#allocation37_spill] sm:$0xff] %v12461_v6 }
 0x228   :  { %9184 = vmatprep.subr.bf16.mxu0 %v9183_v20  ;;  %14348 = vst [vmem:[#allocation21_spill] sm:$0xff] %v12407_v49 }
 0x229   :  { %8697 = vmatmul.mubr.f32.gmra.mrb[14].mxu0 %v4841_v50  ;;  %8108 = vmatmul.mubr.f32.gmra.mrb[48].mxu1 %v12395_v0  ;;  %v4846_v50 = vld [vmem:[#allocation2 + $0x121] sm:$0xff] }
 0x22a   :  { %8699 = vmatprep.mubr.f32.mxu0 %v4842_v63  ;;  %8110 = vmatprep.mubr.f32.mxu1 %v12397_v48  ;;  %v12409_v63 = vld [vmem:[#allocation2 + $0x2ba] sm:$0xff]  ;;  %v4847_v48 = vld [vmem:[#allocation2 + $0x129] sm:$0xff] }
 0x22b   :  { %9186 = vmatpush3.bf16.msra.mxu0 %v9183_v20  ;;  %14349 = vst [vmem:[#allocation31_spill] sm:$0xff] %v12409_v63  ;;  %v12413_v20 = vld [vmem:[#allocation2 + $0x2c2] sm:$0xff] }
 0x22c   :  { %14350 = vst [vmem:[#allocation32_spill] sm:$0xff] %v12413_v20  ;;  %v12440_v0 = vld [vmem:[#allocation2 + $0x1e1] sm:$0xff] }
 0x22d   :  { %8700 = vmatmul.mubr.f32.gmra.mrb[16].mxu0 %v4843_v28  ;;  %8111 = vmatmul.mubr.f32.gmra.mrb[50].mxu1 %v12401_v29  ;;  %v4848_v28 = vld [vmem:[#allocation2 + $0x139] sm:$0xff] }
 0x22e   :  { %8702 = vmatprep.mubr.f32.mxu0 %v4844_v27  ;;  %8113 = vmatprep.mubr.f32.mxu1 %v12403_v34  ;;  %v12415_v29 = vld [vmem:[#allocation2 + $0x2d2] sm:$0xff]  ;;  %v4849_v27 = vld [vmem:[#allocation2 + $0x141] sm:$0xff] }
 0x22f   :  { %14351 = vst [vmem:[#allocation33_spill] sm:$0xff] %v12415_v29  ;;  %v12419_v34 = vld [vmem:[#allocation2 + $0x2da] sm:$0xff] }
 0x230   :  { %14352 = vst [vmem:[#allocation22_spill] sm:$0xff] %v12419_v34 }
 0x231   :  { %8703 = vmatmul.mubr.f32.gmra.mrb[18].mxu0 %v4845_v12  ;;  %8114 = vmatmul.mubr.f32.gmra.mrb[52].mxu1 %v12407_v49  ;;  %v4850_v12 = vld [vmem:[#allocation2 + $0x151] sm:$0xff] }
 0x232   :  { %8705 = vmatprep.mubr.f32.mxu0 %v4846_v50  ;;  %8116 = vmatprep.mubr.f32.mxu1 %v12409_v63  ;;  %v12421_v49 = vld [vmem:[#allocation2 + $0x2ea] sm:$0xff]  ;;  %v4851_v50 = vld [vmem:[#allocation2 + $0x159] sm:$0xff] }
 0x233   :  { %14353 = vst [vmem:[#allocation23_spill] sm:$0xff] %v12421_v49  ;;  %v12425_v63 = vld [vmem:[#allocation2 + $0x2f2] sm:$0xff] }
 0x234   :  { %14354 = vst [vmem:[#allocation25_spill] sm:$0xff] %v12425_v63 }
 0x235   :  { %8706 = vmatmul.mubr.f32.gmra.mrb[20].mxu0 %v4847_v48  ;;  %8117 = vmatmul.mubr.f32.gmra.mrb[54].mxu1 %v12413_v20  ;;  %v4852_v48 = vld [vmem:[#allocation2 + $0x169] sm:$0xff] }
 0x236   :  { %8708 = vmatprep.mubr.f32.mxu0 %v4848_v28  ;;  %8119 = vmatprep.mubr.f32.mxu1 %v12415_v29  ;;  %v12427_v20 = vld [vmem:[#allocation2 + $0x302] sm:$0xff]  ;;  %v4853_v28 = vld [vmem:[#allocation2 + $0x171] sm:$0xff] }
 0x237   :  { %14355 = vst [vmem:[#allocation5_spill] sm:$0xff] %v12427_v20  ;;  %v12431_v29 = vld [vmem:[#allocation2 + $0x30a] sm:$0xff] }
 0x238   :  { %14356 = vst [vmem:[#allocation34_spill] sm:$0xff] %v12431_v29 }
 0x239   :  { %8709 = vmatmul.mubr.f32.gmra.mrb[22].mxu0 %v4849_v27  ;;  %8120 = vmatmul.mubr.f32.gmra.mrb[56].mxu1 %v12419_v34  ;;  %v4854_v27 = vld [vmem:[#allocation2 + $0x181] sm:$0xff] }
 0x23a   :  { %8711 = vmatprep.mubr.f32.mxu0 %v4850_v12  ;;  %8122 = vmatprep.mubr.f32.mxu1 %v12421_v49  ;;  %v12433_v34 = vld [vmem:[#allocation2 + $0x31a] sm:$0xff]  ;;  %v4855_v12 = vld [vmem:[#allocation2 + $0x189] sm:$0xff] }
 0x23b   :  { %14357 = vst [vmem:[#allocation35_spill] sm:$0xff] %v12433_v34  ;;  %v12437_v49 = vld [vmem:[#allocation2 + $0x322] sm:$0xff] }
 0x23c   :  { %14358 = vst [vmem:[#allocation36_spill] sm:$0xff] %v12437_v49 }
 0x23d   :  { %8712 = vmatmul.mubr.f32.gmra.mrb[24].mxu0 %v4851_v50  ;;  %8123 = vmatmul.mubr.f32.gmra.mrb[58].mxu1 %v12425_v63  ;;  %v4856_v50 = vld [vmem:[#allocation2 + $0x199] sm:$0xff] }
 0x23e   :  { %8714 = vmatprep.mubr.f32.mxu0 %v4852_v48  ;;  %8125 = vmatprep.mubr.f32.mxu1 %v12427_v20  ;;  %v2705_v63 = vld [vmem:[#allocation2 + $0x18] sm:$0xff]  ;;  %v4857_v48 = vld [vmem:[#allocation2 + $0x1a1] sm:$0xff] }
 0x23f   :  { %v2706_v20 = vld [vmem:[#allocation2 + $0x20] sm:$0xff] }
 0x241   :  { %8715 = vmatmul.mubr.f32.gmra.mrb[26].mxu0 %v4853_v28  ;;  %8126 = vmatmul.mubr.f32.gmra.mrb[60].mxu1 %v12431_v29  ;;  %v2707_v28 = vld [vmem:[#allocation2 + $0x30] sm:$0xff]  ;;  %v12459_v29 = vld [vmem:[#allocation2 + $0x219] sm:$0xff] }
 0x242   :  { %8717 = vmatprep.mubr.f32.mxu0 %v4854_v27  ;;  %8128 = vmatprep.mubr.f32.mxu1 %v12433_v34  ;;  %v12443_v27 = vld [vmem:[#allocation2 + $0x1e9] sm:$0xff]  ;;  %v2708_v34 = vld [vmem:[#allocation2 + $0x38] sm:$0xff] }
 0x245   :  { %8718 = vmatmul.mubr.f32.gmra.mrb[28].mxu0 %v4855_v12  ;;  %8129 = vmatmul.mubr.f32.gmra.mrb[62].mxu1 %v12437_v49  ;;  %v12446_v12 = vld [vmem:[#allocation2 + $0x1f9] sm:$0xff]  ;;  %v2709_v49 = vld [vmem:[#allocation2 + $0x48] sm:$0xff] }
 0x246   :  { %8720 = vmatprep.mubr.f32.mxu0 %v4856_v50  ;;  %8163 = vmatprep.mubr.f32.mxu1 %v2705_v63  ;;  %v14359_v50 = vld [vmem:[#allocation6_spill] sm:$0xff] }
 0x247   :  { %v12451_v63 = vld [vmem:[#allocation2 + $0x201] sm:$0xff] }
 0x249   :  { %8721 = vmatmul.mubr.f32.gmra.mrb[30].mxu0 %v4857_v48  ;;  %8164 = vmatmul.mubr.f32.vlgmr.msra.gmra.mrb[0].mxu1 %v2706_v20  ;;  %v2710_v20 = vld [vmem:[#allocation2 + $0x50] sm:$0xff] }
 0x24a   :  { %8723 = vmatprep.mubr.f32.mxu0 %v12440_v0  ;;  %8166 = vmatprep.mubr.f32.mxu1 %v2707_v28  ;;  %v12453_v48 = vld [vmem:[#allocation2 + $0x211] sm:$0xff]  ;;  %v2711_v28 = vld [vmem:[#allocation2 + $0x60] sm:$0xff] }
 0x24b   :  { %9195 = vmatpush3.bf16.msra.mxu1 %v14333_v15  ;;  %14360 = vst [vmem:[#allocation6_spill] sm:$0xff] %v12453_v48  ;;  %v14361_v15 = vld [vmem:[#allocation7_spill] sm:$0xff] }
 0x24c   :  { %9188 = vmatprep.subr.bf16.mxu1 %v14359_v50  ;;  %14362 = vst [vmem:[#allocation7_spill] sm:$0xff] %v12459_v29 }
 0x24d   :  { %8724 = vmatmul.mubr.f32.gmra.mrb[32].mxu0 %v12443_v27  ;;  %8167 = vmatmul.mubr.f32.gmra.mrb[2].mxu1 %v2708_v34  ;;  %v2712_v34 = vld [vmem:[#allocation2 + $0x68] sm:$0xff] }
 0x24e   :  { %8726 = vmatprep.mubr.f32.mxu0 %v12446_v12  ;;  %8169 = vmatprep.mubr.f32.mxu1 %v2709_v49  ;;  %v2713_v49 = vld [vmem:[#allocation2 + $0x78] sm:$0xff] }
 0x24f   :  { %9196 = vmatpush3.bf16.msra.mxu1 %v14359_v50  ;;  %v12467_v50 = vld [vmem:[#allocation2 + $0x231] sm:$0xff] }
 0x250   :  { %9189 = vmatprep.subr.bf16.mxu1 %v14361_v15  ;;  %14365 = vst [vmem:[#allocation8_spill] sm:$0xff] %v12467_v50 }
 0x251   :  { %8727 = vmatmul.mubr.f32.gmra.mrb[34].mxu0 %v12451_v63  ;;  %8170 = vmatmul.mubr.f32.gmra.mrb[4].mxu1 %v2710_v20  ;;  %v2714_v20 = vld [vmem:[#allocation2 + $0x80] sm:$0xff] }
 0x252   :  { %8729 = vmatprep.mubr.f32.mxu0 %v12453_v48  ;;  %8172 = vmatprep.mubr.f32.mxu1 %v2711_v28  ;;  %v2715_v28 = vld [vmem:[#allocation2 + $0x90] sm:$0xff]  ;;  %v14367_v48 = vld [vmem:[#allocation9_spill] sm:$0xff] }
 0x253   :  { %9197 = vmatpush3.bf16.msra.mxu1 %v14361_v15  ;;  %v12475_v15 = vld [vmem:[#allocation2 + $0x249] sm:$0xff] }
 0x254   :  { %9190 = vmatprep.subr.bf16.mxu1 %v14364_v1  ;;  %14368 = vst [vmem:[#allocation9_spill] sm:$0xff] %v12475_v15 }
 0x255   :  { %8730 = vmatmul.mubr.f32.gmra.mrb[36].mxu0 %v12459_v29  ;;  %8173 = vmatmul.mubr.f32.gmra.mrb[6].mxu1 %v2712_v34  ;;  %v2716_v34 = vld [vmem:[#allocation2 + $0x98] sm:$0xff]  ;;  %v14370_v29 = vld [vmem:[#allocation10_spill] sm:$0xff] }
 0x256   :  { %8732 = vmatprep.mubr.f32.mxu0 %v12461_v6  ;;  %8175 = vmatprep.mubr.f32.mxu1 %v2713_v49  ;;  %v12477_v6 = vld [vmem:[#allocation2 + $0x259] sm:$0xff]  ;;  %v2717_v49 = vld [vmem:[#allocation2 + $0xa8] sm:$0xff] }
 0x257   :  { %9198 = vmatpush3.bf16.msra.mxu1 %v14364_v1  ;;  %14369 = vst [vmem:[#allocation39_spill] sm:$0xff] %v12477_v6  ;;  %v12483_v1 = vld [vmem:[#allocation2 + $0x261] sm:$0xff] }
 0x258   :  { %9191 = vmatprep.subr.bf16.mxu1 %v14367_v48  ;;  %14371 = vst [vmem:[#allocation10_spill] sm:$0xff] %v12483_v1 }
 0x259   :  { %8733 = vmatmul.mubr.f32.gmra.mrb[38].mxu0 %v12467_v50  ;;  %8176 = vmatmul.mubr.f32.gmra.mrb[8].mxu1 %v2714_v20  ;;  %v2718_v20 = vld [vmem:[#allocation2 + $0xb0] sm:$0xff] }
 0x25a   :  { %8735 = vmatprep.mubr.f32.mxu0 %v12469_v59  ;;  %8178 = vmatprep.mubr.f32.mxu1 %v2715_v28  ;;  %v12485_v59 = vld [vmem:[#allocation2 + $0x271] sm:$0xff]  ;;  %v2719_v28 = vld [vmem:[#allocation2 + $0xc0] sm:$0xff] }
 0x25b   :  { %9199 = vmatpush3.bf16.msra.mxu1 %v14367_v48  ;;  %14372 = vst [vmem:[#allocation40_spill] sm:$0xff] %v12485_v59  ;;  %v14373_v50 = vld [vmem:[#allocation11_spill] sm:$0xff]  ;;  %v12491_v48 = vld [vmem:[#allocation2 + $0x279] sm:$0xff] }
 0x25c   :  { %9192 = vmatprep.subr.bf16.mxu1 %v14370_v29  ;;  %14374 = vst [vmem:[#allocation11_spill] sm:$0xff] %v12491_v48 }
 0x25d   :  { %8736 = vmatmul.mubr.f32.gmra.mrb[40].mxu0 %v12475_v15  ;;  %8179 = vmatmul.mubr.f32.gmra.mrb[10].mxu1 %v2716_v34  ;;  %v2720_v34 = vld [vmem:[#allocation2 + $0xc8] sm:$0xff]  ;;  %v14376_v15 = vld [vmem:[#allocation12_spill] sm:$0xff] }
 0x25e   :  { %8738 = vmatprep.mubr.f32.mxu0 %v12477_v6  ;;  %8181 = vmatprep.mubr.f32.mxu1 %v2717_v49  ;;  %v12493_v6 = vld [vmem:[#allocation2 + $0x289] sm:$0xff]  ;;  %v2721_v49 = vld [vmem:[#allocation2 + $0xd8] sm:$0xff] }
 0x25f   :  { %9200 = vmatpush3.bf16.msra.mxu1 %v14370_v29  ;;  %14375 = vst [vmem:[#allocation41_spill] sm:$0xff] %v12493_v6  ;;  %v12499_v29 = vld [vmem:[#allocation2 + $0x291] sm:$0xff] }
 0x260   :  { %9193 = vmatprep.subr.bf16.mxu1 %v14373_v50  ;;  %14377 = vst [vmem:[#allocation12_spill] sm:$0xff] %v12499_v29 }
 0x261   :  { %8739 = vmatmul.mubr.f32.gmra.mrb[42].mxu0 %v12483_v1  ;;  %8182 = vmatmul.mubr.f32.gmra.mrb[12].mxu1 %v2718_v20  ;;  %v2722_v20 = vld [vmem:[#allocation2 + $0xe0] sm:$0xff] }
 0x262   :  { %8741 = vmatprep.mubr.f32.mxu0 %v12485_v59  ;;  %8184 = vmatprep.mubr.f32.mxu1 %v2719_v28  ;;  %v12501_v59 = vld [vmem:[#allocation2 + $0x2a1] sm:$0xff]  ;;  %v2723_v28 = vld [vmem:[#allocation2 + $0xf0] sm:$0xff] }
 0x263   :  { %9201 = vmatpush3.bf16.msra.mxu1 %v14373_v50  ;;  %14378 = vst [vmem:[#allocation42_spill] sm:$0xff] %v12501_v59  ;;  %v12506_v50 = vld [vmem:[#allocation2 + $0x2a9] sm:$0xff]  ;;  %v2739_v1 = vld [vmem:[#allocation2 + $0x1e0] sm:$0xff] }
 0x264   :  { %9194 = vmatprep.subr.bf16.mxu1 %v14376_v15  ;;  %14379 = vst [vmem:[#allocation43_spill] sm:$0xff] %v12506_v50 }
 0x265   :  { %8742 = vmatmul.mubr.f32.gmra.mrb[44].mxu0 %v12491_v48  ;;  %8185 = vmatmul.mubr.f32.gmra.mrb[14].mxu1 %v2720_v34  ;;  %v2724_v34 = vld [vmem:[#allocation2 + $0xf8] sm:$0xff] }
 0x266   :  { %8744 = vmatprep.mubr.f32.mxu0 %v12493_v6  ;;  %8187 = vmatprep.mubr.f32.mxu1 %v2721_v49  ;;  %v12508_v48 = vld [vmem:[#allocation2 + $0x2b9] sm:$0xff]  ;;  %v2725_v6 = vld [vmem:[#allocation2 + $0x108] sm:$0xff] }
 0x267   :  { %9202 = vmatpush3.bf16.msra.mxu1 %v14376_v15  ;;  %14380 = vst [vmem:[#allocation44_spill] sm:$0xff] %v12508_v48  ;;  %v12512_v49 = vld [vmem:[#allocation2 + $0x2c1] sm:$0xff]  ;;  %v2726_v15 = vld [vmem:[#allocation2 + $0x110] sm:$0xff] }
 0x268   :  { %14381 = vst [vmem:[#allocation45_spill] sm:$0xff] %v12512_v49 }
 0x269   :  { %8745 = vmatmul.mubr.f32.gmra.mrb[46].mxu0 %v12499_v29  ;;  %8188 = vmatmul.mubr.f32.gmra.mrb[16].mxu1 %v2722_v20  ;;  %v12514_v29 = vld [vmem:[#allocation2 + $0x2d1] sm:$0xff]  ;;  %v2727_v20 = vld [vmem:[#allocation2 + $0x120] sm:$0xff] }
 0x26a   :  { %8747 = vmatprep.mubr.f32.mxu0 %v12501_v59  ;;  %8190 = vmatprep.mubr.f32.mxu1 %v2723_v28  ;;  %14382 = vst [vmem:[#allocation46_spill] sm:$0xff] %v12514_v29  ;;  %v12518_v28 = vld [vmem:[#allocation2 + $0x2d9] sm:$0xff]  ;;  %v2728_v59 = vld [vmem:[#allocation2 + $0x128] sm:$0xff] }
 0x26b   :  { %14383 = vst [vmem:[#allocation47_spill] sm:$0xff] %v12518_v28 }
 0x26d   :  { %8748 = vmatmul.mubr.f32.gmra.mrb[48].mxu0 %v12506_v50  ;;  %8191 = vmatmul.mubr.f32.gmra.mrb[18].mxu1 %v2724_v34  ;;  %v12520_v50 = vld [vmem:[#allocation2 + $0x2e9] sm:$0xff]  ;;  %v2729_v34 = vld [vmem:[#allocation2 + $0x138] sm:$0xff] }
 0x26e   :  { %8750 = vmatprep.mubr.f32.mxu0 %v12508_v48  ;;  %8193 = vmatprep.mubr.f32.mxu1 %v2725_v6  ;;  %14384 = vst [vmem:[#allocation48_spill] sm:$0xff] %v12520_v50  ;;  %v12524_v6 = vld [vmem:[#allocation2 + $0x2f1] sm:$0xff]  ;;  %v2730_v48 = vld [vmem:[#allocation2 + $0x140] sm:$0xff] }
 0x26f   :  { %14385 = vst [vmem:[#allocation49_spill] sm:$0xff] %v12524_v6 }
 0x271   :  { %8751 = vmatmul.mubr.f32.gmra.mrb[50].mxu0 %v12512_v49  ;;  %8194 = vmatmul.mubr.f32.gmra.mrb[20].mxu1 %v2726_v15  ;;  %v12526_v49 = vld [vmem:[#allocation2 + $0x301] sm:$0xff]  ;;  %v2731_v15 = vld [vmem:[#allocation2 + $0x150] sm:$0xff] }
 0x272   :  { %8753 = vmatprep.mubr.f32.mxu0 %v12514_v29  ;;  %8196 = vmatprep.mubr.f32.mxu1 %v2727_v20  ;;  %14386 = vst [vmem:[#allocation50_spill] sm:$0xff] %v12526_v49  ;;  %v12530_v20 = vld [vmem:[#allocation2 + $0x309] sm:$0xff]  ;;  %v2732_v29 = vld [vmem:[#allocation2 + $0x158] sm:$0xff] }
 0x273   :  { %14387 = vst [vmem:[#allocation51_spill] sm:$0xff] %v12530_v20 }
 0x275   :  { %8754 = vmatmul.mubr.f32.gmra.mrb[52].mxu0 %v12518_v28  ;;  %8197 = vmatmul.mubr.f32.gmra.mrb[22].mxu1 %v2728_v59  ;;  %v12532_v28 = vld [vmem:[#allocation2 + $0x319] sm:$0xff]  ;;  %v2733_v59 = vld [vmem:[#allocation2 + $0x168] sm:$0xff] }
 0x276   :  { %8756 = vmatprep.mubr.f32.mxu0 %v12520_v50  ;;  %8199 = vmatprep.mubr.f32.mxu1 %v2729_v34  ;;  %14388 = vst [vmem:[#allocation52_spill] sm:$0xff] %v12532_v28  ;;  %v12536_v34 = vld [vmem:[#allocation2 + $0x321] sm:$0xff]  ;;  %v2734_v50 = vld [vmem:[#allocation2 + $0x170] sm:$0xff] }
 0x279   :  { %8757 = vmatmul.mubr.f32.gmra.mrb[54].mxu0 %v12524_v6  ;;  %8200 = vmatmul.mubr.f32.gmra.mrb[24].mxu1 %v2730_v48  ;;  %v12538_v6 = vld [vmem:[#allocation2 + $0x331] sm:$0xff]  ;;  %v2735_v48 = vld [vmem:[#allocation2 + $0x180] sm:$0xff] }
 0x27a   :  { %8759 = vmatprep.mubr.f32.mxu0 %v12526_v49  ;;  %8202 = vmatprep.mubr.f32.mxu1 %v2731_v15  ;;  %14389 = vst [vmem:[#allocation53_spill] sm:$0xff] %v12538_v6  ;;  %v12542_v15 = vld [vmem:[#allocation2 + $0x339] sm:$0xff]  ;;  %v2736_v49 = vld [vmem:[#allocation2 + $0x188] sm:$0xff] }
 0x27d   :  { %8760 = vmatmul.mubr.f32.gmra.mrb[56].mxu0 %v12530_v20  ;;  %8203 = vmatmul.mubr.f32.gmra.mrb[26].mxu1 %v2732_v29  ;;  %v4888_v20 = vld [vmem:[#allocation2 + $0x349] sm:$0xff] }
 0x27e   :  { %8762 = vmatprep.mubr.f32.mxu0 %v12532_v28  ;;  %8205 = vmatprep.mubr.f32.mxu1 %v2733_v59  ;;  %v2737_v29 = vld [vmem:[#allocation2 + $0x1c8] sm:$0xff]  ;;  %v4889_v59 = vld [vmem:[#allocation2 + $0x351] sm:$0xff] }
 0x27f   :  { %v2738_v28 = vld [vmem:[#allocation2 + $0x1d0] sm:$0xff] }
 0x281   :  { %8763 = vmatmul.mubr.f32.gmra.mrb[58].mxu0 %v12536_v34  ;;  %8206 = vmatmul.mubr.f32.gmra.mrb[28].mxu1 %v2734_v50  ;;  %v2740_v50 = vld [vmem:[#allocation2 + $0x1e8] sm:$0xff] }
 0x282   :  { %8765 = vmatprep.mubr.f32.mxu0 %v12538_v6  ;;  %8208 = vmatprep.mubr.f32.mxu1 %v2735_v48  ;;  %v2741_v6 = vld [vmem:[#allocation2 + $0x1f8] sm:$0xff]  ;;  %v2742_v48 = vld [vmem:[#allocation2 + $0x200] sm:$0xff] }
 0x285   :  { %8766 = vmatmul.mubr.f32.gmra.mrb[60].mxu0 %v12542_v15  ;;  %8209 = vmatmul.mubr.f32.gmra.mrb[30].mxu1 %v2736_v49  ;;  %v2743_v49 = vld [vmem:[#allocation2 + $0x210] sm:$0xff] }
 0x286   :  { %8768 = vmatprep.mubr.f32.mxu0 %v4888_v20  ;;  %8211 = vmatprep.mubr.f32.mxu1 %v2737_v29  ;;  %v2745_v20 = vld [vmem:[#allocation2 + $0x228] sm:$0xff]  ;;  %v14434_v29 = vld [vmem:[#allocation51_spill] sm:$0xff] }
 0x289   :  { %8769 = vmatmul.mubr.f32.gmra.mrb[62].mxu0 %v4889_v59  ;;  %8212 = vmatmul.mubr.f32.gmra.mrb[32].mxu1 %v2738_v28  ;;  %v2744_v28 = vld [vmem:[#allocation2 + $0x218] sm:$0xff]  ;;  %v14435_v59 = vld [vmem:[#allocation35_spill] sm:$0xff] }
 0x28a   :  { %8803 = vmatprep.mubr.f32.mxu0 %v12126_v38  ;;  %8214 = vmatprep.mubr.f32.mxu1 %v2739_v1  ;;  %v2746_v38 = vld [vmem:[#allocation2 + $0x230] sm:$0xff]  ;;  %v14432_v1 = vld [vmem:[#allocation50_spill] sm:$0xff] }
 0x28d   :  { %8804 = vmatmul.mubr.f32.vlgmr.msra.gmra.mrb[0].mxu0 %v12137_v58  ;;  %8215 = vmatmul.mubr.f32.gmra.mrb[34].mxu1 %v2740_v50  ;;  %v2747_v58 = vld [vmem:[#allocation2 + $0x240] sm:$0xff]  ;;  %v14436_v50 = vld [vmem:[#allocation52_spill] sm:$0xff] }
 0x28e   :  { %8806 = vmatprep.mubr.f32.mxu0 %v12139_v21  ;;  %8217 = vmatprep.mubr.f32.mxu1 %v2741_v6  ;;  %v2748_v21 = vld [vmem:[#allocation2 + $0x248] sm:$0xff] }
 0x28f   :  { %v14433_v6 = vld [vmem:[#allocation34_spill] sm:$0xff] }
 0x291   :  { %8807 = vmatmul.mubr.f32.gmra.mrb[2].mxu0 %v12151_v23  ;;  %8218 = vmatmul.mubr.f32.gmra.mrb[36].mxu1 %v2742_v48  ;;  %v5384_v23 = vld [vmem:[#allocation2 + $0x182] sm:$0xff]  ;;  %v5416_v48 = vld [vmem:[#allocation2 + $0x332] sm:$0xff] }
 0x292   :  { %8809 = vmatprep.mubr.f32.mxu0 %v12153_v4  ;;  %8220 = vmatprep.mubr.f32.mxu1 %v2743_v49  ;;  %v2767_v4 = vld [vmem:[#allocation2 + $0x330] sm:$0xff]  ;;  %v14437_v49 = vld [vmem:[#allocation36_spill] sm:$0xff] }
 0x295   :  { %8810 = vmatmul.mubr.f32.gmra.mrb[4].mxu0 %v12165_v13  ;;  %8221 = vmatmul.mubr.f32.gmra.mrb[38].mxu1 %v2744_v28  ;;  %v5385_v13 = vld [vmem:[#allocation2 + $0x18a] sm:$0xff]  ;;  %v5417_v28 = vld [vmem:[#allocation2 + $0x33a] sm:$0xff] }
 0x296   :  { %8812 = vmatprep.mubr.f32.mxu0 %v12167_v7  ;;  %8223 = vmatprep.mubr.f32.mxu1 %v2745_v20  ;;  %v2768_v7 = vld [vmem:[#allocation2 + $0x338] sm:$0xff]  ;;  %v14438_v20 = vld [vmem:[#allocation53_spill] sm:$0xff] }
 0x299   :  { %8813 = vmatmul.mubr.f32.gmra.mrb[6].mxu0 %v12179_v62  ;;  %8224 = vmatmul.mubr.f32.gmra.mrb[40].mxu1 %v2746_v38  ;;  %v5386_v62 = vld [vmem:[#allocation2 + $0x19a] sm:$0xff]  ;;  %v5418_v38 = vld [vmem:[#allocation2 + $0x34a] sm:$0xff] }
 0x29a   :  { %8815 = vmatprep.mubr.f32.mxu0 %v12183_v40  ;;  %8226 = vmatprep.mubr.f32.mxu1 %v2747_v58  ;;  %v5387_v40 = vld [vmem:[#allocation2 + $0x1a2] sm:$0xff]  ;;  %v5419_v58 = vld [vmem:[#allocation2 + $0x352] sm:$0xff] }
 0x29d   :  { %8816 = vmatmul.mubr.f32.gmra.mrb[8].mxu0 %v12197_v2  ;;  %8227 = vmatmul.mubr.f32.gmra.mrb[42].mxu1 %v2748_v21  ;;  %v14390_v2 = vld [vmem:[#allocation13_spill] sm:$0xff] }
 0x29e   :  { %8818 = vmatprep.mubr.f32.mxu0 %v12201_v33  ;;  %8229 = vmatprep.mubr.f32.mxu1 %v12181_v5  ;;  %v3267_v5 = vld [vmem:[#allocation2 + $0x1c9] sm:$0xff] }
 0x29f   :  { %v14392_v33 = vld [vmem:[#allocation6_spill] sm:$0xff] }
 0x2a1   :  { %8819 = vmatmul.mubr.f32.gmra.mrb[10].mxu0 %v12209_v56  ;;  %8230 = vmatmul.mubr.f32.gmra.mrb[44].mxu1 %v12194_v55  ;;  %v3268_v55 = vld [vmem:[#allocation2 + $0x1d1] sm:$0xff] }
 0x2a2   :  { %8821 = vmatprep.mubr.f32.mxu0 %v12213_v16  ;;  %8232 = vmatprep.mubr.f32.mxu1 %v12199_v60  ;;  %v14391_v60 = vld [vmem:[#allocation24_spill] sm:$0xff]  ;;  %v14394_v56 = vld [vmem:[#allocation7_spill] sm:$0xff]  ;;  %v14396_v16 = vld [vmem:[#allocation37_spill] sm:$0xff] }
 0x2a5   :  { %8822 = vmatmul.mubr.f32.gmra.mrb[12].mxu0 %v12221_v37  ;;  %8233 = vmatmul.mubr.f32.gmra.mrb[46].mxu1 %v12206_v44  ;;  %v14393_v44 = vld [vmem:[#allocation14_spill] sm:$0xff]  ;;  %v14398_v37 = vld [vmem:[#allocation8_spill] sm:$0xff] }
 0x2a6   :  { %8824 = vmatprep.mubr.f32.mxu0 %v12225_v57  ;;  %8235 = vmatprep.mubr.f32.mxu1 %v12211_v30  ;;  %v14395_v30 = vld [vmem:[#allocation26_spill] sm:$0xff] }
 0x2a7   :  { %v14400_v57 = vld [vmem:[#allocation38_spill] sm:$0xff] }
 0x2a9   :  { %8825 = vmatmul.mubr.f32.gmra.mrb[14].mxu0 %v12234_v31  ;;  %8236 = vmatmul.mubr.f32.gmra.mrb[48].mxu1 %v12218_v46  ;;  %v14397_v46 = vld [vmem:[#allocation15_spill] sm:$0xff]  ;;  %v14402_v31 = vld [vmem:[#allocation9_spill] sm:$0xff] }
 0x2aa   :  { %8827 = vmatprep.mubr.f32.mxu0 %v12238_v26  ;;  %8238 = vmatprep.mubr.f32.mxu1 %v12223_v36  ;;  %v14399_v36 = vld [vmem:[#allocation27_spill] sm:$0xff] }
 0x2ab   :  { %v14404_v26 = vld [vmem:[#allocation39_spill] sm:$0xff] }
 0x2ad   :  { %8828 = vmatmul.mubr.f32.gmra.mrb[16].mxu0 %v12246_v24  ;;  %8239 = vmatmul.mubr.f32.gmra.mrb[50].mxu1 %v12231_v22  ;;  %v14401_v22 = vld [vmem:[#allocation16_spill] sm:$0xff]  ;;  %v14406_v24 = vld [vmem:[#allocation10_spill] sm:$0xff] }
 0x2ae   :  { %8830 = vmatprep.mubr.f32.mxu0 %v12250_v47  ;;  %8241 = vmatprep.mubr.f32.mxu1 %v12236_v39  ;;  %v14403_v39 = vld [vmem:[#allocation28_spill] sm:$0xff] }
 0x2af   :  { %v14408_v47 = vld [vmem:[#allocation40_spill] sm:$0xff] }
 0x2b1   :  { %8831 = vmatmul.mubr.f32.gmra.mrb[18].mxu0 %v12258_v14  ;;  %8242 = vmatmul.mubr.f32.gmra.mrb[52].mxu1 %v12243_v8  ;;  %v14405_v8 = vld [vmem:[#allocation17_spill] sm:$0xff]  ;;  %v14410_v14 = vld [vmem:[#allocation11_spill] sm:$0xff] }
 0x2b2   :  { %8833 = vmatprep.mubr.f32.mxu0 %v12262_v25  ;;  %8244 = vmatprep.mubr.f32.mxu1 %v12248_v51  ;;  %v14407_v51 = vld [vmem:[#allocation29_spill] sm:$0xff] }
 0x2b3   :  { %v14412_v25 = vld [vmem:[#allocation41_spill] sm:$0xff] }
 0x2b5   :  { %8834 = vmatmul.mubr.f32.gmra.mrb[20].mxu0 %v12270_v42  ;;  %8245 = vmatmul.mubr.f32.gmra.mrb[54].mxu1 %v12255_v45  ;;  %v14409_v45 = vld [vmem:[#allocation18_spill] sm:$0xff]  ;;  %v14414_v42 = vld [vmem:[#allocation12_spill] sm:$0xff] }
 0x2b6   :  { %8836 = vmatprep.mubr.f32.mxu0 %v12274_v52  ;;  %8247 = vmatprep.mubr.f32.mxu1 %v12260_v18  ;;  %v14411_v18 = vld [vmem:[#allocation19_spill] sm:$0xff]  ;;  %v14416_v52 = vld [vmem:[#allocation42_spill] sm:$0xff] }
 0x2b9   :  { %8837 = vmatmul.mubr.f32.gmra.mrb[22].mxu0 %v12286_v17  ;;  %8248 = vmatmul.mubr.f32.gmra.mrb[56].mxu1 %v12267_v53  ;;  %v14413_v53 = vld [vmem:[#allocation30_spill] sm:$0xff]  ;;  %v14418_v17 = vld [vmem:[#allocation43_spill] sm:$0xff] }
 0x2ba   :  { %8839 = vmatprep.mubr.f32.mxu0 %v12290_v9  ;;  %8250 = vmatprep.mubr.f32.mxu1 %v12272_v61  ;;  %v14415_v61 = vld [vmem:[#allocation20_spill] sm:$0xff] }
 0x2bb   :  { %v14420_v9 = vld [vmem:[#allocation44_spill] sm:$0xff] }
 0x2bd   :  { %8840 = vmatmul.mubr.f32.gmra.mrb[24].mxu0 %v12298_v35  ;;  %8251 = vmatmul.mubr.f32.gmra.mrb[58].mxu1 %v12283_v43  ;;  %v14417_v43 = vld [vmem:[#allocation21_spill] sm:$0xff] }
 0x2be   :  { %8842 = vmatprep.mubr.f32.mxu0 %v12300_v32  ;;  %8253 = vmatprep.mubr.f32.mxu1 %v12288_v54  ;;  %v14419_v54 = vld [vmem:[#allocation31_spill] sm:$0xff]  ;;  %v14422_v35 = vld [vmem:[#allocation45_spill] sm:$0xff] }
 0x2bf   :  { %v14423_v32 = vld [vmem:[#allocation33_spill] sm:$0xff] }
 0x2c1   :  { %8843 = vmatmul.mubr.f32.gmra.mrb[26].mxu0 %v12307_v41  ;;  %8254 = vmatmul.mubr.f32.gmra.mrb[60].mxu1 %v12295_v3  ;;  %v14421_v3 = vld [vmem:[#allocation32_spill] sm:$0xff]  ;;  %v14424_v41 = vld [vmem:[#allocation46_spill] sm:$0xff] }
 0x2c2   :  { %8845 = vmatprep.mubr.f32.mxu0 %v5384_v23  ;;  %8256 = vmatprep.mubr.f32.mxu1 %v2767_v4 }
 0x2c5   :  { %8846 = vmatmul.mubr.f32.gmra.mrb[28].mxu0 %v5385_v13  ;;  %8257 = vmatmul.mubr.f32.gmra.mrb[62].mxu1 %v2768_v7 }
 0x2c6   :  { %8848 = vmatprep.mubr.f32.mxu0 %v5386_v62  ;;  %8339 = vmatprep.mubr.f32.mxu1 %v3267_v5 }
 0x2c9   :  { %8849 = vmatmul.mubr.f32.gmra.mrb[30].mxu0 %v5387_v40  ;;  %8340 = vmatmul.mubr.f32.vlgmr.msra.gmra.mrb[32].mxu1 %v3268_v55 }
 0x2ca   :  { %8851 = vmatprep.mubr.f32.mxu0 %v12319_v19  ;;  %8342 = vmatprep.mubr.f32.mxu1 %v12440_v0  ;;  %v14425_v19 = vld [vmem:[#allocation22_spill] sm:$0xff]  ;;  %v14428_v0 = vld [vmem:[#allocation48_spill] sm:$0xff] }
 0x2cd   :  { %8852 = vmatmul.mubr.f32.gmra.mrb[32].mxu0 %v12328_v11  ;;  %8343 = vmatmul.mubr.f32.gmra.mrb[34].mxu1 %v12443_v27  ;;  %v14426_v11 = vld [vmem:[#allocation47_spill] sm:$0xff]  ;;  %v14429_v27 = vld [vmem:[#allocation25_spill] sm:$0xff] }
 0x2ce   :  { %8854 = vmatprep.mubr.f32.mxu0 %v12331_v10  ;;  %8345 = vmatprep.mubr.f32.mxu1 %v12446_v12  ;;  %v14427_v10 = vld [vmem:[#allocation23_spill] sm:$0xff]  ;;  %v14430_v12 = vld [vmem:[#allocation49_spill] sm:$0xff] }
 0x2d1   :  { %8855 = vmatmul.mubr.f32.gmra.mrb[34].mxu0 %v14390_v2  ;;  %8346 = vmatmul.mubr.f32.gmra.mrb[36].mxu1 %v12451_v63  ;;  %v14431_v63 = vld [vmem:[#allocation5_spill] sm:$0xff] }
 0x2d2   :  { %8857 = vmatprep.mubr.f32.mxu0 %v14391_v60  ;;  %8348 = vmatprep.mubr.f32.mxu1 %v14392_v33 }
 0x2d5   :  { %8858 = vmatmul.mubr.f32.gmra.mrb[36].mxu0 %v14393_v44  ;;  %8349 = vmatmul.mubr.f32.gmra.mrb[38].mxu1 %v14394_v56 }
 0x2d6   :  { %8860 = vmatprep.mubr.f32.mxu0 %v14395_v30  ;;  %8351 = vmatprep.mubr.f32.mxu1 %v14396_v16 }
 0x2d9   :  { %8861 = vmatmul.mubr.f32.gmra.mrb[38].mxu0 %v14397_v46  ;;  %8352 = vmatmul.mubr.f32.gmra.mrb[40].mxu1 %v14398_v37 }
 0x2da   :  { %8863 = vmatprep.mubr.f32.mxu0 %v14399_v36  ;;  %8354 = vmatprep.mubr.f32.mxu1 %v14400_v57 }
 0x2dd   :  { %8864 = vmatmul.mubr.f32.gmra.mrb[40].mxu0 %v14401_v22  ;;  %8355 = vmatmul.mubr.f32.gmra.mrb[42].mxu1 %v14402_v31 }
 0x2de   :  { %8866 = vmatprep.mubr.f32.mxu0 %v14403_v39  ;;  %8357 = vmatprep.mubr.f32.mxu1 %v14404_v26 }
 0x2e1   :  { %8867 = vmatmul.mubr.f32.gmra.mrb[42].mxu0 %v14405_v8  ;;  %8358 = vmatmul.mubr.f32.gmra.mrb[44].mxu1 %v14406_v24 }
 0x2e2   :  { %8869 = vmatprep.mubr.f32.mxu0 %v14407_v51  ;;  %8360 = vmatprep.mubr.f32.mxu1 %v14408_v47 }
 0x2e5   :  { %8870 = vmatmul.mubr.f32.gmra.mrb[44].mxu0 %v14409_v45  ;;  %8361 = vmatmul.mubr.f32.gmra.mrb[46].mxu1 %v14410_v14 }
 0x2e6   :  { %8872 = vmatprep.mubr.f32.mxu0 %v14411_v18  ;;  %8363 = vmatprep.mubr.f32.mxu1 %v14412_v25  ;;  %v12698_v25 = vld [vmem:[%s14062_s2] ss:$0 sm:$0xff] }
 0x2e9   :  { %8873 = vmatmul.mubr.f32.gmra.mrb[46].mxu0 %v14413_v53  ;;  %8364 = vmatmul.mubr.f32.gmra.mrb[48].mxu1 %v14414_v42 }
 0x2ea   :  { %8875 = vmatprep.mubr.f32.mxu0 %v14415_v61  ;;  %8366 = vmatprep.mubr.f32.mxu1 %v14416_v52 }
 0x2ed   :  { %8876 = vmatmul.mubr.f32.gmra.mrb[48].mxu0 %v14417_v43  ;;  %8367 = vmatmul.mubr.f32.gmra.mrb[50].mxu1 %v14418_v17 }
 0x2ee   :  { %8878 = vmatprep.mubr.f32.mxu0 %v14419_v54  ;;  %8369 = vmatprep.mubr.f32.mxu1 %v14420_v9 }
 0x2f1   :  { %8879 = vmatmul.mubr.f32.gmra.mrb[50].mxu0 %v14421_v3  ;;  %8370 = vmatmul.mubr.f32.gmra.mrb[52].mxu1 %v14422_v35 }
 0x2f2   :  { %8881 = vmatprep.mubr.f32.mxu0 %v14423_v32  ;;  %8372 = vmatprep.mubr.f32.mxu1 %v14424_v41 }
 0x2f5   :  { %8882 = vmatmul.mubr.f32.gmra.mrb[52].mxu0 %v14425_v19  ;;  %8373 = vmatmul.mubr.f32.gmra.mrb[54].mxu1 %v14426_v11 }
 0x2f6   :  { %8884 = vmatprep.mubr.f32.mxu0 %v14427_v10  ;;  %8375 = vmatprep.mubr.f32.mxu1 %v14428_v0 }
 0x2f9   :  { %8885 = vmatmul.mubr.f32.gmra.mrb[54].mxu0 %v14429_v27  ;;  %8376 = vmatmul.mubr.f32.gmra.mrb[56].mxu1 %v14430_v12 }
 0x2fa   :  { %8887 = vmatprep.mubr.f32.mxu0 %v14431_v63  ;;  %8378 = vmatprep.mubr.f32.mxu1 %v14432_v1 }
 0x2fd   :  { %8888 = vmatmul.mubr.f32.gmra.mrb[56].mxu0 %v14433_v6  ;;  %8379 = vmatmul.mubr.f32.gmra.mrb[58].mxu1 %v14434_v29 }
 0x2fe   :  { %8890 = vmatprep.mubr.f32.mxu0 %v14435_v59  ;;  %8381 = vmatprep.mubr.f32.mxu1 %v14436_v50 }
 0x301   :  { %8891 = vmatmul.mubr.f32.gmra.mrb[58].mxu0 %v14437_v49  ;;  %8382 = vmatmul.mubr.f32.gmra.mrb[60].mxu1 %v12536_v34 }
 0x302   :  { %8893 = vmatprep.mubr.f32.mxu0 %v5416_v48  ;;  %8384 = vmatprep.mubr.f32.mxu1 %v14438_v20 }
 0x305   :  { %8894 = vmatmul.mubr.f32.gmra.mrb[60].mxu0 %v5417_v28  ;;  %8385 = vmatmul.mubr.f32.gmra.mrb[62].mxu1 %v12542_v15 }
 0x306   :  { %8896 = vmatprep.mubr.f32.mxu0 %v5418_v38 }
 0x309   :  { %8897 = vmatmul.mubr.f32.gmra.mrb[62].mxu0 %v5419_v58 }
 0x31c   :  { %v8165_v21 = vpop.f32.mrb[0].mxu1 }
 0x31d   :  { %v2852_v23 = vpop.f32.mrb[1].mxu1 }
 0x320   :  { %v8168_v4 = vpop.f32.mrb[2].mxu1 }
 0x321   :  { %v2862_v13 = vpop.f32.mrb[3].mxu1 }
 0x324   :  { %v8171_v7 = vpop.f32.mrb[4].mxu1 }
 0x325   :  { %v2872_v62 = vpop.f32.mrb[5].mxu1 }
 0x328   :  { %v8174_v5 = vpop.f32.mrb[6].mxu1 }
 0x329   :  { %v2882_v40 = vpop.f32.mrb[7].mxu1 }
 0x32c   :  { %v8177_v34 = vpop.f32.mrb[8].mxu1 }
 0x32d   :  { %v12649_v55 = vpop.f32.mrb[9].mxu1 }
 0x330   :  { %v12651_v2 = vpop.f32.mrb[10].mxu1 }
 0x331   :  { %v12653_v60 = vpop.f32.mrb[11].mxu1 }
 0x334   :  { %v12655_v33 = vpop.f32.mrb[12].mxu1 }
 0x335   :  { %v12657_v15 = vpop.f32.mrb[13].mxu1 }
 0x338   :  { %v12659_v44 = vpop.f32.mrb[14].mxu1 }
 0x339   :  { %v12661_v56 = vpop.f32.mrb[15].mxu1 }
 0x33c   :  { %v12663_v30 = vpop.f32.mrb[16].mxu1 }
 0x33d   :  { %v12665_v16 = vpop.f32.mrb[17].mxu1 }
 0x340   :  { %v12667_v46 = vpop.f32.mrb[18].mxu1 }
 0x341   :  { %v12669_v37 = vpop.f32.mrb[19].mxu1 }
 0x344   :  { %v12671_v36 = vpop.f32.mrb[20].mxu1 }
 0x345   :  { %v12673_v57 = vpop.f32.mrb[21].mxu1 }
 0x348   :  { %v12675_v22 = vpop.f32.mrb[22].mxu1 }
 0x349   :  { %v12677_v31 = vpop.f32.mrb[23].mxu1 }
 0x34c   :  { %v12679_v39 = vpop.f32.mrb[24].mxu1 }
 0x34d   :  { %v12681_v26 = vpop.f32.mrb[25].mxu1 }
 0x350   :  { %v12683_v8 = vpop.f32.mrb[26].mxu1 }
 0x351   :  { %v12685_v24 = vpop.f32.mrb[27].mxu1 }
 0x354   :  { %v12687_v51 = vpop.f32.mrb[28].mxu1 }
 0x355   :  { %v12689_v47 = vpop.f32.mrb[29].mxu1 }
 0x358   :  { %v12691_v45 = vpop.f32.mrb[30].mxu1 }
 0x359   :  { %v12693_v14 = vpop.f32.mrb[31].mxu1 }
 0x360   :  { %v8805_v18 = vpop.f32.mrb[0].mxu0 }
 0x361   :  { %v9203_v53 = vadd.f32 %v8805_v18, %v8165_v21  ;;  %v5503_v42 = vpop.f32.mrb[1].mxu0 }
 0x362   :  { %v9204_v61 = vadd.f32 %v5503_v42, %v2852_v23 }
 0x363   :  { %v12701_v52 = vadd.f32 %v9203_v53, %v12698_v25 }
 0x364   :  { %v8808_v43 = vpop.f32.mrb[2].mxu0  ;;  %v12704_v17 = vadd.f32 %v9204_v61, %v12698_v25 }
 0x365   :  { %v9205_v54 = vadd.f32 %v8808_v43, %v8168_v4  ;;  %v5513_v9 = vpop.f32.mrb[3].mxu0  ;;  %v5958_v3 = vand.u32 2147483647, %v12701_v52 }
 0x366   :  { %v9206_v35 = vadd.f32 %v5513_v9, %v2862_v13  ;;  %v5957_v0 = vand.u32 2147483647, %v12704_v17 }
 0x367   :  { %6023 = vmax.xlane.f32.xlu0 %v5958_v3  ;;  %v12708_v32 = vadd.f32 %v9205_v54, %v12698_v25 }
 0x368   :  { %v8811_v41 = vpop.f32.mrb[4].mxu0  ;;  %v12711_v19 = vadd.f32 %v9206_v35, %v12698_v25 }
 0x369   :  { %v9207_v11 = vadd.f32 %v8811_v41, %v8171_v7  ;;  %v5523_v10 = vpop.f32.mrb[5].mxu0  ;;  %v5960_v27 = vand.u32 2147483647, %v12708_v32 }
 0x36a   :  { %v9208_v12 = vadd.f32 %v5523_v10, %v2872_v62  ;;  %v5959_v50 = vand.u32 2147483647, %v12711_v19 }
 0x36b   :  { %6021 = vmax.xlane.f32.xlu0 %v5957_v0  ;;  %6027 = vmax.xlane.f32.xlu1 %v5960_v27  ;;  %v12719_v6 = vadd.f32 %v9207_v11, %v12698_v25 }
 0x36c   :  { %v12716_v63 = vadd.f32 %v9208_v12, %v12698_v25  ;;  %v8814_v1 = vpop.f32.mrb[6].mxu0 }
 0x36d   :  { %v9209_v29 = vadd.f32 %v8814_v1, %v8174_v5  ;;  %v5533_v59 = vpop.f32.mrb[7].mxu0  ;;  %v5962_v23 = vand.u32 2147483647, %v12719_v6 }
 0x36e   :  { %v9210_v48 = vadd.f32 %v5533_v59, %v2882_v40  ;;  %v5961_v49 = vand.u32 2147483647, %v12716_v63 }
 0x36f   :  { %6025 = vmax.xlane.f32.xlu1 %v5959_v50  ;;  %v12727_v38 = vadd.f32 %v9209_v29, %v12698_v25 }
 0x370   :  { %v12724_v28 = vadd.f32 %v9210_v48, %v12698_v25  ;;  %v8817_v20 = vpop.f32.mrb[8].mxu0  ;;  %6029 = vmax.xlane.f32.xlu0 %v5961_v49 }
 0x371   :  { %v9211_v58 = vadd.f32 %v8817_v20, %v8177_v34  ;;  %v5543_v21 = vpop.f32.mrb[9].mxu0  ;;  %v5964_v34 = vand.u32 2147483647, %v12727_v38 }
 0x372   :  { %v9212_v4 = vadd.f32 %v5543_v21, %v12649_v55  ;;  %v5963_v13 = vand.u32 2147483647, %v12724_v28 }
 0x373   :  { %6031 = vmax.xlane.f32.xlu1 %v5962_v23  ;;  %v12736_v5 = vadd.f32 %v9211_v58, %v12698_v25 }
 0x374   :  { %v12733_v7 = vadd.f32 %v9212_v4, %v12698_v25  ;;  %v8820_v62 = vpop.f32.mrb[10].mxu0  ;;  %6033 = vmax.xlane.f32.xlu0 %v5963_v13 }
 0x375   :  { %14439 = vst [vmem:[#allocation13_spill] sm:$0xff] %v12736_v5  ;;  %v9213_v40 = vadd.f32 %v8820_v62, %v12651_v2  ;;  %v5553_v18 = vpop.f32.mrb[11].mxu0  ;;  %v5966_v2 = vand.u32 2147483647, %v12736_v5 }
 0x376   :  { %v9214_v53 = vadd.f32 %v5553_v18, %v12653_v60  ;;  %v5965_v55 = vand.u32 2147483647, %v12733_v7 }
 0x377   :  { %6035 = vmax.xlane.f32.xlu1 %v5964_v34  ;;  %v12746_v43 = vadd.f32 %v9213_v40, %v12698_v25 }
 0x378   :  { %v12743_v42 = vadd.f32 %v9214_v53, %v12698_v25  ;;  %v8823_v61 = vpop.f32.mrb[12].mxu0  ;;  %6037 = vmax.xlane.f32.xlu0 %v5965_v55 }
 0x379   :  { %14441 = vst [vmem:[#allocation6_spill] sm:$0xff] %v12746_v43  ;;  %v9215_v54 = vadd.f32 %v8823_v61, %v12655_v33  ;;  %v5563_v9 = vpop.f32.mrb[13].mxu0  ;;  %v5968_v33 = vand.u32 2147483647, %v12746_v43 }
 0x37a   :  { %14440 = vst [vmem:[#allocation24_spill] sm:$0xff] %v12743_v42  ;;  %v9216_v3 = vadd.f32 %v5563_v9, %v12657_v15  ;;  %v5967_v60 = vand.u32 2147483647, %v12743_v42 }
 0x37b   :  { %6039 = vmax.xlane.f32.xlu1 %v5966_v2  ;;  %v12756_v11 = vadd.f32 %v9215_v54, %v12698_v25 }
 0x37c   :  { %v12753_v35 = vadd.f32 %v9216_v3, %v12698_v25  ;;  %v8826_v41 = vpop.f32.mrb[14].mxu0  ;;  %6041 = vmax.xlane.f32.xlu0 %v5967_v60 }
 0x37d   :  { %14443 = vst [vmem:[#allocation7_spill] sm:$0xff] %v12756_v11  ;;  %v9217_v10 = vadd.f32 %v8826_v41, %v12659_v44  ;;  %v5573_v0 = vpop.f32.mrb[15].mxu0  ;;  %v5970_v44 = vand.u32 2147483647, %v12756_v11 }
 0x37e   :  { %14442 = vst [vmem:[#allocation14_spill] sm:$0xff] %v12753_v35  ;;  %v9218_v27 = vadd.f32 %v5573_v0, %v12661_v56  ;;  %v5969_v15 = vand.u32 2147483647, %v12753_v35 }
 0x37f   :  { %6043 = vmax.xlane.f32.xlu1 %v5968_v33  ;;  %v12766_v29 = vadd.f32 %v9217_v10, %v12698_v25 }
 0x380   :  { %v12763_v12 = vadd.f32 %v9218_v27, %v12698_v25  ;;  %v8829_v1 = vpop.f32.mrb[16].mxu0  ;;  %6045 = vmax.xlane.f32.xlu0 %v5969_v15 }
 0x381   :  { %14445 = vst [vmem:[#allocation37_spill] sm:$0xff] %v12766_v29  ;;  %v9219_v59 = vadd.f32 %v8829_v1, %v12663_v30  ;;  %v5583_v50 = vpop.f32.mrb[17].mxu0  ;;  %v5972_v30 = vand.u32 2147483647, %v12766_v29 }
 0x382   :  { %14444 = vst [vmem:[#allocation26_spill] sm:$0xff] %v12763_v12  ;;  %v9220_v48 = vadd.f32 %v5583_v50, %v12665_v16  ;;  %v5971_v56 = vand.u32 2147483647, %v12763_v12 }
 0x383   :  { %6047 = vmax.xlane.f32.xlu1 %v5970_v44  ;;  %v12776_v58 = vadd.f32 %v9219_v59, %v12698_v25 }
 0x384   :  { %v12773_v49 = vadd.f32 %v9220_v48, %v12698_v25  ;;  %v8832_v20 = vpop.f32.mrb[18].mxu0  ;;  %6049 = vmax.xlane.f32.xlu0 %v5971_v56 }
 0x385   :  { %14447 = vst [vmem:[#allocation8_spill] sm:$0xff] %v12776_v58  ;;  %v9221_v21 = vadd.f32 %v8832_v20, %v12667_v46  ;;  %v5593_v23 = vpop.f32.mrb[19].mxu0  ;;  %v5974_v46 = vand.u32 2147483647, %v12776_v58 }
 0x386   :  { %14446 = vst [vmem:[#allocation15_spill] sm:$0xff] %v12773_v49  ;;  %v9222_v4 = vadd.f32 %v5593_v23, %v12669_v37  ;;  %v5973_v16 = vand.u32 2147483647, %v12773_v49 }
 0x387   :  { %6051 = vmax.xlane.f32.xlu1 %v5972_v30  ;;  %v12786_v40 = vadd.f32 %v9221_v21, %v12698_v25 }
 0x388   :  { %v12783_v13 = vadd.f32 %v9222_v4, %v12698_v25  ;;  %v8835_v62 = vpop.f32.mrb[20].mxu0  ;;  %6053 = vmax.xlane.f32.xlu0 %v5973_v16 }
 0x389   :  { %14449 = vst [vmem:[#allocation38_spill] sm:$0xff] %v12786_v40  ;;  %v9223_v18 = vadd.f32 %v8835_v62, %v12671_v36  ;;  %v5603_v34 = vpop.f32.mrb[21].mxu0  ;;  %v5976_v36 = vand.u32 2147483647, %v12786_v40 }
 0x38a   :  { %14448 = vst [vmem:[#allocation27_spill] sm:$0xff] %v12783_v13  ;;  %v9224_v53 = vadd.f32 %v5603_v34, %v12673_v57  ;;  %v5975_v37 = vand.u32 2147483647, %v12783_v13 }
 0x38b   :  { %6055 = vmax.xlane.f32.xlu1 %v5974_v46  ;;  %v12796_v54 = vadd.f32 %v9223_v18, %v12698_v25 }
 0x38c   :  { %v12793_v55 = vadd.f32 %v9224_v53, %v12698_v25  ;;  %v8838_v61 = vpop.f32.mrb[22].mxu0  ;;  %6057 = vmax.xlane.f32.xlu0 %v5975_v37 }
 0x38d   :  { %14451 = vst [vmem:[#allocation9_spill] sm:$0xff] %v12796_v54  ;;  %v9225_v9 = vadd.f32 %v8838_v61, %v12675_v22  ;;  %v5613_v2 = vpop.f32.mrb[23].mxu0  ;;  %v5978_v22 = vand.u32 2147483647, %v12796_v54 }
 0x38e   :  { %14450 = vst [vmem:[#allocation16_spill] sm:$0xff] %v12793_v55  ;;  %v9226_v3 = vadd.f32 %v5613_v2, %v12677_v31  ;;  %v5977_v57 = vand.u32 2147483647, %v12793_v55 }
 0x38f   :  { %6059 = vmax.xlane.f32.xlu1 %v5976_v36  ;;  %v12806_v10 = vadd.f32 %v9225_v9, %v12698_v25 }
 0x390   :  { %v12803_v60 = vadd.f32 %v9226_v3, %v12698_v25  ;;  %v8841_v41 = vpop.f32.mrb[24].mxu0  ;;  %6061 = vmax.xlane.f32.xlu0 %v5977_v57 }
 0x391   :  { %14453 = vst [vmem:[#allocation39_spill] sm:$0xff] %v12806_v10  ;;  %v9227_v0 = vadd.f32 %v8841_v41, %v12679_v39  ;;  %v5623_v33 = vpop.f32.mrb[25].mxu0  ;;  %v5980_v39 = vand.u32 2147483647, %v12806_v10 }
 0x392   :  { %14452 = vst [vmem:[#allocation28_spill] sm:$0xff] %v12803_v60  ;;  %v9228_v27 = vadd.f32 %v5623_v33, %v12681_v26  ;;  %v5979_v31 = vand.u32 2147483647, %v12803_v60 }
 0x393   :  { %6063 = vmax.xlane.f32.xlu1 %v5978_v22  ;;  %v12816_v59 = vadd.f32 %v9227_v0, %v12698_v25 }
 0x394   :  { %v12813_v15 = vadd.f32 %v9228_v27, %v12698_v25  ;;  %v8844_v1 = vpop.f32.mrb[26].mxu0  ;;  %6065 = vmax.xlane.f32.xlu0 %v5979_v31 }
 0x395   :  { %14455 = vst [vmem:[#allocation10_spill] sm:$0xff] %v12816_v59  ;;  %v9229_v50 = vadd.f32 %v8844_v1, %v12683_v8  ;;  %v5633_v44 = vpop.f32.mrb[27].mxu0  ;;  %v5982_v8 = vand.u32 2147483647, %v12816_v59 }
 0x396   :  { %14454 = vst [vmem:[#allocation17_spill] sm:$0xff] %v12813_v15  ;;  %v9230_v48 = vadd.f32 %v5633_v44, %v12685_v24  ;;  %v5981_v26 = vand.u32 2147483647, %v12813_v15 }
 0x397   :  { %6067 = vmax.xlane.f32.xlu1 %v5980_v39  ;;  %v12826_v21 = vadd.f32 %v9229_v50, %v12698_v25 }
 0x398   :  { %v12823_v56 = vadd.f32 %v9230_v48, %v12698_v25  ;;  %v8847_v20 = vpop.f32.mrb[28].mxu0  ;;  %6069 = vmax.xlane.f32.xlu0 %v5981_v26 }
 0x399   :  { %14457 = vst [vmem:[#allocation40_spill] sm:$0xff] %v12826_v21  ;;  %v9231_v23 = vadd.f32 %v8847_v20, %v12687_v51  ;;  %v5643_v30 = vpop.f32.mrb[29].mxu0  ;;  %v5984_v53 = vand.u32 2147483647, %v12826_v21 }
 0x39a   :  { %14456 = vst [vmem:[#allocation29_spill] sm:$0xff] %v12823_v56  ;;  %v9232_v4 = vadd.f32 %v5643_v30, %v12689_v47  ;;  %v5983_v24 = vand.u32 2147483647, %v12823_v56 }
 0x39b   :  { %6071 = vmax.xlane.f32.xlu1 %v5982_v8  ;;  %v12836_v34 = vadd.f32 %v9231_v23, %v12698_v25 }
 0x39c   :  { %v12833_v16 = vadd.f32 %v9232_v4, %v12698_v25  ;;  %v8850_v62 = vpop.f32.mrb[30].mxu0  ;;  %6073 = vmax.xlane.f32.xlu0 %v5983_v24  ;;  %v8341_v18 = vpop.f32.mrb[32].mxu1 }
 0x39d   :  { %14459 = vst [vmem:[#allocation11_spill] sm:$0xff] %v12836_v34  ;;  %v9233_v46 = vadd.f32 %v8850_v62, %v12691_v45  ;;  %v5653_v51 = vpop.f32.mrb[31].mxu0  ;;  %v3542_v37 = vpop.f32.mrb[33].mxu1  ;;  %v5986_v41 = vand.u32 2147483647, %v12836_v34 }
 0x39e   :  { %14458 = vst [vmem:[#allocation18_spill] sm:$0xff] %v12833_v16  ;;  %v9234_v47 = vadd.f32 %v5653_v51, %v12693_v14  ;;  %v5985_v61 = vand.u32 2147483647, %v12833_v16 }
 0x39f   :  { %6075 = vmax.xlane.f32.xlu1 %v5984_v53  ;;  %v12846_v3 = vadd.f32 %v9233_v46, %v12698_v25 }
 0x3a0   :  { %v12843_v9 = vadd.f32 %v9234_v47, %v12698_v25  ;;  %v8853_v2 = vpop.f32.mrb[32].mxu0  ;;  %6077 = vmax.xlane.f32.xlu0 %v5985_v61  ;;  %v8344_v36 = vpop.f32.mrb[34].mxu1 }
 0x3a1   :  { %14461 = vst [vmem:[#allocation41_spill] sm:$0xff] %v12846_v3  ;;  %v9235_v57 = vadd.f32 %v8853_v2, %v8341_v18  ;;  %v5663_v45 = vpop.f32.mrb[33].mxu0  ;;  %v3552_v0 = vpop.f32.mrb[35].mxu1  ;;  %v5988_v39 = vand.u32 2147483647, %v12846_v3 }
 0x3a2   :  { %14460 = vst [vmem:[#allocation19_spill] sm:$0xff] %v12843_v9  ;;  %v9236_v33 = vadd.f32 %v5663_v45, %v3542_v37  ;;  %v5987_v14 = vand.u32 2147483647, %v12843_v9 }
 0x3a3   :  { %6079 = vmax.xlane.f32.xlu1 %v5986_v41  ;;  %v12854_v1 = vadd.f32 %v9235_v57, %v12698_v25 }
 0x3a4   :  { %v12851_v22 = vadd.f32 %v9236_v33, %v12698_v25  ;;  %v8856_v27 = vpop.f32.mrb[34].mxu0  ;;  %6081 = vmax.xlane.f32.xlu0 %v5987_v14  ;;  %v8347_v31 = vpop.f32.mrb[36].mxu1 }
 0x3a5   :  { %14463 = vst [vmem:[#allocation12_spill] sm:$0xff] %v12854_v1  ;;  %v9237_v50 = vadd.f32 %v8856_v27, %v8344_v36  ;;  %v5673_v44 = vpop.f32.mrb[35].mxu0  ;;  %v3562_v48 = vpop.f32.mrb[37].mxu1  ;;  %v5990_v18 = vand.u32 2147483647, %v12854_v1 }
 0x3a6   :  { %14462 = vst [vmem:[#allocation30_spill] sm:$0xff] %v12851_v22  ;;  %v9238_v26 = vadd.f32 %v5673_v44, %v3552_v0  ;;  %v5989_v20 = vand.u32 2147483647, %v12851_v22 }
 0x3a7   :  { %6083 = vmax.xlane.f32.xlu1 %v5988_v39  ;;  %v12862_v4 = vadd.f32 %v9237_v50, %v12698_v25 }
 0x3a8   :  { %v12859_v23 = vadd.f32 %v9238_v26, %v12698_v25  ;;  %v8859_v30 = vpop.f32.mrb[36].mxu0  ;;  %6085 = vmax.xlane.f32.xlu0 %v5989_v20  ;;  %v8350_v8 = vpop.f32.mrb[38].mxu1 }
 0x3a9   :  { %14465 = vst [vmem:[#allocation42_spill] sm:$0xff] %v12862_v4  ;;  %v9239_v24 = vadd.f32 %v8859_v30, %v8347_v31  ;;  %v5683_v62 = vpop.f32.mrb[37].mxu0  ;;  %v3572_v46 = vpop.f32.mrb[39].mxu1  ;;  %v5992_v45 = vand.u32 2147483647, %v12862_v4 }
 0x3aa   :  { %14464 = vst [vmem:[#allocation20_spill] sm:$0xff] %v12859_v23  ;;  %v9240_v51 = vadd.f32 %v5683_v62, %v3562_v48  ;;  %v5991_v53 = vand.u32 2147483647, %v12859_v23 }
 0x3ab   :  { %6087 = vmax.xlane.f32.xlu1 %v5990_v18  ;;  %v12870_v2 = vadd.f32 %v9239_v24, %v12698_v25 }
 0x3ac   :  { %v12867_v37 = vadd.f32 %v9240_v51, %v12698_v25  ;;  %v8862_v47 = vpop.f32.mrb[38].mxu0  ;;  %6089 = vmax.xlane.f32.xlu0 %v5991_v53  ;;  %v8353_v61 = vpop.f32.mrb[40].mxu1 }
 0x3ad   :  { %14467 = vst [vmem:[#allocation43_spill] sm:$0xff] %v12870_v2  ;;  %v9241_v36 = vadd.f32 %v8862_v47, %v8350_v8  ;;  %v5693_v57 = vpop.f32.mrb[39].mxu0  ;;  %v3582_v41 = vpop.f32.mrb[41].mxu1  ;;  %v5994_v48 = vand.u32 2147483647, %v12870_v2 }
 0x3ae   :  { %14466 = vst [vmem:[#allocation21_spill] sm:$0xff] %v12867_v37  ;;  %v9242_v0 = vadd.f32 %v5693_v57, %v3572_v46  ;;  %v5993_v33 = vand.u32 2147483647, %v12867_v37 }
 0x3af   :  { %6091 = vmax.xlane.f32.xlu1 %v5992_v45  ;;  %v12878_v50 = vadd.f32 %v9241_v36, %v12698_v25 }
 0x3b0   :  { %v12875_v14 = vadd.f32 %v9242_v0, %v12698_v25  ;;  %v8865_v27 = vpop.f32.mrb[40].mxu0  ;;  %6093 = vmax.xlane.f32.xlu0 %v5993_v33  ;;  %v8356_v31 = vpop.f32.mrb[42].mxu1 }
 0x3b1   :  { %14469 = vst [vmem:[#allocation44_spill] sm:$0xff] %v12878_v50  ;;  %v9243_v44 = vadd.f32 %v8865_v27, %v8353_v61  ;;  %v5703_v39 = vpop.f32.mrb[41].mxu0  ;;  %v3592_v26 = vpop.f32.mrb[43].mxu1  ;;  %v5996_v53 = vand.u32 2147483647, %v12878_v50 }
 0x3b2   :  { %14468 = vst [vmem:[#allocation31_spill] sm:$0xff] %v12875_v14  ;;  %v9244_v20 = vadd.f32 %v5703_v39, %v3582_v41  ;;  %v5995_v30 = vand.u32 2147483647, %v12875_v14 }
 0x3b3   :  { %6095 = vmax.xlane.f32.xlu1 %v5994_v48  ;;  %v12886_v18 = vadd.f32 %v9243_v44, %v12698_v25 }
 0x3b4   :  { %v12883_v8 = vadd.f32 %v9244_v20, %v12698_v25  ;;  %v8868_v24 = vpop.f32.mrb[42].mxu0  ;;  %6097 = vmax.xlane.f32.xlu0 %v5995_v30  ;;  %v8359_v62 = vpop.f32.mrb[44].mxu1 }
 0x3b5   :  { %14471 = vst [vmem:[#allocation45_spill] sm:$0xff] %v12886_v18  ;;  %v9245_v46 = vadd.f32 %v8868_v24, %v8356_v31  ;;  %v5713_v51 = vpop.f32.mrb[43].mxu0  ;;  %v3602_v47 = vpop.f32.mrb[45].mxu1  ;;  %v5998_v31 = vand.u32 2147483647, %v12886_v18 }
 0x3b6   :  { %14470 = vst [vmem:[#allocation32_spill] sm:$0xff] %v12883_v8  ;;  %v9246_v61 = vadd.f32 %v5713_v51, %v3592_v26  ;;  %v5997_v36 = vand.u32 2147483647, %v12883_v8 }
 0x3b7   :  { %6099 = vmax.xlane.f32.xlu1 %v5996_v53  ;;  %v12894_v0 = vadd.f32 %v9245_v46, %v12698_v25 }
 0x3b8   :  { %v12891_v57 = vadd.f32 %v9246_v61, %v12698_v25  ;;  %v8871_v45 = vpop.f32.mrb[44].mxu0  ;;  %6101 = vmax.xlane.f32.xlu0 %v5997_v36  ;;  %v8362_v41 = vpop.f32.mrb[46].mxu1 }
 0x3b9   :  { %14473 = vst [vmem:[#allocation46_spill] sm:$0xff] %v12894_v0  ;;  %v9247_v33 = vadd.f32 %v8871_v45, %v8359_v62  ;;  %v5723_v27 = vpop.f32.mrb[45].mxu0  ;;  %v3612_v44 = vpop.f32.mrb[47].mxu1  ;;  %v6000_v62 = vand.u32 2147483647, %v12894_v0 }
 0x3ba   :  { %14472 = vst [vmem:[#allocation33_spill] sm:$0xff] %v12891_v57  ;;  %v9248_v39 = vadd.f32 %v5723_v27, %v3602_v47  ;;  %v5999_v48 = vand.u32 2147483647, %v12891_v57 }
 0x3bb   :  { %6103 = vmax.xlane.f32.xlu1 %v5998_v31  ;;  %v12902_v24 = vadd.f32 %v9247_v33, %v12698_v25 }
 0x3bc   :  { %v12899_v26 = vadd.f32 %v9248_v39, %v12698_v25  ;;  %v8874_v20 = vpop.f32.mrb[46].mxu0  ;;  %6105 = vmax.xlane.f32.xlu0 %v5999_v48  ;;  %v8365_v30 = vpop.f32.mrb[48].mxu1 }
 0x3bd   :  { %14475 = vst [vmem:[#allocation47_spill] sm:$0xff] %v12902_v24  ;;  %v9249_v46 = vadd.f32 %v8874_v20, %v8362_v41  ;;  %v5733_v51 = vpop.f32.mrb[47].mxu0  ;;  %v3622_v53 = vpop.f32.mrb[49].mxu1  ;;  %v6002_v41 = vand.u32 2147483647, %v12902_v24 }
 0x3be   :  { %14474 = vst [vmem:[#allocation22_spill] sm:$0xff] %v12899_v26  ;;  %v9250_v61 = vadd.f32 %v5733_v51, %v3612_v44  ;;  %v6001_v47 = vand.u32 2147483647, %v12899_v26 }
 0x3bf   :  { %6107 = vmax.xlane.f32.xlu1 %v6000_v62  ;;  %v12910_v31 = vadd.f32 %v9249_v46, %v12698_v25 }
 0x3c0   :  { %v12907_v36 = vadd.f32 %v9250_v61, %v12698_v25  ;;  %v8877_v45 = vpop.f32.mrb[48].mxu0  ;;  %6109 = vmax.xlane.f32.xlu0 %v6001_v47  ;;  %v8368_v27 = vpop.f32.mrb[50].mxu1 }
 0x3c1   :  { %14477 = vst [vmem:[#allocation48_spill] sm:$0xff] %v12910_v31  ;;  %v9251_v33 = vadd.f32 %v8877_v45, %v8365_v30  ;;  %v5743_v39 = vpop.f32.mrb[49].mxu0  ;;  %v3632_v48 = vpop.f32.mrb[51].mxu1  ;;  %v6004_v30 = vand.u32 2147483647, %v12910_v31 }
 0x3c2   :  { %14476 = vst [vmem:[#allocation23_spill] sm:$0xff] %v12907_v36  ;;  %v9252_v20 = vadd.f32 %v5743_v39, %v3622_v53  ;;  %v6003_v44 = vand.u32 2147483647, %v12907_v36 }
 0x3c3   :  { %6111 = vmax.xlane.f32.xlu1 %v6002_v41  ;;  %v12918_v47 = vadd.f32 %v9251_v33, %v12698_v25 }
 0x3c4   :  { %v12915_v51 = vadd.f32 %v9252_v20, %v12698_v25  ;;  %v8880_v62 = vpop.f32.mrb[50].mxu0  ;;  %6113 = vmax.xlane.f32.xlu0 %v6003_v44  ;;  %v8371_v61 = vpop.f32.mrb[52].mxu1 }
 0x3c5   :  { %14479 = vst [vmem:[#allocation49_spill] sm:$0xff] %v12918_v47  ;;  %v9253_v46 = vadd.f32 %v8880_v62, %v8368_v27  ;;  %v5753_v26 = vpop.f32.mrb[51].mxu0  ;;  %v3642_v45 = vpop.f32.mrb[53].mxu1  ;;  %v6006_v27 = vand.u32 2147483647, %v12918_v47 }
 0x3c6   :  { %14478 = vst [vmem:[#allocation25_spill] sm:$0xff] %v12915_v51  ;;  %v9254_v24 = vadd.f32 %v5753_v26, %v3632_v48  ;;  %v6005_v53 = vand.u32 2147483647, %v12915_v51 }
 0x3c7   :  { %6115 = vmax.xlane.f32.xlu1 %v6004_v30  ;;  %v12926_v44 = vadd.f32 %v9253_v46, %v12698_v25 }
 0x3c8   :  { %v12923_v39 = vadd.f32 %v9254_v24, %v12698_v25  ;;  %v8883_v41 = vpop.f32.mrb[52].mxu0  ;;  %6117 = vmax.xlane.f32.xlu0 %v6005_v53  ;;  %v8374_v20 = vpop.f32.mrb[54].mxu1 }
 0x3c9   :  { %14481 = vst [vmem:[#allocation50_spill] sm:$0xff] %v12926_v44  ;;  %v9255_v33 = vadd.f32 %v8883_v41, %v8371_v61  ;;  %v5763_v36 = vpop.f32.mrb[53].mxu0  ;;  %v3652_v62 = vpop.f32.mrb[55].mxu1  ;;  %v6008_v61 = vand.u32 2147483647, %v12926_v44 }
 0x3ca   :  { %14480 = vst [vmem:[#allocation5_spill] sm:$0xff] %v12923_v39  ;;  %v9256_v31 = vadd.f32 %v5763_v36, %v3642_v45  ;;  %v6007_v26 = vand.u32 2147483647, %v12923_v39 }
 0x3cb   :  { %6119 = vmax.xlane.f32.xlu1 %v6006_v27  ;;  %v12934_v53 = vadd.f32 %v9255_v33, %v12698_v25 }
 0x3cc   :  { %v12931_v48 = vadd.f32 %v9256_v31, %v12698_v25  ;;  %v8886_v24 = vpop.f32.mrb[54].mxu0  ;;  %6121 = vmax.xlane.f32.xlu0 %v6007_v26  ;;  %v8377_v30 = vpop.f32.mrb[56].mxu1 }
 0x3cd   :  { %14483 = vst [vmem:[#allocation51_spill] sm:$0xff] %v12934_v53  ;;  %v9257_v46 = vadd.f32 %v8886_v24, %v8374_v20  ;;  %v5773_v51 = vpop.f32.mrb[55].mxu0  ;;  %v3662_v41 = vpop.f32.mrb[57].mxu1  ;;  %v6010_v20 = vand.u32 2147483647, %v12934_v53 }
 0x3ce   :  { %14482 = vst [vmem:[#allocation34_spill] sm:$0xff] %v12931_v48  ;;  %v9258_v47 = vadd.f32 %v5773_v51, %v3652_v62  ;;  %v6009_v36 = vand.u32 2147483647, %v12931_v48 }
 0x3cf   :  { %6123 = vmax.xlane.f32.xlu1 %v6008_v61  ;;  %v12942_v26 = vadd.f32 %v9257_v46, %v12698_v25 }
 0x3d0   :  { %v12939_v45 = vadd.f32 %v9258_v47, %v12698_v25  ;;  %v8889_v31 = vpop.f32.mrb[56].mxu0  ;;  %6125 = vmax.xlane.f32.xlu0 %v6009_v36  ;;  %v8380_v27 = vpop.f32.mrb[58].mxu1 }
 0x3d1   :  { %14485 = vst [vmem:[#allocation52_spill] sm:$0xff] %v12942_v26  ;;  %v9259_v33 = vadd.f32 %v8889_v31, %v8377_v30  ;;  %v5783_v39 = vpop.f32.mrb[57].mxu0  ;;  %v3672_v24 = vpop.f32.mrb[59].mxu1  ;;  %v6012_v30 = vand.u32 2147483647, %v12942_v26 }
 0x3d2   :  { %14484 = vst [vmem:[#allocation35_spill] sm:$0xff] %v12939_v45  ;;  %v9260_v44 = vadd.f32 %v5783_v39, %v3662_v41  ;;  %v6011_v51 = vand.u32 2147483647, %v12939_v45 }
 0x3d3   :  { %6127 = vmax.xlane.f32.xlu1 %v6010_v20  ;;  %v12950_v36 = vadd.f32 %v9259_v33, %v12698_v25 }
 0x3d4   :  { %v12947_v62 = vadd.f32 %v9260_v44, %v12698_v25  ;;  %v8892_v47 = vpop.f32.mrb[58].mxu0  ;;  %6129 = vmax.xlane.f32.xlu0 %v6011_v51  ;;  %v8383_v61 = vpop.f32.mrb[60].mxu1 }
 0x3d5   :  { %14487 = vst [vmem:[#allocation53_spill] sm:$0xff] %v12950_v36  ;;  %v9261_v46 = vadd.f32 %v8892_v47, %v8380_v27  ;;  %v5793_v48 = vpop.f32.mrb[59].mxu0  ;;  %v3682_v31 = vpop.f32.mrb[61].mxu1  ;;  %v6014_v27 = vand.u32 2147483647, %v12950_v36 }
 0x3d6   :  { %14486 = vst [vmem:[#allocation36_spill] sm:$0xff] %v12947_v62  ;;  %v9262_v53 = vadd.f32 %v5793_v48, %v3672_v24  ;;  %v6013_v39 = vand.u32 2147483647, %v12947_v62 }
 0x3d7   :  { %6131 = vmax.xlane.f32.xlu1 %v6012_v30  ;;  %v12958_v51 = vadd.f32 %v9261_v46, %v12698_v25 }
 0x3d8   :  { %v12955_v41 = vadd.f32 %v9262_v53, %v12698_v25  ;;  %v8895_v44 = vpop.f32.mrb[60].mxu0  ;;  %6133 = vmax.xlane.f32.xlu0 %v6013_v39  ;;  %v8386_v20 = vpop.f32.mrb[62].mxu1 }
 0x3d9   :  { %14489 = vst [vmem:[#allocation55_spill] sm:$0xff] %v12958_v51  ;;  %v9263_v33 = vadd.f32 %v8895_v44, %v8383_v61  ;;  %v5803_v45 = vpop.f32.mrb[61].mxu0  ;;  %v3692_v47 = vpop.f32.mrb[63].mxu1  ;;  %v6016_v61 = vand.u32 2147483647, %v12958_v51 }
 0x3da   :  { %14488 = vst [vmem:[#allocation54_spill] sm:$0xff] %v12955_v41  ;;  %v9264_v26 = vadd.f32 %v5803_v45, %v3682_v31  ;;  %v6015_v48 = vand.u32 2147483647, %v12955_v41 }
 0x3db   :  { %6135 = vmax.xlane.f32.xlu1 %v6014_v27  ;;  %v12966_v30 = vadd.f32 %v9263_v33, %v12698_v25 }
 0x3dc   :  { %v12963_v24 = vadd.f32 %v9264_v26, %v12698_v25  ;;  %v8898_v53 = vpop.f32.mrb[62].mxu0  ;;  %6137 = vmax.xlane.f32.xlu0 %v6015_v48 }
 0x3dd   :  { %14491 = vst [vmem:[#allocation57_spill] sm:$0xff] %v12966_v30  ;;  %v9265_v39 = vadd.f32 %v8898_v53, %v8386_v20  ;;  %v5813_v46 = vpop.f32.mrb[63].mxu0  ;;  %v6018_v31 = vand.u32 2147483647, %v12966_v30 }
 0x3de   :  { %14490 = vst [vmem:[#allocation56_spill] sm:$0xff] %v12963_v24  ;;  %v9266_v44 = vadd.f32 %v5813_v46, %v3692_v47  ;;  %v6017_v36 = vand.u32 2147483647, %v12963_v24 }
 0x3df   :  { %6139 = vmax.xlane.f32.xlu1 %v6016_v61  ;;  %v12974_v26 = vadd.f32 %v9265_v39, %v12698_v25 }
 0x3e0   :  { %v12971_v45 = vadd.f32 %v9266_v44, %v12698_v25  ;;  %6141 = vmax.xlane.f32.xlu0 %v6017_v36 }
 0x3e1   :  { %14493 = vst [vmem:[#allocation59_spill] sm:$0xff] %v12974_v26  ;;  %v6020_v20 = vand.u32 2147483647, %v12974_v26 }
 0x3e2   :  { %14492 = vst [vmem:[#allocation58_spill] sm:$0xff] %v12971_v45  ;;  %v6019_v33 = vand.u32 2147483647, %v12971_v45 }
 0x3e3   :  { %6143 = vmax.xlane.f32.xlu1 %v6018_v31 }
 0x3e4   :  { %6145 = vmax.xlane.f32.xlu0 %v6019_v33 }
 0x3e7   :  { %6147 = vmax.xlane.f32.xlu1 %v6020_v20 }
 0x3f4   :  { %v6024_v27 = vpop.xlane.xlu0 %6023 }
 0x3f8   :  { %v6022_v47 = vpop.xlane.xlu0 %6021  ;;  %v6028_v48 = vpop.xlane.xlu1 %6027 }
 0x3fc   :  { %v6026_v53 = vpop.xlane.xlu1 %6025 }
 0x3fd   :  { %v6030_v46 = vpop.xlane.xlu0 %6029 }
 0x3fe   :  { %v6149_v61 = vmax.f32 %v6022_v47, %v6030_v46 }
 0x400   :  { %v6032_v44 = vpop.xlane.xlu1 %6031 }
 0x401   :  { %v6150_v36 = vmax.f32 %v6024_v27, %v6032_v44  ;;  %v6034_v24 = vpop.xlane.xlu0 %6033 }
 0x402   :  { %v6151_v25 = vmax.f32 %v6026_v53, %v6034_v24 }
 0x404   :  { %v6036_v39 = vpop.xlane.xlu1 %6035 }
 0x405   :  { %v6152_v51 = vmax.f32 %v6028_v48, %v6036_v39  ;;  %v6038_v30 = vpop.xlane.xlu0 %6037 }
 0x406   :  { %v6153_v41 = vmax.f32 %v6149_v61, %v6038_v30 }
 0x408   :  { %v6040_v45 = vpop.xlane.xlu1 %6039 }
 0x409   :  { %v6154_v31 = vmax.f32 %v6150_v36, %v6040_v45  ;;  %v6042_v33 = vpop.xlane.xlu0 %6041 }
 0x40a   :  { %v6155_v62 = vmax.f32 %v6151_v25, %v6042_v33 }
 0x40c   :  { %v6044_v26 = vpop.xlane.xlu1 %6043 }
 0x40d   :  { %v6156_v20 = vmax.f32 %v6152_v51, %v6044_v26  ;;  %v6046_v0 = vpop.xlane.xlu0 %6045 }
 0x40e   :  { %v6157_v57 = vmax.f32 %v6153_v41, %v6046_v0 }
 0x410   :  { %v6048_v18 = vpop.xlane.xlu1 %6047 }
 0x411   :  { %v6158_v8 = vmax.f32 %v6154_v31, %v6048_v18  ;;  %v6050_v50 = vpop.xlane.xlu0 %6049 }
 0x412   :  { %v6159_v47 = vmax.f32 %v6155_v62, %v6050_v50 }
 0x414   :  { %v6052_v46 = vpop.xlane.xlu1 %6051 }
 0x415   :  { %v6160_v27 = vmax.f32 %v6156_v20, %v6052_v46  ;;  %v6054_v44 = vpop.xlane.xlu0 %6053 }
 0x416   :  { %v6161_v24 = vmax.f32 %v6157_v57, %v6054_v44 }
 0x418   :  { %v6056_v53 = vpop.xlane.xlu1 %6055 }
 0x419   :  { %v6162_v48 = vmax.f32 %v6158_v8, %v6056_v53  ;;  %v6058_v39 = vpop.xlane.xlu0 %6057 }
 0x41a   :  { %v6163_v30 = vmax.f32 %v6159_v47, %v6058_v39 }
 0x41c   :  { %v6060_v61 = vpop.xlane.xlu1 %6059 }
 0x41d   :  { %v6164_v45 = vmax.f32 %v6160_v27, %v6060_v61  ;;  %v6062_v36 = vpop.xlane.xlu0 %6061 }
 0x41e   :  { %v6165_v25 = vmax.f32 %v6161_v24, %v6062_v36 }
 0x420   :  { %v6064_v33 = vpop.xlane.xlu1 %6063 }
 0x421   :  { %v6166_v51 = vmax.f32 %v6162_v48, %v6064_v33  ;;  %v6066_v26 = vpop.xlane.xlu0 %6065 }
 0x422   :  { %v6167_v59 = vmax.f32 %v6163_v30, %v6066_v26 }
 0x424   :  { %v6068_v0 = vpop.xlane.xlu1 %6067 }
 0x425   :  { %v6070_v41 = vpop.xlane.xlu0 %6069  ;;  %v6168_v15 = vmax.f32 %v6164_v45, %v6068_v0 }
 0x426   :  { %v6169_v16 = vmax.f32 %v6165_v25, %v6070_v41 }
 0x428   :  { %v6072_v18 = vpop.xlane.xlu1 %6071 }
 0x429   :  { %v6074_v31 = vpop.xlane.xlu0 %6073  ;;  %v6170_v21 = vmax.f32 %v6166_v51, %v6072_v18 }
 0x42a   :  { %v6171_v55 = vmax.f32 %v6167_v59, %v6074_v31 }
 0x42c   :  { %v6076_v50 = vpop.xlane.xlu1 %6075 }
 0x42d   :  { %v6078_v62 = vpop.xlane.xlu0 %6077  ;;  %v6172_v40 = vmax.f32 %v6168_v15, %v6076_v50 }
 0x42e   :  { %v6173_v10 = vmax.f32 %v6169_v16, %v6078_v62 }
 0x430   :  { %v6080_v20 = vpop.xlane.xlu1 %6079 }
 0x431   :  { %v6082_v46 = vpop.xlane.xlu0 %6081  ;;  %v6174_v60 = vmax.f32 %v6170_v21, %v6080_v20 }
 0x432   :  { %v6175_v29 = vmax.f32 %v6171_v55, %v6082_v46 }
 0x434   :  { %v6084_v57 = vpop.xlane.xlu1 %6083 }
 0x435   :  { %v6086_v44 = vpop.xlane.xlu0 %6085  ;;  %v6176_v12 = vmax.f32 %v6172_v40, %v6084_v57 }
 0x436   :  { %v6177_v13 = vmax.f32 %v6173_v10, %v6086_v44 }
 0x438   :  { %v6088_v8 = vpop.xlane.xlu1 %6087 }
 0x439   :  { %v6090_v53 = vpop.xlane.xlu0 %6089  ;;  %v6178_v58 = vmax.f32 %v6174_v60, %v6088_v8 }
 0x43a   :  { %v6179_v42 = vmax.f32 %v6175_v29, %v6090_v53 }
 0x43c   :  { %v6092_v47 = vpop.xlane.xlu1 %6091 }
 0x43d   :  { %v6094_v39 = vpop.xlane.xlu0 %6093  ;;  %v6180_v5 = vmax.f32 %v6176_v12, %v6092_v47 }
 0x43e   :  { %v6181_v11 = vmax.f32 %v6177_v13, %v6094_v39 }
 0x440   :  { %v6096_v27 = vpop.xlane.xlu1 %6095 }
 0x441   :  { %v6098_v61 = vpop.xlane.xlu0 %6097  ;;  %v6182_v35 = vmax.f32 %v6178_v58, %v6096_v27 }
 0x442   :  { %v6183_v30 = vmax.f32 %v6179_v42, %v6098_v61  ;;  %v14495_v61 = vld [vmem:[#allocation13_spill] sm:$0xff] }
 0x444   :  { %v6100_v24 = vpop.xlane.xlu1 %6099 }
 0x445   :  { %v6102_v36 = vpop.xlane.xlu0 %6101  ;;  %v6184_v45 = vmax.f32 %v6180_v5, %v6100_v24  ;;  %v14496_v24 = vld [vmem:[#allocation24_spill] sm:$0xff] }
 0x446   :  { %v6185_v25 = vmax.f32 %v6181_v11, %v6102_v36  ;;  %v14497_v36 = vld [vmem:[#allocation6_spill] sm:$0xff] }
 0x448   :  { %v6104_v48 = vpop.xlane.xlu1 %6103 }
 0x449   :  { %v6106_v33 = vpop.xlane.xlu0 %6105  ;;  %v6186_v51 = vmax.f32 %v6182_v35, %v6104_v48  ;;  %v14498_v48 = vld [vmem:[#allocation14_spill] sm:$0xff] }
 0x44a   :  { %v6187_v59 = vmax.f32 %v6183_v30, %v6106_v33  ;;  %v14499_v33 = vld [vmem:[#allocation7_spill] sm:$0xff] }
 0x44c   :  { %v6108_v14 = vpop.xlane.xlu1 %6107 }
 0x44d   :  { %v6110_v2 = vpop.xlane.xlu0 %6109  ;;  %v6188_v15 = vmax.f32 %v6184_v45, %v6108_v14  ;;  %v14502_v45 = vld [vmem:[#allocation15_spill] sm:$0xff] }
 0x44e   :  { %v6189_v16 = vmax.f32 %v6185_v25, %v6110_v2  ;;  %v14500_v25 = vld [vmem:[#allocation26_spill] sm:$0xff] }
 0x450   :  { %v6112_v37 = vpop.xlane.xlu1 %6111 }
 0x451   :  { %v6114_v4 = vpop.xlane.xlu0 %6113  ;;  %v6190_v21 = vmax.f32 %v6186_v51, %v6112_v37 }
 0x452   :  { %v6191_v55 = vmax.f32 %v6187_v59, %v6114_v4  ;;  %v14504_v59 = vld [vmem:[#allocation27_spill] sm:$0xff] }
 0x454   :  { %v6116_v23 = vpop.xlane.xlu1 %6115 }
 0x455   :  { %v6118_v1 = vpop.xlane.xlu0 %6117  ;;  %v6192_v40 = vmax.f32 %v6188_v15, %v6116_v23 }
 0x456   :  { %v6193_v10 = vmax.f32 %v6189_v16, %v6118_v1 }
 0x458   :  { %v6120_v22 = vpop.xlane.xlu1 %6119 }
 0x459   :  { %v6122_v3 = vpop.xlane.xlu0 %6121  ;;  %v6194_v60 = vmax.f32 %v6190_v21, %v6120_v22  ;;  %v14503_v21 = vld [vmem:[#allocation8_spill] sm:$0xff] }
 0x45a   :  { %v6195_v29 = vmax.f32 %v6191_v55, %v6122_v3 }
 0x45c   :  { %v6124_v9 = vpop.xlane.xlu1 %6123 }
 0x45d   :  { %v6126_v34 = vpop.xlane.xlu0 %6125  ;;  %v6196_v12 = vmax.f32 %v6192_v40, %v6124_v9  ;;  %v14507_v40 = vld [vmem:[#allocation9_spill] sm:$0xff] }
 0x45e   :  { %v6197_v13 = vmax.f32 %v6193_v10, %v6126_v34  ;;  %v14505_v10 = vld [vmem:[#allocation38_spill] sm:$0xff] }
 0x460   :  { %v6128_v56 = vpop.xlane.xlu1 %6127 }
 0x461   :  { %v6130_v54 = vpop.xlane.xlu0 %6129  ;;  %v6198_v58 = vmax.f32 %v6194_v60, %v6128_v56 }
 0x462   :  { %v6199_v42 = vmax.f32 %v6195_v29, %v6130_v54  ;;  %v14509_v29 = vld [vmem:[#allocation39_spill] sm:$0xff] }
 0x464   :  { %v6132_v49 = vpop.xlane.xlu1 %6131 }
 0x465   :  { %v6134_v43 = vpop.xlane.xlu0 %6133  ;;  %v6200_v5 = vmax.f32 %v6196_v12, %v6132_v49 }
 0x466   :  { %v6201_v11 = vmax.f32 %v6197_v13, %v6134_v43 }
 0x468   :  { %v6136_v41 = vpop.xlane.xlu1 %6135 }
 0x469   :  { %v6138_v26 = vpop.xlane.xlu0 %6137  ;;  %v6202_v35 = vmax.f32 %v6198_v58, %v6136_v41  ;;  %v14501_v41 = vld [vmem:[#allocation37_spill] sm:$0xff]  ;;  %v14508_v58 = vld [vmem:[#allocation28_spill] sm:$0xff] }
 0x46a   :  { %v6203_v62 = vmax.f32 %v6199_v42, %v6138_v26 }
 0x46c   :  { %v6140_v0 = vpop.xlane.xlu1 %6139 }
 0x46d   :  { %v6142_v18 = vpop.xlane.xlu0 %6141  ;;  %v6204_v14 = vmax.f32 %v6200_v5, %v6140_v0  ;;  %v14506_v0 = vld [vmem:[#allocation16_spill] sm:$0xff]  ;;  %v14512_v5 = vld [vmem:[#allocation29_spill] sm:$0xff] }
 0x46e   :  { %v6205_v2 = vmax.f32 %v6201_v11, %v6142_v18  ;;  %v14510_v11 = vld [vmem:[#allocation17_spill] sm:$0xff] }
 0x470   :  { %v6144_v31 = vpop.xlane.xlu1 %6143 }
 0x471   :  { %v6206_v37 = vmax.f32 %v6202_v35, %v6144_v31  ;;  %v6146_v50 = vpop.xlane.xlu0 %6145  ;;  %v14511_v31 = vld [vmem:[#allocation10_spill] sm:$0xff] }
 0x472   :  { %v6207_v20 = vmax.f32 %v6203_v62, %v6146_v50  ;;  %v14514_v62 = vld [vmem:[#allocation18_spill] sm:$0xff] }
 0x473   :  { %v6209_v1 = vmax.f32 %v6205_v2, %v6206_v37  ;;  %v14513_v37 = vld [vmem:[#allocation40_spill] sm:$0xff] }
 0x474   :  { %v6148_v22 = vpop.xlane.xlu1 %6147 }
 0x475   :  { %v6208_v4 = vmax.f32 %v6204_v14, %v6148_v22 }
 0x477   :  { %v6210_v23 = vmax.f32 %v6207_v20, %v6208_v4  ;;  %v14516_v20 = vld [vmem:[#allocation19_spill] sm:$0xff] }
 0x479   :  { %v6211_v34 = vmax.f32 %v6209_v1, %v6210_v23  ;;  %v14515_v1 = vld [vmem:[#allocation11_spill] sm:$0xff]  ;;  %v14517_v23 = vld [vmem:[#allocation41_spill] sm:$0xff] }
 0x47b   :  { %v6212_v56 = vrot.slane %v6211_v34, 4 }
 0x47d   :  { %v6213_v46 = vmax.f32 %v6211_v34, %v6212_v56  ;;  %v14518_v56 = vld [vmem:[#allocation30_spill] sm:$0xff] }
 0x47f   :  { %v6214_v3 = vrot.slane %v6213_v46, 2 }
 0x481   :  { %v6215_v9 = vmax.f32 %v6213_v46, %v6214_v3  ;;  %v14519_v3 = vld [vmem:[#allocation12_spill] sm:$0xff] }
 0x483   :  { %v6216_v43 = vrot.slane %v6215_v9, 1 }
 0x485   :  { %v6217_v57 = vmax.f32 %v6215_v9, %v6216_v43  ;;  %v14520_v43 = vld [vmem:[#allocation20_spill] sm:$0xff] }
 0x487   :  { %vm6218_vm2 = vcmp.gt.f32.partialorder %v6217_v57, 0.0  ;;  %v6219_v54 = vmul.f32 0.007874016, %v6217_v57 }
 0x489   :  { %v12979_v49 = vsel %vm6218_vm2, %v6219_v54, 1.0  ;;  %v14521_v54 = vld [vmem:[#allocation42_spill] sm:$0xff] }
 0x48a   :  { %14494 = vst [vmem:[#allocation60_spill] sm:$0xff] %v12979_v49  ;;  %9889 = vrcp.f32 %v12979_v49  ;;  %v14558_v49 = vld [vmem:[#allocation53_spill] sm:$0xff] }
 0x494   :  { %v12982_v44 = vpop.eup %9889 }
 0x495   :  { %v12986_v8 = vmul.f32 %v12982_v44, %v12704_v17  ;;  %v12990_v53 = vmul.f32 %v12982_v44, %v12701_v52  ;;  %v12994_v47 = vmul.f32 %v12982_v44, %v12711_v19  ;;  %v12998_v39 = vmul.f32 %v12982_v44, %v12708_v32 }
 0x496   :  { %v13002_v27 = vmul.f32 %v12982_v44, %v12716_v63  ;;  %v13006_v17 = vmul.f32 %v12982_v44, %v12719_v6  ;;  %v13010_v52 = vmul.f32 %v12982_v44, %v12724_v28  ;;  %v13014_v19 = vmul.f32 %v12982_v44, %v12727_v38 }
 0x497   :  { %v13018_v32 = vmul.f32 %v12982_v44, %v12733_v7  ;;  %v13022_v63 = vmul.f32 %v12982_v44, %v14495_v61  ;;  %v13026_v6 = vmul.f32 %v12982_v44, %v14496_v24  ;;  %v13030_v28 = vmul.f32 %v12982_v44, %v14497_v36  ;;  %v14522_v24 = vld [vmem:[#allocation21_spill] sm:$0xff] }
 0x498   :  { %v13034_v38 = vmul.f32 %v12982_v44, %v14498_v48  ;;  %v13038_v7 = vmul.f32 %v12982_v44, %v14499_v33  ;;  %v13042_v51 = vmul.f32 %v12982_v44, %v14500_v25  ;;  %v13046_v30 = vmul.f32 %v12982_v44, %v14501_v41  ;;  %v14523_v48 = vld [vmem:[#allocation43_spill] sm:$0xff] }
 0x499   :  { %v13050_v16 = vmul.f32 %v12982_v44, %v14502_v45  ;;  %v13054_v26 = vmul.f32 %v12982_v44, %v14503_v21  ;;  %v13058_v15 = vmul.f32 %v12982_v44, %v14504_v59  ;;  %v13062_v60 = vmul.f32 %v12982_v44, %v14505_v10  ;;  %v14524_v25 = vld [vmem:[#allocation31_spill] sm:$0xff]  ;;  %v14525_v45 = vld [vmem:[#allocation44_spill] sm:$0xff] }
 0x49a   :  { %v13066_v55 = vmul.f32 %v12982_v44, %v14506_v0  ;;  %v13070_v13 = vmul.f32 %v12982_v44, %v14507_v40  ;;  %v13074_v18 = vmul.f32 %v12982_v44, %v14508_v58  ;;  %v13078_v12 = vmul.f32 %v12982_v44, %v14509_v29  ;;  %v14526_v59 = vld [vmem:[#allocation32_spill] sm:$0xff]  ;;  %v14527_v0 = vld [vmem:[#allocation45_spill] sm:$0xff] }
 0x49b   :  { %v13082_v35 = vmul.f32 %v12982_v44, %v14510_v11  ;;  %v13086_v42 = vmul.f32 %v12982_v44, %v14511_v31  ;;  %v13090_v2 = vmul.f32 %v12982_v44, %v14512_v5  ;;  %v13094_v50 = vmul.f32 %v12982_v44, %v14513_v37  ;;  %v14528_v58 = vld [vmem:[#allocation33_spill] sm:$0xff]  ;;  %v14530_v11 = vld [vmem:[#allocation46_spill] sm:$0xff] }
 0x49c   :  { %v13098_v14 = vmul.f32 %v12982_v44, %v14514_v62  ;;  %v13102_v22 = vmul.f32 %v12982_v44, %v14515_v1  ;;  %v13106_v4 = vmul.f32 %v12982_v44, %v14516_v20  ;;  %v13110_v34 = vmul.f32 %v12982_v44, %v14517_v23  ;;  %v14532_v5 = vld [vmem:[#allocation22_spill] sm:$0xff]  ;;  %v14534_v62 = vld [vmem:[#allocation47_spill] sm:$0xff] }
 0x49d   :  { %v13114_v46 = vmul.f32 %v12982_v44, %v14518_v56  ;;  %v13118_v9 = vmul.f32 %v12982_v44, %v14519_v3  ;;  %v13122_v57 = vmul.f32 %v12982_v44, %v14520_v43  ;;  %v13126_v61 = vmul.f32 %v12982_v44, %v14521_v54  ;;  %v14536_v20 = vld [vmem:[#allocation23_spill] sm:$0xff]  ;;  %v14538_v56 = vld [vmem:[#allocation48_spill] sm:$0xff]  ;;  %v14540_v43 = vld [vmem:[#allocation25_spill] sm:$0xff] }
 0x49e   :  { %v13130_v36 = vmul.f32 %v12982_v44, %v14522_v24  ;;  %v13134_v33 = vmul.f32 %v12982_v44, %v14523_v48  ;;  %v13138_v41 = vmul.f32 %v12982_v44, %v14524_v25  ;;  %v13142_v21 = vmul.f32 %v12982_v44, %v14525_v45  ;;  %v14542_v24 = vld [vmem:[#allocation49_spill] sm:$0xff] }
 0x49f   :  { %v13146_v10 = vmul.f32 %v12982_v44, %v14526_v59  ;;  %v13150_v40 = vmul.f32 %v12982_v44, %v14527_v0  ;;  %v13154_v29 = vmul.f32 %v12982_v44, %v14528_v58  ;;  %v13158_v31 = vmul.f32 %v12982_v44, %v14530_v11  ;;  %v14544_v25 = vld [vmem:[#allocation5_spill] sm:$0xff]  ;;  %v14546_v59 = vld [vmem:[#allocation50_spill] sm:$0xff] }
 0x4a0   :  { %v13162_v37 = vmul.f32 %v12982_v44, %v14532_v5  ;;  %v13166_v1 = vmul.f32 %v12982_v44, %v14534_v62  ;;  %v13170_v23 = vmul.f32 %v12982_v44, %v14536_v20  ;;  %v13174_v3 = vmul.f32 %v12982_v44, %v14538_v56  ;;  %v14548_v58 = vld [vmem:[#allocation34_spill] sm:$0xff]  ;;  %v14550_v5 = vld [vmem:[#allocation51_spill] sm:$0xff] }
 0x4a1   :  { %14529 = vst [vmem:[#allocation13_spill] sm:$0xff] %v13154_v29  ;;  %14531 = vst [vmem:[#allocation24_spill] sm:$0xff] %v13158_v31  ;;  %v13178_v54 = vmul.f32 %v12982_v44, %v14540_v43  ;;  %v13182_v48 = vmul.f32 %v12982_v44, %v14542_v24  ;;  %v13186_v45 = vmul.f32 %v12982_v44, %v14544_v25  ;;  %v14552_v20 = vld [vmem:[#allocation35_spill] sm:$0xff]  ;;  %v14554_v43 = vld [vmem:[#allocation52_spill] sm:$0xff] }
 0x4a2   :  { %14533 = vst [vmem:[#allocation6_spill] sm:$0xff] %v13162_v37  ;;  %14535 = vst [vmem:[#allocation14_spill] sm:$0xff] %v13166_v1  ;;  %v13190_v0 = vmul.f32 %v12982_v44, %v14546_v59  ;;  %v13194_v11 = vmul.f32 %v12982_v44, %v14548_v58  ;;  %v13198_v62 = vmul.f32 %v12982_v44, %v14550_v5  ;;  %v14556_v25 = vld [vmem:[#allocation36_spill] sm:$0xff] }
 0x4a3   :  { %14537 = vst [vmem:[#allocation7_spill] sm:$0xff] %v13170_v23  ;;  %14539 = vst [vmem:[#allocation26_spill] sm:$0xff] %v13174_v3  ;;  %v13202_v56 = vmul.f32 %v12982_v44, %v14552_v20  ;;  %v13206_v24 = vmul.f32 %v12982_v44, %v14554_v43  ;;  %v13210_v59 = vmul.f32 %v12982_v44, %v14556_v25 }
 0x4a4   :  { %14541 = vst [vmem:[#allocation37_spill] sm:$0xff] %v13178_v54  ;;  %14543 = vst [vmem:[#allocation15_spill] sm:$0xff] %v13182_v48  ;;  %v13214_v58 = vmul.f32 %v12982_v44, %v14558_v49 }
 0x4a5   :  { %14545 = vst [vmem:[#allocation8_spill] sm:$0xff] %v13186_v45  ;;  %14547 = vst [vmem:[#allocation27_spill] sm:$0xff] %v13190_v0 }
 0x4a6   :  { %14549 = vst [vmem:[#allocation38_spill] sm:$0xff] %v13194_v11  ;;  %14551 = vst [vmem:[#allocation16_spill] sm:$0xff] %v13198_v62  ;;  %v14560_v11 = vld [vmem:[#allocation54_spill] sm:$0xff]  ;;  %v14562_v62 = vld [vmem:[#allocation55_spill] sm:$0xff] }
 0x4a7   :  { %14553 = vst [vmem:[#allocation9_spill] sm:$0xff] %v13202_v56  ;;  %14555 = vst [vmem:[#allocation28_spill] sm:$0xff] %v13206_v24  ;;  %v13218_v5 = vmul.f32 %v12982_v44, %v14560_v11  ;;  %v13222_v20 = vmul.f32 %v12982_v44, %v14562_v62  ;;  %v14564_v56 = vld [vmem:[#allocation56_spill] sm:$0xff]  ;;  %v14566_v24 = vld [vmem:[#allocation57_spill] sm:$0xff] }
 0x4a8   :  { %14557 = vst [vmem:[#allocation39_spill] sm:$0xff] %v13210_v59  ;;  %14559 = vst [vmem:[#allocation17_spill] sm:$0xff] %v13214_v58  ;;  %v13226_v43 = vmul.f32 %v12982_v44, %v14564_v56  ;;  %v13230_v25 = vmul.f32 %v12982_v44, %v14566_v24  ;;  %v14568_v59 = vld [vmem:[#allocation58_spill] sm:$0xff]  ;;  %v14570_v58 = vld [vmem:[#allocation59_spill] sm:$0xff] }
 0x4a9   :  { %14561 = vst [vmem:[#allocation10_spill] sm:$0xff] %v13218_v5  ;;  %14563 = vst [vmem:[#allocation29_spill] sm:$0xff] %v13222_v20  ;;  %v13234_v49 = vmul.f32 %v12982_v44, %v14568_v59  ;;  %v13238_v11 = vmul.f32 %v12982_v44, %v14570_v58  ;;  %v14578_v54 = vmov %v13222_v20  ;;  %v14585_v58 = vround.rtne.f32 %v12998_v39  ;;  %v14638_v56 = vld [vmem:[#allocation13_spill] sm:$0xff] }
 0x4aa   :  { %14565 = vst [vmem:[#allocation40_spill] sm:$0xff] %v13226_v43  ;;  %14567 = vst [vmem:[#allocation18_spill] sm:$0xff] %v13230_v25  ;;  %v14579_v48 = vmov %v13226_v43  ;;  %v14580_v45 = vmov %v13230_v25  ;;  %v14582_v43 = vround.rtne.f32 %v12986_v8  ;;  %v14583_v25 = vround.rtne.f32 %v12990_v53 }
 0x4ab   :  { %14569 = vst [vmem:[#allocation11_spill] sm:$0xff] %v13234_v49  ;;  %v14581_v0 = vmov %v13234_v49  ;;  %v14584_v49 = vround.rtne.f32 %v12994_v47  ;;  %v13318_v44 = vmax.f32 %v14585_v58, -128.0  ;;  %v14586_v20 = vround.rtne.f32 %v13002_v27 }
 0x4ac   :  { %v13306_v31 = vmax.f32 %v14582_v43, -128.0  ;;  %v13310_v24 = vmax.f32 %v14583_v25, -128.0  ;;  %v14587_v8 = vround.rtne.f32 %v13006_v17  ;;  %v14588_v53 = vround.rtne.f32 %v13010_v52 }
 0x4ad   :  { %v14571_v5 = vld [vmem:[#allocation38_spill] sm:$0xff]  ;;  %v14572_v29 = vld [vmem:[#allocation16_spill] sm:$0xff]  ;;  %v13314_v59 = vmax.f32 %v14584_v49, -128.0  ;;  %v13322_v62 = vmax.f32 %v14586_v20, -128.0  ;;  %v14589_v47 = vround.rtne.f32 %v13014_v19  ;;  %v14590_v39 = vround.rtne.f32 %v13018_v32 }
 0x4ae   :  { %v14574_v37 = vld [vmem:[#allocation28_spill] sm:$0xff]  ;;  %v13326_v43 = vmax.f32 %v14587_v8, -128.0  ;;  %v13330_v25 = vmax.f32 %v14588_v53, -128.0  ;;  %v14591_v27 = vround.rtne.f32 %v13022_v63  ;;  %v14592_v17 = vround.rtne.f32 %v13026_v6 }
 0x4af   :  { %v14575_v1 = vld [vmem:[#allocation39_spill] sm:$0xff]  ;;  %v14576_v23 = vld [vmem:[#allocation17_spill] sm:$0xff]  ;;  %v13334_v49 = vmax.f32 %v14589_v47, -128.0  ;;  %v13338_v58 = vmax.f32 %v14590_v39, -128.0  ;;  %v14593_v52 = vround.rtne.f32 %v13030_v28  ;;  %v14594_v19 = vround.rtne.f32 %v13034_v38 }
 0x4b0   :  { %v14577_v3 = vld [vmem:[#allocation10_spill] sm:$0xff]  ;;  %v13342_v20 = vmax.f32 %v14591_v27, -128.0  ;;  %v13346_v8 = vmax.f32 %v14592_v17, -128.0  ;;  %v14595_v32 = vround.rtne.f32 %v13038_v7  ;;  %v14596_v63 = vround.rtne.f32 %v13042_v51 }
 0x4b1   :  { %v13350_v53 = vmax.f32 %v14593_v52, -128.0  ;;  %v13354_v47 = vmax.f32 %v14594_v19, -128.0  ;;  %v14597_v6 = vround.rtne.f32 %v13046_v30  ;;  %v14598_v28 = vround.rtne.f32 %v13050_v16 }
 0x4b2   :  { %v13358_v39 = vmax.f32 %v14595_v32, -128.0  ;;  %v13362_v27 = vmax.f32 %v14596_v63, -128.0  ;;  %v14599_v38 = vround.rtne.f32 %v13054_v26  ;;  %v14600_v7 = vround.rtne.f32 %v13058_v15 }
 0x4b3   :  { %v13366_v17 = vmax.f32 %v14597_v6, -128.0  ;;  %v13370_v52 = vmax.f32 %v14598_v28, -128.0  ;;  %v14601_v51 = vround.rtne.f32 %v13062_v60  ;;  %v14602_v30 = vround.rtne.f32 %v13066_v55 }
 0x4b4   :  { %v13374_v19 = vmax.f32 %v14599_v38, -128.0  ;;  %v13378_v32 = vmax.f32 %v14600_v7, -128.0  ;;  %v14603_v16 = vround.rtne.f32 %v13070_v13  ;;  %v14604_v26 = vround.rtne.f32 %v13074_v18 }
 0x4b5   :  { %v13382_v63 = vmax.f32 %v14601_v51, -128.0  ;;  %v13386_v6 = vmax.f32 %v14602_v30, -128.0  ;;  %v14605_v15 = vround.rtne.f32 %v13078_v12  ;;  %v14606_v60 = vround.rtne.f32 %v13082_v35 }
 0x4b6   :  { %v13390_v28 = vmax.f32 %v14603_v16, -128.0  ;;  %v13394_v38 = vmax.f32 %v14604_v26, -128.0  ;;  %v14607_v55 = vround.rtne.f32 %v13086_v42  ;;  %v14608_v13 = vround.rtne.f32 %v13090_v2 }
 0x4b7   :  { %v13398_v7 = vmax.f32 %v14605_v15, -128.0  ;;  %v13402_v51 = vmax.f32 %v14606_v60, -128.0  ;;  %v14610_v18 = vround.rtne.f32 %v13094_v50  ;;  %v14612_v12 = vround.rtne.f32 %v13098_v14 }
 0x4b8   :  { %v13406_v30 = vmax.f32 %v14607_v55, -128.0  ;;  %v13410_v16 = vmax.f32 %v14608_v13, -128.0  ;;  %v14614_v35 = vround.rtne.f32 %v13102_v22  ;;  %v14616_v42 = vround.rtne.f32 %v13106_v4 }
 0x4b9   :  { %v13414_v26 = vmax.f32 %v14610_v18, -128.0  ;;  %v13418_v15 = vmax.f32 %v14612_v12, -128.0  ;;  %v14618_v2 = vround.rtne.f32 %v13110_v34  ;;  %v14620_v50 = vround.rtne.f32 %v13114_v46 }
 0x4ba   :  { %14609 = vst [vmem:[#allocation19_spill] sm:$0xff] %v13410_v16  ;;  %v13422_v60 = vmax.f32 %v14614_v35, -128.0  ;;  %v13426_v55 = vmax.f32 %v14616_v42, -128.0  ;;  %v14622_v14 = vround.rtne.f32 %v13118_v9  ;;  %v14624_v22 = vround.rtne.f32 %v13122_v57 }
 0x4bb   :  { %14611 = vst [vmem:[#allocation41_spill] sm:$0xff] %v13414_v26  ;;  %14613 = vst [vmem:[#allocation30_spill] sm:$0xff] %v13418_v15  ;;  %v13430_v13 = vmax.f32 %v14618_v2, -128.0  ;;  %v13434_v18 = vmax.f32 %v14620_v50, -128.0  ;;  %v14626_v4 = vround.rtne.f32 %v13126_v61  ;;  %v14627_v34 = vround.rtne.f32 %v13130_v36 }
 0x4bc   :  { %14615 = vst [vmem:[#allocation12_spill] sm:$0xff] %v13422_v60  ;;  %14617 = vst [vmem:[#allocation20_spill] sm:$0xff] %v13426_v55  ;;  %v13438_v12 = vmax.f32 %v14622_v14, -128.0  ;;  %v13442_v35 = vmax.f32 %v14624_v22, -128.0  ;;  %v14628_v46 = vround.rtne.f32 %v13134_v33  ;;  %v14630_v9 = vround.rtne.f32 %v13138_v41 }
 0x4bd   :  { %14619 = vst [vmem:[#allocation42_spill] sm:$0xff] %v13430_v13  ;;  %14621 = vst [vmem:[#allocation21_spill] sm:$0xff] %v13434_v18  ;;  %v13446_v42 = vmax.f32 %v14626_v4, -128.0  ;;  %v13450_v2 = vmax.f32 %v14627_v34, -128.0  ;;  %v14632_v57 = vround.rtne.f32 %v13142_v21  ;;  %v14634_v61 = vround.rtne.f32 %v13146_v10 }
 0x4be   :  { %14623 = vst [vmem:[#allocation43_spill] sm:$0xff] %v13438_v12  ;;  %14625 = vst [vmem:[#allocation31_spill] sm:$0xff] %v13442_v35  ;;  %v13454_v50 = vmax.f32 %v14628_v46, -128.0  ;;  %v13458_v14 = vmax.f32 %v14630_v9, -128.0  ;;  %v14636_v36 = vround.rtne.f32 %v13150_v40  ;;  %v14639_v33 = vround.rtne.f32 %v14638_v56 }
 0x4bf   :  { %v13462_v22 = vmax.f32 %v14632_v57, -128.0  ;;  %v13466_v4 = vmax.f32 %v14634_v61, -128.0 }
 0x4c0   :  { %14629 = vst [vmem:[#allocation44_spill] sm:$0xff] %v13454_v50  ;;  %14631 = vst [vmem:[#allocation32_spill] sm:$0xff] %v13458_v14  ;;  %v13470_v34 = vmax.f32 %v14636_v36, -128.0  ;;  %v13474_v46 = vmax.f32 %v14639_v33, -128.0  ;;  %v14641_v50 = vld [vmem:[#allocation24_spill] sm:$0xff]  ;;  %v14644_v14 = vld [vmem:[#allocation6_spill] sm:$0xff] }
 0x4c1   :  { %14633 = vst [vmem:[#allocation45_spill] sm:$0xff] %v13462_v22  ;;  %14635 = vst [vmem:[#allocation33_spill] sm:$0xff] %v13466_v4  ;;  %v14642_v41 = vround.rtne.f32 %v14641_v50  ;;  %v14645_v21 = vround.rtne.f32 %v14644_v14  ;;  %v14647_v22 = vld [vmem:[#allocation14_spill] sm:$0xff]  ;;  %v14650_v4 = vld [vmem:[#allocation7_spill] sm:$0xff] }
 0x4c2   :  { %14637 = vst [vmem:[#allocation46_spill] sm:$0xff] %v13470_v34  ;;  %14640 = vst [vmem:[#allocation22_spill] sm:$0xff] %v13474_v46  ;;  %v14648_v10 = vround.rtne.f32 %v14647_v22  ;;  %v14651_v40 = vround.rtne.f32 %v14650_v4  ;;  %v14652_v34 = vld [vmem:[#allocation26_spill] sm:$0xff]  ;;  %v14654_v46 = vld [vmem:[#allocation37_spill] sm:$0xff] }
 0x4c3   :  { %v13478_v9 = vmax.f32 %v14642_v41, -128.0  ;;  %v13482_v57 = vmax.f32 %v14645_v21, -128.0  ;;  %v14653_v56 = vround.rtne.f32 %v14652_v34  ;;  %v14655_v50 = vround.rtne.f32 %v14654_v46 }
 0x4c4   :  { %v13486_v61 = vmax.f32 %v14648_v10, -128.0  ;;  %v13490_v36 = vmax.f32 %v14651_v40, -128.0  ;;  %v14663_v34 = vround.rtne.f32 %v14571_v5  ;;  %v14664_v46 = vround.rtne.f32 %v14572_v29 }
 0x4c5   :  { %14643 = vst [vmem:[#allocation47_spill] sm:$0xff] %v13478_v9  ;;  %14646 = vst [vmem:[#allocation23_spill] sm:$0xff] %v13482_v57  ;;  %v13494_v33 = vmax.f32 %v14653_v56, -128.0  ;;  %v13498_v41 = vmax.f32 %v14655_v50, -128.0  ;;  %v14657_v9 = vld [vmem:[#allocation15_spill] sm:$0xff]  ;;  %v14659_v57 = vld [vmem:[#allocation8_spill] sm:$0xff]  ;;  %v14670_v5 = vround.rtne.f32 %v14576_v23  ;;  %v14671_v29 = vround.rtne.f32 %v14577_v3 }
 0x4c6   :  { %14649 = vst [vmem:[#allocation48_spill] sm:$0xff] %v13486_v61  ;;  %v14658_v14 = vround.rtne.f32 %v14657_v9  ;;  %v14660_v22 = vround.rtne.f32 %v14659_v57  ;;  %v14661_v61 = vld [vmem:[#allocation27_spill] sm:$0xff]  ;;  %v13514_v56 = vmax.f32 %v14663_v34, -128.0  ;;  %v13518_v50 = vmax.f32 %v14664_v46, -128.0 }
 0x4c7   :  { %14656 = vst [vmem:[#allocation25_spill] sm:$0xff] %v13498_v41  ;;  %v14662_v4 = vround.rtne.f32 %v14661_v61  ;;  %v14666_v41 = vld [vmem:[#allocation9_spill] sm:$0xff]  ;;  %v14668_v57 = vround.rtne.f32 %v14574_v37  ;;  %v14669_v61 = vround.rtne.f32 %v14575_v1  ;;  %v13534_v34 = vmax.f32 %v14670_v5, -128.0  ;;  %v14678_v26 = vld [vmem:[#allocation32_spill] sm:$0xff] }
 0x4c8   :  { %v13502_v21 = vmax.f32 %v14658_v14, -128.0  ;;  %v13506_v10 = vmax.f32 %v14660_v22, -128.0  ;;  %14665 = vst [vmem:[#allocation49_spill] sm:$0xff] %v13518_v50  ;;  %v14667_v9 = vround.rtne.f32 %v14666_v41  ;;  %v13538_v46 = vmax.f32 %v14671_v29, -128.0  ;;  %v14679_v15 = vld [vmem:[#allocation45_spill] sm:$0xff]  ;;  %v14687_v50 = vld [vmem:[#allocation60_spill] sm:$0xff] }
 0x4c9   :  { %v13510_v40 = vmax.f32 %v14662_v4, -128.0  ;;  %v13526_v22 = vmax.f32 %v14668_v57, -128.0  ;;  %v13530_v4 = vmax.f32 %v14669_v61, -128.0  ;;  %v14672_v41 = vround.rtne.f32 %v14578_v54  ;;  %v14680_v60 = vld [vmem:[#allocation33_spill] sm:$0xff]  ;;  %v14681_v55 = vld [vmem:[#allocation46_spill] sm:$0xff] }
 0x4ca   :  { %v13522_v14 = vmax.f32 %v14667_v9, -128.0  ;;  %v14673_v37 = vround.rtne.f32 %v14579_v48  ;;  %v14674_v1 = vround.rtne.f32 %v14580_v45  ;;  %v14675_v23 = vround.rtne.f32 %v14581_v0  ;;  %v14682_v13 = vld [vmem:[#allocation22_spill] sm:$0xff] }
 0x4cb   :  { %v13542_v9 = vmax.f32 %v14672_v41, -128.0  ;;  %v14676_v3 = vround.rtne.f32 %v13238_v11  ;;  %v14688_v45 = vmin.f32 %v13306_v31, 127.0  ;;  %v14693_v48 = vmin.f32 %v13318_v44, 127.0  ;;  %v14722_v11 = vld [vmem:[#allocation41_spill] sm:$0xff] }
 0x4cc   :  { %v13546_v57 = vmax.f32 %v14673_v37, -128.0  ;;  %v13550_v61 = vmax.f32 %v14674_v1, -128.0  ;;  %v13554_v5 = vmax.f32 %v14675_v23, -128.0  ;;  %v14683_v18 = vld [vmem:[#allocation47_spill] sm:$0xff]  ;;  %v14690_v23 = vmin.f32 %v13310_v24, 127.0 }
 0x4cd   :  { %v13558_v29 = vmax.f32 %v14676_v3, -128.0  ;;  %v14684_v12 = vld [vmem:[#allocation23_spill] sm:$0xff]  ;;  %v14685_v35 = vld [vmem:[#allocation48_spill] sm:$0xff]  ;;  %v13627_v1 = vmul.f32 %v14688_v45, %v14687_v50  ;;  %v14692_v3 = vmin.f32 %v13314_v59, 127.0  ;;  %v13642_v41 = vmul.f32 %v14693_v48, %v14687_v50 }
 0x4ce   :  { %v14686_v16 = vld [vmem:[#allocation25_spill] sm:$0xff]  ;;  %v13632_v0 = vmul.f32 %v14690_v23, %v14687_v50  ;;  %v14694_v31 = vmin.f32 %v13322_v62, 127.0  ;;  %v14695_v24 = vmin.f32 %v13326_v43, 127.0  ;;  %v14696_v59 = vmin.f32 %v13330_v25, 127.0  ;;  %v14719_v37 = vld [vmem:[#allocation19_spill] sm:$0xff] }
 0x4cf   :  { %14689 = vst [vmem:[#allocation5_spill] sm:$0xff] %v13627_v1  ;;  %v13637_v54 = vmul.f32 %v14692_v3, %v14687_v50  ;;  %v14697_v44 = vmin.f32 %v13334_v49, 127.0  ;;  %v14698_v62 = vmin.f32 %v13338_v58, 127.0  ;;  %v14699_v43 = vmin.f32 %v13342_v20, 127.0 }
 0x4d0   :  { %14691 = vst [vmem:[#allocation50_spill] sm:$0xff] %v13632_v0  ;;  %v13647_v45 = vmul.f32 %v14694_v31, %v14687_v50  ;;  %v13652_v23 = vmul.f32 %v14695_v24, %v14687_v50  ;;  %v13657_v3 = vmul.f32 %v14696_v59, %v14687_v50  ;;  %v14700_v25 = vmin.f32 %v13346_v8, 127.0 }
 0x4d1   :  { %v13662_v48 = vmul.f32 %v14697_v44, %v14687_v50  ;;  %v13667_v31 = vmul.f32 %v14698_v62, %v14687_v50  ;;  %v13672_v24 = vmul.f32 %v14699_v43, %v14687_v50  ;;  %v14701_v49 = vmin.f32 %v13350_v53, 127.0 }
 0x4d2   :  { %v13677_v59 = vmul.f32 %v14700_v25, %v14687_v50  ;;  %v14702_v58 = vmin.f32 %v13354_v47, 127.0  ;;  %v14703_v20 = vmin.f32 %v13358_v39, 127.0  ;;  %v14704_v8 = vmin.f32 %v13362_v27, 127.0 }
 0x4d3   :  { %v13682_v44 = vmul.f32 %v14701_v49, %v14687_v50  ;;  %v14705_v53 = vmin.f32 %v13366_v17, 127.0  ;;  %v14706_v47 = vmin.f32 %v13370_v52, 127.0  ;;  %v14707_v39 = vmin.f32 %v13374_v19, 127.0 }
 0x4d4   :  { %v13687_v62 = vmul.f32 %v14702_v58, %v14687_v50  ;;  %v13692_v43 = vmul.f32 %v14703_v20, %v14687_v50  ;;  %v13697_v25 = vmul.f32 %v14704_v8, %v14687_v50  ;;  %v14708_v27 = vmin.f32 %v13378_v32, 127.0 }
 0x4d5   :  { %v13702_v49 = vmul.f32 %v14705_v53, %v14687_v50  ;;  %v13707_v58 = vmul.f32 %v14706_v47, %v14687_v50  ;;  %v13712_v20 = vmul.f32 %v14707_v39, %v14687_v50  ;;  %v14709_v17 = vmin.f32 %v13382_v63, 127.0 }
 0x4d6   :  { %v13717_v8 = vmul.f32 %v14708_v27, %v14687_v50  ;;  %v14710_v52 = vmin.f32 %v13386_v6, 127.0  ;;  %v14711_v19 = vmin.f32 %v13390_v28, 127.0  ;;  %v14712_v32 = vmin.f32 %v13394_v38, 127.0 }
 0x4d7   :  { %v13722_v53 = vmul.f32 %v14709_v17, %v14687_v50  ;;  %v14713_v63 = vmin.f32 %v13398_v7, 127.0  ;;  %v14715_v6 = vmin.f32 %v13402_v51, 127.0  ;;  %v14717_v28 = vmin.f32 %v13406_v30, 127.0 }
 0x4d8   :  { %v13727_v47 = vmul.f32 %v14710_v52, %v14687_v50  ;;  %v13732_v39 = vmul.f32 %v14711_v19, %v14687_v50  ;;  %v13737_v27 = vmul.f32 %v14712_v32, %v14687_v50  ;;  %v14720_v38 = vmin.f32 %v14719_v37, 127.0 }
 0x4d9   :  { %v13742_v17 = vmul.f32 %v14713_v63, %v14687_v50  ;;  %v13747_v52 = vmul.f32 %v14715_v6, %v14687_v50  ;;  %v13752_v19 = vmul.f32 %v14717_v28, %v14687_v50  ;;  %v14723_v7 = vmin.f32 %v14722_v11, 127.0 }
 0x4da   :  { %v13757_v32 = vmul.f32 %v14720_v38, %v14687_v50 }
 0x4db   :  { %14714 = vst [vmem:[#allocation34_spill] sm:$0xff] %v13742_v17  ;;  %14716 = vst [vmem:[#allocation51_spill] sm:$0xff] %v13747_v52  ;;  %v13762_v63 = vmul.f32 %v14723_v7, %v14687_v50  ;;  %v14725_v17 = vld [vmem:[#allocation30_spill] sm:$0xff]  ;;  %v14728_v52 = vld [vmem:[#allocation12_spill] sm:$0xff] }
 0x4dc   :  { %14718 = vst [vmem:[#allocation35_spill] sm:$0xff] %v13752_v19  ;;  %14721 = vst [vmem:[#allocation52_spill] sm:$0xff] %v13757_v32  ;;  %v14726_v51 = vmin.f32 %v14725_v17, 127.0  ;;  %v14729_v30 = vmin.f32 %v14728_v52, 127.0  ;;  %v14731_v19 = vld [vmem:[#allocation20_spill] sm:$0xff]  ;;  %v14733_v32 = vld [vmem:[#allocation42_spill] sm:$0xff] }
 0x4dd   :  { %14724 = vst [vmem:[#allocation36_spill] sm:$0xff] %v13762_v63  ;;  %v14732_v37 = vmin.f32 %v14731_v19, 127.0  ;;  %v14734_v11 = vmin.f32 %v14733_v32, 127.0  ;;  %v14735_v63 = vld [vmem:[#allocation21_spill] sm:$0xff]  ;;  %v14742_v32 = vmin.f32 %v13446_v42, 127.0  ;;  %v14747_v42 = vmin.f32 %v14679_v15, 127.0 }
 0x4de   :  { %v13767_v6 = vmul.f32 %v14726_v51, %v14687_v50  ;;  %v13772_v28 = vmul.f32 %v14729_v30, %v14687_v50  ;;  %v14736_v17 = vmin.f32 %v14735_v63, 127.0  ;;  %v14743_v63 = vmin.f32 %v13450_v2, 127.0 }
 0x4df   :  { %v13777_v38 = vmul.f32 %v14732_v37, %v14687_v50  ;;  %v13782_v7 = vmul.f32 %v14734_v11, %v14687_v50  ;;  %v13802_v11 = vmul.f32 %v14742_v32, %v14687_v50  ;;  %v13822_v32 = vmul.f32 %v14747_v42, %v14687_v50 }
 0x4e0   :  { %14727 = vst [vmem:[#allocation53_spill] sm:$0xff] %v13767_v6  ;;  %14730 = vst [vmem:[#allocation54_spill] sm:$0xff] %v13772_v28  ;;  %v13787_v51 = vmul.f32 %v14736_v17, %v14687_v50  ;;  %v14738_v6 = vld [vmem:[#allocation43_spill] sm:$0xff]  ;;  %v13807_v17 = vmul.f32 %v14743_v63, %v14687_v50  ;;  %v14748_v2 = vmin.f32 %v14680_v60, 127.0  ;;  %v14751_v15 = vmin.f32 %v14683_v18, 127.0 }
 0x4e1   :  { %v14739_v52 = vmin.f32 %v14738_v6, 127.0  ;;  %v14740_v28 = vld [vmem:[#allocation31_spill] sm:$0xff]  ;;  %v14752_v60 = vmin.f32 %v14684_v12, 127.0  ;;  %v14755_v18 = vmin.f32 %v13494_v33, 127.0  ;;  %v14756_v12 = vmin.f32 %v14686_v16, 127.0 }
 0x4e2   :  { %14737 = vst [vmem:[#allocation55_spill] sm:$0xff] %v13787_v51  ;;  %v14741_v19 = vmin.f32 %v14740_v28, 127.0  ;;  %v14744_v51 = vld [vmem:[#allocation44_spill] sm:$0xff]  ;;  %v14746_v28 = vmin.f32 %v14678_v26, 127.0  ;;  %v13827_v63 = vmul.f32 %v14748_v2, %v14687_v50  ;;  %v14750_v26 = vmin.f32 %v14682_v13, 127.0  ;;  %v14783_v0 = vld [vmem:[#allocation51_spill] sm:$0xff] }
 0x4e3   :  { %v13792_v30 = vmul.f32 %v14739_v52, %v14687_v50  ;;  %v14745_v6 = vmin.f32 %v14744_v51, 127.0  ;;  %v14749_v51 = vmin.f32 %v14681_v55, 127.0  ;;  %v13842_v42 = vmul.f32 %v14751_v15, %v14687_v50  ;;  %v14784_v1 = vld [vmem:[#allocation35_spill] sm:$0xff] }
 0x4e4   :  { %v13797_v37 = vmul.f32 %v14741_v19, %v14687_v50  ;;  %v13817_v19 = vmul.f32 %v14746_v28, %v14687_v50  ;;  %v13837_v28 = vmul.f32 %v14750_v26, %v14687_v50  ;;  %v13847_v2 = vmul.f32 %v14752_v60, %v14687_v50 }
 0x4e5   :  { %v13812_v52 = vmul.f32 %v14745_v6, %v14687_v50  ;;  %v13832_v6 = vmul.f32 %v14749_v51, %v14687_v50  ;;  %v14753_v55 = vmin.f32 %v14685_v35, 127.0  ;;  %v14754_v13 = vmin.f32 %v13490_v36, 127.0 }
 0x4e6   :  { %v13862_v15 = vmul.f32 %v14755_v18, %v14687_v50  ;;  %v13867_v60 = vmul.f32 %v14756_v12, %v14687_v50  ;;  %v14758_v35 = vmin.f32 %v13502_v21, 127.0  ;;  %v14759_v36 = vmin.f32 %v13506_v10, 127.0 }
 0x4e7   :  { %v13852_v51 = vmul.f32 %v14753_v55, %v14687_v50  ;;  %v13857_v26 = vmul.f32 %v14754_v13, %v14687_v50  ;;  %v14760_v33 = vmin.f32 %v13510_v40, 127.0  ;;  %v14761_v16 = vmin.f32 %v13514_v56, 127.0 }
 0x4e8   :  { %14757 = vst [vmem:[#allocation56_spill] sm:$0xff] %v13867_v60  ;;  %v13872_v55 = vmul.f32 %v14758_v35, %v14687_v50  ;;  %v13877_v13 = vmul.f32 %v14759_v36, %v14687_v50  ;;  %v14762_v60 = vld [vmem:[#allocation49_spill] sm:$0xff]  ;;  %v14764_v10 = vmin.f32 %v13522_v14, 127.0  ;;  %v14765_v40 = vmin.f32 %v13526_v22, 127.0 }
 0x4e9   :  { %v13882_v18 = vmul.f32 %v14760_v33, %v14687_v50  ;;  %v13887_v12 = vmul.f32 %v14761_v16, %v14687_v50  ;;  %v14763_v21 = vmin.f32 %v14762_v60, 127.0  ;;  %v14766_v56 = vmin.f32 %v13530_v4, 127.0 }
 0x4ea   :  { %v13897_v36 = vmul.f32 %v14764_v10, %v14687_v50  ;;  %v13902_v33 = vmul.f32 %v14765_v40, %v14687_v50  ;;  %v14768_v60 = vmin.f32 %v13534_v34, 127.0  ;;  %v14770_v14 = vmin.f32 %v13538_v46, 127.0 }
 0x4eb   :  { %v13892_v35 = vmul.f32 %v14763_v21, %v14687_v50  ;;  %v13907_v16 = vmul.f32 %v14766_v56, %v14687_v50  ;;  %v14772_v22 = vmin.f32 %v13542_v9, 127.0  ;;  %v14774_v4 = vmin.f32 %v13546_v57, 127.0 }
 0x4ec   :  { %v13912_v21 = vmul.f32 %v14768_v60, %v14687_v50  ;;  %v13917_v10 = vmul.f32 %v14770_v14, %v14687_v50  ;;  %v14776_v34 = vmin.f32 %v13550_v61, 127.0  ;;  %v14778_v46 = vmin.f32 %v13554_v5, 127.0 }
 0x4ed   :  { %14767 = vst [vmem:[#allocation57_spill] sm:$0xff] %v13907_v16  ;;  %v13922_v40 = vmul.f32 %v14772_v22, %v14687_v50  ;;  %v13927_v56 = vmul.f32 %v14774_v4, %v14687_v50  ;;  %v14780_v9 = vmin.f32 %v13558_v29, 127.0  ;;  %v6544_v4 = vmax.f32 %v13637_v54, 0.0 }
 0x4ee   :  { %14769 = vst [vmem:[#allocation58_spill] sm:$0xff] %v13912_v21  ;;  %14771 = vst [vmem:[#allocation59_spill] sm:$0xff] %v13917_v10  ;;  %v13932_v60 = vmul.f32 %v14776_v34, %v14687_v50  ;;  %v13937_v14 = vmul.f32 %v14778_v46, %v14687_v50  ;;  %v6545_v61 = vmax.f32 %v13642_v41, 0.0  ;;  %v6546_v34 = vmax.f32 %v13647_v45, 0.0  ;;  %v14788_v10 = vld [vmem:[#allocation54_spill] sm:$0xff]  ;;  %v14789_v21 = vld [vmem:[#allocation55_spill] sm:$0xff] }
 0x4ef   :  { %14773 = vst [vmem:[#allocation38_spill] sm:$0xff] %v13922_v40  ;;  %14775 = vst [vmem:[#allocation16_spill] sm:$0xff] %v13927_v56  ;;  %v13942_v22 = vmul.f32 %v14780_v9, %v14687_v50  ;;  %v6548_v5 = vmax.f32 %v13657_v3, 0.0  ;;  %v6549_v46 = vmax.f32 %v13662_v48, 0.0  ;;  %v6550_v29 = vmax.f32 %v13667_v31, 0.0  ;;  %v14782_v40 = vld [vmem:[#allocation34_spill] sm:$0xff] }
 0x4f0   :  { %14777 = vst [vmem:[#allocation28_spill] sm:$0xff] %v13932_v60  ;;  %14779 = vst [vmem:[#allocation39_spill] sm:$0xff] %v13937_v14  ;;  %v6547_v60 = vmax.f32 %v13652_v23, 0.0  ;;  %v6551_v50 = vmax.f32 %v13672_v24, 0.0  ;;  %v6552_v9 = vmax.f32 %v13677_v59, 0.0  ;;  %v6553_v57 = vmax.f32 %v13682_v44, 0.0 }
 0x4f1   :  { %14781 = vst [vmem:[#allocation17_spill] sm:$0xff] %v13942_v22  ;;  %v6554_v54 = vmax.f32 %v13687_v62, 0.0  ;;  %v6555_v41 = vmax.f32 %v13692_v43, 0.0  ;;  %v6556_v45 = vmax.f32 %v13697_v25, 0.0  ;;  %v6557_v23 = vmax.f32 %v13702_v49, 0.0  ;;  %v14785_v22 = vld [vmem:[#allocation52_spill] sm:$0xff] }
 0x4f2   :  { %v6558_v3 = vmax.f32 %v13707_v58, 0.0  ;;  %v6559_v48 = vmax.f32 %v13712_v20, 0.0  ;;  %v6560_v31 = vmax.f32 %v13717_v8, 0.0  ;;  %v6561_v24 = vmax.f32 %v13722_v53, 0.0  ;;  %v14786_v14 = vld [vmem:[#allocation36_spill] sm:$0xff]  ;;  %v14787_v56 = vld [vmem:[#allocation53_spill] sm:$0xff] }
 0x4f3   :  { %v6562_v59 = vmax.f32 %v13727_v47, 0.0  ;;  %v6563_v44 = vmax.f32 %v13732_v39, 0.0  ;;  %v6564_v62 = vmax.f32 %v13737_v27, 0.0  ;;  %v6565_v43 = vmax.f32 %v14782_v40, 0.0  ;;  %v14790_v16 = vld [vmem:[#allocation56_spill] sm:$0xff] }
 0x4f4   :  { %v6566_v25 = vmax.f32 %v14783_v0, 0.0  ;;  %v6567_v49 = vmax.f32 %v14784_v1, 0.0  ;;  %v6568_v58 = vmax.f32 %v14785_v22, 0.0  ;;  %v6569_v20 = vmax.f32 %v14786_v14, 0.0 }
 0x4f5   :  { %v6570_v8 = vmax.f32 %v14787_v56, 0.0  ;;  %v6571_v53 = vmax.f32 %v14788_v10, 0.0  ;;  %v6572_v47 = vmax.f32 %v13777_v38, 0.0  ;;  %v6573_v39 = vmax.f32 %v13782_v7, 0.0 }
 0x4f6   :  { %v6574_v27 = vmax.f32 %v14789_v21, 0.0  ;;  %v6575_v40 = vmax.f32 %v13792_v30, 0.0  ;;  %v6576_v0 = vmax.f32 %v13797_v37, 0.0  ;;  %v6577_v1 = vmax.f32 %v13802_v11, 0.0 }
 0x4f7   :  { %v6578_v22 = vmax.f32 %v13807_v17, 0.0  ;;  %v6579_v14 = vmax.f32 %v13812_v52, 0.0  ;;  %v6580_v56 = vmax.f32 %v13817_v19, 0.0  ;;  %v6581_v10 = vmax.f32 %v13822_v32, 0.0 }
 0x4f8   :  { %v6582_v38 = vmax.f32 %v13827_v63, 0.0  ;;  %v6583_v7 = vmax.f32 %v13832_v6, 0.0  ;;  %v6584_v21 = vmax.f32 %v13837_v28, 0.0  ;;  %v6585_v30 = vmax.f32 %v13842_v42, 0.0 }
 0x4f9   :  { %v6586_v37 = vmax.f32 %v13847_v2, 0.0  ;;  %v6587_v11 = vmax.f32 %v13852_v51, 0.0  ;;  %v6588_v17 = vmax.f32 %v13857_v26, 0.0  ;;  %v6589_v52 = vmax.f32 %v13862_v15, 0.0  ;;  %v14791_v26 = vld [vmem:[#allocation57_spill] sm:$0xff] }
 0x4fa   :  { %v6590_v19 = vmax.f32 %v14790_v16, 0.0  ;;  %v6591_v32 = vmax.f32 %v13872_v55, 0.0  ;;  %v6592_v63 = vmax.f32 %v13877_v13, 0.0  ;;  %v6593_v6 = vmax.f32 %v13882_v18, 0.0  ;;  %v14792_v16 = vld [vmem:[#allocation58_spill] sm:$0xff]  ;;  %v14793_v13 = vld [vmem:[#allocation59_spill] sm:$0xff] }
 0x4fb   :  { %v6594_v28 = vmax.f32 %v13887_v12, 0.0  ;;  %v6595_v42 = vmax.f32 %v13892_v35, 0.0  ;;  %v6596_v2 = vmax.f32 %v13897_v36, 0.0  ;;  %v6597_v51 = vmax.f32 %v13902_v33, 0.0  ;;  %v14794_v12 = vld [vmem:[#allocation38_spill] sm:$0xff]  ;;  %v14795_v36 = vld [vmem:[#allocation16_spill] sm:$0xff] }
 0x4fc   :  { %v6598_v15 = vmax.f32 %v14791_v26, 0.0  ;;  %v6599_v55 = vmax.f32 %v14792_v16, 0.0  ;;  %v6600_v18 = vmax.f32 %v14793_v13, 0.0  ;;  %v6601_v35 = vmax.f32 %v14794_v12, 0.0  ;;  %v14796_v26 = vld [vmem:[#allocation28_spill] sm:$0xff]  ;;  %v14797_v13 = vld [vmem:[#allocation39_spill] sm:$0xff] }
 0x4fd   :  { %v6602_v33 = vmax.f32 %v14795_v36, 0.0  ;;  %v6603_v16 = vmax.f32 %v14796_v26, 0.0  ;;  %v6604_v12 = vmax.f32 %v14797_v13, 0.0  ;;  %v14798_v36 = vld [vmem:[#allocation17_spill] sm:$0xff] }
 0x4fe   :  { %v6605_v26 = vmax.f32 %v14798_v36, 0.0  ;;  %v14799_v13 = vld [vmem:[#allocation5_spill] sm:$0xff] }
 0x4ff   :  { %v14800_v36 = vmax.f32 %v14799_v13, 0.0 }
 0x501   :  { %v6735_v13 = vmax.f32 %v14800_v36, %v6544_v4  ;;  %v14801_v4 = vld [vmem:[#allocation50_spill] sm:$0xff] }
 0x502   :  { %v14802_v36 = vmax.f32 %v14801_v4, 0.0 }
 0x503   :  { %6767 = vst [vmem:[#allocation4] sm:$0xff] %v6735_v13 }
 0x504   :  { %v6736_v4 = vmax.f32 %v14802_v36, %v6545_v61  ;;  %v6737_v36 = vmax.f32 %v6546_v34, %v6548_v5  ;;  %v6738_v61 = vmax.f32 %v6547_v60, %v6549_v46  ;;  %v6739_v5 = vmax.f32 %v6550_v29, %v6552_v9 }
 0x505   :  { %v6740_v34 = vmax.f32 %v6551_v50, %v6553_v57  ;;  %v6741_v46 = vmax.f32 %v6554_v54, %v6556_v45  ;;  %v6742_v60 = vmax.f32 %v6555_v41, %v6557_v23  ;;  %v6743_v9 = vmax.f32 %v6558_v3, %v6560_v31 }
 0x506   :  { %v6744_v29 = vmax.f32 %v6559_v48, %v6561_v24  ;;  %v6745_v50 = vmax.f32 %v6562_v59, %v6564_v62  ;;  %v6746_v57 = vmax.f32 %v6563_v44, %v6565_v43  ;;  %6768 = vst [vmem:[#allocation4 + $0x8] sm:$0xff] %v6736_v4  ;;  %6769 = vst [vmem:[#allocation4 + $0x10] sm:$0xff] %v6737_v36 }
 0x507   :  { %6770 = vst [vmem:[#allocation4 + $0x18] sm:$0xff] %v6738_v61  ;;  %v6747_v45 = vmax.f32 %v6566_v25, %v6568_v58  ;;  %v6748_v54 = vmax.f32 %v6567_v49, %v6569_v20  ;;  %v6749_v23 = vmax.f32 %v6570_v8, %v6572_v47  ;;  %v6750_v41 = vmax.f32 %v6571_v53, %v6573_v39 }
 0x508   :  { %6771 = vst [vmem:[#allocation4 + $0x20] sm:$0xff] %v6739_v5  ;;  %6772 = vst [vmem:[#allocation4 + $0x28] sm:$0xff] %v6740_v34  ;;  %v6751_v3 = vmax.f32 %v6574_v27, %v6576_v0  ;;  %v6752_v31 = vmax.f32 %v6575_v40, %v6577_v1  ;;  %v6753_v24 = vmax.f32 %v6578_v22, %v6580_v56 }
 0x509   :  { %6773 = vst [vmem:[#allocation4 + $0x30] sm:$0xff] %v6741_v46  ;;  %6774 = vst [vmem:[#allocation4 + $0x38] sm:$0xff] %v6742_v60  ;;  %v6754_v48 = vmax.f32 %v6579_v14, %v6581_v10  ;;  %v6755_v59 = vmax.f32 %v6582_v38, %v6584_v21  ;;  %v6756_v44 = vmax.f32 %v6583_v7, %v6585_v30 }
 0x50a   :  { %6775 = vst [vmem:[#allocation4 + $0x40] sm:$0xff] %v6743_v9  ;;  %6776 = vst [vmem:[#allocation4 + $0x48] sm:$0xff] %v6744_v29  ;;  %v6757_v62 = vmax.f32 %v6586_v37, %v6588_v17  ;;  %v6758_v43 = vmax.f32 %v6587_v11, %v6589_v52  ;;  %v6759_v25 = vmax.f32 %v6590_v19, %v6592_v63 }
 0x50b   :  { %6777 = vst [vmem:[#allocation4 + $0x50] sm:$0xff] %v6745_v50  ;;  %6778 = vst [vmem:[#allocation4 + $0x58] sm:$0xff] %v6746_v57  ;;  %v6760_v49 = vmax.f32 %v6591_v32, %v6593_v6  ;;  %v6761_v58 = vmax.f32 %v6594_v28, %v6596_v2  ;;  %v6762_v20 = vmax.f32 %v6595_v42, %v6597_v51 }
 0x50c   :  { %6779 = vst [vmem:[#allocation4 + $0x60] sm:$0xff] %v6747_v45  ;;  %6780 = vst [vmem:[#allocation4 + $0x68] sm:$0xff] %v6748_v54  ;;  %v6763_v8 = vmax.f32 %v6598_v15, %v6600_v18  ;;  %v6764_v53 = vmax.f32 %v6599_v55, %v6601_v35  ;;  %v6765_v47 = vmax.f32 %v6602_v33, %v6604_v12 }
 0x50d   :  { %6781 = vst [vmem:[#allocation4 + $0x70] sm:$0xff] %v6749_v23  ;;  %6782 = vst [vmem:[#allocation4 + $0x78] sm:$0xff] %v6750_v41  ;;  %v6766_v39 = vmax.f32 %v6603_v16, %v6605_v26  ;;  %v6799_v27 = vld [vmem:[#allocation4] ss:$2 sm:$0xff]  ;;  %v6831_v0 = vld [vmem:[#allocation4 + $0x1] ss:$2 sm:$0xff] }
 0x50e   :  { %6783 = vst [vmem:[#allocation4 + $0x80] sm:$0xff] %v6751_v3  ;;  %6784 = vst [vmem:[#allocation4 + $0x88] sm:$0xff] %v6752_v31  ;;  %v6801_v40 = vld [vmem:[#allocation4 + $0x10] ss:$2 sm:$0xff]  ;;  %v6833_v14 = vld [vmem:[#allocation4 + $0x11] ss:$2 sm:$0xff]  ;;  %v6862_v56 = vmax.f32 %v6799_v27, %v6831_v0 }
 0x50f   :  { %6785 = vst [vmem:[#allocation4 + $0x90] sm:$0xff] %v6753_v24  ;;  %6786 = vst [vmem:[#allocation4 + $0x98] sm:$0xff] %v6754_v48  ;;  %v6803_v1 = vld [vmem:[#allocation4 + $0x20] ss:$2 sm:$0xff]  ;;  %v6835_v7 = vld [vmem:[#allocation4 + $0x21] ss:$2 sm:$0xff]  ;;  %v6863_v21 = vmax.f32 %v6801_v40, %v6833_v14 }
 0x510   :  { %6787 = vst [vmem:[#allocation4 + $0xa0] sm:$0xff] %v6755_v59  ;;  %6788 = vst [vmem:[#allocation4 + $0xa8] sm:$0xff] %v6756_v44  ;;  %v6805_v22 = vld [vmem:[#allocation4 + $0x30] ss:$2 sm:$0xff]  ;;  %v6837_v11 = vld [vmem:[#allocation4 + $0x31] ss:$2 sm:$0xff]  ;;  %v6864_v17 = vmax.f32 %v6803_v1, %v6835_v7 }
 0x511   :  { %6789 = vst [vmem:[#allocation4 + $0xb0] sm:$0xff] %v6757_v62  ;;  %6790 = vst [vmem:[#allocation4 + $0xb8] sm:$0xff] %v6758_v43  ;;  %v6807_v10 = vld [vmem:[#allocation4 + $0x40] ss:$2 sm:$0xff]  ;;  %v6839_v32 = vld [vmem:[#allocation4 + $0x41] ss:$2 sm:$0xff]  ;;  %v6865_v63 = vmax.f32 %v6805_v22, %v6837_v11 }
 0x512   :  { %6791 = vst [vmem:[#allocation4 + $0xc0] sm:$0xff] %v6759_v25  ;;  %6792 = vst [vmem:[#allocation4 + $0xc8] sm:$0xff] %v6760_v49  ;;  %v6809_v38 = vld [vmem:[#allocation4 + $0x50] ss:$2 sm:$0xff]  ;;  %v6841_v42 = vld [vmem:[#allocation4 + $0x51] ss:$2 sm:$0xff]  ;;  %v6866_v2 = vmax.f32 %v6807_v10, %v6839_v32 }
 0x513   :  { %6793 = vst [vmem:[#allocation4 + $0xd0] sm:$0xff] %v6761_v58  ;;  %6794 = vst [vmem:[#allocation4 + $0xd8] sm:$0xff] %v6762_v20  ;;  %v6811_v30 = vld [vmem:[#allocation4 + $0x60] ss:$2 sm:$0xff]  ;;  %v6843_v55 = vld [vmem:[#allocation4 + $0x61] ss:$2 sm:$0xff]  ;;  %v6867_v18 = vmax.f32 %v6809_v38, %v6841_v42 }
 0x514   :  { %6795 = vst [vmem:[#allocation4 + $0xe0] sm:$0xff] %v6763_v8  ;;  %6796 = vst [vmem:[#allocation4 + $0xe8] sm:$0xff] %v6764_v53  ;;  %v6813_v37 = vld [vmem:[#allocation4 + $0x70] ss:$2 sm:$0xff]  ;;  %v6845_v16 = vld [vmem:[#allocation4 + $0x71] ss:$2 sm:$0xff]  ;;  %v6868_v12 = vmax.f32 %v6811_v30, %v6843_v55 }
 0x515   :  { %6797 = vst [vmem:[#allocation4 + $0xf0] sm:$0xff] %v6765_v47  ;;  %6798 = vst [vmem:[#allocation4 + $0xf8] sm:$0xff] %v6766_v39  ;;  %v6815_v52 = vld [vmem:[#allocation4 + $0x80] ss:$2 sm:$0xff]  ;;  %v6847_v26 = vld [vmem:[#allocation4 + $0x81] ss:$2 sm:$0xff]  ;;  %v6869_v36 = vmax.f32 %v6813_v37, %v6845_v16 }
 0x516   :  { %6878 = vst [vmem:[%s14063_s3] sm:$0xff] %v6862_v56  ;;  %v6817_v19 = vld [vmem:[#allocation4 + $0x90] ss:$2 sm:$0xff]  ;;  %6879 = vst [vmem:[%s14063_s3 + $0x8] sm:$0xff] %v6863_v21  ;;  %v6849_v13 = vld [vmem:[#allocation4 + $0x91] ss:$2 sm:$0xff]  ;;  %v6870_v46 = vmax.f32 %v6815_v52, %v6847_v26 }
 0x517   :  { %v6819_v6 = vld [vmem:[#allocation4 + $0xa0] ss:$2 sm:$0xff]  ;;  %6880 = vst [vmem:[%s14063_s3 + $0x10] sm:$0xff] %v6864_v17  ;;  %6881 = vst [vmem:[%s14063_s3 + $0x18] sm:$0xff] %v6865_v63  ;;  %v6851_v4 = vld [vmem:[#allocation4 + $0xa1] ss:$2 sm:$0xff]  ;;  %v6871_v60 = vmax.f32 %v6817_v19, %v6849_v13 }
 0x518   :  { %v6821_v28 = vld [vmem:[#allocation4 + $0xb0] ss:$2 sm:$0xff]  ;;  %6882 = vst [vmem:[%s14063_s3 + $0x20] sm:$0xff] %v6866_v2  ;;  %6883 = vst [vmem:[%s14063_s3 + $0x28] sm:$0xff] %v6867_v18  ;;  %v6853_v61 = vld [vmem:[#allocation4 + $0xb1] ss:$2 sm:$0xff]  ;;  %v6872_v9 = vmax.f32 %v6819_v6, %v6851_v4 }
 0x519   :  { %v6823_v51 = vld [vmem:[#allocation4 + $0xc0] ss:$2 sm:$0xff]  ;;  %v6855_v5 = vld [vmem:[#allocation4 + $0xc1] ss:$2 sm:$0xff]  ;;  %6884 = vst [vmem:[%s14063_s3 + $0x30] sm:$0xff] %v6868_v12  ;;  %v6873_v57 = vmax.f32 %v6821_v28, %v6853_v61  ;;  %6885 = vst [vmem:[%s14063_s3 + $0x38] sm:$0xff] %v6869_v36 }
 0x51a   :  { %v6825_v15 = vld [vmem:[#allocation4 + $0xd0] ss:$2 sm:$0xff]  ;;  %v6857_v34 = vld [vmem:[#allocation4 + $0xd1] ss:$2 sm:$0xff]  ;;  %v6874_v45 = vmax.f32 %v6823_v51, %v6855_v5  ;;  %6886 = vst [vmem:[%s14063_s3 + $0x40] sm:$0xff] %v6870_v46  ;;  %6887 = vst [vmem:[%s14063_s3 + $0x48] sm:$0xff] %v6871_v60 }
 0x51b   :  { %v6827_v35 = vld [vmem:[#allocation4 + $0xe0] ss:$2 sm:$0xff]  ;;  %v6859_v29 = vld [vmem:[#allocation4 + $0xe1] ss:$2 sm:$0xff]  ;;  %v6875_v54 = vmax.f32 %v6825_v15, %v6857_v34  ;;  %6888 = vst [vmem:[%s14063_s3 + $0x50] sm:$0xff] %v6872_v9  ;;  %6889 = vst [vmem:[%s14063_s3 + $0x58] sm:$0xff] %v6873_v57 }
 0x51c   :  { %v6829_v33 = vld [vmem:[#allocation4 + $0xf0] ss:$2 sm:$0xff]  ;;  %v6861_v50 = vld [vmem:[#allocation4 + $0xf1] ss:$2 sm:$0xff]  ;;  %v6876_v23 = vmax.f32 %v6827_v35, %v6859_v29  ;;  %6890 = vst [vmem:[%s14063_s3 + $0x60] sm:$0xff] %v6874_v45 }
 0x51d   :  { %v6877_v41 = vmax.f32 %v6829_v33, %v6861_v50  ;;  %6891 = vst [vmem:[%s14063_s3 + $0x68] sm:$0xff] %v6875_v54 }
 0x51e   :  { %6892 = vst [vmem:[%s14063_s3 + $0x70] sm:$0xff] %v6876_v23 }
 0x51f   :  { %6893 = vst [vmem:[%s14063_s3 + $0x78] sm:$0xff] %v6877_v41 }

</bundles_post_ra>
